<compile_context>
chip_gen: v7x
topology: tpu7x:2x2x1
jax: 0.10.0
libtpu: 0.0.40
codegen_flags: <defaults>
</compile_context>

<pallas_src>
import jax
import jax.numpy as jnp
import numpy as np
from jax import lax
from jax.experimental import pallas as pl
from jax.experimental.pallas import tpu as pltpu


# ---------------------------------------------------------------------------
# Phase 1: 3x3 conv over one (image, row-band) as 9 accumulated K=Cin matmuls
# from shifted views of the zero-padded window, plus per-band partial BN stats.
# Grid = (N, num_bands); every step is independent ("parallel", "parallel").
# ---------------------------------------------------------------------------
def _conv_stats_kernel(xa_ref, xb_ref, w_ref, conv_ref, stats_ref):
    band = xa_ref.shape[1]          # rows of the band
    W2p = xa_ref.shape[2]           # W2 + 2 (zero-padded width)
    Cin = xa_ref.shape[3]
    W2 = W2p - 2
    Cout_p = w_ref.shape[2]

    # (band + 2, W2 + 2, Cin) zero-padded upsampled window: the band rows plus
    # the 2-row halo, delivered as two non-overlapping Blocked inputs.
    xw = jnp.concatenate([xa_ref[0], xb_ref[0]], axis=0)

    # 3x3 conv: 9 accumulated matmuls (K = Cin) over shifted views — no im2col
    # patch materialization, no in-kernel padding copies. bf16 x bf16 -> f32.
    acc = jnp.zeros((band * W2, Cout_p), jnp.float32)
    for dy in range(3):
        for dx in range(3):
            tap = xw[dy:dy + band, dx:dx + W2, :].reshape(band * W2, Cin)
            acc = acc + jnp.dot(tap, w_ref[dy * 3 + dx],
                                preferred_element_type=jnp.float32)

    # bf16 intermediate (halves the write + re-read HBM traffic of phase-2).
    conv_ref[...] = acc.astype(conv_ref.dtype)

    # Per-(image, band) partial BN statistics from the f32 accumulator; the
    # cross-band/batch reduction happens in JAX so tiling never changes stats.
    s = jnp.sum(acc, axis=0, keepdims=True)               # (1, Cout_p)
    ss = jnp.sum(acc * acc, axis=0, keepdims=True)        # (1, Cout_p)
    stats_ref[...] = jnp.concatenate([s, ss], axis=0).reshape(1, 1, 2, Cout_p)


# ---------------------------------------------------------------------------
# Phase 2: folded BatchNorm (scale/shift) + PReLU, lane-dense tiled elementwise.
# ---------------------------------------------------------------------------
def _bn_prelu_kernel(y_ref, scale_ref, shift_ref, alpha_ref, out_ref):
    y = y_ref[...].astype(jnp.float32) * scale_ref[...] + shift_ref[...]
    a = alpha_ref[0]                                       # shared PReLU slope
    out_ref[...] = jnp.where(y >= 0.0, y, a * y)


# ---------------------------------------------------------------------------
# XLA-side glue
# ---------------------------------------------------------------------------
def _bilinear_upsample_2x_nhwc(x):
    """Exact 2x bilinear upsample matching F.interpolate(mode='bilinear',
    align_corners=False) — i.e. what F.upsample does in the reference module."""
    def up(v, axis):
        n = v.shape[axis]
        first = lax.slice_in_dim(v, 0, 1, axis=axis)
        last = lax.slice_in_dim(v, n - 1, n, axis=axis)
        prev = jnp.concatenate([first, lax.slice_in_dim(v, 0, n - 1, axis=axis)], axis=axis)
        nxt = jnp.concatenate([lax.slice_in_dim(v, 1, n, axis=axis), last], axis=axis)
        even = 0.25 * prev + 0.75 * v        # output index 2k
        odd = 0.75 * v + 0.25 * nxt          # output index 2k+1
        stacked = jnp.stack([even, odd], axis=axis + 1)
        new_shape = list(v.shape)
        new_shape[axis] = 2 * n
        return stacked.reshape(new_shape)

    return up(up(x, 1), 2)


def _round_up(x, m):
    return (x + m - 1) // m * m


def _vmem_limit_bytes():
    """~3/4 of physical VMEM (64 MiB on v7x, 128 MiB on v5e/v6e)."""
    cap = 64 * 1024 * 1024
    try:
        cap = int(getattr(pltpu.get_tpu_info(), "vmem_capacity_bytes", cap))
    except Exception:
        pass
    return int(min(cap * 3 // 4, 100 * 1024 * 1024))


def _pick_band(H2, W2, Cin, Cout_p, budget):
    """Largest H2 row-band whose phase-1 footprint fits in `budget` bytes."""
    for band in (64, 32, 16, 8, 4, 2):
        if band > H2 or H2 % band or (band * W2) % 16:
            continue
        fp = (2 * band * (W2 + 2) * Cin * 2        # band block, x2 buffers, bf16
              + 2 * 2 * (W2 + 2) * Cin * 2         # halo block, x2 buffers
              + 2 * 9 * Cin * Cout_p * 2           # weights, x2 buffers, bf16
              + 2 * band * W2 * Cout_p * 2         # conv-out block, x2, bf16
              + band * W2 * Cout_p * 4             # f32 accumulator
              + (band + 2) * (W2 + 2) * Cin * 2)   # concatenated window temp
        if fp <= budget:
            return band
    return 2


def _pick_m_tile(M):
    """Phase-2 row tile: >=512 when the problem is big (masked tail via cdiv)."""
    if M % 1024 == 0 or M >= 8192:
        return 1024
    if M % 512 == 0 or M >= 2048:
        return 512
    return max(16, _round_up(M, 16))   # small problems: one (masked) block


def psp_upsample(x_nchw, params):
    """Forward pass of PSPUpsample. x_nchw: (N, Cin, H, W) -> (N, Cout, 2H, 2W)."""
    w_hwio = params["w"].astype(jnp.float32)              # (3, 3, Cin, Cout)
    gamma = params["gamma"].astype(jnp.float32)
    beta = params["beta"].astype(jnp.float32)
    alpha = params["alpha"].astype(jnp.float32)
    # NOTE: the Conv2d bias (params["b"]) is a uniform per-channel shift that is
    # exactly cancelled by the BatchNorm mean subtraction, so it is folded away.

    kh, kw, Cin, Cout = w_hwio.shape
    N, _, H, W = x_nchw.shape
    H2, W2 = 2 * H, 2 * W
    M = N * H2 * W2
    Cout_p = _round_up(Cout, 128)           # lane-dense matmul N-dim & stores

    vmem_limit = _vmem_limit_bytes()
    band = _pick_band(H2, W2, Cin, Cout_p, budget=vmem_limit // 2)
    num_bands = H2 // band

    # prep: NCHW -> NHWC, 2x bilinear upsample + conv zero-pad (cheap XLA pass
    # on the small input), bf16 cast for the MXU operands.
    x = jnp.transpose(x_nchw, (0, 2, 3, 1))
    x_up = _bilinear_upsample_2x_nhwc(x).astype(jnp.bfloat16)     # (N,H2,W2,Cin)
    xp = jnp.pad(x_up, ((0, 0), (1, 1), (1, 1), (0, 0)))          # (N,H2+2,W2+2,Cin)

    # weights: HWIO -> (9, Cin, Cout_p) bf16 (tap-major, out channels padded).
    w_p = jnp.pad(w_hwio, ((0, 0), (0, 0), (0, 0), (0, Cout_p - Cout)))
    w9 = w_p.reshape(kh * kw, Cin, Cout_p).astype(jnp.bfloat16)

    # ---- phase 1: conv (band-tiled, halo via a second Blocked input) --------
    conv_flat, stats = pl.pallas_call(
        _conv_stats_kernel,
        out_shape=(
            jax.ShapeDtypeStruct((M, Cout_p), jnp.bfloat16),          # conv out
            jax.ShapeDtypeStruct((N, num_bands, 2, Cout_p), jnp.float32),
        ),
        grid_spec=pltpu.PrefetchScalarGridSpec(
            num_scalar_prefetch=0,
            grid=(N, num_bands),
            in_specs=[
                # band rows [b*band, b*band+band) of the padded tensor
                pl.BlockSpec((1, band, W2 + 2, Cin), lambda n, b: (n, b, 0, 0)),
                # 2-row halo: rows [(b+1)*band, (b+1)*band+2)
                pl.BlockSpec((1, 2, W2 + 2, Cin),
                             lambda n, b: (n, (b + 1) * (band // 2), 0, 0)),
                pl.BlockSpec((kh * kw, Cin, Cout_p), lambda n, b: (0, 0, 0)),
            ],
            out_specs=(
                pl.BlockSpec((band * W2, Cout_p),
                             lambda n, b: (n * num_bands + b, 0)),
                pl.BlockSpec((1, 1, 2, Cout_p), lambda n, b: (n, b, 0, 0)),
            ),
        ),
        compiler_params=pltpu.CompilerParams(
            dimension_semantics=("parallel", "parallel"),
            vmem_limit_bytes=vmem_limit),
    )(xp, xp, w9)

    # ---- tiny JAX reduction: partial stats -> folded per-channel scale/shift
    # TODO(synk): E[x^2]-E[x]^2 in f32 is cancellation-prone for |mean|>>std;
    # switch to a shifted/two-pass combine if production stats demand it.
    tot = jnp.sum(stats, axis=(0, 1))                      # (2, Cout_p)
    count = float(M)
    mean = tot[0] / count
    var = jnp.maximum(tot[1] / count - mean * mean, 0.0)   # biased (training BN)
    inv = lax.rsqrt(var + 1e-5)
    gamma_p = jnp.pad(gamma, (0, Cout_p - Cout))
    beta_p = jnp.pad(beta, (0, Cout_p - Cout))
    scale = (gamma_p * inv).reshape(1, Cout_p)
    shift = (beta_p - mean * gamma_p * inv).reshape(1, Cout_p)

    # ---- phase 2: normalize + PReLU over lane-dense row-band tiles ----------
    tm = _pick_m_tile(M)
    out_flat = pl.pallas_call(
        _bn_prelu_kernel,
        out_shape=jax.ShapeDtypeStruct((M, Cout_p), jnp.float32),
        grid_spec=pltpu.PrefetchScalarGridSpec(
            num_scalar_prefetch=0,
            grid=(pl.cdiv(M, tm),),
            in_specs=[
                pl.BlockSpec((tm, Cout_p), lambda i: (i, 0)),
                pl.BlockSpec((1, Cout_p), lambda i: (0, 0)),
                pl.BlockSpec((1, Cout_p), lambda i: (0, 0)),
                pl.BlockSpec(memory_space=pltpu.MemorySpace.SMEM),
            ],
            out_specs=pl.BlockSpec((tm, Cout_p), lambda i: (i, 0)),
        ),
        compiler_params=pltpu.CompilerParams(
            dimension_semantics=("parallel",),
            vmem_limit_bytes=vmem_limit),
    )(conv_flat, scale, shift, alpha)

    out = out_flat.reshape(N, H2, W2, Cout_p)[..., :Cout]
    # TODO(synk): return NHWC (or fuse the transpose into phase-2's out_spec)
    # when the consumer allows, to drop this last full HBM pass.
    return jnp.transpose(out, (0, 3, 1, 2))               # NHWC -> NCHW


def psp_upsample_ref(x_nchw, params):
    """Pure-JAX f32 reference (for correctness checking only)."""
    x = jnp.transpose(x_nchw, (0, 2, 3, 1))
    x_up = _bilinear_upsample_2x_nhwc(x)
    y = lax.conv_general_dilated(x_up, params["w"], (1, 1), "SAME",
                                 dimension_numbers=("NHWC", "HWIO", "NHWC"),
                                 precision=lax.Precision.HIGHEST)
    y = y + params["b"]
    mean = jnp.mean(y, axis=(0, 1, 2), keepdims=True)
    var = jnp.mean((y - mean) ** 2, axis=(0, 1, 2), keepdims=True)
    y = (y - mean) * lax.rsqrt(var + 1e-5) * params["gamma"] + params["beta"]
    y = jnp.where(y >= 0, y, params["alpha"][0] * y)
    return jnp.transpose(y, (0, 3, 1, 2))


if __name__ == "__main__":
    key = jax.random.PRNGKey(0)
    N, Cin, H, W = 2, 4, 16, 16
    Cout = 8

    k_x, k_w, k_b, k_g, k_be = jax.random.split(key, 5)
    x = jax.random.normal(k_x, (N, Cin, H, W), jnp.float32)

    # Deterministic synthetic parameters (PyTorch Conv2d weight OIHW -> HWIO).
    w_oihw = 0.1 * jax.random.normal(k_w, (Cout, Cin, 3, 3), jnp.float32)
    params = {
        "w": jnp.transpose(w_oihw, (2, 3, 1, 0)),                        # (3,3,Cin,Cout)
        "b": 0.1 * jax.random.normal(k_b, (Cout,), jnp.float32),
        "gamma": 1.0 + 0.1 * jax.random.normal(k_g, (Cout,), jnp.float32),
        "beta": 0.1 * jax.random.normal(k_be, (Cout,), jnp.float32),
        "alpha": jnp.array([0.25], jnp.float32),                         # nn.PReLU() default
    }

    out = jax.jit(psp_upsample)(x, params)
    out = jax.block_until_ready(out)

    ref = psp_upsample_ref(x, params)
    assert out.shape == (N, Cout, 2 * H, 2 * W), out.shape
    # bf16 MXU operands + bf16 conv intermediate -> relaxed tolerance
    np.testing.assert_allclose(np.asarray(out), np.asarray(ref), rtol=3e-2, atol=5e-2)

    print("KERNEL_OK")
</pallas_src>

<mosaic_0001>
module attributes {stable_mosaic.version = 11 : i64} {
  func.func @_conv_stats_kernel(%arg0: i32, %arg1: i32, %arg2: memref<1x32x34x4xbf16, #tpu.memory_space<vmem>>, %arg3: memref<1x2x34x4xbf16, #tpu.memory_space<vmem>>, %arg4: memref<9x4x128xbf16, #tpu.memory_space<vmem>>, %arg5: memref<1024x128xbf16, #tpu.memory_space<vmem>>, %arg6: memref<1x1x2x128xf32, #tpu.memory_space<vmem>>) attributes {dimension_semantics = [#tpu.dimension_semantics<parallel>, #tpu.dimension_semantics<parallel>], iteration_bounds = array<i64: 2, 1>, scalar_prefetch = 0 : i64, scratch_operands = 0 : i64, tpu.core_type = #tpu.core_type<tc>, window_params = [{transform_indices = @transform_0, window_bounds = array<i64: 1, 32, 34, 4>}, {transform_indices = @transform_1, window_bounds = array<i64: 1, 2, 34, 4>}, {pipeline_mode = #tpu.pipeline_mode<synchronous>, transform_indices = @transform_2, window_bounds = array<i64: 9, 4, 128>}, {transform_indices = @transform_3, window_bounds = array<i64: 1024, 128>}, {transform_indices = @transform_4, window_bounds = array<i64: 1, 1, 2, 128>}]} {
    %c0 = arith.constant 0 : index
    %c0_0 = arith.constant 0 : index
    %c0_1 = arith.constant 0 : index
    %c0_2 = arith.constant 0 : index
    %0 = vector.load %arg2[%c0, %c0_0, %c0_1, %c0_2] : memref<1x32x34x4xbf16, #tpu.memory_space<vmem>>, vector<1x32x34x4xbf16>
    %1 = vector.shape_cast %0 : vector<1x32x34x4xbf16> to vector<32x34x4xbf16>
    %c0_3 = arith.constant 0 : index
    %c0_4 = arith.constant 0 : index
    %c0_5 = arith.constant 0 : index
    %c0_6 = arith.constant 0 : index
    %2 = vector.load %arg3[%c0_3, %c0_4, %c0_5, %c0_6] : memref<1x2x34x4xbf16, #tpu.memory_space<vmem>>, vector<1x2x34x4xbf16>
    %3 = vector.shape_cast %2 : vector<1x2x34x4xbf16> to vector<2x34x4xbf16>
    %4 = tpu.concatenate %1, %3 in 0 : vector<32x34x4xbf16>, vector<2x34x4xbf16> -> vector<34x34x4xbf16>
    %cst = arith.constant 0.000000e+00 : f32
    %5 = vector.broadcast %cst : f32 to vector<1024x128xf32>
    %6 = vector.extract_strided_slice %4 {offsets = [0, 0, 0], sizes = [32, 32, 4], strides = [1, 1, 1]} : vector<34x34x4xbf16> to vector<32x32x4xbf16>
    %7 = vector.shape_cast %6 : vector<32x32x4xbf16> to vector<1024x4xbf16>
    %c0_7 = arith.constant 0 : index
    %c0_8 = arith.constant 0 : index
    %c0_9 = arith.constant 0 : index
    %8 = vector.load %arg4[%c0_7, %c0_8, %c0_9] : memref<9x4x128xbf16, #tpu.memory_space<vmem>>, vector<1x4x128xbf16>
    %9 = vector.shape_cast %8 : vector<1x4x128xbf16> to vector<4x128xbf16>
    %cst_10 = arith.constant dense<0.000000e+00> : vector<1024x128xf32>
    %10 = tpu.matmul %7, %9, %cst_10 {dimension_numbers = #tpu.dot_dimension_numbers<[1], [0], [0], [1], [0, 0, 1, 1], [], []>} : vector<1024x4xbf16>, vector<4x128xbf16>, vector<1024x128xf32> -> vector<1024x128xf32>
    %11 = arith.addf %5, %10 : vector<1024x128xf32>
    %12 = vector.extract_strided_slice %4 {offsets = [0, 1, 0], sizes = [32, 32, 4], strides = [1, 1, 1]} : vector<34x34x4xbf16> to vector<32x32x4xbf16>
    %13 = vector.shape_cast %12 : vector<32x32x4xbf16> to vector<1024x4xbf16>
    %c1 = arith.constant 1 : index
    %c0_11 = arith.constant 0 : index
    %c0_12 = arith.constant 0 : index
    %14 = vector.load %arg4[%c1, %c0_11, %c0_12] : memref<9x4x128xbf16, #tpu.memory_space<vmem>>, vector<1x4x128xbf16>
    %15 = vector.shape_cast %14 : vector<1x4x128xbf16> to vector<4x128xbf16>
    %cst_13 = arith.constant dense<0.000000e+00> : vector<1024x128xf32>
    %16 = tpu.matmul %13, %15, %cst_13 {dimension_numbers = #tpu.dot_dimension_numbers<[1], [0], [0], [1], [0, 0, 1, 1], [], []>} : vector<1024x4xbf16>, vector<4x128xbf16>, vector<1024x128xf32> -> vector<1024x128xf32>
    %17 = arith.addf %11, %16 : vector<1024x128xf32>
    %18 = vector.extract_strided_slice %4 {offsets = [0, 2, 0], sizes = [32, 32, 4], strides = [1, 1, 1]} : vector<34x34x4xbf16> to vector<32x32x4xbf16>
    %19 = vector.shape_cast %18 : vector<32x32x4xbf16> to vector<1024x4xbf16>
    %c2 = arith.constant 2 : index
    %c0_14 = arith.constant 0 : index
    %c0_15 = arith.constant 0 : index
    %20 = vector.load %arg4[%c2, %c0_14, %c0_15] : memref<9x4x128xbf16, #tpu.memory_space<vmem>>, vector<1x4x128xbf16>
    %21 = vector.shape_cast %20 : vector<1x4x128xbf16> to vector<4x128xbf16>
    %cst_16 = arith.constant dense<0.000000e+00> : vector<1024x128xf32>
    %22 = tpu.matmul %19, %21, %cst_16 {dimension_numbers = #tpu.dot_dimension_numbers<[1], [0], [0], [1], [0, 0, 1, 1], [], []>} : vector<1024x4xbf16>, vector<4x128xbf16>, vector<1024x128xf32> -> vector<1024x128xf32>
    %23 = arith.addf %17, %22 : vector<1024x128xf32>
    %24 = vector.extract_strided_slice %4 {offsets = [1, 0, 0], sizes = [32, 32, 4], strides = [1, 1, 1]} : vector<34x34x4xbf16> to vector<32x32x4xbf16>
    %25 = vector.shape_cast %24 : vector<32x32x4xbf16> to vector<1024x4xbf16>
    %c3 = arith.constant 3 : index
    %c0_17 = arith.constant 0 : index
    %c0_18 = arith.constant 0 : index
    %26 = vector.load %arg4[%c3, %c0_17, %c0_18] : memref<9x4x128xbf16, #tpu.memory_space<vmem>>, vector<1x4x128xbf16>
    %27 = vector.shape_cast %26 : vector<1x4x128xbf16> to vector<4x128xbf16>
    %cst_19 = arith.constant dense<0.000000e+00> : vector<1024x128xf32>
    %28 = tpu.matmul %25, %27, %cst_19 {dimension_numbers = #tpu.dot_dimension_numbers<[1], [0], [0], [1], [0, 0, 1, 1], [], []>} : vector<1024x4xbf16>, vector<4x128xbf16>, vector<1024x128xf32> -> vector<1024x128xf32>
    %29 = arith.addf %23, %28 : vector<1024x128xf32>
    %30 = vector.extract_strided_slice %4 {offsets = [1, 1, 0], sizes = [32, 32, 4], strides = [1, 1, 1]} : vector<34x34x4xbf16> to vector<32x32x4xbf16>
    %31 = vector.shape_cast %30 : vector<32x32x4xbf16> to vector<1024x4xbf16>
    %c4 = arith.constant 4 : index
    %c0_20 = arith.constant 0 : index
    %c0_21 = arith.constant 0 : index
    %32 = vector.load %arg4[%c4, %c0_20, %c0_21] : memref<9x4x128xbf16, #tpu.memory_space<vmem>>, vector<1x4x128xbf16>
    %33 = vector.shape_cast %32 : vector<1x4x128xbf16> to vector<4x128xbf16>
    %cst_22 = arith.constant dense<0.000000e+00> : vector<1024x128xf32>
    %34 = tpu.matmul %31, %33, %cst_22 {dimension_numbers = #tpu.dot_dimension_numbers<[1], [0], [0], [1], [0, 0, 1, 1], [], []>} : vector<1024x4xbf16>, vector<4x128xbf16>, vector<1024x128xf32> -> vector<1024x128xf32>
    %35 = arith.addf %29, %34 : vector<1024x128xf32>
    %36 = vector.extract_strided_slice %4 {offsets = [1, 2, 0], sizes = [32, 32, 4], strides = [1, 1, 1]} : vector<34x34x4xbf16> to vector<32x32x4xbf16>
    %37 = vector.shape_cast %36 : vector<32x32x4xbf16> to vector<1024x4xbf16>
    %c5 = arith.constant 5 : index
    %c0_23 = arith.constant 0 : index
    %c0_24 = arith.constant 0 : index
    %38 = vector.load %arg4[%c5, %c0_23, %c0_24] : memref<9x4x128xbf16, #tpu.memory_space<vmem>>, vector<1x4x128xbf16>
    %39 = vector.shape_cast %38 : vector<1x4x128xbf16> to vector<4x128xbf16>
    %cst_25 = arith.constant dense<0.000000e+00> : vector<1024x128xf32>
    %40 = tpu.matmul %37, %39, %cst_25 {dimension_numbers = #tpu.dot_dimension_numbers<[1], [0], [0], [1], [0, 0, 1, 1], [], []>} : vector<1024x4xbf16>, vector<4x128xbf16>, vector<1024x128xf32> -> vector<1024x128xf32>
    %41 = arith.addf %35, %40 : vector<1024x128xf32>
    %42 = vector.extract_strided_slice %4 {offsets = [2, 0, 0], sizes = [32, 32, 4], strides = [1, 1, 1]} : vector<34x34x4xbf16> to vector<32x32x4xbf16>
    %43 = vector.shape_cast %42 : vector<32x32x4xbf16> to vector<1024x4xbf16>
    %c6 = arith.constant 6 : index
    %c0_26 = arith.constant 0 : index
    %c0_27 = arith.constant 0 : index
    %44 = vector.load %arg4[%c6, %c0_26, %c0_27] : memref<9x4x128xbf16, #tpu.memory_space<vmem>>, vector<1x4x128xbf16>
    %45 = vector.shape_cast %44 : vector<1x4x128xbf16> to vector<4x128xbf16>
    %cst_28 = arith.constant dense<0.000000e+00> : vector<1024x128xf32>
    %46 = tpu.matmul %43, %45, %cst_28 {dimension_numbers = #tpu.dot_dimension_numbers<[1], [0], [0], [1], [0, 0, 1, 1], [], []>} : vector<1024x4xbf16>, vector<4x128xbf16>, vector<1024x128xf32> -> vector<1024x128xf32>
    %47 = arith.addf %41, %46 : vector<1024x128xf32>
    %48 = vector.extract_strided_slice %4 {offsets = [2, 1, 0], sizes = [32, 32, 4], strides = [1, 1, 1]} : vector<34x34x4xbf16> to vector<32x32x4xbf16>
    %49 = vector.shape_cast %48 : vector<32x32x4xbf16> to vector<1024x4xbf16>
    %c7 = arith.constant 7 : index
    %c0_29 = arith.constant 0 : index
    %c0_30 = arith.constant 0 : index
    %50 = vector.load %arg4[%c7, %c0_29, %c0_30] : memref<9x4x128xbf16, #tpu.memory_space<vmem>>, vector<1x4x128xbf16>
    %51 = vector.shape_cast %50 : vector<1x4x128xbf16> to vector<4x128xbf16>
    %cst_31 = arith.constant dense<0.000000e+00> : vector<1024x128xf32>
    %52 = tpu.matmul %49, %51, %cst_31 {dimension_numbers = #tpu.dot_dimension_numbers<[1], [0], [0], [1], [0, 0, 1, 1], [], []>} : vector<1024x4xbf16>, vector<4x128xbf16>, vector<1024x128xf32> -> vector<1024x128xf32>
    %53 = arith.addf %47, %52 : vector<1024x128xf32>
    %54 = vector.extract_strided_slice %4 {offsets = [2, 2, 0], sizes = [32, 32, 4], strides = [1, 1, 1]} : vector<34x34x4xbf16> to vector<32x32x4xbf16>
    %55 = vector.shape_cast %54 : vector<32x32x4xbf16> to vector<1024x4xbf16>
    %c8 = arith.constant 8 : index
    %c0_32 = arith.constant 0 : index
    %c0_33 = arith.constant 0 : index
    %56 = vector.load %arg4[%c8, %c0_32, %c0_33] : memref<9x4x128xbf16, #tpu.memory_space<vmem>>, vector<1x4x128xbf16>
    %57 = vector.shape_cast %56 : vector<1x4x128xbf16> to vector<4x128xbf16>
    %cst_34 = arith.constant dense<0.000000e+00> : vector<1024x128xf32>
    %58 = tpu.matmul %55, %57, %cst_34 {dimension_numbers = #tpu.dot_dimension_numbers<[1], [0], [0], [1], [0, 0, 1, 1], [], []>} : vector<1024x4xbf16>, vector<4x128xbf16>, vector<1024x128xf32> -> vector<1024x128xf32>
    %59 = arith.addf %53, %58 : vector<1024x128xf32>
    %60 = arith.truncf %59 : vector<1024x128xf32> to vector<1024x128xbf16>
    %c0_35 = arith.constant 0 : index
    %c0_36 = arith.constant 0 : index
    %61 = vector.load %arg5[%c0_35, %c0_36] : memref<1024x128xbf16, #tpu.memory_space<vmem>>, vector<1024x128xbf16>
    tpu.vector_store %arg5[%c0_35, %c0_36], %60 {strides = array<i32>} : memref<1024x128xbf16, #tpu.memory_space<vmem>>, vector<1024x128xbf16>,
    %cst_37 = arith.constant dense<0.000000e+00> : vector<128xf32>
    %62 = vector.multi_reduction <add>, %59, %cst_37 [0] : vector<1024x128xf32> to vector<128xf32>
    %63 = vector.shape_cast %62 : vector<128xf32> to vector<1x128xf32>
    %64 = arith.mulf %59, %59 : vector<1024x128xf32>
    %cst_38 = arith.constant dense<0.000000e+00> : vector<128xf32>
    %65 = vector.multi_reduction <add>, %64, %cst_38 [0] : vector<1024x128xf32> to vector<128xf32>
    %66 = vector.shape_cast %65 : vector<128xf32> to vector<1x128xf32>
    %67 = tpu.concatenate %63, %66 in 0 : vector<1x128xf32>, vector<1x128xf32> -> vector<2x128xf32>
    %68 = vector.shape_cast %67 : vector<2x128xf32> to vector<1x1x2x128xf32>
    %c0_39 = arith.constant 0 : index
    %c0_40 = arith.constant 0 : index
    %c0_41 = arith.constant 0 : index
    %c0_42 = arith.constant 0 : index
    %69 = vector.load %arg6[%c0_39, %c0_40, %c0_41, %c0_42] : memref<1x1x2x128xf32, #tpu.memory_space<vmem>>, vector<1x1x2x128xf32>
    tpu.vector_store %arg6[%c0_39, %c0_40, %c0_41, %c0_42], %68 {strides = array<i32>} : memref<1x1x2x128xf32, #tpu.memory_space<vmem>>, vector<1x1x2x128xf32>,
    return
  }
  func.func @transform_0(%arg0: i32, %arg1: i32) -> (i32, i32, i32, i32) {
    %c0_i32 = arith.constant 0 : i32
    %c0_i32_0 = arith.constant 0 : i32
    %c0_i32_1 = arith.constant 0 : i32
    return %arg0, %arg1, %c0_i32, %c0_i32_0 : i32, i32, i32, i32
  }
  func.func @transform_1(%arg0: i32, %arg1: i32) -> (i32, i32, i32, i32) {
    %c1_i32 = arith.constant 1 : i32
    %0 = arith.addi %arg1, %c1_i32 : i32
    %c16_i32 = arith.constant 16 : i32
    %1 = arith.muli %0, %c16_i32 : i32
    %c0_i32 = arith.constant 0 : i32
    %c0_i32_0 = arith.constant 0 : i32
    %c0_i32_1 = arith.constant 0 : i32
    return %arg0, %1, %c0_i32, %c0_i32_0 : i32, i32, i32, i32
  }
  func.func @transform_2(%arg0: i32, %arg1: i32) -> (i32, i32, i32) {
    %c0_i32 = arith.constant 0 : i32
    %c0_i32_0 = arith.constant 0 : i32
    %c0_i32_1 = arith.constant 0 : i32
    %c0_i32_2 = arith.constant 0 : i32
    return %c0_i32, %c0_i32_0, %c0_i32_1 : i32, i32, i32
  }
  func.func @transform_3(%arg0: i32, %arg1: i32) -> (i32, i32) {
    %c1_i32 = arith.constant 1 : i32
    %0 = arith.muli %arg0, %c1_i32 : i32
    %1 = arith.addi %0, %arg1 : i32
    %c0_i32 = arith.constant 0 : i32
    %c0_i32_0 = arith.constant 0 : i32
    return %1, %c0_i32 : i32, i32
  }
  func.func @transform_4(%arg0: i32, %arg1: i32) -> (i32, i32, i32, i32) {
    %c0_i32 = arith.constant 0 : i32
    %c0_i32_0 = arith.constant 0 : i32
    %c0_i32_1 = arith.constant 0 : i32
    return %arg0, %arg1, %c0_i32, %c0_i32_0 : i32, i32, i32, i32
  }
}

module attributes {stable_mosaic.version = 11 : i64} {
  func.func @_bn_prelu_kernel(%arg0: i32, %arg1: memref<1024x128xbf16, #tpu.memory_space<vmem>>, %arg2: memref<1x128xf32, #tpu.memory_space<vmem>>, %arg3: memref<1x128xf32, #tpu.memory_space<vmem>>, %arg4: memref<1xf32, #tpu.memory_space<smem>>, %arg5: memref<1024x128xf32, #tpu.memory_space<vmem>>) attributes {dimension_semantics = [#tpu.dimension_semantics<parallel>], iteration_bounds = array<i64: 2>, scalar_prefetch = 0 : i64, scratch_operands = 0 : i64, tpu.core_type = #tpu.core_type<tc>, window_params = [{transform_indices = @transform_0, window_bounds = array<i64: 1024, 128>}, {pipeline_mode = #tpu.pipeline_mode<synchronous>, transform_indices = @transform_1, window_bounds = array<i64: 1, 128>}, {pipeline_mode = #tpu.pipeline_mode<synchronous>, transform_indices = @transform_2, window_bounds = array<i64: 1, 128>}, {transform_indices = @transform_3, window_bounds = array<i64: 1>}, {transform_indices = @transform_4, window_bounds = array<i64: 1024, 128>}]} {
    %c0 = arith.constant 0 : index
    %c0_0 = arith.constant 0 : index
    %0 = vector.load %arg1[%c0, %c0_0] : memref<1024x128xbf16, #tpu.memory_space<vmem>>, vector<1024x128xbf16>
    %1 = arith.extf %0 : vector<1024x128xbf16> to vector<1024x128xf32>
    %c0_1 = arith.constant 0 : index
    %c0_2 = arith.constant 0 : index
    %2 = vector.load %arg2[%c0_1, %c0_2] : memref<1x128xf32, #tpu.memory_space<vmem>>, vector<1x128xf32>
    %3 = vector.broadcast %2 : vector<1x128xf32> to vector<1024x128xf32>
    %4 = arith.mulf %1, %3 : vector<1024x128xf32>
    %c0_3 = arith.constant 0 : index
    %c0_4 = arith.constant 0 : index
    %5 = vector.load %arg3[%c0_3, %c0_4] : memref<1x128xf32, #tpu.memory_space<vmem>>, vector<1x128xf32>
    %6 = vector.broadcast %5 : vector<1x128xf32> to vector<1024x128xf32>
    %7 = arith.addf %4, %6 : vector<1024x128xf32>
    %c0_5 = arith.constant 0 : index
    %8 = memref.load %arg4[%c0_5] : memref<1xf32, #tpu.memory_space<smem>>
    %cst = arith.constant 0.000000e+00 : f32
    %9 = vector.broadcast %cst : f32 to vector<1024x128xf32>
    %10 = arith.cmpf oge, %7, %9 : vector<1024x128xf32>
    %11 = vector.broadcast %8 : f32 to vector<1024x128xf32>
    %12 = arith.mulf %11, %7 : vector<1024x128xf32>
    %13 = arith.select %10, %7, %12 : vector<1024x128xi1>, vector<1024x128xf32>
    %c0_6 = arith.constant 0 : index
    %c0_7 = arith.constant 0 : index
    %14 = vector.load %arg5[%c0_6, %c0_7] : memref<1024x128xf32, #tpu.memory_space<vmem>>, vector<1024x128xf32>
    tpu.vector_store %arg5[%c0_6, %c0_7], %13 {strides = array<i32>} : memref<1024x128xf32, #tpu.memory_space<vmem>>, vector<1024x128xf32>,
    return
  }
  func.func @transform_0(%arg0: i32) -> (i32, i32) {
    %c0_i32 = arith.constant 0 : i32
    %c0_i32_0 = arith.constant 0 : i32
    return %arg0, %c0_i32 : i32, i32
  }
  func.func @transform_1(%arg0: i32) -> (i32, i32) {
    %c0_i32 = arith.constant 0 : i32
    %c0_i32_0 = arith.constant 0 : i32
    %c0_i32_1 = arith.constant 0 : i32
    return %c0_i32, %c0_i32_0 : i32, i32
  }
  func.func @transform_2(%arg0: i32) -> (i32, i32) {
    %c0_i32 = arith.constant 0 : i32
    %c0_i32_0 = arith.constant 0 : i32
    %c0_i32_1 = arith.constant 0 : i32
    return %c0_i32, %c0_i32_0 : i32, i32
  }
  func.func @transform_3(%arg0: i32) -> i32 {
    %c0_i32 = arith.constant 0 : i32
    %c0_i32_0 = arith.constant 0 : i32
    return %c0_i32 : i32
  }
  func.func @transform_4(%arg0: i32) -> (i32, i32) {
    %c0_i32 = arith.constant 0 : i32
    %c0_i32_0 = arith.constant 0 : i32
    return %arg0, %c0_i32 : i32, i32
  }
}

</mosaic_0001>

<bundles_post_ra>
// kernel: psp_upsample.3
= control target key start
LH: loop header
LB: loop body
LE: loop exit
PB: predicated region body
PF: predicated region fallthrough
CT: control target
= control target key end

     0   :  { %s1676_s17 = smov 0   ;;  %s2299_s0 = inlined_call_operand.vmem [shape: bf16[2048,128], index: 0, kind: input, shape index: {}]   ;;  %s2300_s1 = inlined_call_operand.vmem [shape: f32[1,128], index: 1, kind: input, shape index: {}]   ;;  %s2301_s2 = inlined_call_operand.vmem [shape: f32[1,128], index: 2, kind: input, shape index: {}]   ;;  %s2302_s3 = inlined_call_operand.<no memory space> [shape: f32[1], index: 3, kind: input, shape index: {}]   ;;  %s2303_s4 = inlined_call_operand.vmem [shape: f32[2048,128], index: 4, kind: output, shape index: {}]  }
   0x1   :  { %9 = sst [smem:[#allocation2]] %s2302_s3 }
   0x2 LB: > { %s1298_s18 = sadd.s32 4294967295, %s1646_s17   ;;  %p1302_p0 = scmp.ge.s32.totalorder %s1646_s17, 1  ;;  %s1646_s17 = sphi %s1676_s17, %s15_s17  }
   0x3   : > { %p164_p1 = scmp.lt.s32.totalorder %s1646_s17, 3 }
   0x5   : > { %p165_p2 = pnand %p1302_p0, %p164_p1 }
   0x6   : > { %s1303_s19 = sshll.u32 (!%p165_p2), %s1298_s18, 7  ;;  %s728_s20 = sld [smem:[#allocation2]] (!%p165_p2)  ;;  %v1695_v0 = vld [vmem:[%s2300_s1] ss:$0 sm:$0xff] (!%p165_p2) }
   0x7   : > { %168 = sbr.rel (%p165_p2) target bundleno = 213 (0xd5), region = 36  ;;  %p191_p3 = scmp.lt.s32.totalorder (!%p165_p2), %s1303_s19, 255  ;;  %v1706_v10 = vld [vmem:[%s2301_s2] ss:$0 sm:$0xff] (!%p165_p2) }
   0xc   : > { %v1698_v2 = vstv (!%p165_p2), %s728_s20 }
   0xe   : > { %s2305_s19 = smov (!%p191_p3, %s1303_s19), 255 }
   0xf   : > { %s1304_s3 = sshll.u32 %s2305_s19, 2  ;;  %s1306_s28 = sshll.u32 %s2305_s19, 3 }
  0x10   : > { %s1690_s23 = scalar_lea.vmem %s2299_s0, %s1304_s3  ;;  %s1728_s5 = scalar_lea.vmem %s2303_s4, %s1306_s28 }
  0x11   : > { %v1312_v1 = vld [vmem:[%s1690_s23] sm:$0xff]   ;;  %v1567_v3 = vld [vmem:[%s1690_s23 + $0x8] sm:$0xff]   ;;  %v1568_v4 = vld [vmem:[%s1690_s23 + $0x10] sm:$0xff]  }
  0x12   : > { %v1313_v5 = vunpack.c.l.bf16 %v1312_v1  ;;  %v1314_v6 = vunpack.c.h.bf16 %v1312_v1  ;;  %v1317_v7 = vunpack.c.l.bf16 %v1567_v3  ;;  %v1318_v8 = vunpack.c.h.bf16 %v1567_v3  ;;  %v1569_v9 = vld [vmem:[%s1690_s23 + $0x18] sm:$0xff]   ;;  %v1570_v38 = vld [vmem:[%s1690_s23 + $0x20] sm:$0xff]   ;;  %v1571_v42 = vld [vmem:[%s1690_s23 + $0x28] sm:$0xff]  }
  0x13   : > { %v1321_v11 = vunpack.c.l.bf16 %v1568_v4  ;;  %v1322_v12 = vunpack.c.h.bf16 %v1568_v4  ;;  %v1325_v13 = vunpack.c.l.bf16 %v1569_v9  ;;  %v1326_v14 = vunpack.c.h.bf16 %v1569_v9  ;;  %v1572_v43 = vld [vmem:[%s1690_s23 + $0x30] sm:$0xff]   ;;  %v1573_v50 = vld [vmem:[%s1690_s23 + $0x38] sm:$0xff]  }
  0x14   : > { %v465_v15 = vmul.f32 %v1313_v5, %v1695_v0  ;;  %v466_v16 = vmul.f32 %v1314_v6, %v1695_v0  ;;  %v467_v17 = vmul.f32 %v1317_v7, %v1695_v0  ;;  %v468_v18 = vmul.f32 %v1318_v8, %v1695_v0 }
  0x15   : > { %v469_v19 = vmul.f32 %v1321_v11, %v1695_v0  ;;  %v470_v20 = vmul.f32 %v1322_v12, %v1695_v0  ;;  %v471_v21 = vmul.f32 %v1325_v13, %v1695_v0  ;;  %v472_v22 = vmul.f32 %v1326_v14, %v1695_v0  ;;  %v1574_v14 = vld [vmem:[%s1690_s23 + $0x40] sm:$0xff]  }
  0x16   : > { %v600_v23 = vadd.f32 %v1706_v10, %v465_v15  ;;  %v601_v24 = vadd.f32 %v1706_v10, %v466_v16  ;;  %v602_v25 = vadd.f32 %v1706_v10, %v467_v17  ;;  %v603_v26 = vadd.f32 %v1706_v10, %v468_v18 }
  0x17   : > { %v604_v27 = vadd.f32 %v1706_v10, %v469_v19  ;;  %v605_v28 = vadd.f32 %v1706_v10, %v470_v20  ;;  %v606_v29 = vadd.f32 %v1706_v10, %v471_v21  ;;  %v607_v30 = vadd.f32 %v1706_v10, %v472_v22  ;;  %v1575_v22 = vld [vmem:[%s1690_s23 + $0x48] sm:$0xff]  }
  0x18   : > { %vm729_vm0 = vcmp.ge.f32.partialorder %v600_v23, 0.0  ;;  %v858_v31 = vmul.f32 %v1698_v2, %v600_v23  ;;  %vm730_vm1 = vcmp.ge.f32.partialorder %v601_v24, 0.0  ;;  %v859_v32 = vmul.f32 %v1698_v2, %v601_v24 }
  0x19   : > { %vm731_vm2 = vcmp.ge.f32.partialorder %v602_v25, 0.0  ;;  %v860_v33 = vmul.f32 %v1698_v2, %v602_v25  ;;  %vm732_vm3 = vcmp.ge.f32.partialorder %v603_v26, 0.0  ;;  %v861_v34 = vmul.f32 %v1698_v2, %v603_v26 }
  0x1a   : > { %v986_v35 = vsel %vm729_vm0, %v600_v23, %v858_v31  ;;  %v987_v36 = vsel %vm730_vm1, %v601_v24, %v859_v32  ;;  %vm733_vm4 = vcmp.ge.f32.partialorder %v604_v27, 0.0  ;;  %v862_v37 = vmul.f32 %v1698_v2, %v604_v27 }
  0x1b   : > { %1114 = vst [vmem:[%s1728_s5] sm:$0xff] %v986_v35  ;;  %1115 = vst [vmem:[%s1728_s5 + $0x8] sm:$0xff] %v987_v36  ;;  %v988_v39 = vsel %vm731_vm2, %v602_v25, %v860_v33  ;;  %v989_v40 = vsel %vm732_vm3, %v603_v26, %v861_v34  ;;  %vm734_vm5 = vcmp.ge.f32.partialorder %v605_v28, 0.0  ;;  %v863_v41 = vmul.f32 %v1698_v2, %v605_v28 }
  0x1c   : > { %1116 = vst [vmem:[%s1728_s5 + $0x10] sm:$0xff] %v988_v39  ;;  %1117 = vst [vmem:[%s1728_s5 + $0x18] sm:$0xff] %v989_v40  ;;  %v990_v44 = vsel %vm733_vm4, %v604_v27, %v862_v37  ;;  %vm735_vm6 = vcmp.ge.f32.partialorder %v606_v29, 0.0  ;;  %v864_v45 = vmul.f32 %v1698_v2, %v606_v29  ;;  %vm736_vm7 = vcmp.ge.f32.partialorder %v607_v30, 0.0  ;;  %v1576_v27 = vld [vmem:[%s1690_s23 + $0x50] sm:$0xff]  }
  0x1d   : > { %1118 = vst [vmem:[%s1728_s5 + $0x20] sm:$0xff] %v990_v44  ;;  %v991_v46 = vsel %vm734_vm5, %v605_v28, %v863_v41  ;;  %v865_v47 = vmul.f32 %v1698_v2, %v607_v30  ;;  %v1329_v48 = vunpack.c.l.bf16 %v1570_v38  ;;  %v1330_v49 = vunpack.c.h.bf16 %v1570_v38 }
  0x1e   : > { %1119 = vst [vmem:[%s1728_s5 + $0x28] sm:$0xff] %v991_v46  ;;  %v992_v51 = vsel %vm735_vm6, %v606_v29, %v864_v45  ;;  %v1333_v52 = vunpack.c.l.bf16 %v1571_v42  ;;  %v1334_v53 = vunpack.c.h.bf16 %v1571_v42  ;;  %v1337_v54 = vunpack.c.l.bf16 %v1572_v43  ;;  %v1577_v45 = vld [vmem:[%s1690_s23 + $0x58] sm:$0xff]  }
  0x1f   : > { %1120 = vst [vmem:[%s1728_s5 + $0x30] sm:$0xff] %v992_v51  ;;  %v993_v55 = vsel %vm736_vm7, %v607_v30, %v865_v47  ;;  %v473_v56 = vmul.f32 %v1329_v48, %v1695_v0  ;;  %v474_v57 = vmul.f32 %v1330_v49, %v1695_v0  ;;  %v1338_v58 = vunpack.c.h.bf16 %v1572_v43 }
  0x20   : > { %1121 = vst [vmem:[%s1728_s5 + $0x38] sm:$0xff] %v993_v55  ;;  %v475_v59 = vmul.f32 %v1333_v52, %v1695_v0  ;;  %v476_v60 = vmul.f32 %v1334_v53, %v1695_v0  ;;  %v477_v61 = vmul.f32 %v1337_v54, %v1695_v0  ;;  %v1341_v62 = vunpack.c.l.bf16 %v1573_v50 }
  0x21   : > { %v608_v63 = vadd.f32 %v1706_v10, %v473_v56  ;;  %v609_v1 = vadd.f32 %v1706_v10, %v474_v57  ;;  %v478_v3 = vmul.f32 %v1338_v58, %v1695_v0  ;;  %v1342_v4 = vunpack.c.h.bf16 %v1573_v50  ;;  %v1578_v56 = vld [vmem:[%s1690_s23 + $0x60] sm:$0xff]  }
  0x22   : > { %v610_v5 = vadd.f32 %v1706_v10, %v475_v59  ;;  %v611_v6 = vadd.f32 %v1706_v10, %v476_v60  ;;  %v612_v7 = vadd.f32 %v1706_v10, %v477_v61  ;;  %v479_v8 = vmul.f32 %v1341_v62, %v1695_v0 }
  0x23   : > { %vm737_vm8 = vcmp.ge.f32.partialorder %v608_v63, 0.0  ;;  %v866_v9 = vmul.f32 %v1698_v2, %v608_v63  ;;  %vm738_vm9 = vcmp.ge.f32.partialorder %v609_v1, 0.0  ;;  %v867_v11 = vmul.f32 %v1698_v2, %v609_v1 }
  0x24   : > { %vm739_vm10 = vcmp.ge.f32.partialorder %v610_v5, 0.0  ;;  %v868_v12 = vmul.f32 %v1698_v2, %v610_v5  ;;  %vm740_vm11 = vcmp.ge.f32.partialorder %v611_v6, 0.0  ;;  %v869_v13 = vmul.f32 %v1698_v2, %v611_v6 }
  0x25   : > { %v994_v15 = vsel %vm737_vm8, %v608_v63, %v866_v9  ;;  %v995_v16 = vsel %vm738_vm9, %v609_v1, %v867_v11  ;;  %vm741_vm12 = vcmp.ge.f32.partialorder %v612_v7, 0.0  ;;  %v870_v17 = vmul.f32 %v1698_v2, %v612_v7 }
  0x26   : > { %1122 = vst [vmem:[%s1728_s5 + $0x40] sm:$0xff] %v994_v15  ;;  %1123 = vst [vmem:[%s1728_s5 + $0x48] sm:$0xff] %v995_v16  ;;  %v996_v18 = vsel %vm739_vm10, %v610_v5, %v868_v12  ;;  %v997_v19 = vsel %vm740_vm11, %v611_v6, %v869_v13  ;;  %v613_v20 = vadd.f32 %v1706_v10, %v478_v3  ;;  %v1345_v25 = vunpack.c.l.bf16 %v1574_v14  ;;  %v1580_v5 = vld [vmem:[%s1690_s23 + $0x70] sm:$0xff]  }
  0x27   : > { %v614_v21 = vadd.f32 %v1706_v10, %v479_v8  ;;  %1124 = vst [vmem:[%s1728_s5 + $0x50] sm:$0xff] %v996_v18  ;;  %1125 = vst [vmem:[%s1728_s5 + $0x58] sm:$0xff] %v997_v19  ;;  %v998_v23 = vsel %vm741_vm12, %v612_v7, %v870_v17  ;;  %v480_v24 = vmul.f32 %v1342_v4, %v1695_v0  ;;  %v1346_v26 = vunpack.c.h.bf16 %v1574_v14  ;;  %v1579_v4 = vld [vmem:[%s1690_s23 + $0x68] sm:$0xff]  }
  0x28   : > { %1126 = vst [vmem:[%s1728_s5 + $0x60] sm:$0xff] %v998_v23  ;;  %vm742_vm13 = vcmp.ge.f32.partialorder %v613_v20, 0.0  ;;  %v871_v28 = vmul.f32 %v1698_v2, %v613_v20  ;;  %v481_v31 = vmul.f32 %v1345_v25, %v1695_v0  ;;  %v1349_v33 = vunpack.c.l.bf16 %v1575_v22 }
  0x29   : > { %vm743_vm14 = vcmp.ge.f32.partialorder %v614_v21, 0.0  ;;  %v872_v29 = vmul.f32 %v1698_v2, %v614_v21  ;;  %v615_v30 = vadd.f32 %v1706_v10, %v480_v24  ;;  %v482_v32 = vmul.f32 %v1346_v26, %v1695_v0  ;;  %v1581_v24 = vld [vmem:[%s1690_s23 + $0x78] sm:$0xff]  }
  0x2a   : > { %v999_v34 = vsel %vm742_vm13, %v613_v20, %v871_v28  ;;  %v1350_v36 = vunpack.c.h.bf16 %v1575_v22  ;;  %v1353_v37 = vunpack.c.l.bf16 %v1576_v27  ;;  %v616_v39 = vadd.f32 %v1706_v10, %v481_v31 }
  0x2b   : > { %v1000_v35 = vsel %vm743_vm14, %v614_v21, %v872_v29  ;;  %1127 = vst [vmem:[%s1728_s5 + $0x68] sm:$0xff] %v999_v34  ;;  %vm744_vm15 = vcmp.ge.f32.partialorder %v615_v30, 0.0  ;;  %v873_v38 = vmul.f32 %v1698_v2, %v615_v30  ;;  %v617_v40 = vadd.f32 %v1706_v10, %v482_v32 }
  0x2c   : > { %1128 = vst [vmem:[%s1728_s5 + $0x70] sm:$0xff] %v1000_v35  ;;  %v483_v41 = vmul.f32 %v1349_v33, %v1695_v0  ;;  %v484_v42 = vmul.f32 %v1350_v36, %v1695_v0  ;;  %v485_v43 = vmul.f32 %v1353_v37, %v1695_v0  ;;  %v1354_v44 = vunpack.c.h.bf16 %v1576_v27 }
  0x2d   : > { %v1001_v46 = vsel %vm744_vm15, %v615_v30, %v873_v38  ;;  %vm745_vm0 = vcmp.ge.f32.partialorder %v616_v39, 0.0  ;;  %v874_v47 = vmul.f32 %v1698_v2, %v616_v39  ;;  %vm746_vm1 = vcmp.ge.f32.partialorder %v617_v40, 0.0  ;;  %v1582_v38 = vld [vmem:[%s1690_s23 + $0x80] sm:$0xff]  }
  0x2e   : > { %1129 = vst [vmem:[%s1728_s5 + $0x78] sm:$0xff] %v1001_v46  ;;  %v875_v48 = vmul.f32 %v1698_v2, %v617_v40  ;;  %v618_v49 = vadd.f32 %v1706_v10, %v483_v41  ;;  %v619_v50 = vadd.f32 %v1706_v10, %v484_v42  ;;  %v620_v51 = vadd.f32 %v1706_v10, %v485_v43 }
  0x2f   : > { %v1002_v52 = vsel %vm745_vm0, %v616_v39, %v874_v47  ;;  %v486_v53 = vmul.f32 %v1354_v44, %v1695_v0  ;;  %v1357_v54 = vunpack.c.l.bf16 %v1577_v45  ;;  %v1358_v55 = vunpack.c.h.bf16 %v1577_v45  ;;  %v1583_v45 = vld [vmem:[%s1690_s23 + $0x88] sm:$0xff]  }
  0x30   : > { %1130 = vst [vmem:[%s1728_s5 + $0x80] sm:$0xff] %v1002_v52  ;;  %v1003_v57 = vsel %vm746_vm1, %v617_v40, %v875_v48  ;;  %vm747_vm2 = vcmp.ge.f32.partialorder %v618_v49, 0.0  ;;  %v876_v58 = vmul.f32 %v1698_v2, %v618_v49  ;;  %vm748_vm3 = vcmp.ge.f32.partialorder %v619_v50, 0.0 }
  0x31   : > { %1131 = vst [vmem:[%s1728_s5 + $0x88] sm:$0xff] %v1003_v57  ;;  %v877_v59 = vmul.f32 %v1698_v2, %v619_v50  ;;  %vm749_vm4 = vcmp.ge.f32.partialorder %v620_v51, 0.0  ;;  %v878_v60 = vmul.f32 %v1698_v2, %v620_v51  ;;  %v621_v61 = vadd.f32 %v1706_v10, %v486_v53  ;;  %v1584_v57 = vld [vmem:[%s1690_s23 + $0x90] sm:$0xff]  }
  0x32   : > { %v1004_v62 = vsel %vm747_vm2, %v618_v49, %v876_v58  ;;  %v487_v63 = vmul.f32 %v1357_v54, %v1695_v0  ;;  %v488_v1 = vmul.f32 %v1358_v55, %v1695_v0  ;;  %v1361_v3 = vunpack.c.l.bf16 %v1578_v56 }
  0x33   : > { %1132 = vst [vmem:[%s1728_s5 + $0x90] sm:$0xff] %v1004_v62  ;;  %v1005_v6 = vsel %vm748_vm3, %v619_v50, %v877_v59  ;;  %v1006_v7 = vsel %vm749_vm4, %v620_v51, %v878_v60  ;;  %vm750_vm5 = vcmp.ge.f32.partialorder %v621_v61, 0.0  ;;  %v879_v8 = vmul.f32 %v1698_v2, %v621_v61 }
  0x34   : > { %1133 = vst [vmem:[%s1728_s5 + $0x98] sm:$0xff] %v1005_v6  ;;  %1134 = vst [vmem:[%s1728_s5 + $0xa0] sm:$0xff] %v1006_v7  ;;  %v622_v9 = vadd.f32 %v1706_v10, %v487_v63  ;;  %v623_v11 = vadd.f32 %v1706_v10, %v488_v1  ;;  %v489_v12 = vmul.f32 %v1361_v3, %v1695_v0  ;;  %v1362_v13 = vunpack.c.h.bf16 %v1578_v56  ;;  %v1585_v7 = vld [vmem:[%s1690_s23 + $0x98] sm:$0xff]  }
  0x35   : > { %v1007_v14 = vsel %vm750_vm5, %v621_v61, %v879_v8  ;;  %v1365_v15 = vunpack.c.l.bf16 %v1579_v4  ;;  %v1366_v16 = vunpack.c.h.bf16 %v1579_v4  ;;  %v1369_v17 = vunpack.c.l.bf16 %v1580_v5 }
  0x36   : > { %1135 = vst [vmem:[%s1728_s5 + $0xa8] sm:$0xff] %v1007_v14  ;;  %vm751_vm6 = vcmp.ge.f32.partialorder %v622_v9, 0.0  ;;  %v880_v18 = vmul.f32 %v1698_v2, %v622_v9  ;;  %vm752_vm7 = vcmp.ge.f32.partialorder %v623_v11, 0.0  ;;  %v881_v19 = vmul.f32 %v1698_v2, %v623_v11 }
  0x37   : > { %v624_v20 = vadd.f32 %v1706_v10, %v489_v12  ;;  %v490_v21 = vmul.f32 %v1362_v13, %v1695_v0  ;;  %v491_v22 = vmul.f32 %v1365_v15, %v1695_v0  ;;  %v492_v23 = vmul.f32 %v1366_v16, %v1695_v0 }
  0x38   : > { %v1008_v25 = vsel %vm751_vm6, %v622_v9, %v880_v18  ;;  %v1009_v26 = vsel %vm752_vm7, %v623_v11, %v881_v19  ;;  %v493_v27 = vmul.f32 %v1369_v17, %v1695_v0  ;;  %v1370_v28 = vunpack.c.h.bf16 %v1580_v5 }
  0x39   : > { %1136 = vst [vmem:[%s1728_s5 + $0xb0] sm:$0xff] %v1008_v25  ;;  %1137 = vst [vmem:[%s1728_s5 + $0xb8] sm:$0xff] %v1009_v26  ;;  %vm753_vm8 = vcmp.ge.f32.partialorder %v624_v20, 0.0  ;;  %v882_v29 = vmul.f32 %v1698_v2, %v624_v20  ;;  %v625_v30 = vadd.f32 %v1706_v10, %v490_v21  ;;  %v626_v31 = vadd.f32 %v1706_v10, %v491_v22 }
  0x3a   : > { %v627_v32 = vadd.f32 %v1706_v10, %v492_v23  ;;  %v628_v33 = vadd.f32 %v1706_v10, %v493_v27  ;;  %v494_v34 = vmul.f32 %v1370_v28, %v1695_v0  ;;  %v1373_v35 = vunpack.c.l.bf16 %v1581_v24 }
  0x3b   : > { %v1010_v36 = vsel %vm753_vm8, %v624_v20, %v882_v29  ;;  %vm754_vm9 = vcmp.ge.f32.partialorder %v625_v30, 0.0  ;;  %v883_v37 = vmul.f32 %v1698_v2, %v625_v30  ;;  %vm755_vm10 = vcmp.ge.f32.partialorder %v626_v31, 0.0  ;;  %v1587_v29 = vld [vmem:[%s1690_s23 + $0xa8] sm:$0xff]  }
  0x3c   : > { %1138 = vst [vmem:[%s1728_s5 + $0xc0] sm:$0xff] %v1010_v36  ;;  %v884_v39 = vmul.f32 %v1698_v2, %v626_v31  ;;  %vm756_vm11 = vcmp.ge.f32.partialorder %v627_v32, 0.0  ;;  %v885_v40 = vmul.f32 %v1698_v2, %v627_v32  ;;  %vm757_vm12 = vcmp.ge.f32.partialorder %v628_v33, 0.0 }
  0x3d   : > { %v1011_v41 = vsel %vm754_vm9, %v625_v30, %v883_v37  ;;  %v886_v42 = vmul.f32 %v1698_v2, %v628_v33  ;;  %v629_v43 = vadd.f32 %v1706_v10, %v494_v34  ;;  %v495_v44 = vmul.f32 %v1373_v35, %v1695_v0 }
  0x3e   : > { %1139 = vst [vmem:[%s1728_s5 + $0xc8] sm:$0xff] %v1011_v41  ;;  %v1012_v46 = vsel %vm755_vm10, %v626_v31, %v884_v39  ;;  %v1013_v47 = vsel %vm756_vm11, %v627_v32, %v885_v40  ;;  %v1374_v48 = vunpack.c.h.bf16 %v1581_v24  ;;  %v1377_v49 = vunpack.c.l.bf16 %v1582_v38  ;;  %v1586_v24 = vld [vmem:[%s1690_s23 + $0xa0] sm:$0xff]   ;;  %v1588_v40 = vld [vmem:[%s1690_s23 + $0xb0] sm:$0xff]  }
  0x3f   : > { %1140 = vst [vmem:[%s1728_s5 + $0xd0] sm:$0xff] %v1012_v46  ;;  %1141 = vst [vmem:[%s1728_s5 + $0xd8] sm:$0xff] %v1013_v47  ;;  %v1014_v50 = vsel %vm757_vm12, %v628_v33, %v886_v42  ;;  %vm758_vm13 = vcmp.ge.f32.partialorder %v629_v43, 0.0  ;;  %v887_v51 = vmul.f32 %v1698_v2, %v629_v43  ;;  %v630_v52 = vadd.f32 %v1706_v10, %v495_v44 }
  0x40   : > { %1142 = vst [vmem:[%s1728_s5 + $0xe0] sm:$0xff] %v1014_v50  ;;  %v496_v53 = vmul.f32 %v1374_v48, %v1695_v0  ;;  %v497_v54 = vmul.f32 %v1377_v49, %v1695_v0  ;;  %v1378_v55 = vunpack.c.h.bf16 %v1582_v38  ;;  %v1381_v56 = vunpack.c.l.bf16 %v1583_v45  ;;  %v1589_v48 = vld [vmem:[%s1690_s23 + $0xb8] sm:$0xff]  }
  0x41   : > { %v1015_v58 = vsel %vm758_vm13, %v629_v43, %v887_v51  ;;  %vm759_vm14 = vcmp.ge.f32.partialorder %v630_v52, 0.0  ;;  %v888_v59 = vmul.f32 %v1698_v2, %v630_v52  ;;  %v1382_v60 = vunpack.c.h.bf16 %v1583_v45 }
  0x42   : > { %1143 = vst [vmem:[%s1728_s5 + $0xe8] sm:$0xff] %v1015_v58  ;;  %v631_v61 = vadd.f32 %v1706_v10, %v496_v53  ;;  %v632_v62 = vadd.f32 %v1706_v10, %v497_v54  ;;  %v498_v63 = vmul.f32 %v1378_v55, %v1695_v0  ;;  %v499_v1 = vmul.f32 %v1381_v56, %v1695_v0 }
  0x43   : > { %v1016_v3 = vsel %vm759_vm14, %v630_v52, %v888_v59  ;;  %v500_v4 = vmul.f32 %v1382_v60, %v1695_v0  ;;  %v1385_v5 = vunpack.c.l.bf16 %v1584_v57  ;;  %v1386_v6 = vunpack.c.h.bf16 %v1584_v57 }
  0x44   : > { %1144 = vst [vmem:[%s1728_s5 + $0xf0] sm:$0xff] %v1016_v3  ;;  %vm760_vm15 = vcmp.ge.f32.partialorder %v631_v61, 0.0  ;;  %v889_v8 = vmul.f32 %v1698_v2, %v631_v61  ;;  %vm761_vm0 = vcmp.ge.f32.partialorder %v632_v62, 0.0  ;;  %v890_v9 = vmul.f32 %v1698_v2, %v632_v62 }
  0x45   : > { %v633_v11 = vadd.f32 %v1706_v10, %v498_v63  ;;  %v634_v12 = vadd.f32 %v1706_v10, %v499_v1  ;;  %v635_v13 = vadd.f32 %v1706_v10, %v500_v4  ;;  %v501_v14 = vmul.f32 %v1385_v5, %v1695_v0  ;;  %v1590_v1 = vld [vmem:[%s1690_s23 + $0xc0] sm:$0xff]  }
  0x46   : > { %v1017_v15 = vsel %vm760_vm15, %v631_v61, %v889_v8  ;;  %v1018_v16 = vsel %vm761_vm0, %v632_v62, %v890_v9  ;;  %v502_v17 = vmul.f32 %v1386_v6, %v1695_v0  ;;  %v1389_v18 = vunpack.c.l.bf16 %v1585_v7 }
  0x47   : > { %1145 = vst [vmem:[%s1728_s5 + $0xf8] sm:$0xff] %v1017_v15  ;;  %1146 = vst [vmem:[%s1728_s5 + $0x100] sm:$0xff] %v1018_v16  ;;  %vm762_vm1 = vcmp.ge.f32.partialorder %v633_v11, 0.0  ;;  %v891_v19 = vmul.f32 %v1698_v2, %v633_v11  ;;  %vm763_vm2 = vcmp.ge.f32.partialorder %v634_v12, 0.0  ;;  %v892_v20 = vmul.f32 %v1698_v2, %v634_v12 }
  0x48   : > { %vm764_vm3 = vcmp.ge.f32.partialorder %v635_v13, 0.0  ;;  %v893_v21 = vmul.f32 %v1698_v2, %v635_v13  ;;  %v636_v22 = vadd.f32 %v1706_v10, %v501_v14  ;;  %v637_v23 = vadd.f32 %v1706_v10, %v502_v17 }
  0x49   : > { %v1019_v25 = vsel %vm762_vm1, %v633_v11, %v891_v19  ;;  %v1020_v26 = vsel %vm763_vm2, %v634_v12, %v892_v20  ;;  %v503_v27 = vmul.f32 %v1389_v18, %v1695_v0  ;;  %v1390_v28 = vunpack.c.h.bf16 %v1585_v7  ;;  %v1591_v7 = vld [vmem:[%s1690_s23 + $0xc8] sm:$0xff]  }
  0x4a   : > { %1147 = vst [vmem:[%s1728_s5 + $0x108] sm:$0xff] %v1019_v25  ;;  %1148 = vst [vmem:[%s1728_s5 + $0x110] sm:$0xff] %v1020_v26  ;;  %v1021_v30 = vsel %vm764_vm3, %v635_v13, %v893_v21  ;;  %vm765_vm4 = vcmp.ge.f32.partialorder %v636_v22, 0.0  ;;  %v894_v31 = vmul.f32 %v1698_v2, %v636_v22  ;;  %vm766_vm5 = vcmp.ge.f32.partialorder %v637_v23, 0.0 }
  0x4b   : > { %1149 = vst [vmem:[%s1728_s5 + $0x118] sm:$0xff] %v1021_v30  ;;  %v895_v32 = vmul.f32 %v1698_v2, %v637_v23  ;;  %v638_v33 = vadd.f32 %v1706_v10, %v503_v27  ;;  %v504_v34 = vmul.f32 %v1390_v28, %v1695_v0  ;;  %v1393_v35 = vunpack.c.l.bf16 %v1586_v24  ;;  %v1592_v30 = vld [vmem:[%s1690_s23 + $0xd0] sm:$0xff]  }
  0x4c   : > { %v1022_v36 = vsel %vm765_vm4, %v636_v22, %v894_v31  ;;  %v1394_v37 = vunpack.c.h.bf16 %v1586_v24  ;;  %v1397_v38 = vunpack.c.l.bf16 %v1587_v29  ;;  %v1398_v39 = vunpack.c.h.bf16 %v1587_v29 }
  0x4d   : > { %1150 = vst [vmem:[%s1728_s5 + $0x120] sm:$0xff] %v1022_v36  ;;  %v1023_v41 = vsel %vm766_vm5, %v637_v23, %v895_v32  ;;  %vm767_vm6 = vcmp.ge.f32.partialorder %v638_v33, 0.0  ;;  %v896_v42 = vmul.f32 %v1698_v2, %v638_v33  ;;  %v639_v43 = vadd.f32 %v1706_v10, %v504_v34 }
  0x4e   : > { %1151 = vst [vmem:[%s1728_s5 + $0x128] sm:$0xff] %v1023_v41  ;;  %v505_v44 = vmul.f32 %v1393_v35, %v1695_v0  ;;  %v506_v45 = vmul.f32 %v1394_v37, %v1695_v0  ;;  %v507_v46 = vmul.f32 %v1397_v38, %v1695_v0  ;;  %v508_v47 = vmul.f32 %v1398_v39, %v1695_v0  ;;  %v1593_v37 = vld [vmem:[%s1690_s23 + $0xd8] sm:$0xff]  }
  0x4f   : > { %v1024_v49 = vsel %vm767_vm6, %v638_v33, %v896_v42  ;;  %vm768_vm7 = vcmp.ge.f32.partialorder %v639_v43, 0.0  ;;  %v897_v50 = vmul.f32 %v1698_v2, %v639_v43  ;;  %v1401_v51 = vunpack.c.l.bf16 %v1588_v40 }
  0x50   : > { %1152 = vst [vmem:[%s1728_s5 + $0x130] sm:$0xff] %v1024_v49  ;;  %v640_v52 = vadd.f32 %v1706_v10, %v505_v44  ;;  %v641_v53 = vadd.f32 %v1706_v10, %v506_v45  ;;  %v642_v54 = vadd.f32 %v1706_v10, %v507_v46  ;;  %v643_v55 = vadd.f32 %v1706_v10, %v508_v47  ;;  %v1594_v44 = vld [vmem:[%s1690_s23 + $0xe0] sm:$0xff]   ;;  %v1595_v49 = vld [vmem:[%s1690_s23 + $0xe8] sm:$0xff]  }
  0x51   : > { %v1025_v56 = vsel %vm768_vm7, %v639_v43, %v897_v50  ;;  %v509_v57 = vmul.f32 %v1401_v51, %v1695_v0  ;;  %v1402_v58 = vunpack.c.h.bf16 %v1588_v40  ;;  %v1405_v59 = vunpack.c.l.bf16 %v1589_v48 }
  0x52   : > { %1153 = vst [vmem:[%s1728_s5 + $0x138] sm:$0xff] %v1025_v56  ;;  %vm769_vm8 = vcmp.ge.f32.partialorder %v640_v52, 0.0  ;;  %v898_v60 = vmul.f32 %v1698_v2, %v640_v52  ;;  %vm770_vm9 = vcmp.ge.f32.partialorder %v641_v53, 0.0  ;;  %v899_v61 = vmul.f32 %v1698_v2, %v641_v53 }
  0x53   : > { %vm771_vm10 = vcmp.ge.f32.partialorder %v642_v54, 0.0  ;;  %v900_v62 = vmul.f32 %v1698_v2, %v642_v54  ;;  %vm772_vm11 = vcmp.ge.f32.partialorder %v643_v55, 0.0  ;;  %v901_v63 = vmul.f32 %v1698_v2, %v643_v55 }
  0x54   : > { %v1026_v3 = vsel %vm769_vm8, %v640_v52, %v898_v60  ;;  %v1027_v4 = vsel %vm770_vm9, %v641_v53, %v899_v61  ;;  %v644_v5 = vadd.f32 %v1706_v10, %v509_v57  ;;  %v510_v6 = vmul.f32 %v1402_v58, %v1695_v0 }
  0x55   : > { %1154 = vst [vmem:[%s1728_s5 + $0x140] sm:$0xff] %v1026_v3  ;;  %1155 = vst [vmem:[%s1728_s5 + $0x148] sm:$0xff] %v1027_v4  ;;  %v1028_v8 = vsel %vm771_vm10, %v642_v54, %v900_v62  ;;  %v1029_v9 = vsel %vm772_vm11, %v643_v55, %v901_v63  ;;  %v511_v11 = vmul.f32 %v1405_v59, %v1695_v0  ;;  %v1406_v12 = vunpack.c.h.bf16 %v1589_v48 }
  0x56   : > { %1156 = vst [vmem:[%s1728_s5 + $0x150] sm:$0xff] %v1028_v8  ;;  %1157 = vst [vmem:[%s1728_s5 + $0x158] sm:$0xff] %v1029_v9  ;;  %vm773_vm12 = vcmp.ge.f32.partialorder %v644_v5, 0.0  ;;  %v902_v13 = vmul.f32 %v1698_v2, %v644_v5  ;;  %v645_v14 = vadd.f32 %v1706_v10, %v510_v6  ;;  %v1409_v15 = vunpack.c.l.bf16 %v1590_v1 }
  0x57   : > { %v646_v16 = vadd.f32 %v1706_v10, %v511_v11  ;;  %v512_v17 = vmul.f32 %v1406_v12, %v1695_v0  ;;  %v1410_v18 = vunpack.c.h.bf16 %v1590_v1  ;;  %v1413_v19 = vunpack.c.l.bf16 %v1591_v7 }
  0x58   : > { %v1030_v20 = vsel %vm773_vm12, %v644_v5, %v902_v13  ;;  %vm774_vm13 = vcmp.ge.f32.partialorder %v645_v14, 0.0  ;;  %v903_v21 = vmul.f32 %v1698_v2, %v645_v14  ;;  %v513_v22 = vmul.f32 %v1409_v15, %v1695_v0 }
  0x59   : > { %1158 = vst [vmem:[%s1728_s5 + $0x160] sm:$0xff] %v1030_v20  ;;  %vm775_vm14 = vcmp.ge.f32.partialorder %v646_v16, 0.0  ;;  %v904_v23 = vmul.f32 %v1698_v2, %v646_v16  ;;  %v647_v24 = vadd.f32 %v1706_v10, %v512_v17  ;;  %v514_v25 = vmul.f32 %v1410_v18, %v1695_v0  ;;  %v1597_v20 = vld [vmem:[%s1690_s23 + $0xf8] sm:$0xff]  }
  0x5a   : > { %v1031_v26 = vsel %vm774_vm13, %v645_v14, %v903_v21  ;;  %v648_v27 = vadd.f32 %v1706_v10, %v513_v22  ;;  %v515_v28 = vmul.f32 %v1413_v19, %v1695_v0  ;;  %v1414_v29 = vunpack.c.h.bf16 %v1591_v7 }
  0x5b   : > { %1159 = vst [vmem:[%s1728_s5 + $0x168] sm:$0xff] %v1031_v26  ;;  %v1032_v31 = vsel %vm775_vm14, %v646_v16, %v904_v23  ;;  %vm776_vm15 = vcmp.ge.f32.partialorder %v647_v24, 0.0  ;;  %v905_v32 = vmul.f32 %v1698_v2, %v647_v24  ;;  %v649_v33 = vadd.f32 %v1706_v10, %v514_v25  ;;  %v1596_v16 = vld [vmem:[%s1690_s23 + $0xf0] sm:$0xff]   ;;  %v1598_v23 = vld [vmem:[%s1690_s23 + $0x100] sm:$0xff]  }
  0x5c   : > { %1160 = vst [vmem:[%s1728_s5 + $0x170] sm:$0xff] %v1032_v31  ;;  %vm777_vm0 = vcmp.ge.f32.partialorder %v648_v27, 0.0  ;;  %v906_v34 = vmul.f32 %v1698_v2, %v648_v27  ;;  %v650_v35 = vadd.f32 %v1706_v10, %v515_v28  ;;  %v516_v36 = vmul.f32 %v1414_v29, %v1695_v0  ;;  %v1599_v28 = vld [vmem:[%s1690_s23 + $0x108] sm:$0xff]  }
  0x5d   : > { %v1033_v38 = vsel %vm776_vm15, %v647_v24, %v905_v32  ;;  %vm778_vm1 = vcmp.ge.f32.partialorder %v649_v33, 0.0  ;;  %v907_v39 = vmul.f32 %v1698_v2, %v649_v33  ;;  %v1417_v40 = vunpack.c.l.bf16 %v1592_v30 }
  0x5e   : > { %1161 = vst [vmem:[%s1728_s5 + $0x178] sm:$0xff] %v1033_v38  ;;  %v1034_v41 = vsel %vm777_vm0, %v648_v27, %v906_v34  ;;  %vm779_vm2 = vcmp.ge.f32.partialorder %v650_v35, 0.0  ;;  %v908_v42 = vmul.f32 %v1698_v2, %v650_v35  ;;  %v651_v43 = vadd.f32 %v1706_v10, %v516_v36 }
  0x5f   : > { %1162 = vst [vmem:[%s1728_s5 + $0x180] sm:$0xff] %v1034_v41  ;;  %v1035_v45 = vsel %vm778_vm1, %v649_v33, %v907_v39  ;;  %v517_v46 = vmul.f32 %v1417_v40, %v1695_v0  ;;  %v1418_v47 = vunpack.c.h.bf16 %v1592_v30  ;;  %v1421_v48 = vunpack.c.l.bf16 %v1593_v37 }
  0x60   : > { %1163 = vst [vmem:[%s1728_s5 + $0x188] sm:$0xff] %v1035_v45  ;;  %v1036_v50 = vsel %vm779_vm2, %v650_v35, %v908_v42  ;;  %vm780_vm3 = vcmp.ge.f32.partialorder %v651_v43, 0.0  ;;  %v909_v51 = vmul.f32 %v1698_v2, %v651_v43  ;;  %v1422_v52 = vunpack.c.h.bf16 %v1593_v37 }
  0x61   : > { %1164 = vst [vmem:[%s1728_s5 + $0x190] sm:$0xff] %v1036_v50  ;;  %v652_v53 = vadd.f32 %v1706_v10, %v517_v46  ;;  %v518_v54 = vmul.f32 %v1418_v47, %v1695_v0  ;;  %v519_v55 = vmul.f32 %v1421_v48, %v1695_v0  ;;  %v1425_v56 = vunpack.c.l.bf16 %v1594_v44 }
  0x62   : > { %v1037_v57 = vsel %vm780_vm3, %v651_v43, %v909_v51  ;;  %v520_v58 = vmul.f32 %v1422_v52, %v1695_v0  ;;  %v1426_v59 = vunpack.c.h.bf16 %v1594_v44  ;;  %v1429_v60 = vunpack.c.l.bf16 %v1595_v49 }
  0x63   : > { %1165 = vst [vmem:[%s1728_s5 + $0x198] sm:$0xff] %v1037_v57  ;;  %vm781_vm4 = vcmp.ge.f32.partialorder %v652_v53, 0.0  ;;  %v910_v61 = vmul.f32 %v1698_v2, %v652_v53  ;;  %v653_v62 = vadd.f32 %v1706_v10, %v518_v54  ;;  %v654_v63 = vadd.f32 %v1706_v10, %v519_v55 }
  0x64   : > { %v655_v1 = vadd.f32 %v1706_v10, %v520_v58  ;;  %v521_v3 = vmul.f32 %v1425_v56, %v1695_v0  ;;  %v522_v4 = vmul.f32 %v1426_v59, %v1695_v0  ;;  %v523_v5 = vmul.f32 %v1429_v60, %v1695_v0  ;;  %v1600_v56 = vld [vmem:[%s1690_s23 + $0x110] sm:$0xff]  }
  0x65   : > { %v1038_v6 = vsel %vm781_vm4, %v652_v53, %v910_v61  ;;  %vm782_vm5 = vcmp.ge.f32.partialorder %v653_v62, 0.0  ;;  %v911_v7 = vmul.f32 %v1698_v2, %v653_v62  ;;  %vm783_vm6 = vcmp.ge.f32.partialorder %v654_v63, 0.0  ;;  %v1601_v61 = vld [vmem:[%s1690_s23 + $0x118] sm:$0xff]  }
  0x66   : > { %1166 = vst [vmem:[%s1728_s5 + $0x1a0] sm:$0xff] %v1038_v6  ;;  %v912_v8 = vmul.f32 %v1698_v2, %v654_v63  ;;  %vm784_vm7 = vcmp.ge.f32.partialorder %v655_v1, 0.0  ;;  %v913_v9 = vmul.f32 %v1698_v2, %v655_v1  ;;  %v656_v11 = vadd.f32 %v1706_v10, %v521_v3 }
  0x67   : > { %v1039_v12 = vsel %vm782_vm5, %v653_v62, %v911_v7  ;;  %v657_v13 = vadd.f32 %v1706_v10, %v522_v4  ;;  %v658_v14 = vadd.f32 %v1706_v10, %v523_v5  ;;  %v1430_v15 = vunpack.c.h.bf16 %v1595_v49 }
  0x68   : > { %1167 = vst [vmem:[%s1728_s5 + $0x1a8] sm:$0xff] %v1039_v12  ;;  %v1040_v17 = vsel %vm783_vm6, %v654_v63, %v912_v8  ;;  %v1041_v18 = vsel %vm784_vm7, %v655_v1, %v913_v9  ;;  %vm785_vm8 = vcmp.ge.f32.partialorder %v656_v11, 0.0  ;;  %v914_v19 = vmul.f32 %v1698_v2, %v656_v11 }
  0x69   : > { %1168 = vst [vmem:[%s1728_s5 + $0x1b0] sm:$0xff] %v1040_v17  ;;  %1169 = vst [vmem:[%s1728_s5 + $0x1b8] sm:$0xff] %v1041_v18  ;;  %vm786_vm9 = vcmp.ge.f32.partialorder %v657_v13, 0.0  ;;  %v915_v21 = vmul.f32 %v1698_v2, %v657_v13  ;;  %vm787_vm10 = vcmp.ge.f32.partialorder %v658_v14, 0.0  ;;  %v916_v22 = vmul.f32 %v1698_v2, %v658_v14 }
  0x6a   : > { %v1042_v24 = vsel %vm785_vm8, %v656_v11, %v914_v19  ;;  %v524_v25 = vmul.f32 %v1430_v15, %v1695_v0  ;;  %v1433_v26 = vunpack.c.l.bf16 %v1596_v16  ;;  %v1434_v27 = vunpack.c.h.bf16 %v1596_v16  ;;  %v1602_v11 = vld [vmem:[%s1690_s23 + $0x120] sm:$0xff]   ;;  %v1603_v19 = vld [vmem:[%s1690_s23 + $0x128] sm:$0xff]  }
  0x6b   : > { %1170 = vst [vmem:[%s1728_s5 + $0x1c0] sm:$0xff] %v1042_v24  ;;  %v1043_v29 = vsel %vm786_vm9, %v657_v13, %v915_v21  ;;  %v1044_v30 = vsel %vm787_vm10, %v658_v14, %v916_v22  ;;  %v1437_v31 = vunpack.c.l.bf16 %v1597_v20  ;;  %v1438_v32 = vunpack.c.h.bf16 %v1597_v20  ;;  %v2031_v22 = vld [vmem:[%s2301_s2] ss:$0 sm:$0xff] }
  0x6c   : > { %1171 = vst [vmem:[%s1728_s5 + $0x1c8] sm:$0xff] %v1043_v29  ;;  %1172 = vst [vmem:[%s1728_s5 + $0x1d0] sm:$0xff] %v1044_v30  ;;  %v659_v33 = vadd.f32 %v1706_v10, %v524_v25  ;;  %v525_v34 = vmul.f32 %v1433_v26, %v1695_v0  ;;  %v526_v35 = vmul.f32 %v1434_v27, %v1695_v0  ;;  %v1441_v36 = vunpack.c.l.bf16 %v1598_v23 }
  0x6d   : > { %v527_v37 = vmul.f32 %v1437_v31, %v1695_v0  ;;  %v528_v38 = vmul.f32 %v1438_v32, %v1695_v0  ;;  %v1442_v39 = vunpack.c.h.bf16 %v1598_v23  ;;  %v1445_v40 = vunpack.c.l.bf16 %v1599_v28 }
  0x6e   : > { %vm788_vm11 = vcmp.ge.f32.partialorder %v659_v33, 0.0  ;;  %v917_v41 = vmul.f32 %v1698_v2, %v659_v33  ;;  %v660_v42 = vadd.f32 %v1706_v10, %v525_v34  ;;  %v661_v43 = vadd.f32 %v1706_v10, %v526_v35  ;;  %v1604_v35 = vld [vmem:[%s1690_s23 + $0x130] sm:$0xff]  }
  0x6f   : > { %v662_v44 = vadd.f32 %v1706_v10, %v527_v37  ;;  %v663_v45 = vadd.f32 %v1706_v10, %v528_v38  ;;  %v529_v46 = vmul.f32 %v1441_v36, %v1695_v0  ;;  %v530_v47 = vmul.f32 %v1442_v39, %v1695_v0 }
  0x70   : > { %v1045_v48 = vsel %vm788_vm11, %v659_v33, %v917_v41  ;;  %vm789_vm12 = vcmp.ge.f32.partialorder %v660_v42, 0.0  ;;  %v918_v49 = vmul.f32 %v1698_v2, %v660_v42  ;;  %vm790_vm13 = vcmp.ge.f32.partialorder %v661_v43, 0.0 }
  0x71   : > { %1173 = vst [vmem:[%s1728_s5 + $0x1d8] sm:$0xff] %v1045_v48  ;;  %v919_v50 = vmul.f32 %v1698_v2, %v661_v43  ;;  %vm791_vm14 = vcmp.ge.f32.partialorder %v662_v44, 0.0  ;;  %v920_v51 = vmul.f32 %v1698_v2, %v662_v44  ;;  %vm792_vm15 = vcmp.ge.f32.partialorder %v663_v45, 0.0 }
  0x72   : > { %v1046_v52 = vsel %vm789_vm12, %v660_v42, %v918_v49  ;;  %v921_v53 = vmul.f32 %v1698_v2, %v663_v45  ;;  %v664_v54 = vadd.f32 %v1706_v10, %v529_v46  ;;  %v665_v55 = vadd.f32 %v1706_v10, %v530_v47 }
  0x73   : > { %1174 = vst [vmem:[%s1728_s5 + $0x1e0] sm:$0xff] %v1046_v52  ;;  %v1047_v57 = vsel %vm790_vm13, %v661_v43, %v919_v50  ;;  %v1048_v58 = vsel %vm791_vm14, %v662_v44, %v920_v51  ;;  %v531_v59 = vmul.f32 %v1445_v40, %v1695_v0  ;;  %v1446_v60 = vunpack.c.h.bf16 %v1599_v28  ;;  %v1605_v40 = vld [vmem:[%s1690_s23 + $0x138] sm:$0xff]  }
  0x74   : > { %1175 = vst [vmem:[%s1728_s5 + $0x1e8] sm:$0xff] %v1047_v57  ;;  %1176 = vst [vmem:[%s1728_s5 + $0x1f0] sm:$0xff] %v1048_v58  ;;  %v1049_v62 = vsel %vm792_vm15, %v663_v45, %v921_v53  ;;  %vm793_vm0 = vcmp.ge.f32.partialorder %v664_v54, 0.0  ;;  %v922_v63 = vmul.f32 %v1698_v2, %v664_v54  ;;  %vm794_vm1 = vcmp.ge.f32.partialorder %v665_v55, 0.0 }
  0x75   : > { %1177 = vst [vmem:[%s1728_s5 + $0x1f8] sm:$0xff] %v1049_v62  ;;  %v923_v1 = vmul.f32 %v1698_v2, %v665_v55  ;;  %v666_v3 = vadd.f32 %v1706_v10, %v531_v59  ;;  %v532_v4 = vmul.f32 %v1446_v60, %v1695_v0  ;;  %v1449_v5 = vunpack.c.l.bf16 %v1600_v56  ;;  %v2019_v0 = vld [vmem:[%s2300_s1] ss:$0 sm:$0xff] }
  0x76   : > { %v1050_v6 = vsel %vm793_vm0, %v664_v54, %v922_v63  ;;  %v1450_v7 = vunpack.c.h.bf16 %v1600_v56  ;;  %v1453_v8 = vunpack.c.l.bf16 %v1601_v61  ;;  %v1454_v9 = vunpack.c.h.bf16 %v1601_v61  ;;  %v1606_v62 = vld [vmem:[%s1690_s23 + $0x140] sm:$0xff]  }
  0x77   : > { %1178 = vst [vmem:[%s1728_s5 + $0x200] sm:$0xff] %v1050_v6  ;;  %v1051_v12 = vsel %vm794_vm1, %v665_v55, %v923_v1  ;;  %vm795_vm2 = vcmp.ge.f32.partialorder %v666_v3, 0.0  ;;  %v924_v13 = vmul.f32 %v1698_v2, %v666_v3  ;;  %v667_v14 = vadd.f32 %v1706_v10, %v532_v4 }
  0x78   : > { %1179 = vst [vmem:[%s1728_s5 + $0x208] sm:$0xff] %v1051_v12  ;;  %v533_v15 = vmul.f32 %v2019_v0, %v1449_v5  ;;  %v534_v16 = vmul.f32 %v2019_v0, %v1450_v7  ;;  %v535_v17 = vmul.f32 %v2019_v0, %v1453_v8  ;;  %v536_v18 = vmul.f32 %v2019_v0, %v1454_v9  ;;  %v1607_v7 = vld [vmem:[%s1690_s23 + $0x148] sm:$0xff]  }
  0x79   : > { %v1052_v20 = vsel %vm795_vm2, %v666_v3, %v924_v13  ;;  %vm796_vm3 = vcmp.ge.f32.partialorder %v667_v14, 0.0  ;;  %v925_v10 = vmul.f32 %v1698_v2, %v667_v14  ;;  %v1457_v21 = vunpack.c.l.bf16 %v1602_v11 }
  0x7a   : > { %1180 = vst [vmem:[%s1728_s5 + $0x210] sm:$0xff] %v1052_v20  ;;  %v668_v23 = vadd.f32 %v2031_v22, %v533_v15  ;;  %v669_v24 = vadd.f32 %v2031_v22, %v534_v16  ;;  %v670_v25 = vadd.f32 %v2031_v22, %v535_v17  ;;  %v671_v26 = vadd.f32 %v2031_v22, %v536_v18  ;;  %v1608_v15 = vld [vmem:[%s1690_s23 + $0x150] sm:$0xff]   ;;  %v1609_v20 = vld [vmem:[%s1690_s23 + $0x158] sm:$0xff]  }
  0x7b   : > { %v1053_v27 = vsel %vm796_vm3, %v667_v14, %v925_v10  ;;  %v537_v28 = vmul.f32 %v2019_v0, %v1457_v21  ;;  %v1458_v29 = vunpack.c.h.bf16 %v1602_v11  ;;  %v1461_v30 = vunpack.c.l.bf16 %v1603_v19 }
  0x7c   : > { %1181 = vst [vmem:[%s1728_s5 + $0x218] sm:$0xff] %v1053_v27  ;;  %vm797_vm4 = vcmp.ge.f32.partialorder %v668_v23, 0.0  ;;  %v926_v31 = vmul.f32 %v1698_v2, %v668_v23  ;;  %vm798_vm5 = vcmp.ge.f32.partialorder %v669_v24, 0.0  ;;  %v927_v32 = vmul.f32 %v1698_v2, %v669_v24 }
  0x7d   : > { %vm799_vm6 = vcmp.ge.f32.partialorder %v670_v25, 0.0  ;;  %v928_v33 = vmul.f32 %v1698_v2, %v670_v25  ;;  %vm800_vm7 = vcmp.ge.f32.partialorder %v671_v26, 0.0  ;;  %v929_v34 = vmul.f32 %v1698_v2, %v671_v26 }
  0x7e   : > { %v1054_v36 = vsel %vm797_vm4, %v668_v23, %v926_v31  ;;  %v1055_v37 = vsel %vm798_vm5, %v669_v24, %v927_v32  ;;  %v672_v38 = vadd.f32 %v2031_v22, %v537_v28  ;;  %v538_v39 = vmul.f32 %v2019_v0, %v1458_v29 }
  0x7f   : > { %1182 = vst [vmem:[%s1728_s5 + $0x220] sm:$0xff] %v1054_v36  ;;  %1183 = vst [vmem:[%s1728_s5 + $0x228] sm:$0xff] %v1055_v37  ;;  %v1056_v41 = vsel %vm799_vm6, %v670_v25, %v928_v33  ;;  %v1057_v42 = vsel %vm800_vm7, %v671_v26, %v929_v34  ;;  %v539_v43 = vmul.f32 %v2019_v0, %v1461_v30  ;;  %v1462_v44 = vunpack.c.h.bf16 %v1603_v19 }
  0x80   : > { %1184 = vst [vmem:[%s1728_s5 + $0x230] sm:$0xff] %v1056_v41  ;;  %1185 = vst [vmem:[%s1728_s5 + $0x238] sm:$0xff] %v1057_v42  ;;  %vm801_vm8 = vcmp.ge.f32.partialorder %v672_v38, 0.0  ;;  %v930_v45 = vmul.f32 %v1698_v2, %v672_v38  ;;  %v673_v46 = vadd.f32 %v2031_v22, %v538_v39  ;;  %v1465_v47 = vunpack.c.l.bf16 %v1604_v35 }
  0x81   : > { %v674_v48 = vadd.f32 %v2031_v22, %v539_v43  ;;  %v540_v49 = vmul.f32 %v2019_v0, %v1462_v44  ;;  %v1466_v50 = vunpack.c.h.bf16 %v1604_v35  ;;  %v1469_v51 = vunpack.c.l.bf16 %v1605_v40 }
  0x82   : > { %v1058_v52 = vsel %vm801_vm8, %v672_v38, %v930_v45  ;;  %vm802_vm9 = vcmp.ge.f32.partialorder %v673_v46, 0.0  ;;  %v931_v53 = vmul.f32 %v1698_v2, %v673_v46  ;;  %v541_v54 = vmul.f32 %v2019_v0, %v1465_v47 }
  0x83   : > { %1186 = vst [vmem:[%s1728_s5 + $0x240] sm:$0xff] %v1058_v52  ;;  %vm803_vm10 = vcmp.ge.f32.partialorder %v674_v48, 0.0  ;;  %v932_v55 = vmul.f32 %v1698_v2, %v674_v48  ;;  %v675_v56 = vadd.f32 %v2031_v22, %v540_v49  ;;  %v542_v57 = vmul.f32 %v2019_v0, %v1466_v50  ;;  %v1611_v52 = vld [vmem:[%s1690_s23 + $0x168] sm:$0xff]  }
  0x84   : > { %v1059_v58 = vsel %vm802_vm9, %v673_v46, %v931_v53  ;;  %v676_v59 = vadd.f32 %v2031_v22, %v541_v54  ;;  %v543_v60 = vmul.f32 %v2019_v0, %v1469_v51  ;;  %v1470_v61 = vunpack.c.h.bf16 %v1605_v40 }
  0x85   : > { %1187 = vst [vmem:[%s1728_s5 + $0x248] sm:$0xff] %v1059_v58  ;;  %v1060_v63 = vsel %vm803_vm10, %v674_v48, %v932_v55  ;;  %vm804_vm11 = vcmp.ge.f32.partialorder %v675_v56, 0.0  ;;  %v933_v1 = vmul.f32 %v1698_v2, %v675_v56  ;;  %v677_v3 = vadd.f32 %v2031_v22, %v542_v57  ;;  %v1610_v48 = vld [vmem:[%s1690_s23 + $0x160] sm:$0xff]   ;;  %v1612_v55 = vld [vmem:[%s1690_s23 + $0x170] sm:$0xff]  }
  0x86   : > { %1188 = vst [vmem:[%s1728_s5 + $0x250] sm:$0xff] %v1060_v63  ;;  %vm805_vm12 = vcmp.ge.f32.partialorder %v676_v59, 0.0  ;;  %v934_v4 = vmul.f32 %v1698_v2, %v676_v59  ;;  %v678_v5 = vadd.f32 %v2031_v22, %v543_v60  ;;  %v544_v6 = vmul.f32 %v2019_v0, %v1470_v61  ;;  %v1613_v60 = vld [vmem:[%s1690_s23 + $0x178] sm:$0xff]  }
  0x87   : > { %v1061_v8 = vsel %vm804_vm11, %v675_v56, %v933_v1  ;;  %vm806_vm13 = vcmp.ge.f32.partialorder %v677_v3, 0.0  ;;  %v935_v9 = vmul.f32 %v1698_v2, %v677_v3  ;;  %v1473_v11 = vunpack.c.l.bf16 %v1606_v62 }
  0x88   : > { %1189 = vst [vmem:[%s1728_s5 + $0x258] sm:$0xff] %v1061_v8  ;;  %v1062_v12 = vsel %vm805_vm12, %v676_v59, %v934_v4  ;;  %vm807_vm14 = vcmp.ge.f32.partialorder %v678_v5, 0.0  ;;  %v936_v13 = vmul.f32 %v1698_v2, %v678_v5  ;;  %v679_v14 = vadd.f32 %v2031_v22, %v544_v6 }
  0x89   : > { %1190 = vst [vmem:[%s1728_s5 + $0x260] sm:$0xff] %v1062_v12  ;;  %v1063_v16 = vsel %vm806_vm13, %v677_v3, %v935_v9  ;;  %v545_v17 = vmul.f32 %v2019_v0, %v1473_v11  ;;  %v1474_v18 = vunpack.c.h.bf16 %v1606_v62  ;;  %v1477_v19 = vunpack.c.l.bf16 %v1607_v7 }
  0x8a   : > { %1191 = vst [vmem:[%s1728_s5 + $0x268] sm:$0xff] %v1063_v16  ;;  %v1064_v10 = vsel %vm807_vm14, %v678_v5, %v936_v13  ;;  %vm808_vm15 = vcmp.ge.f32.partialorder %v679_v14, 0.0  ;;  %v937_v21 = vmul.f32 %v1698_v2, %v679_v14  ;;  %v1478_v23 = vunpack.c.h.bf16 %v1607_v7 }
  0x8b   : > { %1192 = vst [vmem:[%s1728_s5 + $0x270] sm:$0xff] %v1064_v10  ;;  %v680_v24 = vadd.f32 %v2031_v22, %v545_v17  ;;  %v546_v25 = vmul.f32 %v2019_v0, %v1474_v18  ;;  %v547_v26 = vmul.f32 %v2019_v0, %v1477_v19  ;;  %v1481_v27 = vunpack.c.l.bf16 %v1608_v15 }
  0x8c   : > { %v1065_v28 = vsel %vm808_vm15, %v679_v14, %v937_v21  ;;  %v548_v29 = vmul.f32 %v2019_v0, %v1478_v23  ;;  %v1482_v30 = vunpack.c.h.bf16 %v1608_v15  ;;  %v1485_v31 = vunpack.c.l.bf16 %v1609_v20 }
  0x8d   : > { %1193 = vst [vmem:[%s1728_s5 + $0x278] sm:$0xff] %v1065_v28  ;;  %vm809_vm0 = vcmp.ge.f32.partialorder %v680_v24, 0.0  ;;  %v938_v32 = vmul.f32 %v1698_v2, %v680_v24  ;;  %v681_v33 = vadd.f32 %v2031_v22, %v546_v25  ;;  %v682_v34 = vadd.f32 %v2031_v22, %v547_v26 }
  0x8e   : > { %v683_v35 = vadd.f32 %v2031_v22, %v548_v29  ;;  %v549_v36 = vmul.f32 %v2019_v0, %v1481_v27  ;;  %v550_v37 = vmul.f32 %v2019_v0, %v1482_v30  ;;  %v551_v38 = vmul.f32 %v2019_v0, %v1485_v31  ;;  %v1614_v27 = vld [vmem:[%s1690_s23 + $0x180] sm:$0xff]  }
  0x8f   : > { %v1066_v39 = vsel %vm809_vm0, %v680_v24, %v938_v32  ;;  %vm810_vm1 = vcmp.ge.f32.partialorder %v681_v33, 0.0  ;;  %v939_v40 = vmul.f32 %v1698_v2, %v681_v33  ;;  %vm811_vm2 = vcmp.ge.f32.partialorder %v682_v34, 0.0  ;;  %v1615_v32 = vld [vmem:[%s1690_s23 + $0x188] sm:$0xff]  }
  0x90   : > { %1194 = vst [vmem:[%s1728_s5 + $0x280] sm:$0xff] %v1066_v39  ;;  %v940_v41 = vmul.f32 %v1698_v2, %v682_v34  ;;  %vm812_vm3 = vcmp.ge.f32.partialorder %v683_v35, 0.0  ;;  %v941_v42 = vmul.f32 %v1698_v2, %v683_v35  ;;  %v684_v43 = vadd.f32 %v2031_v22, %v549_v36 }
  0x91   : > { %v1067_v44 = vsel %vm810_vm1, %v681_v33, %v939_v40  ;;  %v685_v45 = vadd.f32 %v2031_v22, %v550_v37  ;;  %v686_v46 = vadd.f32 %v2031_v22, %v551_v38  ;;  %v1486_v47 = vunpack.c.h.bf16 %v1609_v20 }
  0x92   : > { %1195 = vst [vmem:[%s1728_s5 + $0x288] sm:$0xff] %v1067_v44  ;;  %v1068_v49 = vsel %vm811_vm2, %v682_v34, %v940_v41  ;;  %v1069_v50 = vsel %vm812_vm3, %v683_v35, %v941_v42  ;;  %vm813_vm4 = vcmp.ge.f32.partialorder %v684_v43, 0.0  ;;  %v942_v51 = vmul.f32 %v1698_v2, %v684_v43 }
  0x93   : > { %1196 = vst [vmem:[%s1728_s5 + $0x290] sm:$0xff] %v1068_v49  ;;  %1197 = vst [vmem:[%s1728_s5 + $0x298] sm:$0xff] %v1069_v50  ;;  %vm814_vm5 = vcmp.ge.f32.partialorder %v685_v45, 0.0  ;;  %v943_v53 = vmul.f32 %v1698_v2, %v685_v45  ;;  %vm815_vm6 = vcmp.ge.f32.partialorder %v686_v46, 0.0  ;;  %v944_v54 = vmul.f32 %v1698_v2, %v686_v46 }
  0x94   : > { %v1070_v56 = vsel %vm813_vm4, %v684_v43, %v942_v51  ;;  %v552_v57 = vmul.f32 %v2019_v0, %v1486_v47  ;;  %v1489_v58 = vunpack.c.l.bf16 %v1610_v48  ;;  %v1490_v59 = vunpack.c.h.bf16 %v1610_v48  ;;  %v1616_v43 = vld [vmem:[%s1690_s23 + $0x190] sm:$0xff]   ;;  %v1617_v51 = vld [vmem:[%s1690_s23 + $0x198] sm:$0xff]  }
  0x95   : > { %1198 = vst [vmem:[%s1728_s5 + $0x2a0] sm:$0xff] %v1070_v56  ;;  %v1071_v61 = vsel %vm814_vm5, %v685_v45, %v943_v53  ;;  %v1072_v62 = vsel %vm815_vm6, %v686_v46, %v944_v54  ;;  %v1493_v63 = vunpack.c.l.bf16 %v1611_v52  ;;  %v1494_v1 = vunpack.c.h.bf16 %v1611_v52 }
  0x96   : > { %1199 = vst [vmem:[%s1728_s5 + $0x2a8] sm:$0xff] %v1071_v61  ;;  %1200 = vst [vmem:[%s1728_s5 + $0x2b0] sm:$0xff] %v1072_v62  ;;  %v687_v3 = vadd.f32 %v2031_v22, %v552_v57  ;;  %v553_v4 = vmul.f32 %v2019_v0, %v1489_v58  ;;  %v554_v5 = vmul.f32 %v2019_v0, %v1490_v59  ;;  %v1497_v6 = vunpack.c.l.bf16 %v1612_v55 }
  0x97   : > { %v555_v7 = vmul.f32 %v2019_v0, %v1493_v63  ;;  %v556_v8 = vmul.f32 %v2019_v0, %v1494_v1  ;;  %v1498_v9 = vunpack.c.h.bf16 %v1612_v55  ;;  %v1501_v11 = vunpack.c.l.bf16 %v1613_v60 }
  0x98   : > { %vm816_vm7 = vcmp.ge.f32.partialorder %v687_v3, 0.0  ;;  %v945_v12 = vmul.f32 %v1698_v2, %v687_v3  ;;  %v688_v13 = vadd.f32 %v2031_v22, %v553_v4  ;;  %v689_v14 = vadd.f32 %v2031_v22, %v554_v5  ;;  %v1618_v5 = vld [vmem:[%s1690_s23 + $0x1a0] sm:$0xff]  }
  0x99   : > { %v690_v15 = vadd.f32 %v2031_v22, %v555_v7  ;;  %v691_v16 = vadd.f32 %v2031_v22, %v556_v8  ;;  %v557_v17 = vmul.f32 %v2019_v0, %v1497_v6  ;;  %v558_v18 = vmul.f32 %v2019_v0, %v1498_v9 }
  0x9a   : > { %v1073_v19 = vsel %vm816_vm7, %v687_v3, %v945_v12  ;;  %vm817_vm8 = vcmp.ge.f32.partialorder %v688_v13, 0.0  ;;  %v946_v20 = vmul.f32 %v1698_v2, %v688_v13  ;;  %vm818_vm9 = vcmp.ge.f32.partialorder %v689_v14, 0.0 }
  0x9b   : > { %1201 = vst [vmem:[%s1728_s5 + $0x2b8] sm:$0xff] %v1073_v19  ;;  %v947_v10 = vmul.f32 %v1698_v2, %v689_v14  ;;  %vm819_vm10 = vcmp.ge.f32.partialorder %v690_v15, 0.0  ;;  %v948_v21 = vmul.f32 %v1698_v2, %v690_v15  ;;  %vm820_vm11 = vcmp.ge.f32.partialorder %v691_v16, 0.0 }
  0x9c   : > { %v1074_v23 = vsel %vm817_vm8, %v688_v13, %v946_v20  ;;  %v949_v24 = vmul.f32 %v1698_v2, %v691_v16  ;;  %v692_v25 = vadd.f32 %v2031_v22, %v557_v17  ;;  %v693_v26 = vadd.f32 %v2031_v22, %v558_v18 }
  0x9d   : > { %1202 = vst [vmem:[%s1728_s5 + $0x2c0] sm:$0xff] %v1074_v23  ;;  %v1075_v28 = vsel %vm818_vm9, %v689_v14, %v947_v10  ;;  %v1076_v29 = vsel %vm819_vm10, %v690_v15, %v948_v21  ;;  %v559_v30 = vmul.f32 %v2019_v0, %v1501_v11  ;;  %v1502_v31 = vunpack.c.h.bf16 %v1613_v60  ;;  %v1619_v11 = vld [vmem:[%s1690_s23 + $0x1a8] sm:$0xff]  }
  0x9e   : > { %1203 = vst [vmem:[%s1728_s5 + $0x2c8] sm:$0xff] %v1075_v28  ;;  %1204 = vst [vmem:[%s1728_s5 + $0x2d0] sm:$0xff] %v1076_v29  ;;  %v1077_v33 = vsel %vm820_vm11, %v691_v16, %v949_v24  ;;  %vm821_vm12 = vcmp.ge.f32.partialorder %v692_v25, 0.0  ;;  %v950_v34 = vmul.f32 %v1698_v2, %v692_v25  ;;  %vm822_vm13 = vcmp.ge.f32.partialorder %v693_v26, 0.0 }
  0x9f   : > { %1205 = vst [vmem:[%s1728_s5 + $0x2d8] sm:$0xff] %v1077_v33  ;;  %v951_v35 = vmul.f32 %v1698_v2, %v693_v26  ;;  %v694_v36 = vadd.f32 %v2031_v22, %v559_v30  ;;  %v560_v37 = vmul.f32 %v2019_v0, %v1502_v31  ;;  %v1505_v38 = vunpack.c.l.bf16 %v1614_v27  ;;  %v1620_v33 = vld [vmem:[%s1690_s23 + $0x1b0] sm:$0xff]  }
  0xa0   : > { %v1078_v39 = vsel %vm821_vm12, %v692_v25, %v950_v34  ;;  %v1506_v40 = vunpack.c.h.bf16 %v1614_v27  ;;  %v1509_v41 = vunpack.c.l.bf16 %v1615_v32  ;;  %v1510_v42 = vunpack.c.h.bf16 %v1615_v32 }
  0xa1   : > { %1206 = vst [vmem:[%s1728_s5 + $0x2e0] sm:$0xff] %v1078_v39  ;;  %v1079_v44 = vsel %vm822_vm13, %v693_v26, %v951_v35  ;;  %vm823_vm14 = vcmp.ge.f32.partialorder %v694_v36, 0.0  ;;  %v952_v45 = vmul.f32 %v1698_v2, %v694_v36  ;;  %v695_v46 = vadd.f32 %v2031_v22, %v560_v37 }
  0xa2   : > { %1207 = vst [vmem:[%s1728_s5 + $0x2e8] sm:$0xff] %v1079_v44  ;;  %v561_v47 = vmul.f32 %v2019_v0, %v1505_v38  ;;  %v562_v48 = vmul.f32 %v2019_v0, %v1506_v40  ;;  %v563_v49 = vmul.f32 %v2019_v0, %v1509_v41  ;;  %v564_v50 = vmul.f32 %v2019_v0, %v1510_v42  ;;  %v1621_v40 = vld [vmem:[%s1690_s23 + $0x1b8] sm:$0xff]  }
  0xa3   : > { %v1080_v52 = vsel %vm823_vm14, %v694_v36, %v952_v45  ;;  %vm824_vm15 = vcmp.ge.f32.partialorder %v695_v46, 0.0  ;;  %v953_v53 = vmul.f32 %v1698_v2, %v695_v46  ;;  %v1513_v54 = vunpack.c.l.bf16 %v1616_v43 }
  0xa4   : > { %1208 = vst [vmem:[%s1728_s5 + $0x2f0] sm:$0xff] %v1080_v52  ;;  %v696_v55 = vadd.f32 %v2031_v22, %v561_v47  ;;  %v697_v56 = vadd.f32 %v2031_v22, %v562_v48  ;;  %v698_v57 = vadd.f32 %v2031_v22, %v563_v49  ;;  %v699_v58 = vadd.f32 %v2031_v22, %v564_v50  ;;  %v1622_v47 = vld [vmem:[%s1690_s23 + $0x1c0] sm:$0xff]   ;;  %v1623_v52 = vld [vmem:[%s1690_s23 + $0x1c8] sm:$0xff]  }
  0xa5   : > { %v1081_v59 = vsel %vm824_vm15, %v695_v46, %v953_v53  ;;  %v565_v60 = vmul.f32 %v2019_v0, %v1513_v54  ;;  %v1514_v61 = vunpack.c.h.bf16 %v1616_v43  ;;  %v1517_v62 = vunpack.c.l.bf16 %v1617_v51 }
  0xa6   : > { %1209 = vst [vmem:[%s1728_s5 + $0x2f8] sm:$0xff] %v1081_v59  ;;  %vm825_vm0 = vcmp.ge.f32.partialorder %v696_v55, 0.0  ;;  %v954_v63 = vmul.f32 %v1698_v2, %v696_v55  ;;  %vm826_vm1 = vcmp.ge.f32.partialorder %v697_v56, 0.0  ;;  %v955_v1 = vmul.f32 %v1698_v2, %v697_v56 }
  0xa7   : > { %vm827_vm2 = vcmp.ge.f32.partialorder %v698_v57, 0.0  ;;  %v956_v3 = vmul.f32 %v1698_v2, %v698_v57  ;;  %vm828_vm3 = vcmp.ge.f32.partialorder %v699_v58, 0.0  ;;  %v957_v4 = vmul.f32 %v1698_v2, %v699_v58 }
  0xa8   : > { %v1082_v6 = vsel %vm825_vm0, %v696_v55, %v954_v63  ;;  %v1083_v7 = vsel %vm826_vm1, %v697_v56, %v955_v1  ;;  %v700_v8 = vadd.f32 %v2031_v22, %v565_v60  ;;  %v566_v9 = vmul.f32 %v2019_v0, %v1514_v61 }
  0xa9   : > { %1210 = vst [vmem:[%s1728_s5 + $0x300] sm:$0xff] %v1082_v6  ;;  %1211 = vst [vmem:[%s1728_s5 + $0x308] sm:$0xff] %v1083_v7  ;;  %v1084_v12 = vsel %vm827_vm2, %v698_v57, %v956_v3  ;;  %v1085_v13 = vsel %vm828_vm3, %v699_v58, %v957_v4  ;;  %v567_v14 = vmul.f32 %v2019_v0, %v1517_v62  ;;  %v1518_v15 = vunpack.c.h.bf16 %v1617_v51 }
  0xaa   : > { %1212 = vst [vmem:[%s1728_s5 + $0x310] sm:$0xff] %v1084_v12  ;;  %1213 = vst [vmem:[%s1728_s5 + $0x318] sm:$0xff] %v1085_v13  ;;  %vm829_vm4 = vcmp.ge.f32.partialorder %v700_v8, 0.0  ;;  %v958_v16 = vmul.f32 %v1698_v2, %v700_v8  ;;  %v701_v17 = vadd.f32 %v2031_v22, %v566_v9  ;;  %v1521_v18 = vunpack.c.l.bf16 %v1618_v5 }
  0xab   : > { %v702_v19 = vadd.f32 %v2031_v22, %v567_v14  ;;  %v568_v20 = vmul.f32 %v2019_v0, %v1518_v15  ;;  %v1522_v10 = vunpack.c.h.bf16 %v1618_v5  ;;  %v1525_v21 = vunpack.c.l.bf16 %v1619_v11 }
  0xac   : > { %v1086_v23 = vsel %vm829_vm4, %v700_v8, %v958_v16  ;;  %vm830_vm5 = vcmp.ge.f32.partialorder %v701_v17, 0.0  ;;  %v959_v24 = vmul.f32 %v1698_v2, %v701_v17  ;;  %v569_v25 = vmul.f32 %v2019_v0, %v1521_v18 }
  0xad   : > { %1214 = vst [vmem:[%s1728_s5 + $0x320] sm:$0xff] %v1086_v23  ;;  %vm831_vm6 = vcmp.ge.f32.partialorder %v702_v19, 0.0  ;;  %v960_v26 = vmul.f32 %v1698_v2, %v702_v19  ;;  %v703_v27 = vadd.f32 %v2031_v22, %v568_v20  ;;  %v570_v28 = vmul.f32 %v2019_v0, %v1522_v10  ;;  %v1625_v23 = vld [vmem:[%s1690_s23 + $0x1d8] sm:$0xff]  }
  0xae   : > { %v1087_v29 = vsel %vm830_vm5, %v701_v17, %v959_v24  ;;  %v704_v30 = vadd.f32 %v2031_v22, %v569_v25  ;;  %v571_v31 = vmul.f32 %v2019_v0, %v1525_v21  ;;  %v1526_v32 = vunpack.c.h.bf16 %v1619_v11 }
  0xaf   : > { %1215 = vst [vmem:[%s1728_s5 + $0x328] sm:$0xff] %v1087_v29  ;;  %v1088_v34 = vsel %vm831_vm6, %v702_v19, %v960_v26  ;;  %vm832_vm7 = vcmp.ge.f32.partialorder %v703_v27, 0.0  ;;  %v961_v35 = vmul.f32 %v1698_v2, %v703_v27  ;;  %v705_v36 = vadd.f32 %v2031_v22, %v570_v28  ;;  %v1624_v19 = vld [vmem:[%s1690_s23 + $0x1d0] sm:$0xff]   ;;  %v1626_v26 = vld [vmem:[%s1690_s23 + $0x1e0] sm:$0xff]  }
  0xb0   : > { %1216 = vst [vmem:[%s1728_s5 + $0x330] sm:$0xff] %v1088_v34  ;;  %vm833_vm8 = vcmp.ge.f32.partialorder %v704_v30, 0.0  ;;  %v962_v37 = vmul.f32 %v1698_v2, %v704_v30  ;;  %v706_v38 = vadd.f32 %v2031_v22, %v571_v31  ;;  %v572_v39 = vmul.f32 %v2019_v0, %v1526_v32  ;;  %v1627_v31 = vld [vmem:[%s1690_s23 + $0x1e8] sm:$0xff]  }
  0xb1   : > { %v1089_v41 = vsel %vm832_vm7, %v703_v27, %v961_v35  ;;  %vm834_vm9 = vcmp.ge.f32.partialorder %v705_v36, 0.0  ;;  %v963_v42 = vmul.f32 %v1698_v2, %v705_v36  ;;  %v1529_v43 = vunpack.c.l.bf16 %v1620_v33 }
  0xb2   : > { %1217 = vst [vmem:[%s1728_s5 + $0x338] sm:$0xff] %v1089_v41  ;;  %v1090_v44 = vsel %vm833_vm8, %v704_v30, %v962_v37  ;;  %vm835_vm10 = vcmp.ge.f32.partialorder %v706_v38, 0.0  ;;  %v964_v45 = vmul.f32 %v1698_v2, %v706_v38  ;;  %v707_v46 = vadd.f32 %v2031_v22, %v572_v39 }
  0xb3   : > { %1218 = vst [vmem:[%s1728_s5 + $0x340] sm:$0xff] %v1090_v44  ;;  %v1091_v48 = vsel %vm834_vm9, %v705_v36, %v963_v42  ;;  %v573_v49 = vmul.f32 %v2019_v0, %v1529_v43  ;;  %v1530_v50 = vunpack.c.h.bf16 %v1620_v33  ;;  %v1533_v51 = vunpack.c.l.bf16 %v1621_v40 }
  0xb4   : > { %1219 = vst [vmem:[%s1728_s5 + $0x348] sm:$0xff] %v1091_v48  ;;  %v1092_v53 = vsel %vm835_vm10, %v706_v38, %v964_v45  ;;  %vm836_vm11 = vcmp.ge.f32.partialorder %v707_v46, 0.0  ;;  %v965_v54 = vmul.f32 %v1698_v2, %v707_v46  ;;  %v1534_v55 = vunpack.c.h.bf16 %v1621_v40 }
  0xb5   : > { %1220 = vst [vmem:[%s1728_s5 + $0x350] sm:$0xff] %v1092_v53  ;;  %v708_v56 = vadd.f32 %v2031_v22, %v573_v49  ;;  %v574_v57 = vmul.f32 %v2019_v0, %v1530_v50  ;;  %v575_v58 = vmul.f32 %v2019_v0, %v1533_v51  ;;  %v1537_v59 = vunpack.c.l.bf16 %v1622_v47 }
  0xb6   : > { %v1093_v60 = vsel %vm836_vm11, %v707_v46, %v965_v54  ;;  %v576_v61 = vmul.f32 %v2019_v0, %v1534_v55  ;;  %v1538_v62 = vunpack.c.h.bf16 %v1622_v47  ;;  %v1541_v63 = vunpack.c.l.bf16 %v1623_v52 }
  0xb7   : > { %1221 = vst [vmem:[%s1728_s5 + $0x358] sm:$0xff] %v1093_v60  ;;  %vm837_vm12 = vcmp.ge.f32.partialorder %v708_v56, 0.0  ;;  %v966_v1 = vmul.f32 %v1698_v2, %v708_v56  ;;  %v709_v3 = vadd.f32 %v2031_v22, %v574_v57  ;;  %v710_v4 = vadd.f32 %v2031_v22, %v575_v58 }
  0xb8   : > { %v711_v5 = vadd.f32 %v2031_v22, %v576_v61  ;;  %v577_v6 = vmul.f32 %v2019_v0, %v1537_v59  ;;  %v578_v7 = vmul.f32 %v2019_v0, %v1538_v62  ;;  %v579_v8 = vmul.f32 %v2019_v0, %v1541_v63  ;;  %v1628_v59 = vld [vmem:[%s1690_s23 + $0x1f0] sm:$0xff]  }
  0xb9   : > { %v1094_v9 = vsel %vm837_vm12, %v708_v56, %v966_v1  ;;  %vm838_vm13 = vcmp.ge.f32.partialorder %v709_v3, 0.0  ;;  %v967_v11 = vmul.f32 %v1698_v2, %v709_v3  ;;  %vm839_vm14 = vcmp.ge.f32.partialorder %v710_v4, 0.0  ;;  %v1629_v1 = vld [vmem:[%s1690_s23 + $0x1f8] sm:$0xff]  }
  0xba   : > { %1222 = vst [vmem:[%s1728_s5 + $0x360] sm:$0xff] %v1094_v9  ;;  %v968_v12 = vmul.f32 %v1698_v2, %v710_v4  ;;  %vm840_vm15 = vcmp.ge.f32.partialorder %v711_v5, 0.0  ;;  %v969_v13 = vmul.f32 %v1698_v2, %v711_v5  ;;  %v712_v14 = vadd.f32 %v2031_v22, %v577_v6 }
  0xbb   : > { %v1095_v15 = vsel %vm838_vm13, %v709_v3, %v967_v11  ;;  %v713_v16 = vadd.f32 %v2031_v22, %v578_v7  ;;  %v714_v17 = vadd.f32 %v2031_v22, %v579_v8  ;;  %v1542_v18 = vunpack.c.h.bf16 %v1623_v52 }
  0xbc   : > { %1223 = vst [vmem:[%s1728_s5 + $0x368] sm:$0xff] %v1095_v15  ;;  %v1096_v20 = vsel %vm839_vm14, %v710_v4, %v968_v12  ;;  %v1097_v10 = vsel %vm840_vm15, %v711_v5, %v969_v13  ;;  %vm841_vm0 = vcmp.ge.f32.partialorder %v712_v14, 0.0  ;;  %v970_v21 = vmul.f32 %v1698_v2, %v712_v14 }
  0xbd   : > { %1224 = vst [vmem:[%s1728_s5 + $0x370] sm:$0xff] %v1096_v20  ;;  %1225 = vst [vmem:[%s1728_s5 + $0x378] sm:$0xff] %v1097_v10  ;;  %vm842_vm1 = vcmp.ge.f32.partialorder %v713_v16, 0.0  ;;  %v971_v24 = vmul.f32 %v1698_v2, %v713_v16  ;;  %vm843_vm2 = vcmp.ge.f32.partialorder %v714_v17, 0.0  ;;  %v972_v25 = vmul.f32 %v1698_v2, %v714_v17 }
  0xbe   : > { %v1098_v27 = vsel %vm841_vm0, %v712_v14, %v970_v21  ;;  %v580_v28 = vmul.f32 %v2019_v0, %v1542_v18  ;;  %v1545_v29 = vunpack.c.l.bf16 %v1624_v19  ;;  %v1546_v30 = vunpack.c.h.bf16 %v1624_v19 }
  0xbf   : > { %1226 = vst [vmem:[%s1728_s5 + $0x380] sm:$0xff] %v1098_v27  ;;  %v1099_v32 = vsel %vm842_vm1, %v713_v16, %v971_v24  ;;  %v1100_v33 = vsel %vm843_vm2, %v714_v17, %v972_v25  ;;  %v1549_v34 = vunpack.c.l.bf16 %v1625_v23  ;;  %v1550_v35 = vunpack.c.h.bf16 %v1625_v23 }
  0xc0   : > { %1227 = vst [vmem:[%s1728_s5 + $0x388] sm:$0xff] %v1099_v32  ;;  %1228 = vst [vmem:[%s1728_s5 + $0x390] sm:$0xff] %v1100_v33  ;;  %v715_v36 = vadd.f32 %v2031_v22, %v580_v28  ;;  %v581_v37 = vmul.f32 %v2019_v0, %v1545_v29  ;;  %v582_v38 = vmul.f32 %v2019_v0, %v1546_v30  ;;  %v1553_v39 = vunpack.c.l.bf16 %v1626_v26 }
  0xc1   : > { %v583_v40 = vmul.f32 %v2019_v0, %v1549_v34  ;;  %v584_v41 = vmul.f32 %v2019_v0, %v1550_v35  ;;  %v1554_v42 = vunpack.c.h.bf16 %v1626_v26  ;;  %v1557_v43 = vunpack.c.l.bf16 %v1627_v31 }
  0xc2   : > { %vm844_vm3 = vcmp.ge.f32.partialorder %v715_v36, 0.0  ;;  %v973_v44 = vmul.f32 %v1698_v2, %v715_v36  ;;  %v716_v45 = vadd.f32 %v2031_v22, %v581_v37  ;;  %v717_v46 = vadd.f32 %v2031_v22, %v582_v38 }
  0xc3   : > { %v718_v47 = vadd.f32 %v2031_v22, %v583_v40  ;;  %v719_v48 = vadd.f32 %v2031_v22, %v584_v41  ;;  %v585_v49 = vmul.f32 %v2019_v0, %v1553_v39  ;;  %v586_v50 = vmul.f32 %v2019_v0, %v1554_v42 }
  0xc4   : > { %v1101_v51 = vsel %vm844_vm3, %v715_v36, %v973_v44  ;;  %vm845_vm4 = vcmp.ge.f32.partialorder %v716_v45, 0.0  ;;  %v974_v52 = vmul.f32 %v1698_v2, %v716_v45  ;;  %vm846_vm5 = vcmp.ge.f32.partialorder %v717_v46, 0.0 }
  0xc5   : > { %1229 = vst [vmem:[%s1728_s5 + $0x398] sm:$0xff] %v1101_v51  ;;  %v975_v53 = vmul.f32 %v1698_v2, %v717_v46  ;;  %vm847_vm6 = vcmp.ge.f32.partialorder %v718_v47, 0.0  ;;  %v976_v54 = vmul.f32 %v1698_v2, %v718_v47  ;;  %vm848_vm7 = vcmp.ge.f32.partialorder %v719_v48, 0.0 }
  0xc6   : > { %v1102_v55 = vsel %vm845_vm4, %v716_v45, %v974_v52  ;;  %v977_v56 = vmul.f32 %v1698_v2, %v719_v48  ;;  %v720_v57 = vadd.f32 %v2031_v22, %v585_v49  ;;  %v721_v58 = vadd.f32 %v2031_v22, %v586_v50 }
  0xc7   : > { %1230 = vst [vmem:[%s1728_s5 + $0x3a0] sm:$0xff] %v1102_v55  ;;  %v1103_v60 = vsel %vm846_vm5, %v717_v46, %v975_v53  ;;  %v1104_v61 = vsel %vm847_vm6, %v718_v47, %v976_v54  ;;  %v587_v62 = vmul.f32 %v2019_v0, %v1557_v43  ;;  %v1558_v63 = vunpack.c.h.bf16 %v1627_v31 }
  0xc8   : > { %1231 = vst [vmem:[%s1728_s5 + $0x3a8] sm:$0xff] %v1103_v60  ;;  %1232 = vst [vmem:[%s1728_s5 + $0x3b0] sm:$0xff] %v1104_v61  ;;  %v1105_v3 = vsel %vm848_vm7, %v719_v48, %v977_v56  ;;  %vm849_vm8 = vcmp.ge.f32.partialorder %v720_v57, 0.0  ;;  %v978_v4 = vmul.f32 %v1698_v2, %v720_v57  ;;  %vm850_vm9 = vcmp.ge.f32.partialorder %v721_v58, 0.0 }
  0xc9   : > { %1233 = vst [vmem:[%s1728_s5 + $0x3b8] sm:$0xff] %v1105_v3  ;;  %v979_v5 = vmul.f32 %v1698_v2, %v721_v58  ;;  %v722_v6 = vadd.f32 %v2031_v22, %v587_v62  ;;  %v588_v7 = vmul.f32 %v2019_v0, %v1558_v63  ;;  %v1561_v8 = vunpack.c.l.bf16 %v1628_v59 }
  0xca   : > { %v1106_v9 = vsel %vm849_vm8, %v720_v57, %v978_v4  ;;  %v1562_v11 = vunpack.c.h.bf16 %v1628_v59  ;;  %v1565_v12 = vunpack.c.l.bf16 %v1629_v1  ;;  %v1566_v13 = vunpack.c.h.bf16 %v1629_v1 }
  0xcb   : > { %1234 = vst [vmem:[%s1728_s5 + $0x3c0] sm:$0xff] %v1106_v9  ;;  %v1107_v14 = vsel %vm850_vm9, %v721_v58, %v979_v5  ;;  %vm851_vm10 = vcmp.ge.f32.partialorder %v722_v6, 0.0  ;;  %v980_v15 = vmul.f32 %v1698_v2, %v722_v6  ;;  %v723_v16 = vadd.f32 %v2031_v22, %v588_v7 }
  0xcc   : > { %1235 = vst [vmem:[%s1728_s5 + $0x3c8] sm:$0xff] %v1107_v14  ;;  %v589_v17 = vmul.f32 %v2019_v0, %v1561_v8  ;;  %v590_v18 = vmul.f32 %v2019_v0, %v1562_v11  ;;  %v591_v19 = vmul.f32 %v2019_v0, %v1565_v12  ;;  %v592_v20 = vmul.f32 %v2019_v0, %v1566_v13 }
  0xcd   : > { %v1108_v10 = vsel %vm851_vm10, %v722_v6, %v980_v15  ;;  %vm852_vm11 = vcmp.ge.f32.partialorder %v723_v16, 0.0  ;;  %v981_v21 = vmul.f32 %v1698_v2, %v723_v16 }
  0xce   : > { %1236 = vst [vmem:[%s1728_s5 + $0x3d0] sm:$0xff] %v1108_v10  ;;  %v724_v23 = vadd.f32 %v2031_v22, %v589_v17  ;;  %v725_v24 = vadd.f32 %v2031_v22, %v590_v18  ;;  %v726_v25 = vadd.f32 %v2031_v22, %v591_v19  ;;  %v727_v26 = vadd.f32 %v2031_v22, %v592_v20 }
  0xcf   : > { %v1109_v27 = vsel %vm852_vm11, %v723_v16, %v981_v21 }
  0xd0   : > { %1237 = vst [vmem:[%s1728_s5 + $0x3d8] sm:$0xff] %v1109_v27  ;;  %vm853_vm12 = vcmp.ge.f32.partialorder %v724_v23, 0.0  ;;  %v982_v0 = vmul.f32 %v1698_v2, %v724_v23  ;;  %vm854_vm13 = vcmp.ge.f32.partialorder %v725_v24, 0.0  ;;  %v983_v28 = vmul.f32 %v1698_v2, %v725_v24 }
  0xd1   : > { %vm855_vm14 = vcmp.ge.f32.partialorder %v726_v25, 0.0  ;;  %v984_v29 = vmul.f32 %v1698_v2, %v726_v25  ;;  %vm856_vm15 = vcmp.ge.f32.partialorder %v727_v26, 0.0  ;;  %v985_v30 = vmul.f32 %v1698_v2, %v727_v26 }
  0xd2   : > { %v1110_v31 = vsel %vm853_vm12, %v724_v23, %v982_v0  ;;  %v1111_v32 = vsel %vm854_vm13, %v725_v24, %v983_v28 }
  0xd3   : > { %1238 = vst [vmem:[%s1728_s5 + $0x3e0] sm:$0xff] %v1110_v31  ;;  %1239 = vst [vmem:[%s1728_s5 + $0x3e8] sm:$0xff] %v1111_v32  ;;  %v1112_v22 = vsel %vm855_vm14, %v726_v25, %v984_v29  ;;  %v1113_v33 = vsel %vm856_vm15, %v727_v26, %v985_v30 }
  0xd4   : > { %1240 = vst [vmem:[%s1728_s5 + $0x3f0] sm:$0xff] %v1112_v22  ;;  %1241 = vst [vmem:[%s1728_s5 + $0x3f8] sm:$0xff] %v1113_v33 }
  0xd5 PF: > { %s15_s17 = sadd.s32 1, %s1646_s17  }
  0xd6   : > { %p12_p4 = scmp.ge.s32.totalorder %s15_s17, 4  }
  0xd8   :  { %14 = sbr.rel (!%p12_p4) target bundleno = 2 (0x2), region = 66 }

// kernel: psp_upsample.2
= control target key start
LH: loop header
LB: loop body
LE: loop exit
PB: predicated region body
PF: predicated region fallthrough
CT: control target
= control target key end

     0   :  { %s15470_s15 = smov 0   ;;  %s15472_s16 = smov 0   ;;  %s18747_s0 = inlined_call_operand.vmem [shape: bf16[2,34,34,4], index: 0, kind: input, shape index: {}, may-alias: {0,1}]   ;;  %s18748_s1 = inlined_call_operand.vmem [shape: bf16[2,34,34,4], index: 1, kind: input, shape index: {}, may-alias: {0,1}]   ;;  %s18749_s2 = inlined_call_operand.vmem [shape: bf16[9,4,128], index: 2, kind: input, shape index: {}]   ;;  %s18750_s3 = inlined_call_operand.vmem [shape: bf16[2048,128], index: 3, kind: output, shape index: {0}]   ;;  %s18751_s4 = inlined_call_operand.vmem [shape: f32[2,1,2,128], index: 4, kind: output, shape index: {1}]  }
   0x1   :  { %s15474_s17 = smov 0  }
   0x2 LB: > { %s27_s18 = sadd.s32 1, %s15439_s16  ;;  %p10868_p0 = scmp.ge.s32.totalorder %s15443_s17, 1  ;;  %s15443_s17 = sphi %s15474_s17, %s15_s17   ;;  %s15439_s16 = sphi %s15472_s16, %s19640_s16   ;;  %s15435_s15 = sphi %s15470_s15, %s19639_s15  }
   0x3   : > { %p29_p1 = scmp.ge.s32.totalorder %s27_s18, 2  ;;  %p225_p2 = scmp.lt.s32.totalorder %s15443_s17, 3 }
   0x5   : > { %s19642_s18 = smov (%p29_p1, %s27_s18), 0  ;;  %p226_p3 = pnand %p10868_p0, %p225_p2 }
   0x7   : > { %229 = sbr.rel (%p226_p3) target bundleno = 1474 (0x5c2), region = 32 }
   0xe   : > { %v10874_v0 = vld [vmem:[%s18749_s2 + $0x2] sm:$0x3]  ;;  %vm2302_vm0 = vcmask 1041408   ;;  %v11359_v1 = vld [vmem:[%s18749_s2 + $0x8] sm:$0x3]  ;;  %p287_p4 = scmp.lt.s32.totalorder %s15435_s15, 1 }
   0xf   : > { %15120 = vmatprep.subr.msk.bf16.mxu1 %vm2302_vm0, %v10874_v0  ;;  %15124 = vmatprep.subr.msk.bf16.mxu0 %vm2302_vm0, %v11359_v1  ;;  %v2304_v2 = vsel %vm2302_vm0, %v10874_v0, 0  ;;  %v15501_v3 = vsel %vm2302_vm0, %v11359_v1, 0  ;;  %v503_v4 = vld [vmem:[%s18749_s2] sm:$0x3]  ;;  %v11427_v5 = vld [vmem:[%s18749_s2 + $0xa] sm:$0x3] }
  0x10   : > { %19067 = vst [vmem:[#allocation2_spill] sm:$0xff] %v15501_v3  ;;  %12925 = vmatpush3.bf16.msra.mxu1 %v2304_v2  ;;  %13445 = vmatpush3.bf16.msra.mxu0 %v15501_v3  ;;  %s15505_s23 = scalar_select %p287_p4, %s15435_s15, 1  ;;  %vm504_vm1 = vsmask.f32 3328  ;;  %vm505_vm2 = vsmask.f32 7440 }
  0x11   : > { %15121 = vmatprep.subr.msk.bf16.mxu1 %vm2302_vm0, %v503_v4  ;;  %15126 = vmatprep.subr.msk.bf16.mxu0 %vm2302_vm0, %v11427_v5  ;;  %v15524_v6 = vsel %vm2302_vm0, %v503_v4, 0  ;;  %vm2109_vm3 = vcmask 31744   ;;  %vm15535_vm4 = vmor %vm504_vm1, %vm505_vm2  ;;  %v19068_v32 = vmov 0  ;;  %v15548_v58 = vsel %vm2302_vm0, %v11427_v5, 0  ;;  %s10871_s29 = sshll.u32 %s15435_s15, 7 }
  0x12   : > { %s15130_s28 = smul.u32 680, %s15505_s23  ;;  %v19069_v32 = vsel %vm15535_vm4, 4294967295, %v19068_v32  ;;  %vm3943_vm5 = vcmask 1042432   ;;  %vm3944_vm6 = vcmask 1046532   ;;  %p319_p5 = scmp.lt.s32.totalorder %s10871_s29, 255  ;;  %vm10722_vm8 = vcmask 1040384  }
  0x13   : > { %19070 = vst [vmem:[#allocation3_spill] sm:$0xff] %v19069_v32  ;;  %vm15939_vm7 = vmor %vm3943_vm5, %vm3944_vm6  ;;  %s10873_s7 = sshll.u32 %s15505_s23, 1 }
  0x14   : > { %s15521_s5 = scalar_lea.vmem %s18747_s0, %s15130_s28  ;;  %s11827_s14 = sadd.s32 640, %s15130_s28 }
  0x15   : > { %v333_v7 = vld [vmem:[%s15521_s5] sm:$0xf]  ;;  %v334_v8 = vld [vmem:[%s15521_s5 + $0x4] sm:$0xf]  ;;  %v335_v9 = vld [vmem:[%s15521_s5 + $0x8] sm:$0xf]  ;;  %s17361_s21 = scalar_lea.vmem %s18748_s1, %s11827_s14  ;;  %s331_s10 = scalar_lea.vmem %s18751_s4, %s10873_s7 }
  0x16   : > { %v508_v10 = vshrl.u32 %v333_v7, 16  ;;  %v511_v11 = vshll.u32 %v333_v7, 16  ;;  %v517_v12 = vshll.u32 %v334_v8, 16  ;;  %v521_v13 = vshrl.u32 %v334_v8, 16  ;;  %v338_v16 = vld [vmem:[%s15521_s5 + $0x14] sm:$0xf] }
  0x17   : > { %v527_v14 = vshll.u32 %v335_v9, 16  ;;  %v531_v15 = vshrl.u32 %v335_v9, 16  ;;  %v339_v17 = vld [vmem:[%s15521_s5 + $0x18] sm:$0xf]  ;;  %v340_v22 = vld [vmem:[%s15521_s5 + $0x1c] sm:$0xf] }
  0x18   : > { %v510_v18 = vrot.slane %v508_v10, 4  ;;  %v513_v19 = vrot.slane %v511_v11, 5  ;;  %v519_v20 = vrot.slane %v517_v12, 5  ;;  %v523_v21 = vrot.slane %v521_v13, 4  ;;  %v336_v31 = vld [vmem:[%s15521_s5 + $0xc] sm:$0xf] }
  0x19   : > { %v529_v23 = vrot.slane %v527_v14, 5  ;;  %v533_v24 = vrot.slane %v531_v15, 4  ;;  %v552_v25 = vshrl.u32 %v338_v16, 16  ;;  %v555_v26 = vshll.u32 %v338_v16, 16  ;;  %v337_v45 = vld [vmem:[%s15521_s5 + $0x10] sm:$0x1] }
  0x1a   : > { %v514_v27 = vor.u32 %v513_v19, %v510_v18  ;;  %v524_v28 = vor.u32 %v523_v21, %v519_v20  ;;  %v561_v29 = vshll.u32 %v339_v17, 16  ;;  %v565_v30 = vshrl.u32 %v339_v17, 16  ;;  %v15545_v50 = vld [vmem:[%s15521_s5 + $0x20] sm:$0xf]  ;;  %v15554_v62 = vld [vmem:[%s15521_s5 + $0x24] sm:$0x1] }
  0x1b   : > { %v534_v33 = vor.u32 %v533_v24, %v529_v23  ;;  %v554_v34 = vrot.slane %v552_v25, 4  ;;  %v557_v35 = vrot.slane %v555_v26, 5  ;;  %v571_v36 = vshll.u32 %v340_v22, 16  ;;  %v343_v5 = vld [vmem:[%s15521_s5 + $0x28] sm:$0xf]  ;;  %s19644_s29 = smov (!%p319_p5, %s10871_s29), 255 }
  0x1c   : > { %v515_v37 = vrot.slane %v514_v27, 4  ;;  %v525_v38 = vrot.slane %v524_v28, 4  ;;  %v563_v39 = vrot.slane %v561_v29, 5  ;;  %v567_v40 = vrot.slane %v565_v30, 4  ;;  %v344_v11 = vld [vmem:[%s15521_s5 + $0x2c] sm:$0xf] }
  0x1d   : > { %v535_v41 = vrot.slane %v534_v33, 4  ;;  %v558_v42 = vor.u32 %v557_v35, %v554_v34  ;;  %v573_v43 = vrot.slane %v571_v36, 5  ;;  %v575_v44 = vshrl.u32 %v340_v22, 16  ;;  %v345_v16 = vld [vmem:[%s15521_s5 + $0x30] sm:$0xf]  ;;  %s10872_s15 = sshll.u32 %s19644_s29, 2 }
  0x1e   : > { %v520_v46 = vsel %vm15535_vm4, %v515_v37, %v519_v20  ;;  %v530_v47 = vsel %vm15535_vm4, %v525_v38, %v529_v23  ;;  %v568_v48 = vor.u32 %v567_v40, %v563_v39  ;;  %v537_v49 = vshll.u32 %v336_v31, 16  ;;  %v346_v25 = vld [vmem:[%s15521_s5 + $0x34] sm:$0xf]  ;;  %v347_v30 = vld [vmem:[%s15521_s5 + $0x38] sm:$0x1]  ;;  %s18560_s6 = scalar_lea.vmem %s18750_s3, %s10872_s15 }
  0x1f   : > { %v10875_v51 = vcombine.low %v520_v46, %v530_v47  ;;  %v559_v52 = vrot.slane %v558_v42, 4  ;;  %v577_v53 = vrot.slane %v575_v44, 4  ;;  %v541_v54 = vshrl.u32 %v336_v31, 16  ;;  %v348_v40 = vld [vmem:[%s15521_s5 + $0x3c] sm:$0xf] }
  0x20   : > { %v569_v55 = vrot.slane %v568_v48, 4  ;;  %v539_v56 = vrot.slane %v537_v49, 5  ;;  %v547_v57 = vshll.u32 %v337_v45, 16  ;;  %v581_v63 = vshll.u32 %v15545_v50, 16  ;;  %v349_v45 = vld [vmem:[%s15521_s5 + $0x40] sm:$0xf] }
  0x21   : > { %12926 = vmatprep.mubr.msk.bf16.mxu1 %vm2109_vm3, %v10875_v51  ;;  %v564_v59 = vsel %vm15535_vm4, %v559_v52, %v563_v39  ;;  %v578_v60 = vor.u32 %v577_v53, %v573_v43  ;;  %v543_v61 = vrot.slane %v541_v54, 4  ;;  %v585_v4 = vshrl.u32 %v15545_v50, 16 }
  0x22   : > { %v574_v0 = vsel %vm15535_vm4, %v569_v55, %v573_v43  ;;  %v540_v1 = vsel %vm15535_vm4, %v535_v41, %v539_v56  ;;  %v549_v2 = vrot.slane %v547_v57, 5  ;;  %v583_v10 = vrot.slane %v581_v63, 5  ;;  %v350_v57 = vld [vmem:[%s15521_s5 + $0x44] sm:$0xf] }
  0x23   : > { %v579_v7 = vrot.slane %v578_v60, 4  ;;  %v10877_v8 = vcombine.low %v564_v59, %v574_v0  ;;  %v544_v9 = vor.u32 %v543_v61, %v539_v56  ;;  %v587_v12 = vrot.slane %v585_v4, 4 }
  0x24   : > { %v591_v13 = vshll.u32 %v15554_v62, 16  ;;  %v3967_v14 = vrot.slane %v15545_v50, 5  ;;  %v3970_v15 = vrot.slane %v15554_v62, 5  ;;  %v596_v19 = vshrl.u32 %v343_v5, 16  ;;  %v422_v50 = vld [vmem:[%s15521_s5 + $0x164] sm:$0x1] }
  0x25   : > { %13446 = vmatprep.mubr.msk.bf16.mxu0 %vm2109_vm3, %v10877_v8  ;;  %v545_v17 = vrot.slane %v544_v9, 4  ;;  %v584_v18 = vsel %vm15535_vm4, %v579_v7, %v583_v10  ;;  %v599_v20 = vshll.u32 %v343_v5, 16  ;;  %v588_v21 = vor.u32 %v587_v12, %v583_v10 }
  0x26   : > { %v593_v22 = vrot.slane %v591_v13, 5  ;;  %v605_v23 = vshll.u32 %v344_v11, 16  ;;  %v609_v24 = vshrl.u32 %v344_v11, 16  ;;  %v598_v27 = vrot.slane %v596_v19, 4  ;;  %v352_v13 = vld [vmem:[%s15521_s5 + $0x4c] sm:$0x1] }
  0x27   : > { %v550_v26 = vsel %vm15535_vm4, %v545_v17, %v549_v2  ;;  %v601_v28 = vrot.slane %v599_v20, 5  ;;  %v615_v29 = vshll.u32 %v345_v16, 16  ;;  %v589_v33 = vrot.slane %v588_v21, 4 }
  0x28   : > { %v10876_v31 = vcombine.low %v540_v1, %v550_v26  ;;  %v607_v34 = vrot.slane %v605_v23, 5  ;;  %v611_v35 = vrot.slane %v609_v24, 4  ;;  %v619_v38 = vshrl.u32 %v345_v16, 16  ;;  %v351_v1 = vld [vmem:[%s15521_s5 + $0x48] sm:$0xf] }
  0x29   : > { %v602_v36 = vor.u32 %v601_v28, %v598_v27  ;;  %v617_v37 = vrot.slane %v615_v29, 5  ;;  %v625_v39 = vshll.u32 %v346_v25, 16  ;;  %v594_v41 = vsel %vm15535_vm4, %v589_v33, %v593_v22  ;;  %v354_v23 = vld [vmem:[%s15521_s5 + $0x54] sm:$0xf] }
  0x2a   : > { %12927 = vmatmul.mubr.msk.bf16.vlgmr.msra.gmra.mrb[0].mxu1 %vm2109_vm3, %v10876_v31  ;;  %v612_v42 = vor.u32 %v611_v35, %v607_v34  ;;  %v629_v43 = vshrl.u32 %v346_v25, 16  ;;  %v635_v44 = vshll.u32 %v347_v30, 16  ;;  %v10878_v46 = vcombine.low %v584_v18, %v594_v41  ;;  %v353_v18 = vld [vmem:[%s15521_s5 + $0x50] sm:$0xf]  ;;  %v355_v35 = vld [vmem:[%s15521_s5 + $0x58] sm:$0xf] }
  0x2b   : > { %13055 = vmatpush3.bf16.msra.mxu1 %v15524_v6  ;;  %12930 = vmatprep.mubr.msk.bf16.mxu1 %vm2109_vm3, %v10877_v8  ;;  %v603_v47 = vrot.slane %v602_v36, 4  ;;  %v621_v48 = vrot.slane %v619_v38, 4  ;;  %v627_v49 = vrot.slane %v625_v39, 5  ;;  %v640_v54 = vshrl.u32 %v348_v40, 16 }
  0x2c   : > { %v613_v51 = vrot.slane %v612_v42, 4  ;;  %v631_v52 = vrot.slane %v629_v43, 4  ;;  %v637_v53 = vrot.slane %v635_v44, 5  ;;  %13447 = vmatmul.mubr.msk.bf16.vlgmr.msra.gmra.mrb[0].mxu0 %vm2109_vm3, %v10878_v46  ;;  %v643_v59 = vshll.u32 %v348_v40, 16  ;;  %v356_v42 = vld [vmem:[%s15521_s5 + $0x5c] sm:$0xf] }
  0x2d   : > { %v608_v55 = vsel %vm15535_vm4, %v603_v47, %v607_v34  ;;  %v622_v56 = vor.u32 %v621_v48, %v617_v37  ;;  %v649_v6 = vshll.u32 %v349_v45, 16  ;;  %13575 = vmatpush3.bf16.msra.mxu0 %v15548_v58  ;;  %v642_v63 = vrot.slane %v640_v54, 4 }
  0x2e   : > { %v618_v60 = vsel %vm15535_vm4, %v613_v51, %v617_v37  ;;  %v632_v61 = vor.u32 %v631_v52, %v627_v49  ;;  %v653_v0 = vshrl.u32 %v349_v45, 16  ;;  %v645_v5 = vrot.slane %v643_v59, 5  ;;  %v357_v51 = vld [vmem:[%s15521_s5 + $0x60] sm:$0x1] }
  0x2f   : > { %v15590_v2 = vcombine.low %v608_v55, %v618_v60  ;;  %v623_v4 = vrot.slane %v622_v56, 4  ;;  %v651_v7 = vrot.slane %v649_v6, 5  ;;  %v659_v10 = vshll.u32 %v350_v57, 16 }
  0x30   : > { %v633_v8 = vrot.slane %v632_v61, 4  ;;  %v655_v9 = vrot.slane %v653_v0, 4  ;;  %v663_v11 = vshrl.u32 %v350_v57, 16  ;;  %v646_v12 = vor.u32 %v645_v5, %v642_v63  ;;  %v358_v57 = vld [vmem:[%s15521_s5 + $0x64] sm:$0xf] }
  0x31   : > { %19071 = vst [vmem:[#allocation4_spill] sm:$0xff] %v15590_v2  ;;  %13450 = vmatprep.mubr.msk.bf16.mxu0 %vm2109_vm3, %v15590_v2  ;;  %v628_v58 = vsel %vm15535_vm4, %v623_v4, %v627_v49  ;;  %v669_v16 = vshll.u32 %v351_v1, 16  ;;  %v673_v17 = vshrl.u32 %v351_v1, 16  ;;  %v661_v21 = vrot.slane %v659_v10, 5  ;;  %v359_v63 = vld [vmem:[%s15521_s5 + $0x68] sm:$0xf] }
  0x32   : > { %12931 = vmatmul.mubr.msk.bf16.gmra.mrb[4].mxu1 %vm2109_vm3, %v10878_v46  ;;  %v638_v19 = vsel %vm15535_vm4, %v633_v8, %v637_v53  ;;  %v656_v20 = vor.u32 %v655_v9, %v651_v7  ;;  %v665_v22 = vrot.slane %v663_v11, 4  ;;  %v647_v25 = vrot.slane %v646_v12, 4  ;;  %v360_v9 = vld [vmem:[%s15521_s5 + $0x6c] sm:$0xf] }
  0x33   : > { %v15602_v24 = vcombine.low %v628_v58, %v638_v19  ;;  %12934 = vmatprep.mubr.msk.bf16.mxu1 %vm2109_vm3, %v15590_v2  ;;  %v671_v26 = vrot.slane %v669_v16, 5  ;;  %v675_v27 = vrot.slane %v673_v17, 4  ;;  %v679_v30 = vshll.u32 %v352_v13, 16 }
  0x34   : > { %v657_v28 = vrot.slane %v656_v20, 4  ;;  %v666_v29 = vor.u32 %v665_v22, %v661_v21  ;;  %v684_v31 = vshrl.u32 %v353_v18, 16  ;;  %v652_v33 = vsel %vm15535_vm4, %v647_v25, %v651_v7 }
  0x35   : > { %19072 = vst [vmem:[#allocation5_spill] sm:$0xff] %v15602_v24  ;;  %13451 = vmatmul.mubr.msk.bf16.gmra.mrb[4].mxu0 %vm2109_vm3, %v15602_v24  ;;  %v676_v34 = vor.u32 %v675_v27, %v671_v26  ;;  %v687_v36 = vshll.u32 %v353_v18, 16  ;;  %v693_v37 = vshll.u32 %v354_v23, 16  ;;  %v681_v40 = vrot.slane %v679_v30, 5  ;;  %v362_v30 = vld [vmem:[%s15521_s5 + $0x74] sm:$0x1] }
  0x36   : > { %v662_v38 = vsel %vm15535_vm4, %v657_v28, %v661_v21  ;;  %v667_v39 = vrot.slane %v666_v29, 4  ;;  %v686_v41 = vrot.slane %v684_v31, 4  ;;  %v697_v48 = vshrl.u32 %v354_v23, 16 }
  0x37   : > { %v15614_v43 = vcombine.low %v652_v33, %v662_v38  ;;  %v677_v44 = vrot.slane %v676_v34, 4  ;;  %v689_v45 = vrot.slane %v687_v36, 5  ;;  %v695_v46 = vrot.slane %v693_v37, 5  ;;  %v363_v33 = vld [vmem:[%s15521_s5 + $0x78] sm:$0xf] }
  0x38   : > { %v672_v47 = vsel %vm15535_vm4, %v667_v39, %v671_v26  ;;  %v703_v49 = vshll.u32 %v355_v35, 16  ;;  %v707_v52 = vshrl.u32 %v355_v35, 16  ;;  %v713_v55 = vshll.u32 %v356_v42, 16  ;;  %v361_v26 = vld [vmem:[%s15521_s5 + $0x70] sm:$0xf] }
  0x39   : > { %19073 = vst [vmem:[#allocation6_spill] sm:$0xff] %v15614_v43  ;;  %13454 = vmatprep.mubr.msk.bf16.mxu0 %vm2109_vm3, %v15614_v43  ;;  %v682_v53 = vsel %vm15535_vm4, %v677_v44, %v681_v40  ;;  %v690_v54 = vor.u32 %v689_v45, %v686_v41  ;;  %v717_v56 = vshrl.u32 %v356_v42, 16  ;;  %v699_v6 = vrot.slane %v697_v48, 4 }
  0x3a   : > { %12935 = vmatmul.mubr.msk.bf16.gmra.mrb[8].mxu1 %vm2109_vm3, %v15602_v24  ;;  %v15626_v59 = vcombine.low %v672_v47, %v682_v53  ;;  %v705_v60 = vrot.slane %v703_v49, 5  ;;  %v709_v61 = vrot.slane %v707_v52, 4  ;;  %v715_v1 = vrot.slane %v713_v55, 5  ;;  %v365_v52 = vld [vmem:[%s15521_s5 + $0x80] sm:$0xf] }
  0x3b   : > { %12938 = vmatprep.mubr.msk.bf16.mxu1 %vm2109_vm3, %v15614_v43  ;;  %v691_v0 = vrot.slane %v690_v54, 4  ;;  %v719_v4 = vrot.slane %v717_v56, 4  ;;  %v723_v5 = vshll.u32 %v357_v51, 16  ;;  %v700_v7 = vor.u32 %v699_v6, %v695_v46 }
  0x3c   : > { %19074 = vst [vmem:[#allocation7_spill] sm:$0xff] %v15626_v59  ;;  %v710_v8 = vor.u32 %v709_v61, %v705_v60  ;;  %v728_v10 = vshrl.u32 %v358_v57, 16  ;;  %v731_v11 = vshll.u32 %v358_v57, 16  ;;  %v737_v16 = vshll.u32 %v359_v63, 16 }
  0x3d   : > { %13455 = vmatmul.mubr.msk.bf16.gmra.mrb[8].mxu0 %vm2109_vm3, %v15626_v59  ;;  %v696_v58 = vsel %vm15535_vm4, %v691_v0, %v695_v46  ;;  %v720_v12 = vor.u32 %v719_v4, %v715_v1  ;;  %v725_v13 = vrot.slane %v723_v5, 5  ;;  %v701_v17 = vrot.slane %v700_v7, 4  ;;  %v364_v46 = vld [vmem:[%s15521_s5 + $0x7c] sm:$0xf]  ;;  %v366_v5 = vld [vmem:[%s15521_s5 + $0x84] sm:$0xf] }
  0x3e   : > { %v711_v18 = vrot.slane %v710_v8, 4  ;;  %v730_v19 = vrot.slane %v728_v10, 4  ;;  %v733_v20 = vrot.slane %v731_v11, 5  ;;  %v739_v22 = vrot.slane %v737_v16, 5  ;;  %v367_v7 = vld [vmem:[%s15521_s5 + $0x88] sm:$0x1] }
  0x3f   : > { %v721_v21 = vrot.slane %v720_v12, 4  ;;  %v741_v23 = vshrl.u32 %v359_v63, 16  ;;  %v747_v25 = vshll.u32 %v360_v9, 16  ;;  %v706_v27 = vsel %vm15535_vm4, %v701_v17, %v705_v60  ;;  %v368_v12 = vld [vmem:[%s15521_s5 + $0x8c] sm:$0xf] }
  0x40   : > { %v716_v28 = vsel %vm15535_vm4, %v711_v18, %v715_v1  ;;  %v734_v29 = vor.u32 %v733_v20, %v730_v19  ;;  %v751_v31 = vshrl.u32 %v360_v9, 16  ;;  %v15643_v34 = vcombine.low %v696_v58, %v706_v27  ;;  %v369_v27 = vld [vmem:[%s15521_s5 + $0x90] sm:$0xf] }
  0x41   : > { %v726_v35 = vsel %vm15535_vm4, %v721_v21, %v725_v13  ;;  %v743_v36 = vrot.slane %v741_v23, 4  ;;  %v749_v37 = vrot.slane %v747_v25, 5  ;;  %v757_v41 = vshll.u32 %v361_v26, 16 }
  0x42   : > { %19075 = vst [vmem:[#allocation8_spill] sm:$0xff] %v15643_v34  ;;  %12939 = vmatmul.mubr.msk.bf16.gmra.mrb[12].mxu1 %vm2109_vm3, %v15626_v59  ;;  %v15649_v38 = vcombine.low %v716_v28, %v726_v35  ;;  %v735_v39 = vrot.slane %v734_v29, 4  ;;  %v753_v40 = vrot.slane %v751_v31, 4  ;;  %13458 = vmatprep.mubr.msk.bf16.mxu0 %vm2109_vm3, %v15643_v34  ;;  %v761_v44 = vshrl.u32 %v361_v26, 16  ;;  %v370_v35 = vld [vmem:[%s15521_s5 + $0x94] sm:$0xf] }
  0x43   : > { %12942 = vmatprep.mubr.msk.bf16.mxu1 %vm2109_vm3, %v15643_v34  ;;  %v744_v42 = vor.u32 %v743_v36, %v739_v22  ;;  %v767_v45 = vshll.u32 %v362_v30, 16  ;;  %v772_v47 = vshrl.u32 %v363_v33, 16  ;;  %v759_v51 = vrot.slane %v757_v41, 5  ;;  %v16533_v59 = vld [vmem:[%s15521_s5 + $0x244] sm:$0xf] }
  0x44   : > { %19076 = vst [vmem:[#allocation9_spill] sm:$0xff] %v15649_v38  ;;  %v740_v48 = vsel %vm15535_vm4, %v735_v39, %v739_v22  ;;  %v754_v49 = vor.u32 %v753_v40, %v749_v37  ;;  %v775_v53 = vshll.u32 %v363_v33, 16  ;;  %v763_v55 = vrot.slane %v761_v44, 4 }
  0x45   : > { %13459 = vmatmul.mubr.msk.bf16.gmra.mrb[12].mxu0 %vm2109_vm3, %v15649_v38  ;;  %v745_v54 = vrot.slane %v744_v42, 4  ;;  %v769_v56 = vrot.slane %v767_v45, 5  ;;  %v774_v57 = vrot.slane %v772_v47, 4  ;;  %v781_v61 = vshll.u32 %v364_v46, 16 }
  0x46   : > { %v755_v6 = vrot.slane %v754_v49, 4  ;;  %v777_v60 = vrot.slane %v775_v53, 5  ;;  %v785_v63 = vshrl.u32 %v364_v46, 16  ;;  %v764_v1 = vor.u32 %v763_v55, %v759_v51  ;;  %v371_v46 = vld [vmem:[%s15521_s5 + $0x98] sm:$0xf] }
  0x47   : > { %v750_v0 = vsel %vm15535_vm4, %v745_v54, %v749_v37  ;;  %v791_v4 = vshll.u32 %v365_v52, 16  ;;  %v795_v8 = vshrl.u32 %v365_v52, 16  ;;  %v783_v58 = vrot.slane %v781_v61, 5 }
  0x48   : > { %v15665_v9 = vcombine.low %v740_v48, %v750_v0  ;;  %v760_v10 = vsel %vm15535_vm4, %v755_v6, %v759_v51  ;;  %v778_v11 = vor.u32 %v777_v60, %v774_v57  ;;  %v765_v13 = vrot.slane %v764_v1, 4  ;;  %v372_v51 = vld [vmem:[%s15521_s5 + $0x9c] sm:$0x1]  ;;  %v373_v57 = vld [vmem:[%s15521_s5 + $0xa0] sm:$0xf] }
  0x49   : > { %v787_v16 = vrot.slane %v785_v63, 4  ;;  %v793_v17 = vrot.slane %v791_v4, 5  ;;  %v797_v18 = vrot.slane %v795_v8, 4  ;;  %v801_v20 = vshll.u32 %v366_v5, 16  ;;  %v15698_v0 = vld [vmem:[%s18749_s2 + $0xc] sm:$0x3] }
  0x4a   : > { %19077 = vst [vmem:[#allocation10_spill] sm:$0xff] %v15665_v9  ;;  %13462 = vmatprep.mubr.msk.bf16.mxu0 %vm2109_vm3, %v15665_v9  ;;  %12943 = vmatmul.mubr.msk.bf16.gmra.mrb[16].mxu1 %vm2109_vm3, %v15649_v38  ;;  %v779_v19 = vrot.slane %v778_v11, 4  ;;  %v805_v21 = vshrl.u32 %v366_v5, 16  ;;  %v811_v22 = vshll.u32 %v367_v7, 16  ;;  %v770_v23 = vsel %vm15535_vm4, %v765_v13, %v769_v56  ;;  %v374_v8 = vld [vmem:[%s15521_s5 + $0xa4] sm:$0xf] }
  0x4b   : > { %12946 = vmatprep.mubr.msk.bf16.mxu1 %vm2109_vm3, %v15665_v9  ;;  %v788_v25 = vor.u32 %v787_v16, %v783_v58  ;;  %v798_v26 = vor.u32 %v797_v18, %v793_v17  ;;  %v816_v28 = vshrl.u32 %v368_v12, 16  ;;  %v15679_v29 = vcombine.low %v760_v10, %v770_v23  ;;  %15127 = vmatprep.subr.msk.bf16.mxu0 %vm2302_vm0, %v15698_v0  ;;  %v16509_v38 = vld [vmem:[%s15521_s5 + $0x104] sm:$0xf] }
  0x4c   : > { %v784_v30 = vsel %vm15535_vm4, %v779_v19, %v783_v58  ;;  %v803_v31 = vrot.slane %v801_v20, 5  ;;  %v807_v33 = vrot.slane %v805_v21, 4  ;;  %v813_v39 = vrot.slane %v811_v22, 5  ;;  %v375_v21 = vld [vmem:[%s15521_s5 + $0xa8] sm:$0xf] }
  0x4d   : > { %19078 = vst [vmem:[#allocation11_spill] sm:$0xff] %v15679_v29  ;;  %v789_v36 = vrot.slane %v788_v25, 4  ;;  %v799_v37 = vrot.slane %v798_v26, 4  ;;  %v818_v40 = vrot.slane %v816_v28, 4  ;;  %13463 = vmatmul.mubr.msk.bf16.gmra.mrb[16].mxu0 %vm2109_vm3, %v15679_v29  ;;  %v819_v42 = vshll.u32 %v368_v12, 16 }
  0x4e   : > { %v808_v41 = vor.u32 %v807_v33, %v803_v31  ;;  %v825_v44 = vshll.u32 %v369_v27, 16  ;;  %v829_v45 = vshrl.u32 %v369_v27, 16  ;;  %v835_v49 = vshll.u32 %v370_v35, 16 }
  0x4f   : > { %v794_v47 = vsel %vm15535_vm4, %v789_v36, %v793_v17  ;;  %v804_v48 = vsel %vm15535_vm4, %v799_v37, %v803_v31  ;;  %v839_v52 = vshrl.u32 %v370_v35, 16  ;;  %v821_v55 = vrot.slane %v819_v42, 5  ;;  %v377_v37 = vld [vmem:[%s15521_s5 + $0xb0] sm:$0x1] }
  0x50   : > { %v15692_v53 = vcombine.low %v784_v30, %v794_v47  ;;  %v809_v54 = vrot.slane %v808_v41, 4  ;;  %v827_v56 = vrot.slane %v825_v44, 5  ;;  %v831_v6 = vrot.slane %v829_v45, 4  ;;  %v376_v30 = vld [vmem:[%s15521_s5 + $0xac] sm:$0xf] }
  0x51   : > { %v837_v60 = vrot.slane %v835_v49, 5  ;;  %v841_v61 = vrot.slane %v839_v52, 4  ;;  %v845_v63 = vshll.u32 %v371_v46, 16  ;;  %v822_v4 = vor.u32 %v821_v55, %v818_v40  ;;  %v379_v55 = vld [vmem:[%s15521_s5 + $0xb8] sm:$0xf] }
  0x52   : > { %19079 = vst [vmem:[#allocation12_spill] sm:$0xff] %v15692_v53  ;;  %13466 = vmatprep.mubr.msk.bf16.mxu0 %vm2109_vm3, %v15692_v53  ;;  %12947 = vmatmul.mubr.msk.bf16.gmra.mrb[20].mxu1 %vm2109_vm3, %v15679_v29  ;;  %v814_v1 = vsel %vm15535_vm4, %v809_v54, %v813_v39  ;;  %v849_v5 = vshrl.u32 %v371_v46, 16  ;;  %v855_v7 = vshll.u32 %v372_v51, 16  ;;  %v832_v11 = vor.u32 %v831_v6, %v827_v56 }
  0x53   : > { %v15707_v10 = vcombine.low %v804_v48, %v814_v1  ;;  %12950 = vmatprep.mubr.msk.bf16.mxu1 %vm2109_vm3, %v15692_v53  ;;  %v842_v58 = vor.u32 %v841_v61, %v837_v60  ;;  %v847_v12 = vrot.slane %v845_v63, 5  ;;  %v823_v13 = vrot.slane %v822_v4, 4  ;;  %v378_v48 = vld [vmem:[%s15521_s5 + $0xb4] sm:$0xf] }
  0x54   : > { %v851_v16 = vrot.slane %v849_v5, 4  ;;  %v857_v17 = vrot.slane %v855_v7, 5  ;;  %v860_v18 = vshrl.u32 %v373_v57, 16  ;;  %v833_v19 = vrot.slane %v832_v11, 4 }
  0x55   : > { %19080 = vst [vmem:[#allocation13_spill] sm:$0xff] %v15707_v10  ;;  %v843_v20 = vrot.slane %v842_v58, 4  ;;  %v863_v22 = vshll.u32 %v373_v57, 16  ;;  %v869_v23 = vshll.u32 %v374_v8, 16  ;;  %13467 = vmatmul.mubr.msk.bf16.gmra.mrb[20].mxu0 %vm2109_vm3, %v15707_v10  ;;  %v828_v25 = vsel %vm15535_vm4, %v823_v13, %v827_v56 }
  0x56   : > { %v852_v26 = vor.u32 %v851_v16, %v847_v12  ;;  %v862_v27 = vrot.slane %v860_v18, 4  ;;  %v873_v28 = vshrl.u32 %v374_v8, 16  ;;  %v838_v31 = vsel %vm15535_vm4, %v833_v19, %v837_v60  ;;  %v380_v8 = vld [vmem:[%s15521_s5 + $0xbc] sm:$0xf]  ;;  %v381_v18 = vld [vmem:[%s15521_s5 + $0xc0] sm:$0xf] }
  0x57   : > { %v848_v33 = vsel %vm15535_vm4, %v843_v20, %v847_v12  ;;  %v865_v35 = vrot.slane %v863_v22, 5  ;;  %v871_v36 = vrot.slane %v869_v23, 5  ;;  %v15724_v39 = vcombine.low %v828_v25, %v838_v31  ;;  %v382_v31 = vld [vmem:[%s15521_s5 + $0xc4] sm:$0x1] }
  0x58   : > { %v853_v40 = vrot.slane %v852_v26, 4  ;;  %v875_v41 = vrot.slane %v873_v28, 4  ;;  %v879_v42 = vshll.u32 %v375_v21, 16  ;;  %v883_v45 = vshrl.u32 %v375_v21, 16 }
  0x59   : > { %19081 = vst [vmem:[#allocation14_spill] sm:$0xff] %v15724_v39  ;;  %v866_v44 = vor.u32 %v865_v35, %v862_v27  ;;  %v889_v46 = vshll.u32 %v376_v30, 16  ;;  %v893_v47 = vshrl.u32 %v376_v30, 16  ;;  %13470 = vmatprep.mubr.msk.bf16.mxu0 %vm2109_vm3, %v15724_v39  ;;  %v899_v54 = vshll.u32 %v377_v37, 16 }
  0x5a   : > { %12951 = vmatmul.mubr.msk.bf16.gmra.mrb[24].mxu1 %vm2109_vm3, %v15707_v10  ;;  %v858_v49 = vsel %vm15535_vm4, %v853_v40, %v857_v17  ;;  %v876_v51 = vor.u32 %v875_v41, %v871_v36  ;;  %v881_v52 = vrot.slane %v879_v42, 5  ;;  %v885_v6 = vrot.slane %v883_v45, 4  ;;  %v15282_v10 = vld [vmem:[%s15521_s5 + $0x100] sm:$0x1] }
  0x5b   : > { %v15734_v56 = vcombine.low %v848_v33, %v858_v49  ;;  %12954 = vmatprep.mubr.msk.bf16.mxu1 %vm2109_vm3, %v15724_v39  ;;  %v867_v57 = vrot.slane %v866_v44, 4  ;;  %v891_v60 = vrot.slane %v889_v46, 5  ;;  %v895_v63 = vrot.slane %v893_v47, 4  ;;  %v384_v44 = vld [vmem:[%s15521_s5 + $0xcc] sm:$0xf] }
  0x5c   : > { %v877_v61 = vrot.slane %v876_v51, 4  ;;  %v901_v1 = vrot.slane %v899_v54, 5  ;;  %v904_v4 = vshrl.u32 %v378_v48, 16  ;;  %v886_v7 = vor.u32 %v885_v6, %v881_v52  ;;  %v385_v6 = vld [vmem:[%s15521_s5 + $0xd0] sm:$0xf] }
  0x5d   : > { %19082 = vst [vmem:[#allocation15_spill] sm:$0xff] %v15734_v56  ;;  %v872_v5 = vsel %vm15535_vm4, %v867_v57, %v871_v36  ;;  %v907_v11 = vshll.u32 %v378_v48, 16  ;;  %v913_v58 = vshll.u32 %v379_v55, 16  ;;  %13471 = vmatmul.mubr.msk.bf16.gmra.mrb[24].mxu0 %vm2109_vm3, %v15734_v56  ;;  %v896_v13 = vor.u32 %v895_v63, %v891_v60  ;;  %v383_v36 = vld [vmem:[%s15521_s5 + $0xc8] sm:$0xf] }
  0x5e   : > { %v882_v12 = vsel %vm15535_vm4, %v877_v61, %v881_v52  ;;  %v906_v16 = vrot.slane %v904_v4, 4  ;;  %v917_v17 = vshrl.u32 %v379_v55, 16  ;;  %v887_v20 = vrot.slane %v886_v7, 4  ;;  %v386_v7 = vld [vmem:[%s15521_s5 + $0xd4] sm:$0xf] }
  0x5f   : > { %v15746_v19 = vcombine.low %v872_v5, %v882_v12  ;;  %v909_v21 = vrot.slane %v907_v11, 5  ;;  %v915_v22 = vrot.slane %v913_v58, 5  ;;  %v897_v23 = vrot.slane %v896_v13, 4 }
  0x60   : > { %v919_v25 = vrot.slane %v917_v17, 4  ;;  %v923_v26 = vshll.u32 %v380_v8, 16  ;;  %v927_v27 = vshrl.u32 %v380_v8, 16  ;;  %v892_v28 = vsel %vm15535_vm4, %v887_v20, %v891_v60 }
  0x61   : > { %19083 = vst [vmem:[#allocation16_spill] sm:$0xff] %v15746_v19  ;;  %13474 = vmatprep.mubr.msk.bf16.mxu0 %vm2109_vm3, %v15746_v19  ;;  %v910_v30 = vor.u32 %v909_v21, %v906_v16  ;;  %v933_v33 = vshll.u32 %v381_v18, 16  ;;  %v937_v35 = vshrl.u32 %v381_v18, 16  ;;  %v902_v37 = vsel %vm15535_vm4, %v897_v23, %v901_v1  ;;  %v387_v18 = vld [vmem:[%s15521_s5 + $0xd8] sm:$0x1] }
  0x62   : > { %12955 = vmatmul.mubr.msk.bf16.gmra.mrb[28].mxu1 %vm2109_vm3, %v15734_v56  ;;  %v920_v40 = vor.u32 %v919_v25, %v915_v22  ;;  %v925_v41 = vrot.slane %v923_v26, 5  ;;  %v929_v42 = vrot.slane %v927_v27, 4  ;;  %v15759_v45 = vcombine.low %v892_v28, %v902_v37  ;;  %v388_v26 = vld [vmem:[%s15521_s5 + $0xdc] sm:$0xf] }
  0x63   : > { %12958 = vmatprep.mubr.msk.bf16.mxu1 %vm2109_vm3, %v15746_v19  ;;  %v911_v46 = vrot.slane %v910_v30, 4  ;;  %v935_v47 = vrot.slane %v933_v33, 5  ;;  %v939_v48 = vrot.slane %v937_v35, 4  ;;  %v943_v52 = vshll.u32 %v382_v31, 16  ;;  %v389_v33 = vld [vmem:[%s15521_s5 + $0xe0] sm:$0xf] }
  0x64   : > { %19084 = vst [vmem:[#allocation17_spill] sm:$0xff] %v15759_v45  ;;  %v921_v49 = vrot.slane %v920_v40, 4  ;;  %v930_v51 = vor.u32 %v929_v42, %v925_v41  ;;  %v948_v54 = vshrl.u32 %v383_v36, 16  ;;  %v951_v60 = vshll.u32 %v383_v36, 16  ;;  %v16460_v19 = vld [vmem:[%s15521_s5 + $0x230] sm:$0xf] }
  0x65   : > { %v916_v55 = vsel %vm15535_vm4, %v911_v46, %v915_v22  ;;  %v940_v57 = vor.u32 %v939_v48, %v935_v47  ;;  %v957_v61 = vshll.u32 %v384_v44, 16  ;;  %13475 = vmatmul.mubr.msk.bf16.gmra.mrb[28].mxu0 %vm2109_vm3, %v15759_v45  ;;  %v945_v4 = vrot.slane %v943_v52, 5 }
  0x66   : > { %v926_v63 = vsel %vm15535_vm4, %v921_v49, %v925_v41  ;;  %v931_v1 = vrot.slane %v930_v51, 4  ;;  %v950_v5 = vrot.slane %v948_v54, 4  ;;  %v953_v58 = vrot.slane %v951_v60, 5 }
  0x67   : > { %v15771_v8 = vcombine.low %v916_v55, %v926_v63  ;;  %v941_v11 = vrot.slane %v940_v57, 4  ;;  %v959_v12 = vrot.slane %v957_v61, 5  ;;  %v961_v16 = vshrl.u32 %v384_v44, 16  ;;  %v390_v44 = vld [vmem:[%s15521_s5 + $0xe4] sm:$0xf] }
  0x68   : > { %v936_v13 = vsel %vm15535_vm4, %v931_v1, %v935_v47  ;;  %v967_v17 = vshll.u32 %v385_v6, 16  ;;  %v971_v20 = vshrl.u32 %v385_v6, 16  ;;  %v954_v22 = vor.u32 %v953_v58, %v950_v5  ;;  %v392_v58 = vld [vmem:[%s15521_s5 + $0xec] sm:$0x1] }
  0x69   : > { %19085 = vst [vmem:[#allocation18_spill] sm:$0xff] %v15771_v8  ;;  %13478 = vmatprep.mubr.msk.bf16.mxu0 %vm2109_vm3, %v15771_v8  ;;  %v946_v21 = vsel %vm15535_vm4, %v941_v11, %v945_v4  ;;  %v977_v23 = vshll.u32 %v386_v7, 16  ;;  %v981_v25 = vshrl.u32 %v386_v7, 16  ;;  %v963_v28 = vrot.slane %v961_v16, 4  ;;  %v391_v4 = vld [vmem:[%s15521_s5 + $0xe8] sm:$0xf] }
  0x6a   : > { %12959 = vmatmul.mubr.msk.bf16.gmra.mrb[32].mxu1 %vm2109_vm3, %v15759_v45  ;;  %v15783_v27 = vcombine.low %v936_v13, %v946_v21  ;;  %v969_v30 = vrot.slane %v967_v17, 5  ;;  %v973_v31 = vrot.slane %v971_v20, 4  ;;  %v955_v35 = vrot.slane %v954_v22, 4  ;;  %v393_v13 = vld [vmem:[%s15521_s5 + $0xf0] sm:$0xf] }
  0x6b   : > { %12962 = vmatprep.mubr.msk.bf16.mxu1 %vm2109_vm3, %v15771_v8  ;;  %v979_v36 = vrot.slane %v977_v23, 5  ;;  %v983_v37 = vrot.slane %v981_v25, 4  ;;  %v987_v40 = vshll.u32 %v387_v18, 16  ;;  %v964_v41 = vor.u32 %v963_v28, %v959_v12 }
  0x6c   : > { %19086 = vst [vmem:[#allocation19_spill] sm:$0xff] %v15783_v27  ;;  %v974_v42 = vor.u32 %v973_v31, %v969_v30  ;;  %v992_v46 = vshrl.u32 %v388_v26, 16  ;;  %v995_v47 = vshll.u32 %v388_v26, 16  ;;  %v960_v48 = vsel %vm15535_vm4, %v955_v35, %v959_v12  ;;  %v394_v31 = vld [vmem:[%s15521_s5 + $0xf4] sm:$0xf] }
  0x6d   : > { %v984_v49 = vor.u32 %v983_v37, %v979_v36  ;;  %v989_v51 = vrot.slane %v987_v40, 5  ;;  %v1001_v52 = vshll.u32 %v389_v33, 16  ;;  %13479 = vmatmul.mubr.msk.bf16.gmra.mrb[32].mxu0 %vm2109_vm3, %v15783_v27  ;;  %v965_v54 = vrot.slane %v964_v41, 4  ;;  %v395_v40 = vld [vmem:[%s15521_s5 + $0xf8] sm:$0xf] }
  0x6e   : > { %v975_v55 = vrot.slane %v974_v42, 4  ;;  %v994_v57 = vrot.slane %v992_v46, 4  ;;  %v997_v6 = vrot.slane %v995_v47, 5  ;;  %v1005_v63 = vshrl.u32 %v389_v33, 16 }
  0x6f   : > { %v985_v60 = vrot.slane %v984_v49, 4  ;;  %v1003_v61 = vrot.slane %v1001_v52, 5  ;;  %v1011_v1 = vshll.u32 %v390_v44, 16  ;;  %v970_v5 = vsel %vm15535_vm4, %v965_v54, %v969_v30 }
  0x70   : > { %v980_v7 = vsel %vm15535_vm4, %v975_v55, %v979_v36  ;;  %v998_v11 = vor.u32 %v997_v6, %v994_v57  ;;  %v1015_v12 = vshrl.u32 %v390_v44, 16  ;;  %v15800_v16 = vcombine.low %v960_v48, %v970_v5  ;;  %v396_v6 = vld [vmem:[%s15521_s5 + $0xfc] sm:$0xf] }
  0x71   : > { %v990_v17 = vsel %vm15535_vm4, %v985_v60, %v989_v51  ;;  %v1007_v18 = vrot.slane %v1005_v63, 4  ;;  %v1013_v20 = vrot.slane %v1011_v1, 5  ;;  %v1021_v25 = vshll.u32 %v391_v4, 16  ;;  %v397_v60 = vld [vmem:[%s15521_s5 + $0x100] sm:$0x1] }
  0x72   : > { %19087 = vst [vmem:[#allocation20_spill] sm:$0xff] %v15800_v16  ;;  %12963 = vmatmul.mubr.msk.bf16.gmra.mrb[36].mxu1 %vm2109_vm3, %v15783_v27  ;;  %v15806_v21 = vcombine.low %v980_v7, %v990_v17  ;;  %v999_v22 = vrot.slane %v998_v11, 4  ;;  %v1017_v23 = vrot.slane %v1015_v12, 4  ;;  %13482 = vmatprep.mubr.msk.bf16.mxu0 %vm2109_vm3, %v15800_v16  ;;  %v1025_v28 = vshrl.u32 %v391_v4, 16  ;;  %v398_v7 = vld [vmem:[%s15521_s5 + $0x104] sm:$0xf] }
  0x73   : > { %12966 = vmatprep.mubr.msk.bf16.mxu1 %vm2109_vm3, %v15800_v16  ;;  %v1008_v26 = vor.u32 %v1007_v18, %v1003_v61  ;;  %v1031_v30 = vshll.u32 %v392_v58, 16  ;;  %v1036_v33 = vshrl.u32 %v393_v13, 16  ;;  %v1023_v37 = vrot.slane %v1021_v25, 5  ;;  %v16409_v27 = vld [vmem:[%s15521_s5 + $0x224] sm:$0xf] }
  0x74   : > { %19088 = vst [vmem:[#allocation21_spill] sm:$0xff] %v15806_v21  ;;  %v1004_v35 = vsel %vm15535_vm4, %v999_v22, %v1003_v61  ;;  %v1018_v36 = vor.u32 %v1017_v23, %v1013_v20  ;;  %v1039_v41 = vshll.u32 %v393_v13, 16  ;;  %v1027_v44 = vrot.slane %v1025_v28, 4  ;;  %v399_v28 = vld [vmem:[%s15521_s5 + $0x108] sm:$0xf] }
  0x75   : > { %v1009_v42 = vrot.slane %v1008_v26, 4  ;;  %v1033_v46 = vrot.slane %v1031_v30, 5  ;;  %v1038_v47 = vrot.slane %v1036_v33, 4  ;;  %13483 = vmatmul.mubr.msk.bf16.gmra.mrb[36].mxu0 %vm2109_vm3, %v15806_v21  ;;  %v1045_v51 = vshll.u32 %v394_v31, 16 }
  0x76   : > { %v1019_v48 = vrot.slane %v1018_v36, 4  ;;  %v1041_v49 = vrot.slane %v1039_v41, 5  ;;  %v1049_v52 = vshrl.u32 %v394_v31, 16  ;;  %v1028_v55 = vor.u32 %v1027_v44, %v1023_v37 }
  0x77   : > { %v1014_v54 = vsel %vm15535_vm4, %v1009_v42, %v1013_v20  ;;  %v1055_v57 = vshll.u32 %v395_v40, 16  ;;  %v1059_v61 = vshrl.u32 %v395_v40, 16  ;;  %v1047_v5 = vrot.slane %v1045_v51, 5  ;;  %v401_v51 = vld [vmem:[%s15521_s5 + $0x110] sm:$0xf] }
  0x78   : > { %v15822_v63 = vcombine.low %v1004_v35, %v1014_v54  ;;  %v1024_v1 = vsel %vm15535_vm4, %v1019_v48, %v1023_v37  ;;  %v1042_v4 = vor.u32 %v1041_v49, %v1038_v47  ;;  %v1029_v11 = vrot.slane %v1028_v55, 4  ;;  %v400_v37 = vld [vmem:[%s15521_s5 + $0x10c] sm:$0xf] }
  0x79   : > { %v1051_v58 = vrot.slane %v1049_v52, 4  ;;  %v1057_v12 = vrot.slane %v1055_v57, 5  ;;  %v1061_v13 = vrot.slane %v1059_v61, 4  ;;  %v1065_v18 = vshll.u32 %v396_v6, 16  ;;  %v402_v57 = vld [vmem:[%s15521_s5 + $0x114] sm:$0x1] }
  0x7a   : > { %19089 = vst [vmem:[#allocation22_spill] sm:$0xff] %v15822_v63  ;;  %13486 = vmatprep.mubr.msk.bf16.mxu0 %vm2109_vm3, %v15822_v63  ;;  %12967 = vmatmul.mubr.msk.bf16.gmra.mrb[40].mxu1 %vm2109_vm3, %v15806_v21  ;;  %v1043_v17 = vrot.slane %v1042_v4, 4  ;;  %v1069_v20 = vshrl.u32 %v396_v6, 16  ;;  %v1075_v22 = vshll.u32 %v397_v60, 16  ;;  %v1034_v23 = vsel %vm15535_vm4, %v1029_v11, %v1033_v46 }
  0x7b   : > { %12970 = vmatprep.mubr.msk.bf16.mxu1 %vm2109_vm3, %v15822_v63  ;;  %v1052_v25 = vor.u32 %v1051_v58, %v1047_v5  ;;  %v1062_v26 = vor.u32 %v1061_v13, %v1057_v12  ;;  %v1080_v30 = vshrl.u32 %v398_v7, 16  ;;  %v15836_v31 = vcombine.low %v1024_v1, %v1034_v23  ;;  %v403_v13 = vld [vmem:[%s15521_s5 + $0x118] sm:$0xf] }
  0x7c   : > { %v1048_v33 = vsel %vm15535_vm4, %v1043_v17, %v1047_v5  ;;  %v1067_v35 = vrot.slane %v1065_v18, 5  ;;  %v1071_v36 = vrot.slane %v1069_v20, 4  ;;  %v1077_v42 = vrot.slane %v1075_v22, 5  ;;  %v404_v22 = vld [vmem:[%s15521_s5 + $0x11c] sm:$0xf] }
  0x7d   : > { %19090 = vst [vmem:[#allocation23_spill] sm:$0xff] %v15836_v31  ;;  %v1053_v40 = vrot.slane %v1052_v25, 4  ;;  %v1063_v41 = vrot.slane %v1062_v26, 4  ;;  %v1082_v44 = vrot.slane %v1080_v30, 4  ;;  %13487 = vmatmul.mubr.msk.bf16.gmra.mrb[40].mxu0 %vm2109_vm3, %v15836_v31  ;;  %v1083_v47 = vshll.u32 %v398_v7, 16 }
  0x7e   : > { %v1072_v46 = vor.u32 %v1071_v36, %v1067_v35  ;;  %v1089_v48 = vshll.u32 %v399_v28, 16  ;;  %v1093_v49 = vshrl.u32 %v399_v28, 16  ;;  %v1099_v55 = vshll.u32 %v400_v37, 16 }
  0x7f   : > { %v1058_v52 = vsel %vm15535_vm4, %v1053_v40, %v1057_v12  ;;  %v1068_v54 = vsel %vm15535_vm4, %v1063_v41, %v1067_v35  ;;  %v1103_v6 = vshrl.u32 %v400_v37, 16  ;;  %v1085_v1 = vrot.slane %v1083_v47, 5  ;;  %v405_v41 = vld [vmem:[%s15521_s5 + $0x120] sm:$0xf] }
  0x80   : > { %v15849_v60 = vcombine.low %v1048_v33, %v1058_v52  ;;  %v1073_v61 = vrot.slane %v1072_v46, 4  ;;  %v1091_v4 = vrot.slane %v1089_v48, 5  ;;  %v1095_v5 = vrot.slane %v1093_v49, 4 }
  0x81   : > { %v1101_v7 = vrot.slane %v1099_v55, 5  ;;  %v1105_v11 = vrot.slane %v1103_v6, 4  ;;  %v1109_v58 = vshll.u32 %v401_v51, 16  ;;  %v1086_v17 = vor.u32 %v1085_v1, %v1082_v44  ;;  %v407_v6 = vld [vmem:[%s15521_s5 + $0x128] sm:$0x1] }
  0x82   : > { %19091 = vst [vmem:[#allocation24_spill] sm:$0xff] %v15849_v60  ;;  %13490 = vmatprep.mubr.msk.bf16.mxu0 %vm2109_vm3, %v15849_v60  ;;  %12971 = vmatmul.mubr.msk.bf16.gmra.mrb[44].mxu1 %vm2109_vm3, %v15836_v31  ;;  %v1078_v12 = vsel %vm15535_vm4, %v1073_v61, %v1077_v42  ;;  %v1113_v18 = vshrl.u32 %v401_v51, 16  ;;  %v1119_v20 = vshll.u32 %v402_v57, 16  ;;  %v1096_v25 = vor.u32 %v1095_v5, %v1091_v4  ;;  %v406_v51 = vld [vmem:[%s15521_s5 + $0x124] sm:$0xf] }
  0x83   : > { %v15859_v23 = vcombine.low %v1068_v54, %v1078_v12  ;;  %12974 = vmatprep.mubr.msk.bf16.mxu1 %vm2109_vm3, %v15849_v60  ;;  %v1106_v26 = vor.u32 %v1105_v11, %v1101_v7  ;;  %v1111_v28 = vrot.slane %v1109_v58, 5  ;;  %v1087_v30 = vrot.slane %v1086_v17, 4  ;;  %v408_v17 = vld [vmem:[%s15521_s5 + $0x12c] sm:$0xf]  ;;  %v15265_v60 = vld [vmem:[%s15521_s5 + $0xbc] sm:$0xf] }
  0x84   : > { %v1115_v33 = vrot.slane %v1113_v18, 4  ;;  %v1121_v35 = vrot.slane %v1119_v20, 5  ;;  %v1124_v36 = vshrl.u32 %v403_v13, 16  ;;  %v1097_v37 = vrot.slane %v1096_v25, 4  ;;  %v409_v25 = vld [vmem:[%s15521_s5 + $0x130] sm:$0xf] }
  0x85   : > { %19092 = vst [vmem:[#allocation25_spill] sm:$0xff] %v15859_v23  ;;  %v1107_v40 = vrot.slane %v1106_v26, 4  ;;  %v1127_v42 = vshll.u32 %v403_v13, 16  ;;  %v1133_v44 = vshll.u32 %v404_v22, 16  ;;  %13491 = vmatmul.mubr.msk.bf16.gmra.mrb[44].mxu0 %vm2109_vm3, %v15859_v23  ;;  %v1092_v46 = vsel %vm15535_vm4, %v1087_v30, %v1091_v4 }
  0x86   : > { %v1116_v47 = vor.u32 %v1115_v33, %v1111_v28  ;;  %v1126_v48 = vrot.slane %v1124_v36, 4  ;;  %v1137_v49 = vshrl.u32 %v404_v22, 16  ;;  %v1102_v52 = vsel %vm15535_vm4, %v1097_v37, %v1101_v7 }
  0x87   : > { %v1112_v54 = vsel %vm15535_vm4, %v1107_v40, %v1111_v28  ;;  %v1129_v55 = vrot.slane %v1127_v42, 5  ;;  %v1135_v57 = vrot.slane %v1133_v44, 5  ;;  %v15874_v61 = vcombine.low %v1092_v46, %v1102_v52  ;;  %v410_v44 = vld [vmem:[%s15521_s5 + $0x134] sm:$0xf] }
  0x88   : > { %v1117_v1 = vrot.slane %v1116_v47, 4  ;;  %v1139_v5 = vrot.slane %v1137_v49, 4  ;;  %v1143_v4 = vshll.u32 %v405_v41, 16  ;;  %v1147_v58 = vshrl.u32 %v405_v41, 16 }
  0x89   : > { %19093 = vst [vmem:[#allocation26_spill] sm:$0xff] %v15874_v61  ;;  %v1130_v11 = vor.u32 %v1129_v55, %v1126_v48  ;;  %v1153_v13 = vshll.u32 %v406_v51, 16  ;;  %v1157_v12 = vshrl.u32 %v406_v51, 16  ;;  %13494 = vmatprep.mubr.msk.bf16.mxu0 %vm2109_vm3, %v15874_v61  ;;  %v1163_v22 = vshll.u32 %v407_v6, 16 }
  0x8a   : > { %12975 = vmatmul.mubr.msk.bf16.gmra.mrb[48].mxu1 %vm2109_vm3, %v15859_v23  ;;  %v1122_v7 = vsel %vm15535_vm4, %v1117_v1, %v1121_v35  ;;  %v1140_v18 = vor.u32 %v1139_v5, %v1135_v57  ;;  %v1145_v20 = vrot.slane %v1143_v4, 5  ;;  %v1149_v30 = vrot.slane %v1147_v58, 4 }
  0x8b   : > { %v15884_v26 = vcombine.low %v1112_v54, %v1122_v7  ;;  %12978 = vmatprep.mubr.msk.bf16.mxu1 %vm2109_vm3, %v15874_v61  ;;  %v1131_v28 = vrot.slane %v1130_v11, 4  ;;  %v1155_v33 = vrot.slane %v1153_v13, 5  ;;  %v1159_v37 = vrot.slane %v1157_v12, 4  ;;  %v411_v54 = vld [vmem:[%s15521_s5 + $0x138] sm:$0xf] }
  0x8c   : > { %v1141_v36 = vrot.slane %v1140_v18, 4  ;;  %v1165_v40 = vrot.slane %v1163_v22, 5  ;;  %v1168_v41 = vshrl.u32 %v408_v17, 16  ;;  %v1150_v42 = vor.u32 %v1149_v30, %v1145_v20 }
  0x8d   : > { %19094 = vst [vmem:[#allocation27_spill] sm:$0xff] %v15884_v26  ;;  %v1136_v35 = vsel %vm15535_vm4, %v1131_v28, %v1135_v57  ;;  %v1171_v46 = vshll.u32 %v408_v17, 16  ;;  %v1177_v47 = vshll.u32 %v409_v25, 16  ;;  %13495 = vmatmul.mubr.msk.bf16.gmra.mrb[48].mxu0 %vm2109_vm3, %v15884_v26  ;;  %v1160_v49 = vor.u32 %v1159_v37, %v1155_v33  ;;  %v412_v17 = vld [vmem:[%s15521_s5 + $0x13c] sm:$0x1] }
  0x8e   : > { %v1146_v48 = vsel %vm15535_vm4, %v1141_v36, %v1145_v20  ;;  %v1170_v51 = vrot.slane %v1168_v41, 4  ;;  %v1181_v52 = vshrl.u32 %v409_v25, 16  ;;  %v1151_v6 = vrot.slane %v1150_v42, 4  ;;  %v413_v20 = vld [vmem:[%s15521_s5 + $0x140] sm:$0xf] }
  0x8f   : > { %v15896_v55 = vcombine.low %v1136_v35, %v1146_v48  ;;  %v1173_v57 = vrot.slane %v1171_v46, 5  ;;  %v1179_v1 = vrot.slane %v1177_v47, 5  ;;  %v1161_v5 = vrot.slane %v1160_v49, 4  ;;  %v414_v36 = vld [vmem:[%s15521_s5 + $0x144] sm:$0xf] }
  0x90   : > { %v1183_v4 = vrot.slane %v1181_v52, 4  ;;  %v1187_v11 = vshll.u32 %v410_v44, 16  ;;  %v1191_v58 = vshrl.u32 %v410_v44, 16  ;;  %v1156_v13 = vsel %vm15535_vm4, %v1151_v6, %v1155_v33  ;;  %v415_v49 = vld [vmem:[%s15521_s5 + $0x148] sm:$0xf] }
  0x91   : > { %19095 = vst [vmem:[#allocation28_spill] sm:$0xff] %v15896_v55  ;;  %13498 = vmatprep.mubr.msk.bf16.mxu0 %vm2109_vm3, %v15896_v55  ;;  %v1174_v12 = vor.u32 %v1173_v57, %v1170_v51  ;;  %v1197_v7 = vshll.u32 %v411_v54, 16  ;;  %v1201_v18 = vshrl.u32 %v411_v54, 16  ;;  %v1166_v22 = vsel %vm15535_vm4, %v1161_v5, %v1165_v40 }
  0x92   : > { %12979 = vmatmul.mubr.msk.bf16.gmra.mrb[52].mxu1 %vm2109_vm3, %v15884_v26  ;;  %v1184_v25 = vor.u32 %v1183_v4, %v1179_v1  ;;  %v1189_v28 = vrot.slane %v1187_v11, 5  ;;  %v1193_v30 = vrot.slane %v1191_v58, 4  ;;  %v15909_v37 = vcombine.low %v1156_v13, %v1166_v22  ;;  %v416_v4 = vld [vmem:[%s15521_s5 + $0x14c] sm:$0xf] }
  0x93   : > { %12982 = vmatprep.mubr.msk.bf16.mxu1 %vm2109_vm3, %v15896_v55  ;;  %v1175_v33 = vrot.slane %v1174_v12, 4  ;;  %v1199_v41 = vrot.slane %v1197_v7, 5  ;;  %v1203_v35 = vrot.slane %v1201_v18, 4  ;;  %v1207_v46 = vshll.u32 %v412_v17, 16  ;;  %v417_v18 = vld [vmem:[%s15521_s5 + $0x150] sm:$0x1] }
  0x94   : > { %19096 = vst [vmem:[#allocation29_spill] sm:$0xff] %v15909_v37  ;;  %v1185_v42 = vrot.slane %v1184_v25, 4  ;;  %v1194_v44 = vor.u32 %v1193_v30, %v1189_v28  ;;  %v1212_v47 = vshrl.u32 %v413_v20, 16  ;;  %v1215_v51 = vshll.u32 %v413_v20, 16  ;;  %v15255_v55 = vld [vmem:[%s15521_s5 + $0x94] sm:$0xf] }
  0x95   : > { %v1180_v40 = vsel %vm15535_vm4, %v1175_v33, %v1179_v1  ;;  %v1204_v48 = vor.u32 %v1203_v35, %v1199_v41  ;;  %v1221_v52 = vshll.u32 %v414_v36, 16  ;;  %13499 = vmatmul.mubr.msk.bf16.gmra.mrb[52].mxu0 %vm2109_vm3, %v15909_v37  ;;  %v1209_v57 = vrot.slane %v1207_v46, 5 }
  0x96   : > { %v1190_v54 = vsel %vm15535_vm4, %v1185_v42, %v1189_v28  ;;  %v1195_v6 = vrot.slane %v1194_v44, 4  ;;  %v1214_v5 = vrot.slane %v1212_v47, 4  ;;  %v1217_v13 = vrot.slane %v1215_v51, 5 }
  0x97   : > { %v15921_v11 = vcombine.low %v1180_v40, %v1190_v54  ;;  %v1205_v58 = vrot.slane %v1204_v48, 4  ;;  %v1223_v1 = vrot.slane %v1221_v52, 5  ;;  %v1225_v17 = vshrl.u32 %v414_v36, 16 }
  0x98   : > { %v1200_v12 = vsel %vm15535_vm4, %v1195_v6, %v1199_v41  ;;  %v1231_v7 = vshll.u32 %v415_v49, 16  ;;  %v1235_v20 = vshrl.u32 %v415_v49, 16  ;;  %v1218_v25 = vor.u32 %v1217_v13, %v1214_v5  ;;  %v418_v49 = vld [vmem:[%s15521_s5 + $0x154] sm:$0xf]  ;;  %v15226_v13 = vld [vmem:[%s15521_s5 + $0x18] sm:$0xf] }
  0x99   : > { %19097 = vst [vmem:[#allocation30_spill] sm:$0xff] %v15921_v11  ;;  %13502 = vmatprep.mubr.msk.bf16.mxu0 %vm2109_vm3, %v15921_v11  ;;  %v1210_v22 = vsel %vm15535_vm4, %v1205_v58, %v1209_v57  ;;  %v1241_v28 = vshll.u32 %v416_v4, 16  ;;  %v1245_v30 = vshrl.u32 %v416_v4, 16  ;;  %v1227_v41 = vrot.slane %v1225_v17, 4  ;;  %v15225_v57 = vld [vmem:[%s15521_s5 + $0x14] sm:$0xf] }
  0x9a   : > { %12983 = vmatmul.mubr.msk.bf16.gmra.mrb[56].mxu1 %vm2109_vm3, %v15909_v37  ;;  %v15932_v33 = vcombine.low %v1200_v12, %v1210_v22  ;;  %v1233_v36 = vrot.slane %v1231_v7, 5  ;;  %v1237_v35 = vrot.slane %v1235_v20, 4  ;;  %v1219_v42 = vrot.slane %v1218_v25, 4  ;;  %v15227_v17 = vld [vmem:[%s15521_s5 + $0x1c] sm:$0xf] }
  0x9b   : > { %12986 = vmatprep.mubr.msk.bf16.mxu1 %vm2109_vm3, %v15921_v11  ;;  %v1243_v44 = vrot.slane %v1241_v28, 5  ;;  %v1247_v46 = vrot.slane %v1245_v30, 4  ;;  %v1251_v47 = vshll.u32 %v417_v18, 16  ;;  %v1228_v40 = vor.u32 %v1227_v41, %v1223_v1 }
  0x9c   : > { %19098 = vst [vmem:[#allocation31_spill] sm:$0xff] %v15932_v33  ;;  %v1238_v48 = vor.u32 %v1237_v35, %v1233_v36  ;;  %v1224_v51 = vsel %vm15535_vm4, %v1219_v42, %v1223_v1  ;;  %v19099_v6 = vmov 0  ;;  %v11132_v5 = vrot.slane %v15225_v57, 9  ;;  %v419_v35 = vld [vmem:[%s15521_s5 + $0x158] sm:$0xf] }
  0x9d   : > { %v1248_v52 = vor.u32 %v1247_v46, %v1243_v44  ;;  %v1253_v54 = vrot.slane %v1251_v47, 5  ;;  %v19100_v6 = vsel %vm15939_vm7, 4294967295, %v19099_v6  ;;  %13503 = vmatmul.mubr.msk.bf16.gmra.mrb[56].mxu0 %vm2109_vm3, %v15932_v33  ;;  %v1229_v4 = vrot.slane %v1228_v40, 4  ;;  %v420_v47 = vld [vmem:[%s15521_s5 + $0x15c] sm:$0xf] }
  0x9e   : > { %19101 = vst [vmem:[#allocation32_spill] sm:$0xff] %v19100_v6  ;;  %v1239_v58 = vrot.slane %v1238_v48, 4  ;;  %v3961_v12 = vrot.slane %v15226_v13, 5  ;;  %v3964_v7 = vrot.slane %v15227_v17, 5  ;;  %v3969_v18 = vrot.slane %v3967_v14, 4 }
  0x9f   : > { %v1249_v1 = vrot.slane %v1248_v52, 4  ;;  %v15952_v20 = vsel %vm2302_vm0, %v15698_v0, 0  ;;  %v1256_v22 = vshrl.u32 %v418_v49, 16  ;;  %v1234_v25 = vsel %vm15535_vm4, %v1229_v4, %v1233_v36  ;;  %v421_v57 = vld [vmem:[%s15521_s5 + $0x160] sm:$0xf] }
  0xa0   : > { %v1244_v28 = vsel %vm15535_vm4, %v1239_v58, %v1243_v44  ;;  %v3962_v30 = vsel %vm15939_vm7, %v11132_v5, %v3961_v12  ;;  %v3963_v41 = vrot.slane %v3961_v12, 4  ;;  %v15961_v42 = vcombine.low %v1224_v51, %v1234_v25  ;;  %v15228_v58 = vld [vmem:[%s15521_s5 + $0x28] sm:$0xf] }
  0xa1   : > { %v1254_v46 = vsel %vm15535_vm4, %v1249_v1, %v1253_v54  ;;  %v3966_v0 = vrot.slane %v3964_v7, 4  ;;  %v3971_v36 = vsel %vm15939_vm7, %v3969_v18, %v3970_v15  ;;  %v1258_v48 = vrot.slane %v1256_v22, 4  ;;  %v15230_v18 = vld [vmem:[%s15521_s5 + $0x30] sm:$0xf] }
  0xa2   : > { %19102 = vst [vmem:[#allocation33_spill] sm:$0xff] %v15961_v42  ;;  %12987 = vmatmul.mubr.msk.bf16.gmra.mrb[60].mxu1 %vm2109_vm3, %v15932_v33  ;;  %v15972_v44 = vcombine.low %v1244_v28, %v1254_v46  ;;  %v3965_v40 = vsel %vm15939_vm7, %v3963_v41, %v3964_v7  ;;  %v1259_v51 = vshll.u32 %v418_v49, 16  ;;  %13506 = vmatprep.mubr.msk.bf16.mxu0 %vm2109_vm3, %v15961_v42  ;;  %v1265_v52 = vshll.u32 %v419_v35, 16  ;;  %v15229_v7 = vld [vmem:[%s15521_s5 + $0x2c] sm:$0xf] }
  0xa3   : > { %12990 = vmatprep.mubr.msk.bf16.mxu1 %vm2109_vm3, %v15961_v42  ;;  %v15980_v62 = vcombine.low %v3962_v30, %v3965_v40  ;;  %v3968_v15 = vsel %vm15939_vm7, %v3966_v0, %v3967_v14  ;;  %v1269_v54 = vshrl.u32 %v419_v35, 16  ;;  %v1275_v4 = vshll.u32 %v420_v47, 16  ;;  %v15245_v42 = vld [vmem:[%s15521_s5 + $0x6c] sm:$0xf] }
  0xa4   : > { %19103 = vst [vmem:[#allocation34_spill] sm:$0xff] %v15972_v44  ;;  %v15987_v5 = vcombine.low %v3968_v15, %v3971_v36  ;;  %v1261_v49 = vrot.slane %v1259_v51, 5  ;;  %v11133_v13 = vrot.slane %v15228_v58, 9  ;;  %v1267_v12 = vrot.slane %v1265_v52, 5 }
  0xa5   : > { %19104 = vst [vmem:[#allocation35_spill] sm:$0xff] %v15980_v62  ;;  %v1271_v17 = vrot.slane %v1269_v54, 4  ;;  %v3974_v1 = vrot.slane %v15229_v7, 5  ;;  %v3977_v22 = vrot.slane %v15230_v18, 5  ;;  %13507 = vmatmul.mubr.msk.bf16.gmra.mrb[60].mxu0 %vm2109_vm3, %v15972_v44  ;;  %v1277_v25 = vrot.slane %v1275_v4, 5 }
  0xa6   : > { %19105 = vst [vmem:[#allocation36_spill] sm:$0xff] %v15987_v5  ;;  %v1262_v14 = vor.u32 %v1261_v49, %v1258_v48  ;;  %v1279_v28 = vshrl.u32 %v420_v47, 16  ;;  %v1285_v30 = vshll.u32 %v421_v57, 16  ;;  %13576 = vmatprep.mubr.msk.bf16.mxu0 %vm2109_vm3, %v15980_v62  ;;  %v1289_v0 = vshrl.u32 %v421_v57, 16  ;;  %v423_v49 = vld [vmem:[%s15521_s5 + $0x168] sm:$0xf] }
  0xa7   : > { %v1272_v41 = vor.u32 %v1271_v17, %v1267_v12  ;;  %v3975_v35 = vsel %vm15939_vm7, %v11133_v13, %v3974_v1  ;;  %v3976_v46 = vrot.slane %v3974_v1, 4  ;;  %v1295_v15 = vshll.u32 %v422_v50, 16  ;;  %v424_v17 = vld [vmem:[%s15521_s5 + $0x16c] sm:$0xf]  ;;  %v15231_v18 = vld [vmem:[%s15521_s5 + $0x34] sm:$0xf] }
  0xa8   : > { %v1263_v36 = vrot.slane %v1262_v14, 4  ;;  %v1281_v40 = vrot.slane %v1279_v28, 4  ;;  %v1287_v51 = vrot.slane %v1285_v30, 5  ;;  %v1291_v52 = vrot.slane %v1289_v0, 4 }
  0xa9   : > { %v1273_v48 = vrot.slane %v1272_v41, 4  ;;  %v3978_v47 = vsel %vm15939_vm7, %v3976_v46, %v3977_v22  ;;  %v3979_v54 = vrot.slane %v3977_v22, 4  ;;  %v1297_v13 = vrot.slane %v1295_v15, 5  ;;  %v15232_v22 = vld [vmem:[%s15521_s5 + $0x38] sm:$0x1] }
  0xaa   : > { %12991 = vmatmul.mubr.msk.bf16.gmra.mrb[64].mxu1 %vm2109_vm3, %v15972_v44  ;;  %v1268_v57 = vsel %vm15535_vm4, %v1263_v36, %v1267_v12  ;;  %v16006_v4 = vcombine.low %v3975_v35, %v3978_v47  ;;  %v1282_v58 = vor.u32 %v1281_v40, %v1277_v25  ;;  %v1292_v1 = vor.u32 %v1291_v52, %v1287_v51  ;;  %v425_v41 = vld [vmem:[%s15521_s5 + $0x170] sm:$0xf] }
  0xab   : > { %v1278_v7 = vsel %vm15535_vm4, %v1273_v48, %v1277_v25  ;;  %v3980_v50 = vrot.slane %v15231_v18, 5  ;;  %v3983_v14 = vrot.slane %v15232_v22, 5  ;;  %v1300_v46 = vshrl.u32 %v423_v49, 16 }
  0xac   : > { %19106 = vst [vmem:[#allocation37_spill] sm:$0xff] %v16006_v4  ;;  %v16013_v28 = vcombine.low %v1268_v57, %v1278_v7  ;;  %v1283_v30 = vrot.slane %v1282_v58, 4  ;;  %v1303_v0 = vshll.u32 %v423_v49, 16  ;;  %v1293_v12 = vrot.slane %v1292_v1, 4 }
  0xad   : > { %v3981_v35 = vsel %vm15939_vm7, %v3979_v54, %v3980_v50  ;;  %v3982_v36 = vrot.slane %v3980_v50, 4  ;;  %v1309_v40 = vshll.u32 %v424_v17, 16  ;;  %13577 = vmatmul.mubr.msk.bf16.vlgmr.msra.gmra.mrb[0].mxu0 %vm2109_vm3, %v15987_v5  ;;  %v1302_v15 = vrot.slane %v1300_v46, 4  ;;  %v15233_v50 = vld [vmem:[%s15521_s5 + $0x3c] sm:$0xf] }
  0xae   : > { %19107 = vst [vmem:[#allocation38_spill] sm:$0xff] %v16013_v28  ;;  %12994 = vmatprep.mubr.msk.bf16.mxu1 %vm2109_vm3, %v16013_v28  ;;  %v1288_v25 = vsel %vm15535_vm4, %v1283_v30, %v1287_v51  ;;  %v1305_v48 = vrot.slane %v1303_v0, 5  ;;  %v1313_v47 = vshrl.u32 %v424_v17, 16  ;;  %13705 = vmatpush3.bf16.msra.mxu0 %v15952_v20  ;;  %v1298_v52 = vsel %vm15535_vm4, %v1293_v12, %v1297_v13  ;;  %v426_v51 = vld [vmem:[%s15521_s5 + $0x174] sm:$0xf] }
  0xaf   : > { %13580 = vmatprep.mubr.msk.bf16.mxu0 %vm2109_vm3, %v16006_v4  ;;  %v3984_v54 = vsel %vm15939_vm7, %v3982_v36, %v3983_v14  ;;  %v1311_v49 = vrot.slane %v1309_v40, 5  ;;  %v1319_v57 = vshll.u32 %v425_v41, 16  ;;  %v16032_v58 = vcombine.low %v1288_v25, %v1298_v52  ;;  %v427_v20 = vld [vmem:[%s15521_s5 + $0x178] sm:$0x1]  ;;  %v15234_v30 = vld [vmem:[%s15521_s5 + $0x40] sm:$0xf] }
  0xb0   : > { %v16034_v7 = vcombine.low %v3981_v35, %v3984_v54  ;;  %v1306_v17 = vor.u32 %v1305_v48, %v1302_v15  ;;  %v1315_v1 = vrot.slane %v1313_v47, 4  ;;  %v11134_v22 = vrot.slane %v15233_v50, 9  ;;  %v15235_v13 = vld [vmem:[%s15521_s5 + $0x44] sm:$0xf]  ;;  %v428_v50 = vld [vmem:[%s15521_s5 + $0x17c] sm:$0xf] }
  0xb1   : > { %19108 = vst [vmem:[#allocation39_spill] sm:$0xff] %v16032_v58  ;;  %v1321_v18 = vrot.slane %v1319_v57, 5  ;;  %v3987_v46 = vrot.slane %v15234_v30, 5  ;;  %v3990_v0 = vrot.slane %v15235_v13, 5  ;;  %v1323_v36 = vshrl.u32 %v425_v41, 16 }
  0xb2   : > { %19109 = vst [vmem:[#allocation40_spill] sm:$0xff] %v16034_v7  ;;  %12995 = vmatmul.mubr.msk.bf16.gmra.mrb[68].mxu1 %vm2109_vm3, %v16032_v58  ;;  %v1307_v14 = vrot.slane %v1306_v17, 4  ;;  %v1316_v12 = vor.u32 %v1315_v1, %v1311_v49  ;;  %v1329_v40 = vshll.u32 %v426_v51, 16  ;;  %v1333_v15 = vshrl.u32 %v426_v51, 16  ;;  %v15236_v30 = vld [vmem:[%s15521_s5 + $0x48] sm:$0xf] }
  0xb3   : > { %v3988_v35 = vsel %vm15939_vm7, %v11134_v22, %v3987_v46  ;;  %v3989_v25 = vrot.slane %v3987_v46, 4  ;;  %v1339_v48 = vshll.u32 %v427_v20, 16  ;;  %v1325_v54 = vrot.slane %v1323_v36, 4  ;;  %v429_v13 = vld [vmem:[%s15521_s5 + $0x180] sm:$0xf] }
  0xb4   : > { %v1312_v47 = vsel %vm15535_vm4, %v1307_v14, %v1311_v49  ;;  %v1317_v52 = vrot.slane %v1316_v12, 4  ;;  %v1331_v57 = vrot.slane %v1329_v40, 5  ;;  %v1335_v17 = vrot.slane %v1333_v15, 4  ;;  %v15237_v36 = vld [vmem:[%s15521_s5 + $0x4c] sm:$0x1] }
  0xb5   : > { %v3991_v41 = vsel %vm15939_vm7, %v3989_v25, %v3990_v0  ;;  %v1341_v1 = vrot.slane %v1339_v48, 5  ;;  %v3992_v22 = vrot.slane %v3990_v0, 4  ;;  %13581 = vmatmul.mubr.msk.bf16.gmra.mrb[4].mxu0 %vm2109_vm3, %v16034_v7  ;;  %v1326_v49 = vor.u32 %v1325_v54, %v1321_v18  ;;  %v430_v25 = vld [vmem:[%s15521_s5 + $0x184] sm:$0xf]  ;;  %v15297_v7 = vld [vmem:[%s15521_s5 + $0x13c] sm:$0x1] }
  0xb6   : > { %v1322_v51 = vsel %vm15535_vm4, %v1317_v52, %v1321_v18  ;;  %v16053_v20 = vcombine.low %v3988_v35, %v3991_v41  ;;  %v3993_v46 = vrot.slane %v15236_v30, 5  ;;  %v1336_v12 = vor.u32 %v1335_v17, %v1331_v57  ;;  %v16723_v4 = vld [vmem:[%s15521_s5 + $0x27c] sm:$0x1] }
  0xb7   : > { %v16057_v14 = vcombine.low %v1312_v47, %v1322_v51  ;;  %v3996_v40 = vrot.slane %v15237_v36, 5  ;;  %v1344_v15 = vshrl.u32 %v428_v50, 16  ;;  %v1327_v0 = vrot.slane %v1326_v49, 4  ;;  %v431_v36 = vld [vmem:[%s15521_s5 + $0x188] sm:$0xf] }
  0xb8   : > { %19110 = vst [vmem:[#allocation41_spill] sm:$0xff] %v16053_v20  ;;  %13584 = vmatprep.mubr.msk.bf16.mxu0 %vm2109_vm3, %v16053_v20  ;;  %v3994_v48 = vsel %vm15939_vm7, %v3992_v22, %v3993_v46  ;;  %v3995_v35 = vrot.slane %v3993_v46, 4  ;;  %v1347_v18 = vshll.u32 %v428_v50, 16  ;;  %v1337_v47 = vrot.slane %v1336_v12, 4 }
  0xb9   : > { %19111 = vst [vmem:[#allocation42_spill] sm:$0xff] %v16057_v14  ;;  %12998 = vmatprep.mubr.msk.bf16.mxu1 %vm2109_vm3, %v16057_v14  ;;  %v1346_v52 = vrot.slane %v1344_v15, 4  ;;  %v1353_v54 = vshll.u32 %v429_v13, 16  ;;  %v1357_v41 = vshrl.u32 %v429_v13, 16  ;;  %v1332_v17 = vsel %vm15535_vm4, %v1327_v0, %v1331_v57  ;;  %v432_v15 = vld [vmem:[%s15521_s5 + $0x18c] sm:$0x1] }
  0xba   : > { %v3997_v51 = vsel %vm15939_vm7, %v3995_v35, %v3996_v40  ;;  %v1349_v22 = vrot.slane %v1347_v18, 5  ;;  %v1363_v49 = vshll.u32 %v430_v25, 16  ;;  %v1342_v50 = vsel %vm15535_vm4, %v1337_v47, %v1341_v1  ;;  %v15238_v0 = vld [vmem:[%s15521_s5 + $0x50] sm:$0xf]  ;;  %v15239_v40 = vld [vmem:[%s15521_s5 + $0x54] sm:$0xf] }
  0xbb   : > { %v16073_v30 = vcombine.low %v3994_v48, %v3997_v51  ;;  %v1355_v46 = vrot.slane %v1353_v54, 5  ;;  %v1359_v12 = vrot.slane %v1357_v41, 4  ;;  %v16077_v13 = vcombine.low %v1332_v17, %v1342_v50  ;;  %v15240_v18 = vld [vmem:[%s15521_s5 + $0x58] sm:$0xf] }
  0xbc   : > { %v1350_v3 = vor.u32 %v1349_v22, %v1346_v52  ;;  %v1365_v57 = vrot.slane %v1363_v49, 5  ;;  %v11135_v14 = vrot.slane %v15238_v0, 9  ;;  %v4000_v35 = vrot.slane %v15239_v40, 5  ;;  %v15241_v40 = vld [vmem:[%s15521_s5 + $0x5c] sm:$0xf] }
  0xbd   : > { %19112 = vst [vmem:[#allocation43_spill] sm:$0xff] %v16073_v30  ;;  %19113 = vst [vmem:[#allocation44_spill] sm:$0xff] %v16077_v13  ;;  %v1360_v58 = vor.u32 %v1359_v12, %v1355_v46  ;;  %v4003_v28 = vrot.slane %v15240_v18, 5  ;;  %v1367_v44 = vshrl.u32 %v430_v25, 16  ;;  %12999 = vmatmul.mubr.msk.bf16.gmra.mrb[72].mxu1 %vm2109_vm3, %v16077_v13  ;;  %13585 = vmatmul.mubr.msk.bf16.gmra.mrb[8].mxu0 %vm2109_vm3, %v16073_v30  ;;  %v1373_v48 = vshll.u32 %v431_v36, 16 }
  0xbe   : > { %v1351_v1 = vrot.slane %v1350_v3, 4  ;;  %v1377_v47 = vshrl.u32 %v431_v36, 16  ;;  %v1383_v52 = vshll.u32 %v432_v15, 16  ;;  %v4001_v41 = vsel %vm15939_vm7, %v11135_v14, %v4000_v35  ;;  %v433_v3 = vld [vmem:[%s15521_s5 + $0x190] sm:$0xf] }
  0xbf   : > { %v1361_v54 = vrot.slane %v1360_v58, 4  ;;  %v4002_v17 = vrot.slane %v4000_v35, 4  ;;  %v1369_v51 = vrot.slane %v1367_v44, 4  ;;  %v1375_v22 = vrot.slane %v1373_v48, 5  ;;  %v434_v15 = vld [vmem:[%s15521_s5 + $0x194] sm:$0xf] }
  0xc0   : > { %v1356_v25 = vsel %vm15535_vm4, %v1351_v1, %v1355_v46  ;;  %v1379_v49 = vrot.slane %v1377_v47, 4  ;;  %v1385_v50 = vrot.slane %v1383_v52, 5  ;;  %v4005_v14 = vrot.slane %v4003_v28, 4  ;;  %v15242_v1 = vld [vmem:[%s15521_s5 + $0x60] sm:$0x1] }
  0xc1   : > { %v1366_v12 = vsel %vm15535_vm4, %v1361_v54, %v1365_v57  ;;  %v4004_v58 = vsel %vm15939_vm7, %v4002_v17, %v4003_v28  ;;  %v1370_v36 = vor.u32 %v1369_v51, %v1365_v57  ;;  %v4006_v35 = vrot.slane %v15241_v40, 5  ;;  %v435_v47 = vld [vmem:[%s15521_s5 + $0x198] sm:$0xf] }
  0xc2   : > { %v16096_v0 = vcombine.low %v1356_v25, %v1366_v12  ;;  %v16098_v44 = vcombine.low %v4001_v41, %v4004_v58  ;;  %v1380_v46 = vor.u32 %v1379_v49, %v1375_v22  ;;  %v4009_v48 = vrot.slane %v15242_v1, 5 }
  0xc3   : > { %v1371_v18 = vrot.slane %v1370_v36, 4  ;;  %v1388_v52 = vshrl.u32 %v433_v3, 16  ;;  %v1391_v54 = vshll.u32 %v433_v3, 16  ;;  %v4007_v57 = vsel %vm15939_vm7, %v4005_v14, %v4006_v35 }
  0xc4   : > { %19114 = vst [vmem:[#allocation45_spill] sm:$0xff] %v16096_v0  ;;  %19115 = vst [vmem:[#allocation46_spill] sm:$0xff] %v16098_v44  ;;  %13002 = vmatprep.mubr.msk.bf16.mxu1 %vm2109_vm3, %v16096_v0  ;;  %13588 = vmatprep.mubr.msk.bf16.mxu0 %vm2109_vm3, %v16098_v44  ;;  %v1381_v28 = vrot.slane %v1380_v46, 4  ;;  %v4008_v41 = vrot.slane %v4006_v35, 4  ;;  %v1397_v17 = vshll.u32 %v434_v15, 16  ;;  %v1401_v3 = vshrl.u32 %v434_v15, 16 }
  0xc5   : > { %v1376_v51 = vsel %vm15535_vm4, %v1371_v18, %v1375_v22  ;;  %v1390_v25 = vrot.slane %v1388_v52, 4  ;;  %v1393_v49 = vrot.slane %v1391_v54, 5  ;;  %v1407_v14 = vshll.u32 %v435_v47, 16  ;;  %v436_v46 = vld [vmem:[%s15521_s5 + $0x19c] sm:$0xf] }
  0xc6   : > { %v1386_v12 = vsel %vm15535_vm4, %v1381_v28, %v1385_v50  ;;  %v4010_v58 = vsel %vm15939_vm7, %v4008_v41, %v4009_v48  ;;  %v1399_v36 = vrot.slane %v1397_v17, 5  ;;  %v1403_v22 = vrot.slane %v1401_v3, 4  ;;  %v437_v18 = vld [vmem:[%s15521_s5 + $0x1a0] sm:$0x1]  ;;  %v15243_v54 = vld [vmem:[%s15521_s5 + $0x64] sm:$0xf] }
  0xc7   : > { %v16116_v40 = vcombine.low %v1376_v51, %v1386_v12  ;;  %v16118_v35 = vcombine.low %v4007_v57, %v4010_v58  ;;  %v1394_v1 = vor.u32 %v1393_v49, %v1390_v25  ;;  %v1409_v52 = vrot.slane %v1407_v14, 5  ;;  %v15244_v0 = vld [vmem:[%s15521_s5 + $0x68] sm:$0xf]  ;;  %v438_v58 = vld [vmem:[%s15521_s5 + $0x1a4] sm:$0xf] }
  0xc8   : > { %v11136_v15 = vrot.slane %v15243_v54, 9  ;;  %v4013_v13 = vrot.slane %v15244_v0, 5  ;;  %v4016_v50 = vrot.slane %v15245_v42, 5  ;;  %v1404_v28 = vor.u32 %v1403_v22, %v1399_v36  ;;  %v15246_v54 = vld [vmem:[%s15521_s5 + $0x70] sm:$0xf] }
  0xc9   : > { %19116 = vst [vmem:[#allocation47_spill] sm:$0xff] %v16116_v40  ;;  %19117 = vst [vmem:[#allocation48_spill] sm:$0xff] %v16118_v35  ;;  %13003 = vmatmul.mubr.msk.bf16.gmra.mrb[76].mxu1 %vm2109_vm3, %v16116_v40  ;;  %13589 = vmatmul.mubr.msk.bf16.gmra.mrb[12].mxu0 %vm2109_vm3, %v16118_v35  ;;  %v1395_v48 = vrot.slane %v1394_v1, 4  ;;  %v1411_v57 = vshrl.u32 %v435_v47, 16  ;;  %v1417_v41 = vshll.u32 %v436_v46, 16  ;;  %v1421_v25 = vshrl.u32 %v436_v46, 16 }
  0xca   : > { %v4014_v17 = vsel %vm15939_vm7, %v11136_v15, %v4013_v13  ;;  %v4015_v51 = vrot.slane %v4013_v13, 4  ;;  %v1427_v0 = vshll.u32 %v437_v18, 16  ;;  %v1405_v49 = vrot.slane %v1404_v28, 4  ;;  %v439_v15 = vld [vmem:[%s15521_s5 + $0x1a8] sm:$0xf] }
  0xcb   : > { %v1400_v42 = vsel %vm15535_vm4, %v1395_v48, %v1399_v36  ;;  %v1413_v3 = vrot.slane %v1411_v57, 4  ;;  %v1419_v12 = vrot.slane %v1417_v41, 5  ;;  %v1423_v14 = vrot.slane %v1421_v25, 4  ;;  %v15247_v57 = vld [vmem:[%s15521_s5 + $0x74] sm:$0x1] }
  0xcc   : > { %v4017_v47 = vsel %vm15939_vm7, %v4015_v51, %v4016_v50  ;;  %v1429_v1 = vrot.slane %v1427_v0, 5  ;;  %v4018_v22 = vrot.slane %v4016_v50, 4  ;;  %v1410_v13 = vsel %vm15535_vm4, %v1405_v49, %v1409_v52  ;;  %v440_v40 = vld [vmem:[%s15521_s5 + $0x1ac] sm:$0xf] }
  0xcd   : > { %v16137_v46 = vcombine.low %v4014_v17, %v4017_v47  ;;  %v1414_v18 = vor.u32 %v1413_v3, %v1409_v52  ;;  %v4019_v36 = vrot.slane %v15246_v54, 5  ;;  %v16141_v48 = vcombine.low %v1400_v42, %v1410_v13  ;;  %v441_v54 = vld [vmem:[%s15521_s5 + $0x1b0] sm:$0xf] }
  0xce   : > { %v1424_v28 = vor.u32 %v1423_v14, %v1419_v12  ;;  %v4022_v41 = vrot.slane %v15247_v57, 5  ;;  %v1432_v33 = vshrl.u32 %v438_v58, 16  ;;  %v1435_v52 = vshll.u32 %v438_v58, 16  ;;  %v15248_v57 = vld [vmem:[%s15521_s5 + $0x78] sm:$0xf] }
  0xcf   : > { %19118 = vst [vmem:[#allocation49_spill] sm:$0xff] %v16137_v46  ;;  %19119 = vst [vmem:[#allocation50_spill] sm:$0xff] %v16141_v48  ;;  %13592 = vmatprep.mubr.msk.bf16.mxu0 %vm2109_vm3, %v16137_v46  ;;  %v1415_v50 = vrot.slane %v1414_v18, 4  ;;  %v4020_v51 = vsel %vm15939_vm7, %v4018_v22, %v4019_v36  ;;  %v4021_v17 = vrot.slane %v4019_v36, 4  ;;  %13006 = vmatprep.mubr.msk.bf16.mxu1 %vm2109_vm3, %v16141_v48  ;;  %v1441_v42 = vshll.u32 %v439_v15, 16 }
  0xd0   : > { %v1425_v25 = vrot.slane %v1424_v28, 4  ;;  %v1434_v0 = vrot.slane %v1432_v33, 4  ;;  %v1445_v49 = vshrl.u32 %v439_v15, 16  ;;  %v1437_v14 = vrot.slane %v1435_v52, 5  ;;  %v442_v36 = vld [vmem:[%s15521_s5 + $0x1b4] sm:$0x1] }
  0xd1   : > { %v1420_v3 = vsel %vm15535_vm4, %v1415_v50, %v1419_v12  ;;  %v4023_v47 = vsel %vm15939_vm7, %v4021_v17, %v4022_v41  ;;  %v1451_v22 = vshll.u32 %v440_v40, 16  ;;  %v1443_v18 = vrot.slane %v1441_v42, 5  ;;  %v15249_v17 = vld [vmem:[%s15521_s5 + $0x7c] sm:$0xf]  ;;  %v15250_v48 = vld [vmem:[%s15521_s5 + $0x80] sm:$0xf] }
  0xd2   : > { %v1430_v58 = vsel %vm15535_vm4, %v1425_v25, %v1429_v1  ;;  %v16157_v13 = vcombine.low %v4020_v51, %v4023_v47  ;;  %v1447_v33 = vrot.slane %v1445_v49, 4  ;;  %v1438_v28 = vor.u32 %v1437_v14, %v1434_v0  ;;  %v11163_v25 = vld [vmem:[%s18749_s2 + $0x4] sm:$0x3] }
  0xd3   : > { %v16161_v15 = vcombine.low %v1420_v3, %v1430_v58  ;;  %v1453_v12 = vrot.slane %v1451_v22, 5  ;;  %v11137_v50 = vrot.slane %v15248_v57, 9  ;;  %v4026_v52 = vrot.slane %v15249_v17, 5  ;;  %15122 = vmatprep.subr.msk.bf16.mxu1 %vm2302_vm0, %v11163_v25  ;;  %v444_v17 = vld [vmem:[%s15521_s5 + $0x1bc] sm:$0xf] }
  0xd4   : > { %19120 = vst [vmem:[#allocation51_spill] sm:$0xff] %v16157_v13  ;;  %13593 = vmatmul.mubr.msk.bf16.gmra.mrb[16].mxu0 %vm2109_vm3, %v16157_v13  ;;  %v1448_v41 = vor.u32 %v1447_v33, %v1443_v18  ;;  %v4029_v1 = vrot.slane %v15250_v48, 5  ;;  %v1455_v51 = vshrl.u32 %v440_v40, 16  ;;  %v1439_v0 = vrot.slane %v1438_v28, 4  ;;  %v15251_v25 = vld [vmem:[%s15521_s5 + $0x84] sm:$0xf] }
  0xd5   : > { %19121 = vst [vmem:[#allocation52_spill] sm:$0xff] %v16161_v15  ;;  %13007 = vmatmul.mubr.msk.bf16.gmra.mrb[80].mxu1 %vm2109_vm3, %v16161_v15  ;;  %v1461_v42 = vshll.u32 %v441_v54, 16  ;;  %v1465_v49 = vshrl.u32 %v441_v54, 16  ;;  %v1471_v3 = vshll.u32 %v442_v36, 16  ;;  %v4027_v48 = vsel %vm15939_vm7, %v11137_v50, %v4026_v52  ;;  %v443_v54 = vld [vmem:[%s15521_s5 + $0x1b8] sm:$0xf] }
  0xd6   : > { %v1449_v47 = vrot.slane %v1448_v41, 4  ;;  %v4028_v40 = vrot.slane %v4026_v52, 4  ;;  %v1457_v14 = vrot.slane %v1455_v51, 4  ;;  %v1444_v22 = vsel %vm15535_vm4, %v1439_v0, %v1443_v18  ;;  %v445_v15 = vld [vmem:[%s15521_s5 + $0x1c0] sm:$0xf] }
  0xd7   : > { %v1463_v58 = vrot.slane %v1461_v42, 5  ;;  %v1467_v33 = vrot.slane %v1465_v49, 4  ;;  %v1473_v28 = vrot.slane %v1471_v3, 5  ;;  %v4031_v50 = vrot.slane %v4029_v1, 4  ;;  %v15252_v49 = vld [vmem:[%s15521_s5 + $0x88] sm:$0x1] }
  0xd8   : > { %v1454_v36 = vsel %vm15535_vm4, %v1449_v47, %v1453_v12  ;;  %v4030_v57 = vsel %vm15939_vm7, %v4028_v40, %v4029_v1  ;;  %v1458_v41 = vor.u32 %v1457_v14, %v1453_v12  ;;  %v4032_v0 = vrot.slane %v15251_v25, 5  ;;  %v16679_v13 = vld [vmem:[%s15521_s5 + $0x26c] sm:$0xf] }
  0xd9   : > { %v16184_v52 = vcombine.low %v1444_v22, %v1454_v36  ;;  %v16186_v51 = vcombine.low %v4027_v48, %v4030_v57  ;;  %v1468_v18 = vor.u32 %v1467_v33, %v1463_v58  ;;  %v4035_v3 = vrot.slane %v15252_v49, 5 }
  0xda   : > { %v1459_v42 = vrot.slane %v1458_v41, 4  ;;  %v1476_v11 = vshrl.u32 %v443_v54, 16  ;;  %v1479_v47 = vshll.u32 %v443_v54, 16  ;;  %v4033_v1 = vsel %vm15939_vm7, %v4031_v50, %v4032_v0 }
  0xdb   : > { %19122 = vst [vmem:[#allocation53_spill] sm:$0xff] %v16184_v52  ;;  %19123 = vst [vmem:[#allocation54_spill] sm:$0xff] %v16186_v51  ;;  %13010 = vmatprep.mubr.msk.bf16.mxu1 %vm2109_vm3, %v16184_v52  ;;  %13596 = vmatprep.mubr.msk.bf16.mxu0 %vm2109_vm3, %v16186_v51  ;;  %v1469_v12 = vrot.slane %v1468_v18, 4  ;;  %v4034_v48 = vrot.slane %v4032_v0, 4  ;;  %v1485_v40 = vshll.u32 %v444_v17, 16  ;;  %v1489_v54 = vshrl.u32 %v444_v17, 16 }
  0xdc   : > { %v1464_v14 = vsel %vm15535_vm4, %v1459_v42, %v1463_v58  ;;  %v1478_v22 = vrot.slane %v1476_v11, 4  ;;  %v1481_v33 = vrot.slane %v1479_v47, 5  ;;  %v1495_v50 = vshll.u32 %v445_v15, 16  ;;  %v446_v18 = vld [vmem:[%s15521_s5 + $0x1c4] sm:$0xf] }
  0xdd   : > { %v1474_v36 = vsel %vm15535_vm4, %v1469_v12, %v1473_v28  ;;  %v4036_v57 = vsel %vm15939_vm7, %v4034_v48, %v4035_v3  ;;  %v1487_v41 = vrot.slane %v1485_v40, 5  ;;  %v1491_v58 = vrot.slane %v1489_v54, 4  ;;  %v447_v11 = vld [vmem:[%s15521_s5 + $0x1c8] sm:$0x1]  ;;  %v15253_v47 = vld [vmem:[%s15521_s5 + $0x8c] sm:$0xf] }
  0xde   : > { %v16204_v25 = vcombine.low %v1464_v14, %v1474_v36  ;;  %v16206_v0 = vcombine.low %v4033_v1, %v4036_v57  ;;  %v1482_v49 = vor.u32 %v1481_v33, %v1478_v22  ;;  %v1497_v42 = vrot.slane %v1495_v50, 5  ;;  %v15254_v52 = vld [vmem:[%s15521_s5 + $0x90] sm:$0xf]  ;;  %v448_v57 = vld [vmem:[%s15521_s5 + $0x1cc] sm:$0xf] }
  0xdf   : > { %v11138_v17 = vrot.slane %v15253_v47, 9  ;;  %v4039_v37 = vrot.slane %v15254_v52, 5  ;;  %v4042_v28 = vrot.slane %v15255_v55, 5  ;;  %v1492_v12 = vor.u32 %v1491_v58, %v1487_v41  ;;  %v15256_v47 = vld [vmem:[%s15521_s5 + $0x98] sm:$0xf] }
  0xe0   : > { %19124 = vst [vmem:[#allocation55_spill] sm:$0xff] %v16204_v25  ;;  %19125 = vst [vmem:[#allocation56_spill] sm:$0xff] %v16206_v0  ;;  %13011 = vmatmul.mubr.msk.bf16.gmra.mrb[84].mxu1 %vm2109_vm3, %v16204_v25  ;;  %13597 = vmatmul.mubr.msk.bf16.gmra.mrb[20].mxu0 %vm2109_vm3, %v16206_v0  ;;  %v1483_v3 = vrot.slane %v1482_v49, 4  ;;  %v1499_v1 = vshrl.u32 %v445_v15, 16  ;;  %v1505_v48 = vshll.u32 %v446_v18, 16  ;;  %v1509_v22 = vshrl.u32 %v446_v18, 16 }
  0xe1   : > { %v4040_v40 = vsel %vm15939_vm7, %v11138_v17, %v4039_v37  ;;  %v4041_v14 = vrot.slane %v4039_v37, 4  ;;  %v1515_v52 = vshll.u32 %v447_v11, 16  ;;  %v1493_v33 = vrot.slane %v1492_v12, 4  ;;  %v449_v17 = vld [vmem:[%s15521_s5 + $0x1d0] sm:$0xf] }
  0xe2   : > { %v1488_v55 = vsel %vm15535_vm4, %v1483_v3, %v1487_v41  ;;  %v1501_v54 = vrot.slane %v1499_v1, 4  ;;  %v1507_v36 = vrot.slane %v1505_v48, 5  ;;  %v1511_v50 = vrot.slane %v1509_v22, 4  ;;  %v15257_v1 = vld [vmem:[%s15521_s5 + $0x9c] sm:$0x1] }
  0xe3   : > { %v4043_v15 = vsel %vm15939_vm7, %v4041_v14, %v4042_v28  ;;  %v1517_v49 = vrot.slane %v1515_v52, 5  ;;  %v4044_v58 = vrot.slane %v4042_v28, 4  ;;  %v1498_v37 = vsel %vm15535_vm4, %v1493_v33, %v1497_v42  ;;  %v450_v25 = vld [vmem:[%s15521_s5 + $0x1d4] sm:$0xf]  ;;  %v16655_v51 = vld [vmem:[%s15521_s5 + $0x12c] sm:$0xf] }
  0xe4   : > { %v16225_v18 = vcombine.low %v4040_v40, %v4043_v15  ;;  %v1502_v11 = vor.u32 %v1501_v54, %v1497_v42  ;;  %v4045_v41 = vrot.slane %v15256_v47, 5  ;;  %v16229_v3 = vcombine.low %v1488_v55, %v1498_v37  ;;  %v451_v47 = vld [vmem:[%s15521_s5 + $0x1d8] sm:$0xf] }
  0xe5   : > { %v1512_v12 = vor.u32 %v1511_v50, %v1507_v36  ;;  %v4048_v48 = vrot.slane %v15257_v1, 5  ;;  %v1520_v26 = vshrl.u32 %v448_v57, 16  ;;  %v1523_v42 = vshll.u32 %v448_v57, 16  ;;  %v15258_v1 = vld [vmem:[%s15521_s5 + $0xa0] sm:$0xf] }
  0xe6   : > { %19126 = vst [vmem:[#allocation57_spill] sm:$0xff] %v16225_v18  ;;  %19127 = vst [vmem:[#allocation58_spill] sm:$0xff] %v16229_v3  ;;  %13600 = vmatprep.mubr.msk.bf16.mxu0 %vm2109_vm3, %v16225_v18  ;;  %v1503_v28 = vrot.slane %v1502_v11, 4  ;;  %v4046_v14 = vsel %vm15939_vm7, %v4044_v58, %v4045_v41  ;;  %v4047_v40 = vrot.slane %v4045_v41, 4  ;;  %13014 = vmatprep.mubr.msk.bf16.mxu1 %vm2109_vm3, %v16229_v3  ;;  %v1529_v55 = vshll.u32 %v449_v17, 16 }
  0xe7   : > { %v1513_v22 = vrot.slane %v1512_v12, 4  ;;  %v1522_v52 = vrot.slane %v1520_v26, 4  ;;  %v1533_v33 = vshrl.u32 %v449_v17, 16  ;;  %v1525_v50 = vrot.slane %v1523_v42, 5  ;;  %v452_v41 = vld [vmem:[%s15521_s5 + $0x1dc] sm:$0x1] }
  0xe8   : > { %v1508_v54 = vsel %vm15535_vm4, %v1503_v28, %v1507_v36  ;;  %v4049_v15 = vsel %vm15939_vm7, %v4047_v40, %v4048_v48  ;;  %v1539_v58 = vshll.u32 %v450_v25, 16  ;;  %v1531_v11 = vrot.slane %v1529_v55, 5  ;;  %v15259_v40 = vld [vmem:[%s15521_s5 + $0xa4] sm:$0xf]  ;;  %v15260_v3 = vld [vmem:[%s15521_s5 + $0xa8] sm:$0xf] }
  0xe9   : > { %v1518_v57 = vsel %vm15535_vm4, %v1513_v22, %v1517_v49  ;;  %v16245_v37 = vcombine.low %v4046_v14, %v4049_v15  ;;  %v1535_v26 = vrot.slane %v1533_v33, 4  ;;  %v1526_v12 = vor.u32 %v1525_v50, %v1522_v52 }
  0xea   : > { %v16249_v17 = vcombine.low %v1508_v54, %v1518_v57  ;;  %v1541_v36 = vrot.slane %v1539_v58, 5  ;;  %v11139_v28 = vrot.slane %v15258_v1, 9  ;;  %v4052_v42 = vrot.slane %v15259_v40, 5 }
  0xeb   : > { %19128 = vst [vmem:[#allocation59_spill] sm:$0xff] %v16245_v37  ;;  %13601 = vmatmul.mubr.msk.bf16.gmra.mrb[24].mxu0 %vm2109_vm3, %v16245_v37  ;;  %v1536_v48 = vor.u32 %v1535_v26, %v1531_v11  ;;  %v4055_v49 = vrot.slane %v15260_v3, 5  ;;  %v1543_v14 = vshrl.u32 %v450_v25, 16  ;;  %v1527_v22 = vrot.slane %v1526_v12, 4  ;;  %v453_v12 = vld [vmem:[%s15521_s5 + $0x1e0] sm:$0xf] }
  0xec   : > { %19129 = vst [vmem:[#allocation60_spill] sm:$0xff] %v16249_v17  ;;  %13015 = vmatmul.mubr.msk.bf16.gmra.mrb[88].mxu1 %vm2109_vm3, %v16249_v17  ;;  %v1549_v55 = vshll.u32 %v451_v47, 16  ;;  %v1553_v52 = vshrl.u32 %v451_v47, 16  ;;  %v1559_v33 = vshll.u32 %v452_v41, 16  ;;  %v4053_v15 = vsel %vm15939_vm7, %v11139_v28, %v4052_v42  ;;  %v455_v17 = vld [vmem:[%s15521_s5 + $0x1e8] sm:$0xf] }
  0xed   : > { %v1537_v54 = vrot.slane %v1536_v48, 4  ;;  %v4054_v50 = vrot.slane %v4052_v42, 4  ;;  %v1545_v58 = vrot.slane %v1543_v14, 4  ;;  %v1532_v57 = vsel %vm15535_vm4, %v1527_v22, %v1531_v11  ;;  %v454_v48 = vld [vmem:[%s15521_s5 + $0x1e4] sm:$0xf] }
  0xee   : > { %v1551_v25 = vrot.slane %v1549_v55, 5  ;;  %v1555_v3 = vrot.slane %v1553_v52, 4  ;;  %v1561_v26 = vrot.slane %v1559_v33, 5  ;;  %v4057_v28 = vrot.slane %v4055_v49, 4  ;;  %v15261_v14 = vld [vmem:[%s15521_s5 + $0xac] sm:$0xf] }
  0xef   : > { %v1542_v47 = vsel %vm15535_vm4, %v1537_v54, %v1541_v36  ;;  %v4056_v41 = vsel %vm15939_vm7, %v4054_v50, %v4055_v49  ;;  %v1546_v1 = vor.u32 %v1545_v58, %v1541_v36  ;;  %v4058_v22 = vrot.slane %v15261_v14, 5  ;;  %v15262_v52 = vld [vmem:[%s15521_s5 + $0xb0] sm:$0x1]  ;;  %v15292_v37 = vld [vmem:[%s15521_s5 + $0x128] sm:$0x1] }
  0xf0   : > { %v16268_v40 = vcombine.low %v1532_v57, %v1542_v47  ;;  %v16270_v42 = vcombine.low %v4053_v15, %v4056_v41  ;;  %v1556_v11 = vor.u32 %v1555_v3, %v1551_v25  ;;  %v4061_v33 = vrot.slane %v15262_v52, 5 }
  0xf1   : > { %v1547_v55 = vrot.slane %v1546_v1, 4  ;;  %v1564_v61 = vshrl.u32 %v453_v12, 16  ;;  %v1567_v54 = vshll.u32 %v453_v12, 16  ;;  %v4059_v49 = vsel %vm15939_vm7, %v4057_v28, %v4058_v22 }
  0xf2   : > { %19130 = vst [vmem:[#allocation61_spill] sm:$0xff] %v16268_v40  ;;  %19131 = vst [vmem:[#allocation62_spill] sm:$0xff] %v16270_v42  ;;  %13018 = vmatprep.mubr.msk.bf16.mxu1 %vm2109_vm3, %v16268_v40  ;;  %13604 = vmatprep.mubr.msk.bf16.mxu0 %vm2109_vm3, %v16270_v42  ;;  %v1557_v36 = vrot.slane %v1556_v11, 4  ;;  %v4060_v15 = vrot.slane %v4058_v22, 4  ;;  %v1573_v50 = vshll.u32 %v454_v48, 16  ;;  %v1577_v12 = vshrl.u32 %v454_v48, 16 }
  0xf3   : > { %v1552_v58 = vsel %vm15535_vm4, %v1547_v55, %v1551_v25  ;;  %v1566_v57 = vrot.slane %v1564_v61, 4  ;;  %v1569_v3 = vrot.slane %v1567_v54, 5  ;;  %v1583_v28 = vshll.u32 %v455_v17, 16  ;;  %v456_v11 = vld [vmem:[%s15521_s5 + $0x1ec] sm:$0xf] }
  0xf4   : > { %v1562_v47 = vsel %vm15535_vm4, %v1557_v36, %v1561_v26  ;;  %v4062_v41 = vsel %vm15939_vm7, %v4060_v15, %v4061_v33  ;;  %v1575_v1 = vrot.slane %v1573_v50, 5  ;;  %v1579_v25 = vrot.slane %v1577_v12, 4  ;;  %v457_v61 = vld [vmem:[%s15521_s5 + $0x1f0] sm:$0x1]  ;;  %v15263_v54 = vld [vmem:[%s15521_s5 + $0xb4] sm:$0xf] }
  0xf5   : > { %v16288_v14 = vcombine.low %v1552_v58, %v1562_v47  ;;  %v16290_v22 = vcombine.low %v4059_v49, %v4062_v41  ;;  %v1570_v52 = vor.u32 %v1569_v3, %v1566_v57  ;;  %v1585_v55 = vrot.slane %v1583_v28, 5  ;;  %v15264_v40 = vld [vmem:[%s15521_s5 + $0xb8] sm:$0xf]  ;;  %v458_v41 = vld [vmem:[%s15521_s5 + $0x1f4] sm:$0xf] }
  0xf6   : > { %v11140_v48 = vrot.slane %v15263_v54, 9  ;;  %v4065_v23 = vrot.slane %v15264_v40, 5  ;;  %v4068_v26 = vrot.slane %v15265_v60, 5  ;;  %v1580_v36 = vor.u32 %v1579_v25, %v1575_v1  ;;  %v15266_v54 = vld [vmem:[%s15521_s5 + $0xc0] sm:$0xf] }
  0xf7   : > { %19132 = vst [vmem:[#allocation63_spill] sm:$0xff] %v16288_v14  ;;  %19133 = vst [vmem:[#allocation64_spill] sm:$0xff] %v16290_v22  ;;  %13019 = vmatmul.mubr.msk.bf16.gmra.mrb[92].mxu1 %vm2109_vm3, %v16288_v14  ;;  %13605 = vmatmul.mubr.msk.bf16.gmra.mrb[28].mxu0 %vm2109_vm3, %v16290_v22  ;;  %v1571_v33 = vrot.slane %v1570_v52, 4  ;;  %v1587_v49 = vshrl.u32 %v455_v17, 16  ;;  %v1593_v15 = vshll.u32 %v456_v11, 16  ;;  %v1597_v57 = vshrl.u32 %v456_v11, 16 }
  0xf8   : > { %v4066_v50 = vsel %vm15939_vm7, %v11140_v48, %v4065_v23  ;;  %v4067_v58 = vrot.slane %v4065_v23, 4  ;;  %v1603_v40 = vshll.u32 %v457_v61, 16  ;;  %v1581_v3 = vrot.slane %v1580_v36, 4  ;;  %v459_v48 = vld [vmem:[%s15521_s5 + $0x1f8] sm:$0xf] }
  0xf9   : > { %v1576_v60 = vsel %vm15535_vm4, %v1571_v33, %v1575_v1  ;;  %v1589_v12 = vrot.slane %v1587_v49, 4  ;;  %v1595_v47 = vrot.slane %v1593_v15, 5  ;;  %v1599_v28 = vrot.slane %v1597_v57, 4  ;;  %v15267_v49 = vld [vmem:[%s15521_s5 + $0xc4] sm:$0x1] }
  0xfa   : > { %v4069_v17 = vsel %vm15939_vm7, %v4067_v58, %v4068_v26  ;;  %v1605_v52 = vrot.slane %v1603_v40, 5  ;;  %v4070_v25 = vrot.slane %v4068_v26, 4  ;;  %v1586_v23 = vsel %vm15535_vm4, %v1581_v3, %v1585_v55  ;;  %v460_v14 = vld [vmem:[%s15521_s5 + $0x1fc] sm:$0xf] }
  0xfb   : > { %v16309_v11 = vcombine.low %v4066_v50, %v4069_v17  ;;  %v1590_v61 = vor.u32 %v1589_v12, %v1585_v55  ;;  %v4071_v1 = vrot.slane %v15266_v54, 5  ;;  %v16313_v33 = vcombine.low %v1576_v60, %v1586_v23  ;;  %v461_v54 = vld [vmem:[%s15521_s5 + $0x200] sm:$0xf] }
  0xfc   : > { %v1600_v36 = vor.u32 %v1599_v28, %v1595_v47  ;;  %v4074_v15 = vrot.slane %v15267_v49, 5  ;;  %v1608_v31 = vshrl.u32 %v458_v41, 16  ;;  %v1611_v55 = vshll.u32 %v458_v41, 16  ;;  %v15268_v49 = vld [vmem:[%s15521_s5 + $0xc8] sm:$0xf] }
  0xfd   : > { %19134 = vst [vmem:[#allocation65_spill] sm:$0xff] %v16309_v11  ;;  %19135 = vst [vmem:[#allocation66_spill] sm:$0xff] %v16313_v33  ;;  %13608 = vmatprep.mubr.msk.bf16.mxu0 %vm2109_vm3, %v16309_v11  ;;  %v1591_v26 = vrot.slane %v1590_v61, 4  ;;  %v4072_v58 = vsel %vm15939_vm7, %v4070_v25, %v4071_v1  ;;  %v4073_v50 = vrot.slane %v4071_v1, 4  ;;  %13022 = vmatprep.mubr.msk.bf16.mxu1 %vm2109_vm3, %v16313_v33  ;;  %v1617_v60 = vshll.u32 %v459_v48, 16 }
  0xfe   : > { %v1601_v57 = vrot.slane %v1600_v36, 4  ;;  %v1610_v40 = vrot.slane %v1608_v31, 4  ;;  %v1621_v3 = vshrl.u32 %v459_v48, 16  ;;  %v1613_v28 = vrot.slane %v1611_v55, 5  ;;  %v462_v1 = vld [vmem:[%s15521_s5 + $0x204] sm:$0x1] }
  0xff   : > { %v1596_v12 = vsel %vm15535_vm4, %v1591_v26, %v1595_v47  ;;  %v4075_v17 = vsel %vm15939_vm7, %v4073_v50, %v4074_v15  ;;  %v1627_v25 = vshll.u32 %v460_v14, 16  ;;  %v1619_v61 = vrot.slane %v1617_v60, 5  ;;  %v15269_v50 = vld [vmem:[%s15521_s5 + $0xcc] sm:$0xf]  ;;  %v15270_v33 = vld [vmem:[%s15521_s5 + $0xd0] sm:$0xf] }
 0x100   : > { %v1606_v41 = vsel %vm15535_vm4, %v1601_v57, %v1605_v52  ;;  %v16329_v23 = vcombine.low %v4072_v58, %v4075_v17  ;;  %v1623_v31 = vrot.slane %v1621_v3, 4  ;;  %v1614_v36 = vor.u32 %v1613_v28, %v1610_v40  ;;  %v16606_v11 = vld [vmem:[%s15521_s5 + $0x258] sm:$0xf] }
 0x101   : > { %v16333_v48 = vcombine.low %v1596_v12, %v1606_v41  ;;  %v1629_v47 = vrot.slane %v1627_v25, 5  ;;  %v11141_v26 = vrot.slane %v15268_v49, 9  ;;  %v4078_v55 = vrot.slane %v15269_v50, 5 }
 0x102   : > { %19136 = vst [vmem:[#allocation67_spill] sm:$0xff] %v16329_v23  ;;  %13609 = vmatmul.mubr.msk.bf16.gmra.mrb[32].mxu0 %vm2109_vm3, %v16329_v23  ;;  %v1624_v15 = vor.u32 %v1623_v31, %v1619_v61  ;;  %v4081_v52 = vrot.slane %v15270_v33, 5  ;;  %v1631_v58 = vshrl.u32 %v460_v14, 16  ;;  %v1615_v57 = vrot.slane %v1614_v36, 4  ;;  %v463_v36 = vld [vmem:[%s15521_s5 + $0x208] sm:$0xf] }
 0x103   : > { %19137 = vst [vmem:[#allocation68_spill] sm:$0xff] %v16333_v48  ;;  %13023 = vmatmul.mubr.msk.bf16.gmra.mrb[96].mxu1 %vm2109_vm3, %v16333_v48  ;;  %v1637_v60 = vshll.u32 %v461_v54, 16  ;;  %v1641_v40 = vshrl.u32 %v461_v54, 16  ;;  %v1647_v3 = vshll.u32 %v462_v1, 16  ;;  %v4079_v17 = vsel %vm15939_vm7, %v11141_v26, %v4078_v55  ;;  %v465_v48 = vld [vmem:[%s15521_s5 + $0x210] sm:$0xf] }
 0x104   : > { %v1625_v12 = vrot.slane %v1624_v15, 4  ;;  %v4080_v28 = vrot.slane %v4078_v55, 4  ;;  %v1633_v25 = vrot.slane %v1631_v58, 4  ;;  %v1620_v41 = vsel %vm15535_vm4, %v1615_v57, %v1619_v61  ;;  %v464_v15 = vld [vmem:[%s15521_s5 + $0x20c] sm:$0xf] }
 0x105   : > { %v1639_v14 = vrot.slane %v1637_v60, 5  ;;  %v1643_v33 = vrot.slane %v1641_v40, 4  ;;  %v1649_v31 = vrot.slane %v1647_v3, 5  ;;  %v4083_v26 = vrot.slane %v4081_v52, 4  ;;  %v15271_v58 = vld [vmem:[%s15521_s5 + $0xd4] sm:$0xf] }
 0x106   : > { %v1630_v54 = vsel %vm15535_vm4, %v1625_v12, %v1629_v47  ;;  %v4082_v1 = vsel %vm15939_vm7, %v4080_v28, %v4081_v52  ;;  %v1634_v49 = vor.u32 %v1633_v25, %v1629_v47  ;;  %v4084_v57 = vrot.slane %v15271_v58, 5  ;;  %v15272_v40 = vld [vmem:[%s15521_s5 + $0xd8] sm:$0x1] }
 0x107   : > { %v16352_v50 = vcombine.low %v1620_v41, %v1630_v54  ;;  %v16354_v55 = vcombine.low %v4079_v17, %v4082_v1  ;;  %v1644_v61 = vor.u32 %v1643_v33, %v1639_v14  ;;  %v4087_v3 = vrot.slane %v15272_v40, 5 }
 0x108   : > { %v1635_v60 = vrot.slane %v1634_v49, 4  ;;  %v1652_v63 = vshrl.u32 %v463_v36, 16  ;;  %v1655_v12 = vshll.u32 %v463_v36, 16  ;;  %v4085_v52 = vsel %vm15939_vm7, %v4083_v26, %v4084_v57 }
 0x109   : > { %19138 = vst [vmem:[#allocation69_spill] sm:$0xff] %v16352_v50  ;;  %19139 = vst [vmem:[#allocation70_spill] sm:$0xff] %v16354_v55  ;;  %13026 = vmatprep.mubr.msk.bf16.mxu1 %vm2109_vm3, %v16352_v50  ;;  %13612 = vmatprep.mubr.msk.bf16.mxu0 %vm2109_vm3, %v16354_v55  ;;  %v1645_v47 = vrot.slane %v1644_v61, 4  ;;  %v4086_v17 = vrot.slane %v4084_v57, 4  ;;  %v1661_v28 = vshll.u32 %v464_v15, 16  ;;  %v1665_v36 = vshrl.u32 %v464_v15, 16 }
 0x10a   : > { %v1640_v25 = vsel %vm15535_vm4, %v1635_v60, %v1639_v14  ;;  %v1654_v41 = vrot.slane %v1652_v63, 4  ;;  %v1657_v33 = vrot.slane %v1655_v12, 5  ;;  %v1671_v26 = vshll.u32 %v465_v48, 16  ;;  %v16372_v61 = vld [vmem:[%s15521_s5 + $0x214] sm:$0xf]  ;;  %v19368_v6 = vld [vmem:[#allocation67_spill] sm:$0xff] }
 0x10b   : > { %v1650_v54 = vsel %vm15535_vm4, %v1645_v47, %v1649_v31  ;;  %v4088_v1 = vsel %vm15939_vm7, %v4086_v17, %v4087_v3  ;;  %v1663_v49 = vrot.slane %v1661_v28, 5  ;;  %v1667_v63 = vrot.slane %v1665_v36, 4  ;;  %v467_v60 = vld [vmem:[%s15521_s5 + $0x218] sm:$0x1]  ;;  %v15273_v15 = vld [vmem:[%s15521_s5 + $0xdc] sm:$0xf] }
 0x10c   : > { %v16374_v58 = vcombine.low %v1640_v25, %v1650_v54  ;;  %v16376_v57 = vcombine.low %v4085_v52, %v4088_v1  ;;  %v1658_v14 = vor.u32 %v1657_v33, %v1654_v41  ;;  %v1673_v40 = vrot.slane %v1671_v26, 5  ;;  %v15274_v50 = vld [vmem:[%s15521_s5 + $0xe0] sm:$0xf]  ;;  %v15275_v31 = vld [vmem:[%s15521_s5 + $0xe4] sm:$0xf] }
 0x10d   : > { %v11142_v12 = vrot.slane %v15273_v15, 9  ;;  %v4091_v21 = vrot.slane %v15274_v50, 5  ;;  %v4094_v47 = vrot.slane %v15275_v31, 5  ;;  %v1668_v52 = vor.u32 %v1667_v63, %v1663_v49 }
 0x10e   : > { %19140 = vst [vmem:[#allocation71_spill] sm:$0xff] %v16374_v58  ;;  %19141 = vst [vmem:[#allocation72_spill] sm:$0xff] %v16376_v57  ;;  %13027 = vmatmul.mubr.msk.bf16.gmra.mrb[100].mxu1 %vm2109_vm3, %v16374_v58  ;;  %13613 = vmatmul.mubr.msk.bf16.gmra.mrb[36].mxu0 %vm2109_vm3, %v16376_v57  ;;  %v1659_v3 = vrot.slane %v1658_v14, 4  ;;  %v1675_v17 = vshrl.u32 %v465_v48, 16  ;;  %v1681_v28 = vshll.u32 %v16372_v61, 16  ;;  %v1685_v50 = vshrl.u32 %v16372_v61, 16 }
 0x10f   : > { %v4092_v25 = vsel %vm15939_vm7, %v11142_v12, %v4091_v21  ;;  %v4093_v41 = vrot.slane %v4091_v21, 4  ;;  %v1691_v33 = vshll.u32 %v467_v60, 16  ;;  %v1669_v54 = vrot.slane %v1668_v52, 4  ;;  %v16393_v48 = vld [vmem:[%s15521_s5 + $0x21c] sm:$0xf] }
 0x110   : > { %v1664_v36 = vsel %vm15535_vm4, %v1659_v3, %v1663_v49  ;;  %v1677_v1 = vrot.slane %v1675_v17, 4  ;;  %v1683_v26 = vrot.slane %v1681_v28, 5  ;;  %v1687_v63 = vrot.slane %v1685_v50, 4  ;;  %v15276_v49 = vld [vmem:[%s15521_s5 + $0xe8] sm:$0xf] }
 0x111   : > { %v4095_v14 = vsel %vm15939_vm7, %v4093_v41, %v4094_v47  ;;  %v1693_v15 = vrot.slane %v1691_v33, 5  ;;  %v4096_v21 = vrot.slane %v4094_v47, 4  ;;  %v1674_v12 = vsel %vm15535_vm4, %v1669_v54, %v1673_v40  ;;  %v16403_v52 = vld [vmem:[%s15521_s5 + $0x220] sm:$0xf]  ;;  %v15277_v58 = vld [vmem:[%s15521_s5 + $0xec] sm:$0x1] }
 0x112   : > { %v16399_v60 = vcombine.low %v4092_v25, %v4095_v14  ;;  %v1678_v31 = vor.u32 %v1677_v1, %v1673_v40  ;;  %v4097_v3 = vrot.slane %v15276_v49, 5  ;;  %v16405_v17 = vcombine.low %v1664_v36, %v1674_v12 }
 0x113   : > { %v1688_v28 = vor.u32 %v1687_v63, %v1683_v26  ;;  %v4100_v16 = vrot.slane %v15277_v58, 5  ;;  %v1696_v41 = vshrl.u32 %v16393_v48, 16  ;;  %v1699_v50 = vshll.u32 %v16393_v48, 16 }
 0x114   : > { %19142 = vst [vmem:[#allocation73_spill] sm:$0xff] %v16399_v60  ;;  %19143 = vst [vmem:[#allocation74_spill] sm:$0xff] %v16405_v17  ;;  %13616 = vmatprep.mubr.msk.bf16.mxu0 %vm2109_vm3, %v16399_v60  ;;  %v1679_v47 = vrot.slane %v1678_v31, 4  ;;  %v4098_v40 = vsel %vm15939_vm7, %v4096_v21, %v4097_v3  ;;  %v4099_v25 = vrot.slane %v4097_v3, 4  ;;  %13030 = vmatprep.mubr.msk.bf16.mxu1 %vm2109_vm3, %v16405_v17  ;;  %v1705_v36 = vshll.u32 %v16403_v52, 16 }
 0x115   : > { %v1689_v58 = vrot.slane %v1688_v28, 4  ;;  %v1698_v33 = vrot.slane %v1696_v41, 4  ;;  %v1709_v54 = vshrl.u32 %v16403_v52, 16  ;;  %v1701_v63 = vrot.slane %v1699_v50, 5  ;;  %v16431_v28 = vld [vmem:[%s15521_s5 + $0x228] sm:$0xf] }
 0x116   : > { %v1684_v1 = vsel %vm15535_vm4, %v1679_v47, %v1683_v26  ;;  %v4101_v14 = vsel %vm15939_vm7, %v4099_v25, %v4100_v16  ;;  %v1715_v21 = vshll.u32 %v16409_v27, 16  ;;  %v1707_v49 = vrot.slane %v1705_v36, 5  ;;  %v16434_v41 = vld [vmem:[%s15521_s5 + $0x22c] sm:$0x1]  ;;  %v16439_v25 = vld [vmem:[%s15521_s5 + $0xf0] sm:$0xf] }
 0x117   : > { %v1694_v12 = vsel %vm15535_vm4, %v1689_v58, %v1693_v15  ;;  %v16428_v31 = vcombine.low %v4098_v40, %v4101_v14  ;;  %v1711_v3 = vrot.slane %v1709_v54, 4  ;;  %v1702_v47 = vor.u32 %v1701_v63, %v1698_v33  ;;  %v16445_v40 = vld [vmem:[%s15521_s5 + $0xf4] sm:$0xf]  ;;  %v15280_v36 = vld [vmem:[%s15521_s5 + $0xf8] sm:$0xf] }
 0x118   : > { %v16436_v26 = vcombine.low %v1684_v1, %v1694_v12  ;;  %v1717_v16 = vrot.slane %v1715_v21, 5  ;;  %v11143_v50 = vrot.slane %v16439_v25, 9  ;;  %v4104_v58 = vrot.slane %v16445_v40, 5  ;;  %v16577_v60 = vld [vmem:[%s15521_s5 + $0x254] sm:$0x1] }
 0x119   : > { %19144 = vst [vmem:[#allocation75_spill] sm:$0xff] %v16428_v31  ;;  %13617 = vmatmul.mubr.msk.bf16.gmra.mrb[40].mxu0 %vm2109_vm3, %v16428_v31  ;;  %v1712_v15 = vor.u32 %v1711_v3, %v1707_v49  ;;  %v4107_v54 = vrot.slane %v15280_v36, 5  ;;  %v1719_v1 = vshrl.u32 %v16409_v27, 16  ;;  %v1703_v33 = vrot.slane %v1702_v47, 4  ;;  %v15287_v31 = vld [vmem:[%s15521_s5 + $0x114] sm:$0x1] }
 0x11a   : > { %19145 = vst [vmem:[#allocation76_spill] sm:$0xff] %v16436_v26  ;;  %13031 = vmatmul.mubr.msk.bf16.gmra.mrb[104].mxu1 %vm2109_vm3, %v16436_v26  ;;  %v1725_v14 = vshll.u32 %v16431_v28, 16  ;;  %v1729_v63 = vshrl.u32 %v16431_v28, 16  ;;  %v1735_v21 = vshll.u32 %v16434_v41, 16  ;;  %v4105_v3 = vsel %vm15939_vm7, %v11143_v50, %v4104_v58 }
 0x11b   : > { %v1713_v12 = vrot.slane %v1712_v15, 4  ;;  %v4106_v17 = vrot.slane %v4104_v58, 4  ;;  %v1721_v36 = vrot.slane %v1719_v1, 4  ;;  %v1708_v8 = vsel %vm15535_vm4, %v1703_v33, %v1707_v49  ;;  %v16467_v58 = vld [vmem:[%s15521_s5 + $0x234] sm:$0xf] }
 0x11c   : > { %v1727_v26 = vrot.slane %v1725_v14, 5  ;;  %v1731_v47 = vrot.slane %v1729_v63, 4  ;;  %v1737_v45 = vrot.slane %v1735_v21, 5  ;;  %v4109_v39 = vrot.slane %v4107_v54, 4  ;;  %v16474_v14 = vld [vmem:[%s15521_s5 + $0xfc] sm:$0xf] }
 0x11d   : > { %v1718_v56 = vsel %vm15535_vm4, %v1713_v12, %v1717_v16  ;;  %v4108_v15 = vsel %vm15939_vm7, %v4106_v17, %v4107_v54  ;;  %v1722_v50 = vor.u32 %v1721_v36, %v1717_v16  ;;  %v4110_v63 = vrot.slane %v16474_v14, 5  ;;  %v16479_v12 = vld [vmem:[%s15521_s5 + $0x238] sm:$0xf] }
 0x11e   : > { %v16469_v1 = vcombine.low %v1708_v8, %v1718_v56  ;;  %v16471_v49 = vcombine.low %v4105_v3, %v4108_v15  ;;  %v1732_v33 = vor.u32 %v1731_v47, %v1727_v26  ;;  %v4113_v53 = vrot.slane %v15282_v10, 5 }
 0x11f   : > { %v1723_v21 = vrot.slane %v1722_v50, 4  ;;  %v1740_v17 = vshrl.u32 %v16460_v19, 16  ;;  %v1743_v16 = vshll.u32 %v16460_v19, 16  ;;  %v4111_v8 = vsel %vm15939_vm7, %v4109_v39, %v4110_v63 }
 0x120   : > { %19146 = vst [vmem:[#allocation77_spill] sm:$0xff] %v16469_v1  ;;  %19147 = vst [vmem:[#allocation78_spill] sm:$0xff] %v16471_v49  ;;  %13034 = vmatprep.mubr.msk.bf16.mxu1 %vm2109_vm3, %v16469_v1  ;;  %13620 = vmatprep.mubr.msk.bf16.mxu0 %vm2109_vm3, %v16471_v49  ;;  %v1733_v56 = vrot.slane %v1732_v33, 4  ;;  %v4112_v54 = vrot.slane %v4110_v63, 4  ;;  %v1749_v10 = vshll.u32 %v16467_v58, 16  ;;  %v1753_v15 = vshrl.u32 %v16467_v58, 16 }
 0x121   : > { %v1728_v3 = vsel %vm15535_vm4, %v1723_v21, %v1727_v26  ;;  %v1742_v36 = vrot.slane %v1740_v17, 4  ;;  %v1745_v47 = vrot.slane %v1743_v16, 5  ;;  %v1759_v63 = vshll.u32 %v16479_v12, 16  ;;  %v16499_v1 = vld [vmem:[%s15521_s5 + $0x23c] sm:$0xf] }
 0x122   : > { %v1738_v50 = vsel %vm15535_vm4, %v1733_v56, %v1737_v45  ;;  %v4114_v39 = vsel %vm15939_vm7, %v4112_v54, %v4113_v53  ;;  %v1751_v33 = vrot.slane %v1749_v10, 5  ;;  %v1755_v17 = vrot.slane %v1753_v15, 4  ;;  %v16506_v16 = vld [vmem:[%s15521_s5 + $0x240] sm:$0x1]  ;;  %v16513_v56 = vld [vmem:[%s15521_s5 + $0x108] sm:$0xf] }
 0x123   : > { %v16501_v29 = vcombine.low %v1728_v3, %v1738_v50  ;;  %v16503_v26 = vcombine.low %v4111_v8, %v4114_v39  ;;  %v1746_v21 = vor.u32 %v1745_v47, %v1742_v36  ;;  %v1761_v9 = vrot.slane %v1759_v63, 5  ;;  %v16517_v54 = vld [vmem:[%s15521_s5 + $0x10c] sm:$0xf] }
 0x124   : > { %v11144_v45 = vrot.slane %v16509_v38, 9  ;;  %v4117_v53 = vrot.slane %v16513_v56, 5  ;;  %v4120_v10 = vrot.slane %v16517_v54, 5  ;;  %v1756_v3 = vor.u32 %v1755_v17, %v1751_v33 }
 0x125   : > { %19148 = vst [vmem:[#allocation79_spill] sm:$0xff] %v16501_v29  ;;  %19149 = vst [vmem:[#allocation80_spill] sm:$0xff] %v16503_v26  ;;  %13035 = vmatmul.mubr.msk.bf16.gmra.mrb[108].mxu1 %vm2109_vm3, %v16501_v29  ;;  %13621 = vmatmul.mubr.msk.bf16.gmra.mrb[44].mxu0 %vm2109_vm3, %v16503_v26  ;;  %v1747_v8 = vrot.slane %v1746_v21, 4  ;;  %v1763_v36 = vshrl.u32 %v16479_v12, 16  ;;  %v1769_v47 = vshll.u32 %v16499_v1, 16  ;;  %v1773_v39 = vshrl.u32 %v16499_v1, 16 }
 0x126   : > { %v4118_v15 = vsel %vm15939_vm7, %v11144_v45, %v4117_v53  ;;  %v4119_v50 = vrot.slane %v4117_v53, 4  ;;  %v1779_v63 = vshll.u32 %v16506_v16, 16  ;;  %v1757_v34 = vrot.slane %v1756_v3, 4  ;;  %v16546_v3 = vld [vmem:[%s15521_s5 + $0x248] sm:$0xf] }
 0x127   : > { %v1752_v29 = vsel %vm15535_vm4, %v1747_v8, %v1751_v33  ;;  %v1765_v21 = vrot.slane %v1763_v36, 4  ;;  %v1771_v17 = vrot.slane %v1769_v47, 5  ;;  %v1775_v43 = vrot.slane %v1773_v39, 4  ;;  %v16542_v33 = vld [vmem:[%s15521_s5 + $0x110] sm:$0xf] }
 0x128   : > { %v4121_v45 = vsel %vm15939_vm7, %v4119_v50, %v4120_v10  ;;  %v1781_v53 = vrot.slane %v1779_v63, 5  ;;  %v4122_v24 = vrot.slane %v4120_v10, 4  ;;  %v1762_v2 = vsel %vm15535_vm4, %v1757_v34, %v1761_v9  ;;  %v16552_v39 = vld [vmem:[%s15521_s5 + $0x24c] sm:$0xf] }
 0x129   : > { %v16539_v26 = vcombine.low %v4118_v15, %v4121_v45  ;;  %v1766_v49 = vor.u32 %v1765_v21, %v1761_v9  ;;  %v4123_v8 = vrot.slane %v16542_v33, 5  ;;  %v16548_v36 = vcombine.low %v1752_v29, %v1762_v2 }
 0x12a   : > { %v1776_v47 = vor.u32 %v1775_v43, %v1771_v17  ;;  %v4126_v50 = vrot.slane %v15287_v31, 5  ;;  %v1784_v10 = vshrl.u32 %v16533_v59, 16  ;;  %v1787_v2 = vshll.u32 %v16533_v59, 16 }
 0x12b   : > { %19150 = vst [vmem:[#allocation81_spill] sm:$0xff] %v16539_v26  ;;  %19151 = vst [vmem:[#allocation82_spill] sm:$0xff] %v16548_v36  ;;  %13624 = vmatprep.mubr.msk.bf16.mxu0 %vm2109_vm3, %v16539_v26  ;;  %v1767_v34 = vrot.slane %v1766_v49, 4  ;;  %v4124_v9 = vsel %vm15939_vm7, %v4122_v24, %v4123_v8  ;;  %v4125_v15 = vrot.slane %v4123_v8, 4  ;;  %13038 = vmatprep.mubr.msk.bf16.mxu1 %vm2109_vm3, %v16548_v36  ;;  %v1793_v31 = vshll.u32 %v16546_v3, 16 }
 0x12c   : > { %v1777_v43 = vrot.slane %v1776_v47, 4  ;;  %v1786_v29 = vrot.slane %v1784_v10, 4  ;;  %v1797_v63 = vshrl.u32 %v16546_v3, 16  ;;  %v1789_v21 = vrot.slane %v1787_v2, 5  ;;  %v16574_v26 = vld [vmem:[%s15521_s5 + $0x250] sm:$0xf] }
 0x12d   : > { %v1772_v49 = vsel %vm15535_vm4, %v1767_v34, %v1771_v17  ;;  %v4127_v24 = vsel %vm15939_vm7, %v4125_v15, %v4126_v50  ;;  %v1803_v45 = vshll.u32 %v16552_v39, 16  ;;  %v1795_v10 = vrot.slane %v1793_v31, 5  ;;  %v16582_v15 = vld [vmem:[%s15521_s5 + $0x118] sm:$0xf]  ;;  %v16592_v31 = vld [vmem:[%s15521_s5 + $0x120] sm:$0xf] }
 0x12e   : > { %v1782_v8 = vsel %vm15535_vm4, %v1777_v43, %v1781_v53  ;;  %v16571_v47 = vcombine.low %v4124_v9, %v4127_v24  ;;  %v1799_v36 = vrot.slane %v1797_v63, 4  ;;  %v1790_v34 = vor.u32 %v1789_v21, %v1786_v29  ;;  %v16588_v9 = vld [vmem:[%s15521_s5 + $0x11c] sm:$0xf] }
 0x12f   : > { %v16579_v17 = vcombine.low %v1772_v49, %v1782_v8  ;;  %v1805_v50 = vrot.slane %v1803_v45, 5  ;;  %v11145_v2 = vrot.slane %v16582_v15, 9  ;;  %v4130_v43 = vrot.slane %v16588_v9, 5 }
 0x130   : > { %19152 = vst [vmem:[#allocation83_spill] sm:$0xff] %v16571_v47  ;;  %13625 = vmatmul.mubr.msk.bf16.gmra.mrb[48].mxu0 %vm2109_vm3, %v16571_v47  ;;  %v1800_v53 = vor.u32 %v1799_v36, %v1795_v10  ;;  %v4133_v63 = vrot.slane %v16592_v31, 5  ;;  %v1807_v29 = vshrl.u32 %v16552_v39, 16  ;;  %v1791_v49 = vrot.slane %v1790_v34, 4 }
 0x131   : > { %19153 = vst [vmem:[#allocation84_spill] sm:$0xff] %v16579_v17  ;;  %13039 = vmatmul.mubr.msk.bf16.gmra.mrb[112].mxu1 %vm2109_vm3, %v16579_v17  ;;  %v1813_v24 = vshll.u32 %v16574_v26, 16  ;;  %v1817_v36 = vshrl.u32 %v16574_v26, 16  ;;  %v1823_v21 = vshll.u32 %v16577_v60, 16  ;;  %v4131_v8 = vsel %vm15939_vm7, %v11145_v2, %v4130_v43 }
 0x132   : > { %v1801_v45 = vrot.slane %v1800_v53, 4  ;;  %v4132_v47 = vrot.slane %v4130_v43, 4  ;;  %v1809_v57 = vrot.slane %v1807_v29, 4  ;;  %v1796_v55 = vsel %vm15535_vm4, %v1791_v49, %v1795_v10  ;;  %v16613_v43 = vld [vmem:[%s15521_s5 + $0x25c] sm:$0xf] }
 0x133   : > { %v1815_v17 = vrot.slane %v1813_v24, 5  ;;  %v1819_v34 = vrot.slane %v1817_v36, 4  ;;  %v1825_v23 = vrot.slane %v1823_v21, 5  ;;  %v4135_v42 = vrot.slane %v4133_v63, 4  ;;  %v16620_v24 = vld [vmem:[%s15521_s5 + $0x124] sm:$0xf] }
 0x134   : > { %v1806_v22 = vsel %vm15535_vm4, %v1801_v45, %v1805_v50  ;;  %v4134_v53 = vsel %vm15939_vm7, %v4132_v47, %v4133_v63  ;;  %v1810_v2 = vor.u32 %v1809_v57, %v1805_v50  ;;  %v4136_v36 = vrot.slane %v16620_v24, 5  ;;  %v16625_v45 = vld [vmem:[%s15521_s5 + $0x260] sm:$0xf] }
 0x135   : > { %v16615_v29 = vcombine.low %v1796_v55, %v1806_v22  ;;  %v16617_v10 = vcombine.low %v4131_v8, %v4134_v53  ;;  %v1820_v49 = vor.u32 %v1819_v34, %v1815_v17  ;;  %v4139_v18 = vrot.slane %v15292_v37, 5 }
 0x136   : > { %v1811_v21 = vrot.slane %v1810_v2, 4  ;;  %v1828_v47 = vshrl.u32 %v16606_v11, 16  ;;  %v1831_v57 = vshll.u32 %v16606_v11, 16  ;;  %v4137_v55 = vsel %vm15939_vm7, %v4135_v42, %v4136_v36 }
 0x137   : > { %19154 = vst [vmem:[#allocation85_spill] sm:$0xff] %v16615_v29  ;;  %19155 = vst [vmem:[#allocation86_spill] sm:$0xff] %v16617_v10  ;;  %13042 = vmatprep.mubr.msk.bf16.mxu1 %vm2109_vm3, %v16615_v29  ;;  %13628 = vmatprep.mubr.msk.bf16.mxu0 %vm2109_vm3, %v16617_v10  ;;  %v1821_v22 = vrot.slane %v1820_v49, 4  ;;  %v4138_v50 = vrot.slane %v4136_v36, 4  ;;  %v1837_v37 = vshll.u32 %v16613_v43, 16  ;;  %v1841_v53 = vshrl.u32 %v16613_v43, 16 }
 0x138   : > { %v1816_v63 = vsel %vm15535_vm4, %v1811_v21, %v1815_v17  ;;  %v1830_v8 = vrot.slane %v1828_v47, 4  ;;  %v1833_v34 = vrot.slane %v1831_v57, 5  ;;  %v1847_v36 = vshll.u32 %v16625_v45, 16  ;;  %v16645_v29 = vld [vmem:[%s15521_s5 + $0x264] sm:$0xf] }
 0x139   : > { %v1826_v2 = vsel %vm15535_vm4, %v1821_v22, %v1825_v23  ;;  %v4140_v42 = vsel %vm15939_vm7, %v4138_v50, %v4139_v18  ;;  %v1839_v49 = vrot.slane %v1837_v37, 5  ;;  %v1843_v47 = vrot.slane %v1841_v53, 4  ;;  %v16652_v57 = vld [vmem:[%s15521_s5 + $0x268] sm:$0x1]  ;;  %v16659_v22 = vld [vmem:[%s15521_s5 + $0x130] sm:$0xf] }
 0x13a   : > { %v16647_v10 = vcombine.low %v1816_v63, %v1826_v2  ;;  %v16649_v17 = vcombine.low %v4137_v55, %v4140_v42  ;;  %v1834_v21 = vor.u32 %v1833_v34, %v1830_v8  ;;  %v1849_v0 = vrot.slane %v1847_v36, 5  ;;  %v16663_v50 = vld [vmem:[%s15521_s5 + $0x134] sm:$0xf] }
 0x13b   : > { %v11146_v23 = vrot.slane %v16655_v51, 9  ;;  %v4143_v18 = vrot.slane %v16659_v22, 5  ;;  %19158 = vst [vmem:[#allocation89_spill] sm:$0xff] %v16663_v50  ;;  %v4146_v37 = vrot.slane %v16663_v50, 5  ;;  %v1844_v63 = vor.u32 %v1843_v47, %v1839_v49 }
 0x13c   : > { %19156 = vst [vmem:[#allocation87_spill] sm:$0xff] %v16647_v10  ;;  %19157 = vst [vmem:[#allocation88_spill] sm:$0xff] %v16649_v17  ;;  %13043 = vmatmul.mubr.msk.bf16.gmra.mrb[116].mxu1 %vm2109_vm3, %v16647_v10  ;;  %13629 = vmatmul.mubr.msk.bf16.gmra.mrb[52].mxu0 %vm2109_vm3, %v16649_v17  ;;  %v1835_v55 = vrot.slane %v1834_v21, 4  ;;  %v1851_v8 = vshrl.u32 %v16625_v45, 16  ;;  %v1857_v34 = vshll.u32 %v16645_v29, 16  ;;  %v1861_v42 = vshrl.u32 %v16645_v29, 16 }
 0x13d   : > { %v4144_v53 = vsel %vm15939_vm7, %v11146_v23, %v4143_v18  ;;  %v4145_v2 = vrot.slane %v4143_v18, 4  ;;  %v1867_v36 = vshll.u32 %v16652_v57, 16  ;;  %v1845_v17 = vrot.slane %v1844_v63, 4  ;;  %v16692_v63 = vld [vmem:[%s15521_s5 + $0x270] sm:$0xf] }
 0x13e   : > { %v1840_v10 = vsel %vm15535_vm4, %v1835_v55, %v1839_v49  ;;  %v1853_v21 = vrot.slane %v1851_v8, 4  ;;  %v1859_v47 = vrot.slane %v1857_v34, 5  ;;  %v1863_v46 = vrot.slane %v1861_v42, 4  ;;  %v16688_v49 = vld [vmem:[%s15521_s5 + $0x138] sm:$0xf] }
 0x13f   : > { %v4147_v23 = vsel %vm15939_vm7, %v4145_v2, %v4146_v37  ;;  %v1869_v18 = vrot.slane %v1867_v36, 5  ;;  %v4148_v35 = vrot.slane %v4146_v37, 4  ;;  %v1850_v44 = vsel %vm15535_vm4, %v1845_v17, %v1849_v0  ;;  %v16698_v42 = vld [vmem:[%s15521_s5 + $0x274] sm:$0xf] }
 0x140   : > { %v16685_v30 = vcombine.low %v4144_v53, %v4147_v23  ;;  %v1854_v20 = vor.u32 %v1853_v21, %v1849_v0  ;;  %v4149_v55 = vrot.slane %v16688_v49, 5  ;;  %v16694_v8 = vcombine.low %v1840_v10, %v1850_v44 }
 0x141   : > { %v1864_v34 = vor.u32 %v1863_v46, %v1859_v47  ;;  %v4152_v2 = vrot.slane %v15297_v7, 5  ;;  %v1872_v37 = vshrl.u32 %v16679_v13, 16  ;;  %v1875_v44 = vshll.u32 %v16679_v13, 16 }
 0x142   : > { %19159 = vst [vmem:[#allocation90_spill] sm:$0xff] %v16685_v30  ;;  %19160 = vst [vmem:[#allocation91_spill] sm:$0xff] %v16694_v8  ;;  %13632 = vmatprep.mubr.msk.bf16.mxu0 %vm2109_vm3, %v16685_v30  ;;  %v1855_v17 = vrot.slane %v1854_v20, 4  ;;  %v4150_v0 = vsel %vm15939_vm7, %v4148_v35, %v4149_v55  ;;  %v4151_v53 = vrot.slane %v4149_v55, 4  ;;  %13046 = vmatprep.mubr.msk.bf16.mxu1 %vm2109_vm3, %v16694_v8  ;;  %v1881_v10 = vshll.u32 %v16692_v63, 16 }
 0x143   : > { %v1865_v7 = vrot.slane %v1864_v34, 4  ;;  %v1874_v46 = vrot.slane %v1872_v37, 4  ;;  %v1885_v36 = vshrl.u32 %v16692_v63, 16  ;;  %v1877_v21 = vrot.slane %v1875_v44, 5  ;;  %v16720_v30 = vld [vmem:[%s15521_s5 + $0x278] sm:$0xf] }
 0x144   : > { %v1860_v20 = vsel %vm15535_vm4, %v1855_v17, %v1859_v47  ;;  %v4153_v35 = vsel %vm15939_vm7, %v4151_v53, %v4152_v2  ;;  %v1891_v23 = vshll.u32 %v16698_v42, 16  ;;  %v1883_v37 = vrot.slane %v1881_v10, 5  ;;  %v16728_v53 = vld [vmem:[%s15521_s5 + $0x140] sm:$0xf]  ;;  %v16738_v10 = vld [vmem:[%s15521_s5 + $0x148] sm:$0xf] }
 0x145   : > { %v1870_v55 = vsel %vm15535_vm4, %v1865_v7, %v1869_v18  ;;  %v16717_v34 = vcombine.low %v4150_v0, %v4153_v35  ;;  %v1887_v8 = vrot.slane %v1885_v36, 4  ;;  %v1878_v17 = vor.u32 %v1877_v21, %v1874_v46  ;;  %19163 = vst [vmem:[#allocation94_spill] sm:$0xff] %v16728_v53  ;;  %v16734_v0 = vld [vmem:[%s15521_s5 + $0x144] sm:$0xf]  ;;  %19165 = vst [vmem:[#allocation96_spill] sm:$0xff] %v16738_v10 }
 0x146   : > { %v16725_v47 = vcombine.low %v1860_v20, %v1870_v55  ;;  %v1893_v2 = vrot.slane %v1891_v23, 5  ;;  %v11147_v44 = vrot.slane %v16728_v53, 9  ;;  %19164 = vst [vmem:[#allocation95_spill] sm:$0xff] %v16734_v0  ;;  %v4156_v7 = vrot.slane %v16734_v0, 5 }
 0x147   : > { %19161 = vst [vmem:[#allocation92_spill] sm:$0xff] %v16717_v34  ;;  %13633 = vmatmul.mubr.msk.bf16.gmra.mrb[56].mxu0 %vm2109_vm3, %v16717_v34  ;;  %v1888_v18 = vor.u32 %v1887_v8, %v1883_v37  ;;  %v4159_v36 = vrot.slane %v16738_v10, 5  ;;  %v1895_v20 = vshrl.u32 %v16698_v42, 16  ;;  %v1879_v46 = vrot.slane %v1878_v17, 4 }
 0x148   : > { %19162 = vst [vmem:[#allocation93_spill] sm:$0xff] %v16725_v47  ;;  %13047 = vmatmul.mubr.msk.bf16.gmra.mrb[120].mxu1 %vm2109_vm3, %v16725_v47  ;;  %v1901_v35 = vshll.u32 %v16720_v30, 16  ;;  %v1905_v21 = vshrl.u32 %v16720_v30, 16  ;;  %v1911_v8 = vshll.u32 %v16723_v4, 16  ;;  %v4157_v55 = vsel %vm15939_vm7, %v11147_v44, %v4156_v7 }
 0x149   : > { %v1889_v23 = vrot.slane %v1888_v18, 4  ;;  %v4158_v34 = vrot.slane %v4156_v7, 4  ;;  %v1897_v5 = vrot.slane %v1895_v20, 4  ;;  %v1884_v62 = vsel %vm15535_vm4, %v1879_v46, %v1883_v37  ;;  %v16760_v37 = vld [vmem:[%s15521_s5 + $0x14c] sm:$0xf] }
 0x14a   : > { %v1903_v47 = vrot.slane %v1901_v35, 5  ;;  %v1907_v17 = vrot.slane %v1905_v21, 4  ;;  %v1913_v10 = vrot.slane %v1911_v8, 5  ;;  %v4161_v50 = vrot.slane %v4159_v36, 4  ;;  %v15302_v21 = vld [vmem:[%s15521_s5 + $0x150] sm:$0x1] }
 0x14b   : > { %v1894_v53 = vsel %vm15535_vm4, %v1889_v23, %v1893_v2  ;;  %v4160_v0 = vsel %vm15939_vm7, %v4158_v34, %v4159_v36  ;;  %v1898_v18 = vor.u32 %v1897_v5, %v1893_v2  ;;  %v4162_v46 = vrot.slane %v16760_v37, 5  ;;  %v16765_v34 = vld [vmem:[%s15521_s5 + $0x154] sm:$0xf] }
 0x14c   : > { %v16755_v44 = vcombine.low %v1884_v62, %v1894_v53  ;;  %v16757_v7 = vcombine.low %v4157_v55, %v4160_v0  ;;  %v1908_v20 = vor.u32 %v1907_v17, %v1903_v47  ;;  %v4165_v8 = vrot.slane %v15302_v21, 5  ;;  %19168 = vst [vmem:[#allocation99_spill] sm:$0xff] %v16765_v34  ;;  %v16775_v0 = vld [vmem:[%s15521_s5 + $0x158] sm:$0xf]  ;;  %v16781_v55 = vld [vmem:[%s15521_s5] sm:$0xf] }
 0x14d   : > { %v1899_v35 = vrot.slane %v1898_v18, 4  ;;  %v11148_v5 = vrot.slane %v16765_v34, 9  ;;  %v4163_v2 = vsel %vm15939_vm7, %v4161_v50, %v4162_v46  ;;  %v4164_v53 = vrot.slane %v4162_v46, 4  ;;  %19169 = vst [vmem:[#allocation100_spill] sm:$0xff] %v16775_v0  ;;  %19170 = vst [vmem:[#allocation101_spill] sm:$0xff] %v16781_v55 }
 0x14e   : > { %19166 = vst [vmem:[#allocation97_spill] sm:$0xff] %v16755_v44  ;;  %19167 = vst [vmem:[#allocation98_spill] sm:$0xff] %v16757_v7  ;;  %13050 = vmatprep.mubr.msk.bf16.mxu1 %vm2109_vm3, %v16755_v44  ;;  %13636 = vmatprep.mubr.msk.bf16.mxu0 %vm2109_vm3, %v16757_v7  ;;  %v1909_v62 = vrot.slane %v1908_v20, 4  ;;  %v4169_v36 = vrot.slane %v16775_v0, 5  ;;  %v16784_v17 = vld [vmem:[%s15521_s5 + $0x4] sm:$0xf] }
 0x14f   : > { %v1904_v23 = vsel %vm15535_vm4, %v1899_v35, %v1903_v47  ;;  %19171 = vst [vmem:[#allocation102_spill] sm:$0xff] %v16784_v17  ;;  %v11003_v18 = vcombine.low %v16781_v55, %v16784_v17  ;;  %v16789_v20 = vld [vmem:[%s15521_s5 + $0x15c] sm:$0xf]  ;;  %v16793_v46 = vld [vmem:[%s15521_s5 + $0x160] sm:$0xf]  ;;  %v4166_v35 = vsel %vm15939_vm7, %v4164_v53, %v4165_v8 }
 0x150   : > { %19172 = vst [vmem:[#allocation103_spill] sm:$0xff] %v16789_v20  ;;  %v4172_v50 = vrot.slane %v16789_v20, 5  ;;  %19173 = vst [vmem:[#allocation104_spill] sm:$0xff] %v16793_v46  ;;  %v4175_v21 = vrot.slane %v16793_v46, 5  ;;  %v1914_v47 = vsel %vm15535_vm4, %v1909_v62, %v1913_v10  ;;  %v4170_v44 = vsel %vm15939_vm7, %v11148_v5, %v4169_v36  ;;  %v15309_v10 = vld [vmem:[%s15521_s5 + $0x164] sm:$0x1] }
 0x151   : > { %v4171_v7 = vrot.slane %v4169_v36, 4  ;;  %v16802_v55 = vcombine.low %v1904_v23, %v1914_v47  ;;  %v16804_v17 = vcombine.low %v4163_v2, %v4166_v35  ;;  %v4178_v62 = vrot.slane %v15309_v10, 5  ;;  %v16810_v46 = vld [vmem:[%s15521_s5 + $0x168] sm:$0xf]  ;;  %v16820_v2 = vld [vmem:[%s15521_s5 + $0x16c] sm:$0xf] }
 0x152   : > { %v4174_v20 = vrot.slane %v4172_v50, 4  ;;  %v4177_v34 = vrot.slane %v4175_v21, 4  ;;  %19176 = vst [vmem:[#allocation107_spill] sm:$0xff] %v16810_v46  ;;  %v11149_v8 = vrot.slane %v16810_v46, 9  ;;  %19178 = vst [vmem:[#allocation109_spill] sm:$0xff] %v16820_v2 }
 0x153   : > { %19174 = vst [vmem:[#allocation105_spill] sm:$0xff] %v16802_v55  ;;  %19175 = vst [vmem:[#allocation106_spill] sm:$0xff] %v16804_v17  ;;  %v4173_v32 = vsel %vm15939_vm7, %v4171_v7, %v4172_v50  ;;  %13051 = vmatmul.mubr.msk.bf16.gmra.mrb[124].mxu1 %vm2109_vm3, %v16802_v55  ;;  %13637 = vmatmul.mubr.msk.bf16.gmra.mrb[60].mxu0 %vm2109_vm3, %v16804_v17  ;;  %v4182_v7 = vrot.slane %v16820_v2, 5  ;;  %v16824_v53 = vld [vmem:[%s15521_s5 + $0x170] sm:$0xf] }
 0x154   : > { %v16817_v5 = vcombine.low %v4170_v44, %v4173_v32  ;;  %19179 = vst [vmem:[#allocation110_spill] sm:$0xff] %v16824_v53  ;;  %v4185_v36 = vrot.slane %v16824_v53, 5  ;;  %13056 = vmatprep.mubr.msk.bf16.mxu1 %vm2109_vm3, %v11003_v18  ;;  %v4176_v23 = vsel %vm15939_vm7, %v4174_v20, %v4175_v21  ;;  %v4179_v50 = vsel %vm15939_vm7, %v4177_v34, %v4178_v62  ;;  %v16833_v32 = vld [vmem:[%s15521_s5 + $0x174] sm:$0xf]  ;;  %v16839_v47 = vld [vmem:[%s18749_s2 + $0xe] sm:$0x3] }
 0x155   : > { %19180 = vst [vmem:[#allocation111_spill] sm:$0xff] %v16833_v32  ;;  %v4188_v44 = vrot.slane %v16833_v32, 5  ;;  %19181 = vst [vmem:[#allocation112_spill] sm:$0xff] %v16839_v47  ;;  %v4184_v18 = vrot.slane %v4182_v7, 4  ;;  %15128 = vmatprep.subr.msk.bf16.mxu0 %vm2302_vm0, %v16839_v47  ;;  %v4183_v34 = vsel %vm15939_vm7, %v11149_v8, %v4182_v7  ;;  %v16848_v20 = vld [vmem:[%s15521_s5 + $0x180] sm:$0xf]  ;;  %v16863_v8 = vcombine.low %v4176_v23, %v4179_v50 }
 0x156   : > { %19177 = vst [vmem:[#allocation108_spill] sm:$0xff] %v16817_v5  ;;  %13640 = vmatprep.mubr.msk.bf16.mxu0 %vm2109_vm3, %v16817_v5  ;;  %19182 = vst [vmem:[#allocation113_spill] sm:$0xff] %v16848_v20  ;;  %v4195_v21 = vrot.slane %v16848_v20, 5  ;;  %v16852_v35 = vld [vmem:[%s15521_s5 + $0x8] sm:$0xf]  ;;  %v4187_v32 = vrot.slane %v4185_v36, 4 }
 0x157   : > { %19183 = vst [vmem:[#allocation114_spill] sm:$0xff] %v16852_v35  ;;  %v16855_v10 = vld [vmem:[%s15521_s5 + $0xc] sm:$0xf]  ;;  %v15317_v55 = vld [vmem:[%s18749_s2 + $0x4] sm:$0x3]  ;;  %19185 = vst [vmem:[#allocation116_spill] sm:$0xff] %v16863_v8  ;;  %v4186_v7 = vsel %vm15939_vm7, %v4184_v18, %v4185_v36 }
 0x158   : > { %19184 = vst [vmem:[#allocation115_spill] sm:$0xff] %v16855_v10  ;;  %v11004_v62 = vcombine.low %v16852_v35, %v16855_v10  ;;  %v4749_v5 = vsel %vm2302_vm0, %v15317_v55, 0  ;;  %v15318_v17 = vld [vmem:[%s15521_s5 + $0x14] sm:$0xf]  ;;  %v15319_v20 = vld [vmem:[%s15521_s5 + $0x18] sm:$0xf]  ;;  %v16872_v2 = vcombine.low %v4183_v34, %v4186_v7  ;;  %v4189_v36 = vsel %vm15939_vm7, %v4187_v32, %v4188_v44 }
 0x159   : > { %v16869_v53 = vcombine.low %v15318_v17, %v15319_v20  ;;  %v4190_v46 = vrot.slane %v4188_v44, 4  ;;  %v15320_v10 = vld [vmem:[%s15521_s5 + $0x178] sm:$0x1]  ;;  %v16875_v47 = vld [vmem:[%s15521_s5 + $0x17c] sm:$0xf]  ;;  %v4197_v23 = vrot.slane %v4195_v21, 4 }
 0x15a   : > { %v4191_v35 = vrot.slane %v15320_v10, 5  ;;  %19187 = vst [vmem:[#allocation118_spill] sm:$0xff] %v16872_v2  ;;  %19188 = vst [vmem:[#allocation119_spill] sm:$0xff] %v16875_v47  ;;  %v11150_v55 = vrot.slane %v16875_v47, 9  ;;  %v16879_v50 = vld [vmem:[%s15521_s5 + $0x184] sm:$0xf] }
 0x15b   : > { %19186 = vst [vmem:[#allocation117_spill] sm:$0xff] %v16869_v53  ;;  %19189 = vst [vmem:[#allocation120_spill] sm:$0xff] %v16879_v50  ;;  %v4198_v17 = vrot.slane %v16879_v50, 5  ;;  %13057 = vmatmul.mubr.msk.bf16.vlgmr.msra.gmra.mrb[0].mxu1 %vm2109_vm3, %v11004_v62  ;;  %13641 = vmatmul.mubr.msk.bf16.gmra.mrb[64].mxu0 %vm2109_vm3, %v16863_v8  ;;  %v16892_v34 = vld [vmem:[%s15521_s5 + $0x188] sm:$0xf] }
 0x15c   : > { %13185 = vmatpush3.bf16.msra.mxu1 %v4749_v5  ;;  %13060 = vmatprep.mubr.msk.bf16.mxu1 %vm2109_vm3, %v16869_v53  ;;  %v4192_v18 = vsel %vm15939_vm7, %v4190_v46, %v4191_v35  ;;  %19190 = vst [vmem:[#allocation121_spill] sm:$0xff] %v16892_v34  ;;  %v4201_v20 = vrot.slane %v16892_v34, 5  ;;  %v4196_v5 = vsel %vm15939_vm7, %v11150_v55, %v4195_v21  ;;  %v16902_v62 = vld [vmem:[%s15521_s5 + $0x194] sm:$0xf]  ;;  %v15325_v46 = vld [vmem:[%s15521_s5 + $0x1c] sm:$0xf] }
 0x15d   : > { %13644 = vmatprep.mubr.msk.bf16.mxu0 %vm2109_vm3, %v16872_v2  ;;  %v4199_v10 = vsel %vm15939_vm7, %v4197_v23, %v4198_v17  ;;  %19191 = vst [vmem:[#allocation122_spill] sm:$0xff] %v16902_v62  ;;  %v4208_v32 = vrot.slane %v16902_v62, 5  ;;  %v15326_v44 = vld [vmem:[%s15521_s5 + $0x20] sm:$0xf]  ;;  %v16909_v7 = vcombine.low %v4189_v36, %v4192_v18  ;;  %v15327_v53 = vld [vmem:[%s15521_s5 + $0x28] sm:$0xf] }
 0x15e   : > { %v16907_v35 = vcombine.low %v15325_v46, %v15326_v44  ;;  %v15328_v2 = vld [vmem:[%s15521_s5 + $0x2c] sm:$0xf]  ;;  %v16915_v21 = vcombine.low %v4196_v5, %v4199_v10  ;;  %v4200_v55 = vrot.slane %v4198_v17, 4  ;;  %v4203_v23 = vrot.slane %v4201_v20, 4  ;;  %v16919_v62 = vld [vmem:[%s15521_s5 + $0x190] sm:$0xf] }
 0x15f   : > { %19193 = vst [vmem:[#allocation124_spill] sm:$0xff] %v16909_v7  ;;  %v16913_v8 = vcombine.low %v15327_v53, %v15328_v2  ;;  %v15329_v50 = vld [vmem:[%s15521_s5 + $0x18c] sm:$0x1]  ;;  %19196 = vst [vmem:[#allocation127_spill] sm:$0xff] %v16919_v62  ;;  %v11151_v47 = vrot.slane %v16919_v62, 9  ;;  %v4210_v46 = vrot.slane %v4208_v32, 4 }
 0x160   : > { %19192 = vst [vmem:[#allocation123_spill] sm:$0xff] %v16907_v35  ;;  %19195 = vst [vmem:[#allocation126_spill] sm:$0xff] %v16915_v21  ;;  %v4204_v34 = vrot.slane %v15329_v50, 5  ;;  %v16923_v36 = vld [vmem:[%s15521_s5 + $0x198] sm:$0xf]  ;;  %v4202_v53 = vsel %vm15939_vm7, %v4200_v55, %v4201_v20 }
 0x161   : > { %19194 = vst [vmem:[#allocation125_spill] sm:$0xff] %v16913_v8  ;;  %19197 = vst [vmem:[#allocation128_spill] sm:$0xff] %v16923_v36  ;;  %v4211_v2 = vrot.slane %v16923_v36, 5  ;;  %v16939_v17 = vld [vmem:[%s15521_s5 + $0x19c] sm:$0xf]  ;;  %v4209_v5 = vsel %vm15939_vm7, %v11151_v47, %v4208_v32 }
 0x162   : > { %v4205_v50 = vsel %vm15939_vm7, %v4203_v23, %v4204_v34  ;;  %19198 = vst [vmem:[#allocation129_spill] sm:$0xff] %v16939_v17  ;;  %v4214_v18 = vrot.slane %v16939_v17, 5  ;;  %v16947_v44 = vld [vmem:[%s15521_s5 + $0x1a8] sm:$0xf]  ;;  %v15334_v20 = vld [vmem:[%s15521_s5 + $0x30] sm:$0xf] }
 0x163   : > { %13061 = vmatmul.mubr.msk.bf16.gmra.mrb[4].mxu1 %vm2109_vm3, %v16907_v35  ;;  %13645 = vmatmul.mubr.msk.bf16.gmra.mrb[68].mxu0 %vm2109_vm3, %v16909_v7  ;;  %v4212_v10 = vsel %vm15939_vm7, %v4210_v46, %v4211_v2  ;;  %19199 = vst [vmem:[#allocation130_spill] sm:$0xff] %v16947_v44  ;;  %v4221_v35 = vrot.slane %v16947_v44, 5  ;;  %v15335_v55 = vld [vmem:[%s15521_s5 + $0x34] sm:$0xf]  ;;  %v16954_v23 = vcombine.low %v4202_v53, %v4205_v50  ;;  %v15337_v7 = vld [vmem:[%s15521_s5 + $0x40] sm:$0xf] }
 0x164   : > { %13064 = vmatprep.mubr.msk.bf16.mxu1 %vm2109_vm3, %v16913_v8  ;;  %13648 = vmatprep.mubr.msk.bf16.mxu0 %vm2109_vm3, %v16915_v21  ;;  %v16952_v34 = vcombine.low %v15334_v20, %v15335_v55  ;;  %v15336_v21 = vld [vmem:[%s15521_s5 + $0x3c] sm:$0xf]  ;;  %v16960_v47 = vcombine.low %v4209_v5, %v4212_v10  ;;  %v4213_v32 = vrot.slane %v4211_v2, 4  ;;  %v4216_v46 = vrot.slane %v4214_v18, 4  ;;  %v15338_v17 = vld [vmem:[%s15521_s5 + $0x1a0] sm:$0x1] }
 0x165   : > { %19201 = vst [vmem:[#allocation132_spill] sm:$0xff] %v16954_v23  ;;  %v16958_v36 = vcombine.low %v15336_v21, %v15337_v7  ;;  %v4217_v62 = vrot.slane %v15338_v17, 5  ;;  %v16964_v44 = vld [vmem:[%s15521_s5 + $0x1a4] sm:$0xf]  ;;  %v4223_v20 = vrot.slane %v4221_v35, 4 }
 0x166   : > { %19200 = vst [vmem:[#allocation131_spill] sm:$0xff] %v16952_v34  ;;  %19203 = vst [vmem:[#allocation134_spill] sm:$0xff] %v16960_v47  ;;  %v11152_v0 = vrot.slane %v16964_v44, 9  ;;  %v16968_v53 = vld [vmem:[%s15521_s5 + $0x1ac] sm:$0xf]  ;;  %v4215_v21 = vsel %vm15939_vm7, %v4213_v32, %v4214_v18 }
 0x167   : > { %19202 = vst [vmem:[#allocation133_spill] sm:$0xff] %v16958_v36  ;;  %19204 = vst [vmem:[#allocation135_spill] sm:$0xff] %v16964_v44  ;;  %v4224_v7 = vrot.slane %v16968_v53, 5  ;;  %v4218_v2 = vsel %vm15939_vm7, %v4216_v46, %v4217_v62  ;;  %v16984_v50 = vld [vmem:[%s15521_s5 + $0x1b0] sm:$0xf] }
 0x168   : > { %19205 = vst [vmem:[#allocation136_spill] sm:$0xff] %v16968_v53  ;;  %19206 = vst [vmem:[#allocation137_spill] sm:$0xff] %v16984_v50  ;;  %v4227_v17 = vrot.slane %v16984_v50, 5  ;;  %v4222_v5 = vsel %vm15939_vm7, %v11152_v0, %v4221_v35  ;;  %v16992_v55 = vld [vmem:[%s15521_s5 + $0x1bc] sm:$0xf]  ;;  %v16999_v46 = vcombine.low %v4215_v21, %v4218_v2 }
 0x169   : > { %v4225_v10 = vsel %vm15939_vm7, %v4223_v20, %v4224_v7  ;;  %19207 = vst [vmem:[#allocation138_spill] sm:$0xff] %v16992_v55  ;;  %v15343_v18 = vld [vmem:[%s15521_s5 + $0x44] sm:$0xf]  ;;  %v15344_v32 = vld [vmem:[%s15521_s5 + $0x48] sm:$0xf]  ;;  %v4226_v35 = vrot.slane %v4224_v7, 4 }
 0x16a   : > { %v16997_v62 = vcombine.low %v15343_v18, %v15344_v32  ;;  %19209 = vst [vmem:[#allocation140_spill] sm:$0xff] %v16999_v46  ;;  %v15346_v53 = vld [vmem:[%s15521_s5 + $0x54] sm:$0xf]  ;;  %v17005_v0 = vcombine.low %v4222_v5, %v4225_v10  ;;  %v4229_v20 = vrot.slane %v4227_v17, 4  ;;  %v17013_v21 = vld [vmem:[%s15521_s5 + $0x1c0] sm:$0xf] }
 0x16b   : > { %13065 = vmatmul.mubr.msk.bf16.gmra.mrb[8].mxu1 %vm2109_vm3, %v16952_v34  ;;  %13649 = vmatmul.mubr.msk.bf16.gmra.mrb[72].mxu0 %vm2109_vm3, %v16954_v23  ;;  %v15345_v23 = vld [vmem:[%s15521_s5 + $0x50] sm:$0xf]  ;;  %v15347_v44 = vld [vmem:[%s15521_s5 + $0x1b4] sm:$0x1]  ;;  %19213 = vst [vmem:[#allocation144_spill] sm:$0xff] %v17013_v21 }
 0x16c   : > { %13068 = vmatprep.mubr.msk.bf16.mxu1 %vm2109_vm3, %v16958_v36  ;;  %13652 = vmatprep.mubr.msk.bf16.mxu0 %vm2109_vm3, %v16960_v47  ;;  %v4234_v47 = vrot.slane %v16992_v55, 5  ;;  %19208 = vst [vmem:[#allocation139_spill] sm:$0xff] %v16997_v62  ;;  %v17003_v50 = vcombine.low %v15345_v23, %v15346_v53  ;;  %19211 = vst [vmem:[#allocation142_spill] sm:$0xff] %v17005_v0  ;;  %v4230_v36 = vrot.slane %v15347_v44, 5  ;;  %v17009_v55 = vld [vmem:[%s15521_s5 + $0x1b8] sm:$0xf] }
 0x16d   : > { %19212 = vst [vmem:[#allocation143_spill] sm:$0xff] %v17009_v55  ;;  %v11153_v34 = vrot.slane %v17009_v55, 9  ;;  %v4237_v23 = vrot.slane %v17013_v21, 5  ;;  %v4228_v44 = vsel %vm15939_vm7, %v4226_v35, %v4227_v17  ;;  %v17029_v7 = vld [vmem:[%s15521_s5 + $0x1c4] sm:$0xf] }
 0x16e   : > { %19210 = vst [vmem:[#allocation141_spill] sm:$0xff] %v17003_v50  ;;  %v4236_v18 = vrot.slane %v4234_v47, 4  ;;  %v4231_v53 = vsel %vm15939_vm7, %v4229_v20, %v4230_v36  ;;  %19214 = vst [vmem:[#allocation145_spill] sm:$0xff] %v17029_v7  ;;  %v4240_v2 = vrot.slane %v17029_v7, 5  ;;  %v17037_v32 = vld [vmem:[%s15521_s5 + $0x1d0] sm:$0xf] }
 0x16f   : > { %v4235_v5 = vsel %vm15939_vm7, %v11153_v34, %v4234_v47  ;;  %19215 = vst [vmem:[#allocation146_spill] sm:$0xff] %v17037_v32  ;;  %v15352_v17 = vld [vmem:[%s15521_s5 + $0x58] sm:$0xf]  ;;  %v15353_v35 = vld [vmem:[%s15521_s5 + $0x5c] sm:$0xf]  ;;  %v17044_v20 = vcombine.low %v4228_v44, %v4231_v53  ;;  %v4239_v47 = vrot.slane %v4237_v23, 4 }
 0x170   : > { %v4238_v10 = vsel %vm15939_vm7, %v4236_v18, %v4237_v23  ;;  %v17042_v36 = vcombine.low %v15352_v17, %v15353_v35  ;;  %v15355_v21 = vld [vmem:[%s15521_s5 + $0x68] sm:$0xf]  ;;  %v4242_v18 = vrot.slane %v4240_v2, 4  ;;  %v17058_v44 = vld [vmem:[%s15521_s5 + $0x1d4] sm:$0xf] }
 0x171   : > { %19217 = vst [vmem:[#allocation148_spill] sm:$0xff] %v17044_v20  ;;  %v17050_v34 = vcombine.low %v4235_v5, %v4238_v10  ;;  %v15356_v55 = vld [vmem:[%s15521_s5 + $0x1c8] sm:$0x1]  ;;  %19221 = vst [vmem:[#allocation152_spill] sm:$0xff] %v17058_v44  ;;  %v17074_v23 = vld [vmem:[%s15521_s5 + $0x1d8] sm:$0xf] }
 0x172   : > { %19216 = vst [vmem:[#allocation147_spill] sm:$0xff] %v17042_v36  ;;  %19222 = vst [vmem:[#allocation153_spill] sm:$0xff] %v17074_v23  ;;  %v4253_v53 = vrot.slane %v17074_v23, 5  ;;  %v17082_v35 = vld [vmem:[%s15521_s5 + $0x1e4] sm:$0xf] }
 0x173   : > { %13069 = vmatmul.mubr.msk.bf16.gmra.mrb[12].mxu1 %vm2109_vm3, %v16997_v62  ;;  %13653 = vmatmul.mubr.msk.bf16.gmra.mrb[76].mxu0 %vm2109_vm3, %v16999_v46  ;;  %v15354_v46 = vld [vmem:[%s15521_s5 + $0x64] sm:$0xf]  ;;  %19219 = vst [vmem:[#allocation150_spill] sm:$0xff] %v17050_v34  ;;  %19223 = vst [vmem:[#allocation154_spill] sm:$0xff] %v17082_v35 }
 0x174   : > { %13072 = vmatprep.mubr.msk.bf16.mxu1 %vm2109_vm3, %v17003_v50  ;;  %13656 = vmatprep.mubr.msk.bf16.mxu0 %vm2109_vm3, %v17005_v0  ;;  %v4247_v0 = vrot.slane %v17037_v32, 5  ;;  %v17048_v7 = vcombine.low %v15354_v46, %v15355_v21  ;;  %v4243_v50 = vrot.slane %v15356_v55, 5  ;;  %v17054_v32 = vld [vmem:[%s15521_s5 + $0x1cc] sm:$0xf]  ;;  %v4250_v46 = vrot.slane %v17058_v44, 5 }
 0x175   : > { %19220 = vst [vmem:[#allocation151_spill] sm:$0xff] %v17054_v32  ;;  %v11154_v62 = vrot.slane %v17054_v32, 9  ;;  %v4241_v55 = vsel %vm15939_vm7, %v4239_v47, %v4240_v2  ;;  %v15361_v2 = vld [vmem:[%s15521_s5 + $0x6c] sm:$0xf]  ;;  %v15362_v47 = vld [vmem:[%s15521_s5 + $0x70] sm:$0xf] }
 0x176   : > { %19218 = vst [vmem:[#allocation149_spill] sm:$0xff] %v17048_v7  ;;  %v4249_v17 = vrot.slane %v4247_v0, 4  ;;  %v4244_v21 = vsel %vm15939_vm7, %v4242_v18, %v4243_v50  ;;  %v17087_v50 = vcombine.low %v15361_v2, %v15362_v47  ;;  %v15364_v44 = vld [vmem:[%s15521_s5 + $0x7c] sm:$0xf]  ;;  %v17127_v47 = vld [vmem:[%s15521_s5 + $0x1f8] sm:$0xf] }
 0x177   : > { %v4248_v5 = vsel %vm15939_vm7, %v11154_v62, %v4247_v0  ;;  %v17089_v18 = vcombine.low %v4241_v55, %v4244_v21  ;;  %v4252_v0 = vrot.slane %v4250_v46, 4  ;;  %v15365_v32 = vld [vmem:[%s15521_s5 + $0x1dc] sm:$0x1]  ;;  %v17103_v55 = vld [vmem:[%s15521_s5 + $0x1e8] sm:$0xf]  ;;  %19231 = vst [vmem:[#allocation162_spill] sm:$0xff] %v17127_v47 }
 0x178   : > { %v4251_v10 = vsel %vm15939_vm7, %v4249_v17, %v4250_v46  ;;  %19224 = vst [vmem:[#allocation155_spill] sm:$0xff] %v17087_v50  ;;  %v4255_v17 = vrot.slane %v4253_v53, 4  ;;  %19229 = vst [vmem:[#allocation160_spill] sm:$0xff] %v17103_v55  ;;  %v17119_v46 = vld [vmem:[%s15521_s5 + $0x1ec] sm:$0xf] }
 0x179   : > { %19225 = vst [vmem:[#allocation156_spill] sm:$0xff] %v17089_v18  ;;  %v17095_v62 = vcombine.low %v4248_v5, %v4251_v10  ;;  %19230 = vst [vmem:[#allocation161_spill] sm:$0xff] %v17119_v46  ;;  %v4266_v21 = vrot.slane %v17119_v46, 5 }
 0x17b   : > { %13073 = vmatmul.mubr.msk.bf16.gmra.mrb[16].mxu1 %vm2109_vm3, %v17042_v36  ;;  %13657 = vmatmul.mubr.msk.bf16.gmra.mrb[80].mxu0 %vm2109_vm3, %v17044_v20  ;;  %v15363_v20 = vld [vmem:[%s15521_s5 + $0x78] sm:$0xf]  ;;  %19227 = vst [vmem:[#allocation158_spill] sm:$0xff] %v17095_v62 }
 0x17c   : > { %13076 = vmatprep.mubr.msk.bf16.mxu1 %vm2109_vm3, %v17048_v7  ;;  %13660 = vmatprep.mubr.msk.bf16.mxu0 %vm2109_vm3, %v17050_v34  ;;  %v4260_v34 = vrot.slane %v17082_v35, 5  ;;  %v17093_v23 = vcombine.low %v15363_v20, %v15364_v44  ;;  %v4256_v7 = vrot.slane %v15365_v32, 5  ;;  %v17099_v35 = vld [vmem:[%s15521_s5 + $0x1e0] sm:$0xf]  ;;  %v4263_v20 = vrot.slane %v17103_v55, 5 }
 0x17d   : > { %19228 = vst [vmem:[#allocation159_spill] sm:$0xff] %v17099_v35  ;;  %v11155_v36 = vrot.slane %v17099_v35, 9  ;;  %v4254_v32 = vsel %vm15939_vm7, %v4252_v0, %v4253_v53  ;;  %v15370_v53 = vld [vmem:[%s15521_s5 + $0x80] sm:$0xf]  ;;  %v15371_v0 = vld [vmem:[%s15521_s5 + $0x84] sm:$0xf] }
 0x17e   : > { %19226 = vst [vmem:[#allocation157_spill] sm:$0xff] %v17093_v23  ;;  %v4262_v2 = vrot.slane %v4260_v34, 4  ;;  %v4257_v44 = vsel %vm15939_vm7, %v4255_v17, %v4256_v7  ;;  %v17132_v7 = vcombine.low %v15370_v53, %v15371_v0  ;;  %v15373_v55 = vld [vmem:[%s15521_s5 + $0x90] sm:$0xf]  ;;  %v17172_v0 = vld [vmem:[%s15521_s5 + $0x20c] sm:$0xf] }
 0x17f   : > { %v4261_v5 = vsel %vm15939_vm7, %v11155_v36, %v4260_v34  ;;  %v17134_v17 = vcombine.low %v4254_v32, %v4257_v44  ;;  %v4265_v34 = vrot.slane %v4263_v20, 4  ;;  %v15374_v35 = vld [vmem:[%s15521_s5 + $0x1f0] sm:$0x1]  ;;  %v17148_v32 = vld [vmem:[%s15521_s5 + $0x1fc] sm:$0xf]  ;;  %19239 = vst [vmem:[#allocation170_spill] sm:$0xff] %v17172_v0 }
 0x180   : > { %v4264_v10 = vsel %vm15939_vm7, %v4262_v2, %v4263_v20  ;;  %19232 = vst [vmem:[#allocation163_spill] sm:$0xff] %v17132_v7  ;;  %v4268_v2 = vrot.slane %v4266_v21, 4  ;;  %19237 = vst [vmem:[#allocation168_spill] sm:$0xff] %v17148_v32  ;;  %v17164_v20 = vld [vmem:[%s15521_s5 + $0x200] sm:$0xf] }
 0x181   : > { %19233 = vst [vmem:[#allocation164_spill] sm:$0xff] %v17134_v17  ;;  %v17140_v36 = vcombine.low %v4261_v5, %v4264_v10  ;;  %19238 = vst [vmem:[#allocation169_spill] sm:$0xff] %v17164_v20  ;;  %v4279_v44 = vrot.slane %v17164_v20, 5 }
 0x183   : > { %13077 = vmatmul.mubr.msk.bf16.gmra.mrb[20].mxu1 %vm2109_vm3, %v17087_v50  ;;  %13661 = vmatmul.mubr.msk.bf16.gmra.mrb[84].mxu0 %vm2109_vm3, %v17089_v18  ;;  %v15372_v18 = vld [vmem:[%s15521_s5 + $0x8c] sm:$0xf]  ;;  %19235 = vst [vmem:[#allocation166_spill] sm:$0xff] %v17140_v36 }
 0x184   : > { %13080 = vmatprep.mubr.msk.bf16.mxu1 %vm2109_vm3, %v17093_v23  ;;  %13664 = vmatprep.mubr.msk.bf16.mxu0 %vm2109_vm3, %v17095_v62  ;;  %v4273_v62 = vrot.slane %v17127_v47, 5  ;;  %v17138_v46 = vcombine.low %v15372_v18, %v15373_v55  ;;  %v4269_v23 = vrot.slane %v15374_v35, 5  ;;  %v17144_v47 = vld [vmem:[%s15521_s5 + $0x1f4] sm:$0xf]  ;;  %v4276_v18 = vrot.slane %v17148_v32, 5 }
 0x185   : > { %19236 = vst [vmem:[#allocation167_spill] sm:$0xff] %v17144_v47  ;;  %v11156_v50 = vrot.slane %v17144_v47, 9  ;;  %v4267_v35 = vsel %vm15939_vm7, %v4265_v34, %v4266_v21  ;;  %v15379_v21 = vld [vmem:[%s15521_s5 + $0x94] sm:$0xf]  ;;  %v15380_v34 = vld [vmem:[%s15521_s5 + $0x98] sm:$0xf] }
 0x186   : > { %19234 = vst [vmem:[#allocation165_spill] sm:$0xff] %v17138_v46  ;;  %v4275_v53 = vrot.slane %v4273_v62, 4  ;;  %v4270_v55 = vsel %vm15939_vm7, %v4268_v2, %v4269_v23  ;;  %v17177_v23 = vcombine.low %v15379_v21, %v15380_v34  ;;  %v15382_v32 = vld [vmem:[%s15521_s5 + $0xa4] sm:$0xf]  ;;  %v4281_v47 = vrot.slane %v4279_v44, 4 }
 0x187   : > { %v4274_v5 = vsel %vm15939_vm7, %v11156_v50, %v4273_v62  ;;  %v17179_v2 = vcombine.low %v4267_v35, %v4270_v55  ;;  %v4278_v62 = vrot.slane %v4276_v18, 4  ;;  %v17193_v34 = vld [vmem:[%s15521_s5 + $0x210] sm:$0xf] }
 0x188   : > { %v4277_v10 = vsel %vm15939_vm7, %v4275_v53, %v4276_v18  ;;  %19240 = vst [vmem:[#allocation171_spill] sm:$0xff] %v17177_v23  ;;  %v15383_v53 = vld [vmem:[%s15521_s5 + $0x204] sm:$0x1]  ;;  %19245 = vst [vmem:[#allocation176_spill] sm:$0xff] %v17193_v34  ;;  %v4289_v35 = vrot.slane %v17193_v34, 5  ;;  %v4292_v18 = vrot.slane %v16372_v61, 5 }
 0x189   : > { %19241 = vst [vmem:[#allocation172_spill] sm:$0xff] %v17179_v2  ;;  %v17185_v50 = vcombine.low %v4274_v5, %v4277_v10  ;;  %v4299_v10 = vrot.slane %v16403_v52, 5  ;;  %v11158_v52 = vrot.slane %v16393_v48, 9 }
 0x18a   : > { %v4291_v61 = vrot.slane %v4289_v35, 4 }
 0x18b   : > { %13081 = vmatmul.mubr.msk.bf16.gmra.mrb[24].mxu1 %vm2109_vm3, %v17132_v7  ;;  %13665 = vmatmul.mubr.msk.bf16.gmra.mrb[88].mxu0 %vm2109_vm3, %v17134_v17  ;;  %v15381_v17 = vld [vmem:[%s15521_s5 + $0xa0] sm:$0xf]  ;;  %19243 = vst [vmem:[#allocation174_spill] sm:$0xff] %v17185_v50  ;;  %v17189_v7 = vld [vmem:[%s15521_s5 + $0x208] sm:$0xf] }
 0x18c   : > { %13084 = vmatprep.mubr.msk.bf16.mxu1 %vm2109_vm3, %v17138_v46  ;;  %13668 = vmatprep.mubr.msk.bf16.mxu0 %vm2109_vm3, %v17140_v36  ;;  %v4286_v36 = vrot.slane %v17172_v0, 5  ;;  %v17183_v20 = vcombine.low %v15381_v17, %v15382_v32  ;;  %v4282_v46 = vrot.slane %v15383_v53, 5  ;;  %19244 = vst [vmem:[#allocation175_spill] sm:$0xff] %v17189_v7  ;;  %v11157_v0 = vrot.slane %v17189_v7, 9  ;;  %v15386_v53 = vld [vmem:[%s15521_s5 + $0xa8] sm:$0xf] }
 0x18d   : > { %v4280_v17 = vsel %vm15939_vm7, %v4278_v62, %v4279_v44  ;;  %v15388_v44 = vld [vmem:[%s15521_s5 + $0xb4] sm:$0xf]  ;;  %v15389_v62 = vld [vmem:[%s15521_s5 + $0xb8] sm:$0xf]  ;;  %v4293_v48 = vsel %vm15939_vm7, %v4291_v61, %v4292_v18  ;;  %v15394_v61 = vld [vmem:[%s15521_s5 + $0xcc] sm:$0xf] }
 0x18e   : > { %19242 = vst [vmem:[#allocation173_spill] sm:$0xff] %v17183_v20  ;;  %v4288_v21 = vrot.slane %v4286_v36, 4  ;;  %v4283_v32 = vsel %vm15939_vm7, %v4281_v47, %v4282_v46  ;;  %v4287_v55 = vsel %vm15939_vm7, %v11157_v0, %v4286_v36  ;;  %v17222_v7 = vcombine.low %v15388_v44, %v15389_v62  ;;  %v15390_v36 = vld [vmem:[%s15521_s5 + $0x218] sm:$0x1] }
 0x18f   : > { %v17218_v34 = vcombine.low %v4280_v17, %v4283_v32  ;;  %v4294_v47 = vrot.slane %v4292_v18, 4  ;;  %v4295_v0 = vrot.slane %v15390_v36, 5  ;;  %v4300_v17 = vsel %vm15939_vm7, %v11158_v52, %v4299_v10  ;;  %v15393_v18 = vld [vmem:[%s15521_s5 + $0xc8] sm:$0xf] }
 0x190   : > { %v4290_v5 = vsel %vm15939_vm7, %v4288_v21, %v4289_v35  ;;  %19248 = vst [vmem:[#allocation179_spill] sm:$0xff] %v17222_v7  ;;  %v4301_v21 = vrot.slane %v4299_v10, 4  ;;  %v17255_v36 = vcombine.low %v15393_v18, %v15394_v61  ;;  %v15398_v18 = vld [vmem:[%s15521_s5 + $0xe0] sm:$0xf] }
 0x191   : > { %19247 = vst [vmem:[#allocation178_spill] sm:$0xff] %v17218_v34  ;;  %v17224_v46 = vcombine.low %v4287_v55, %v4290_v5  ;;  %v4296_v35 = vsel %vm15939_vm7, %v4294_v47, %v4295_v0  ;;  %v4312_v55 = vrot.slane %v16467_v58, 5  ;;  %v15391_v5 = vld [vmem:[%s15521_s5 + $0xbc] sm:$0xf]  ;;  %v4308_v0 = vrot.slane %v16434_v41, 5 }
 0x192   : > { %v17251_v62 = vcombine.low %v4293_v48, %v4296_v35  ;;  %19252 = vst [vmem:[#allocation183_spill] sm:$0xff] %v17255_v36  ;;  %v11159_v58 = vrot.slane %v16460_v19, 9  ;;  %v4325_v35 = vrot.slane %v16546_v3, 5  ;;  %v11160_v3 = vrot.slane %v16533_v59, 9 }
 0x193   : > { %13085 = vmatmul.mubr.msk.bf16.gmra.mrb[28].mxu1 %vm2109_vm3, %v17177_v23  ;;  %13669 = vmatmul.mubr.msk.bf16.gmra.mrb[92].mxu0 %vm2109_vm3, %v17179_v2  ;;  %v15387_v2 = vld [vmem:[%s15521_s5 + $0xac] sm:$0xf]  ;;  %19249 = vst [vmem:[#allocation180_spill] sm:$0xff] %v17224_v46  ;;  %v4314_v52 = vrot.slane %v4312_v55, 4 }
 0x194   : > { %13088 = vmatprep.mubr.msk.bf16.mxu1 %vm2109_vm3, %v17183_v20  ;;  %13672 = vmatprep.mubr.msk.bf16.mxu0 %vm2109_vm3, %v17185_v50  ;;  %v17216_v50 = vcombine.low %v15386_v53, %v15387_v2  ;;  %v4302_v2 = vrot.slane %v16409_v27, 5  ;;  %v4305_v27 = vrot.slane %v16431_v28, 5  ;;  %v15392_v53 = vld [vmem:[%s15521_s5 + $0xc0] sm:$0xf]  ;;  %19251 = vst [vmem:[#allocation182_spill] sm:$0xff] %v17251_v62 }
 0x195   : > { %v17249_v44 = vcombine.low %v15391_v5, %v15392_v53 }
 0x196   : > { %19246 = vst [vmem:[#allocation177_spill] sm:$0xff] %v17216_v50  ;;  %v4303_v32 = vsel %vm15939_vm7, %v4301_v21, %v4302_v2  ;;  %v4304_v28 = vrot.slane %v4302_v2, 4  ;;  %v4307_v10 = vrot.slane %v4305_v27, 4  ;;  %v4315_v21 = vrot.slane %v16479_v12, 5 }
 0x197   : > { %19250 = vst [vmem:[#allocation181_spill] sm:$0xff] %v17249_v44  ;;  %v17257_v47 = vcombine.low %v4300_v17, %v4303_v32  ;;  %v4318_v12 = vrot.slane %v16499_v1, 5  ;;  %v4313_v2 = vsel %vm15939_vm7, %v11159_v58, %v4312_v55  ;;  %v15395_v17 = vld [vmem:[%s15521_s5 + $0xd0] sm:$0xf]  ;;  %v15396_v32 = vld [vmem:[%s15521_s5 + $0xd4] sm:$0xf] }
 0x198   : > { %v4306_v19 = vsel %vm15939_vm7, %v4304_v28, %v4305_v27  ;;  %v4309_v41 = vsel %vm15939_vm7, %v4307_v10, %v4308_v0  ;;  %v4316_v48 = vsel %vm15939_vm7, %v4314_v52, %v4315_v21  ;;  %v17282_v5 = vcombine.low %v15395_v17, %v15396_v32  ;;  %v15397_v27 = vld [vmem:[%s15521_s5 + $0xdc] sm:$0xf] }
 0x199   : > { %19253 = vst [vmem:[#allocation184_spill] sm:$0xff] %v17257_v47  ;;  %v17284_v53 = vcombine.low %v4306_v19, %v4309_v41  ;;  %v17288_v61 = vcombine.low %v15397_v27, %v15398_v18  ;;  %v17290_v28 = vcombine.low %v4313_v2, %v4316_v48  ;;  %v4317_v1 = vrot.slane %v4315_v21, 4  ;;  %v15399_v41 = vld [vmem:[%s15521_s5 + $0xe4] sm:$0xf]  ;;  %v15400_v2 = vld [vmem:[%s15521_s5 + $0xe8] sm:$0xf] }
 0x19a   : > { %19254 = vst [vmem:[#allocation185_spill] sm:$0xff] %v17282_v5  ;;  %v4320_v55 = vrot.slane %v4318_v12, 4  ;;  %v4321_v10 = vrot.slane %v16506_v16, 5  ;;  %v4327_v0 = vrot.slane %v4325_v35, 4  ;;  %v4328_v58 = vrot.slane %v16552_v39, 5 }
 0x19b   : > { %13089 = vmatmul.mubr.msk.bf16.gmra.mrb[32].mxu1 %vm2109_vm3, %v17216_v50  ;;  %13673 = vmatmul.mubr.msk.bf16.gmra.mrb[96].mxu0 %vm2109_vm3, %v17218_v34  ;;  %19255 = vst [vmem:[#allocation186_spill] sm:$0xff] %v17284_v53  ;;  %19256 = vst [vmem:[#allocation187_spill] sm:$0xff] %v17288_v61  ;;  %v4319_v16 = vsel %vm15939_vm7, %v4317_v1, %v4318_v12  ;;  %v4331_v39 = vrot.slane %v16574_v26, 5  ;;  %v4326_v52 = vsel %vm15939_vm7, %v11160_v3, %v4325_v35 }
 0x19c   : > { %13092 = vmatprep.mubr.msk.bf16.mxu1 %vm2109_vm3, %v17222_v7  ;;  %13676 = vmatprep.mubr.msk.bf16.mxu0 %vm2109_vm3, %v17224_v46  ;;  %19257 = vst [vmem:[#allocation188_spill] sm:$0xff] %v17290_v28  ;;  %v4322_v59 = vsel %vm15939_vm7, %v4320_v55, %v4321_v10  ;;  %v4329_v21 = vsel %vm15939_vm7, %v4327_v0, %v4328_v58  ;;  %v4338_v19 = vrot.slane %v16613_v43, 5  ;;  %v4330_v32 = vrot.slane %v4328_v58, 4  ;;  %v15401_v10 = vld [vmem:[%s15521_s5 + $0xf8] sm:$0xf] }
 0x19d   : > { %v17315_v48 = vcombine.low %v15399_v41, %v15400_v2  ;;  %v17317_v17 = vcombine.low %v4319_v16, %v4322_v59  ;;  %v17321_v12 = vcombine.low %v16439_v25, %v16445_v40  ;;  %v17323_v26 = vcombine.low %v4326_v52, %v4329_v21 }
 0x19e   : > { %v4333_v35 = vrot.slane %v4331_v39, 4  ;;  %v4334_v27 = vrot.slane %v16577_v60, 5  ;;  %v11161_v43 = vrot.slane %v16606_v11, 9  ;;  %v4340_v18 = vrot.slane %v4338_v19, 4 }
 0x19f   : > { %19258 = vst [vmem:[#allocation189_spill] sm:$0xff] %v17315_v48  ;;  %19259 = vst [vmem:[#allocation190_spill] sm:$0xff] %v17317_v17  ;;  %v4341_v1 = vrot.slane %v16625_v45, 5  ;;  %v4332_v60 = vsel %vm15939_vm7, %v4330_v32, %v4331_v39  ;;  %v4344_v25 = vrot.slane %v16645_v29, 5  ;;  %v4351_v55 = vrot.slane %v16692_v63, 5 }
 0x1a0   : > { %19260 = vst [vmem:[#allocation191_spill] sm:$0xff] %v17321_v12  ;;  %19261 = vst [vmem:[#allocation192_spill] sm:$0xff] %v17323_v26  ;;  %v4335_v11 = vsel %vm15939_vm7, %v4333_v35, %v4334_v27  ;;  %v4339_v40 = vsel %vm15939_vm7, %v11161_v43, %v4338_v19  ;;  %v17350_v3 = vcombine.low %v15401_v10, %v16474_v14  ;;  %v4347_v14 = vrot.slane %v16652_v57, 5  ;;  %v17390_v35 = vld [vmem:[%s17361_s21] sm:$0xf] }
 0x1a1   : > { %v4342_v45 = vsel %vm15939_vm7, %v4340_v18, %v4341_v1  ;;  %v17352_v0 = vcombine.low %v4332_v60, %v4335_v11  ;;  %v17356_v58 = vcombine.low %v16509_v38, %v16513_v56  ;;  %v4343_v16 = vrot.slane %v4341_v1, 4  ;;  %v17369_v56 = vld [vmem:[%s17361_s21 + $0x4] sm:$0xf]  ;;  %v17393_v27 = vld [vmem:[%s17361_s21 + $0x8] sm:$0xf] }
 0x1a2   : > { %19262 = vst [vmem:[#allocation193_spill] sm:$0xff] %v17350_v3  ;;  %v17363_v29 = vcombine.low %v4339_v40, %v4342_v45  ;;  %v4346_v59 = vrot.slane %v4344_v25, 4  ;;  %v11162_v39 = vrot.slane %v16679_v13, 9  ;;  %v4353_v52 = vrot.slane %v4351_v55, 4 }
 0x1a3   : > { %13093 = vmatmul.mubr.msk.bf16.gmra.mrb[36].mxu1 %vm2109_vm3, %v17249_v44  ;;  %13677 = vmatmul.mubr.msk.bf16.gmra.mrb[100].mxu0 %vm2109_vm3, %v17251_v62  ;;  %19263 = vst [vmem:[#allocation194_spill] sm:$0xff] %v17352_v0  ;;  %19264 = vst [vmem:[#allocation195_spill] sm:$0xff] %v17356_v58  ;;  %v4354_v38 = vrot.slane %v16698_v42, 5  ;;  %v4345_v57 = vsel %vm15939_vm7, %v4343_v16, %v4344_v25  ;;  %v4357_v19 = vrot.slane %v16720_v30, 5  ;;  %v6855_v32 = vrot.slane %v17369_v56, 5 }
 0x1a4   : > { %13096 = vmatprep.mubr.msk.bf16.mxu1 %vm2109_vm3, %v17255_v36  ;;  %13680 = vmatprep.mubr.msk.bf16.mxu0 %vm2109_vm3, %v17257_v47  ;;  %19265 = vst [vmem:[#allocation196_spill] sm:$0xff] %v17363_v29  ;;  %v4348_v21 = vsel %vm15939_vm7, %v4346_v59, %v4347_v14  ;;  %v4352_v41 = vsel %vm15939_vm7, %v11162_v39, %v4351_v55  ;;  %v4360_v40 = vrot.slane %v16723_v4, 5  ;;  %v11426_v45 = vrot.slane %v17390_v35, 9  ;;  %v17431_v59 = vld [vmem:[%s17361_s21 + $0x10] sm:$0x1] }
 0x1a5   : > { %v4355_v2 = vsel %vm15939_vm7, %v4353_v52, %v4354_v38  ;;  %v17397_v43 = vcombine.low %v16517_v54, %v16542_v33  ;;  %v17399_v18 = vcombine.low %v4345_v57, %v4348_v21  ;;  %v17403_v1 = vcombine.low %v16582_v15, %v16588_v9  ;;  %v17411_v54 = vld [vmem:[%s17361_s21 + $0xc] sm:$0xf]  ;;  %19270 = vst [vmem:[#allocation201_spill] sm:$0xff] %v17431_v59 }
 0x1a6   : > { %v17405_v60 = vcombine.low %v4352_v41, %v4355_v2  ;;  %v4356_v11 = vrot.slane %v4354_v38, 4  ;;  %v4359_v25 = vrot.slane %v4357_v19, 4  ;;  %v6857_v55 = vrot.slane %v6855_v32, 4  ;;  %v19278_v2 = vld [vmem:[#allocation95_spill] sm:$0xff] }
 0x1a7   : > { %19266 = vst [vmem:[#allocation197_spill] sm:$0xff] %v17397_v43  ;;  %19267 = vst [vmem:[#allocation198_spill] sm:$0xff] %v17399_v18  ;;  %v6858_v10 = vrot.slane %v17393_v27, 5  ;;  %v6861_v15 = vrot.slane %v17411_v54, 5  ;;  %v6856_v9 = vsel %vm15939_vm7, %v11426_v45, %v6855_v32  ;;  %v17435_v14 = vcombine.low %v16592_v31, %v16620_v24  ;;  %v19275_v24 = vld [vmem:[#allocation89_spill] sm:$0xff]  ;;  %v19279_v32 = vld [vmem:[#allocation94_spill] sm:$0xff] }
 0x1a8   : > { %19268 = vst [vmem:[#allocation199_spill] sm:$0xff] %v17403_v1  ;;  %19269 = vst [vmem:[#allocation200_spill] sm:$0xff] %v17405_v60  ;;  %v4358_v4 = vsel %vm15939_vm7, %v4356_v11, %v4357_v19  ;;  %v4361_v33 = vsel %vm15939_vm7, %v4359_v25, %v4360_v40  ;;  %v17441_v52 = vcombine.low %v16655_v51, %v16659_v22  ;;  %v6864_v19 = vrot.slane %v17431_v59, 5  ;;  %v19281_v25 = vld [vmem:[#allocation96_spill] sm:$0xff] }
 0x1a9   : > { %v6859_v16 = vsel %vm15939_vm7, %v6857_v55, %v6858_v10  ;;  %19271 = vst [vmem:[#allocation202_spill] sm:$0xff] %v17435_v14  ;;  %v17437_v39 = vcombine.low %v4358_v4, %v4361_v33  ;;  %v6860_v57 = vrot.slane %v6858_v10, 4  ;;  %v6863_v21 = vrot.slane %v6861_v15, 4  ;;  %v19283_v45 = vld [vmem:[#allocation100_spill] sm:$0xff]  ;;  %v19284_v55 = vld [vmem:[#allocation99_spill] sm:$0xff] }
 0x1aa   : > { %19273 = vst [vmem:[#allocation204_spill] sm:$0xff] %v17441_v52  ;;  %v17443_v38 = vcombine.low %v6856_v9, %v6859_v16  ;;  %v17460_v22 = vcombine.low %v19275_v24, %v16688_v49  ;;  %v17466_v11 = vcombine.low %v19279_v32, %v19278_v2  ;;  %v17479_v49 = vld [vmem:[%s18749_s2 + $0x6] sm:$0x3]  ;;  %v17485_v40 = vcombine.low %v19281_v25, %v16760_v37  ;;  %v19285_v4 = vld [vmem:[#allocation112_spill] sm:$0xff]  ;;  %v19287_v9 = vld [vmem:[#allocation133_spill] sm:$0xff] }
 0x1ab   : > { %13097 = vmatmul.mubr.msk.bf16.gmra.mrb[40].mxu1 %vm2109_vm3, %v17282_v5  ;;  %13681 = vmatmul.mubr.msk.bf16.gmra.mrb[104].mxu0 %vm2109_vm3, %v17284_v53  ;;  %19272 = vst [vmem:[#allocation203_spill] sm:$0xff] %v17437_v39  ;;  %v6862_v51 = vsel %vm15939_vm7, %v6860_v57, %v6861_v15  ;;  %v6865_v31 = vsel %vm15939_vm7, %v6863_v21, %v6864_v19  ;;  %v8309_v33 = vsel %vm2302_vm0, %v19285_v4, 0  ;;  %v19286_v15 = vld [vmem:[#allocation131_spill] sm:$0xff]  ;;  %v19288_v37 = vld [vmem:[#allocation104_spill] sm:$0xff]  ;;  %v19290_v21 = vld [vmem:[#allocation109_spill] sm:$0xff] }
 0x1ac   : > { %13100 = vmatprep.mubr.msk.bf16.mxu1 %vm2109_vm3, %v17288_v61  ;;  %13684 = vmatprep.mubr.msk.bf16.mxu0 %vm2109_vm3, %v17290_v28  ;;  %19274 = vst [vmem:[#allocation205_spill] sm:$0xff] %v17443_v38  ;;  %19276 = vst [vmem:[#allocation89_spill] sm:$0xff] %v17460_v22  ;;  %v17462_v41 = vcombine.low %v6862_v51, %v6865_v31  ;;  %v17489_v10 = vcombine.low %v19284_v55, %v19283_v45  ;;  %v19289_v16 = vld [vmem:[#allocation103_spill] sm:$0xff]  ;;  %v19293_v24 = vld [vmem:[#allocation141_spill] sm:$0xff] }
 0x1ad   : > { %19280 = vst [vmem:[#allocation95_spill] sm:$0xff] %v17466_v11  ;;  %15123 = vmatprep.subr.msk.bf16.mxu1 %vm2302_vm0, %v17479_v49  ;;  %19282 = vst [vmem:[#allocation94_spill] sm:$0xff] %v17485_v40  ;;  %v17503_v57 = vcombine.low %v19289_v16, %v19288_v37  ;;  %v19291_v19 = vld [vmem:[#allocation107_spill] sm:$0xff]  ;;  %v19295_v32 = vld [vmem:[#allocation110_spill] sm:$0xff] }
 0x1ae   : > { %19277 = vst [vmem:[#allocation206_spill] sm:$0xff] %v17462_v41  ;;  %v17507_v51 = vcombine.low %v19291_v19, %v19290_v21  ;;  %v19292_v31 = vld [vmem:[#allocation139_spill] sm:$0xff]  ;;  %v19296_v45 = vld [vmem:[#allocation113_spill] sm:$0xff]  ;;  %v19301_v21 = vld [vmem:[#allocation120_spill] sm:$0xff] }
 0x1af   : > { %v19294_v2 = vld [vmem:[#allocation111_spill] sm:$0xff]  ;;  %v19299_v37 = vld [vmem:[#allocation149_spill] sm:$0xff]  ;;  %v19307_v59 = vld [vmem:[#allocation128_spill] sm:$0xff] }
 0x1b0   : > { %v17519_v25 = vcombine.low %v19295_v32, %v19294_v2  ;;  %v19297_v55 = vld [vmem:[#allocation119_spill] sm:$0xff]  ;;  %v19300_v16 = vld [vmem:[#allocation121_spill] sm:$0xff]  ;;  %v19302_v2 = vld [vmem:[#allocation122_spill] sm:$0xff] }
 0x1b1   : > { %v17523_v4 = vcombine.low %v19297_v55, %v19296_v45  ;;  %v17535_v19 = vcombine.low %v19301_v21, %v19300_v16  ;;  %v19303_v32 = vld [vmem:[#allocation127_spill] sm:$0xff]  ;;  %v19308_v21 = vld [vmem:[#allocation130_spill] sm:$0xff] }
 0x1b2   : > { %v17539_v45 = vcombine.low %v19303_v32, %v19302_v2  ;;  %v19304_v55 = vld [vmem:[#allocation155_spill] sm:$0xff] }
 0x1b3   : > { %13101 = vmatmul.mubr.msk.bf16.gmra.mrb[44].mxu1 %vm2109_vm3, %v17315_v48  ;;  %13685 = vmatmul.mubr.msk.bf16.gmra.mrb[108].mxu0 %vm2109_vm3, %v17317_v17  ;;  %v19310_v32 = vld [vmem:[#allocation163_spill] sm:$0xff] }
 0x1b4   : > { %13104 = vmatprep.mubr.msk.bf16.mxu1 %vm2109_vm3, %v17321_v12  ;;  %13688 = vmatprep.mubr.msk.bf16.mxu0 %vm2109_vm3, %v17323_v26 }
 0x1bb   : > { %13105 = vmatmul.mubr.msk.bf16.gmra.mrb[48].mxu1 %vm2109_vm3, %v17350_v3  ;;  %13689 = vmatmul.mubr.msk.bf16.gmra.mrb[112].mxu0 %vm2109_vm3, %v17352_v0 }
 0x1bc   : > { %13108 = vmatprep.mubr.msk.bf16.mxu1 %vm2109_vm3, %v17356_v58  ;;  %13692 = vmatprep.mubr.msk.bf16.mxu0 %vm2109_vm3, %v17363_v29 }
 0x1c3   : > { %13109 = vmatmul.mubr.msk.bf16.gmra.mrb[52].mxu1 %vm2109_vm3, %v17397_v43  ;;  %13693 = vmatmul.mubr.msk.bf16.gmra.mrb[116].mxu0 %vm2109_vm3, %v17399_v18 }
 0x1c4   : > { %13112 = vmatprep.mubr.msk.bf16.mxu1 %vm2109_vm3, %v17403_v1  ;;  %13696 = vmatprep.mubr.msk.bf16.mxu0 %vm2109_vm3, %v17405_v60 }
 0x1cb   : > { %13113 = vmatmul.mubr.msk.bf16.gmra.mrb[56].mxu1 %vm2109_vm3, %v17435_v14  ;;  %13697 = vmatmul.mubr.msk.bf16.gmra.mrb[120].mxu0 %vm2109_vm3, %v17437_v39 }
 0x1cc   : > { %13116 = vmatprep.mubr.msk.bf16.mxu1 %vm2109_vm3, %v17441_v52  ;;  %13700 = vmatprep.mubr.msk.bf16.mxu0 %vm2109_vm3, %v17443_v38  ;;  %v19306_v38 = vld [vmem:[#allocation129_spill] sm:$0xff] }
 0x1cd   : > { %v17551_v16 = vcombine.low %v19307_v59, %v19306_v38  ;;  %v19314_v38 = vld [vmem:[#allocation138_spill] sm:$0xff] }
 0x1d3   : > { %13117 = vmatmul.mubr.msk.bf16.gmra.mrb[60].mxu1 %vm2109_vm3, %v17460_v22  ;;  %13701 = vmatmul.mubr.msk.bf16.gmra.mrb[124].mxu0 %vm2109_vm3, %v17462_v41  ;;  %v19305_v41 = vld [vmem:[#allocation157_spill] sm:$0xff] }
 0x1d4   : > { %13120 = vmatprep.mubr.msk.bf16.mxu1 %vm2109_vm3, %v17466_v11  ;;  %13706 = vmatprep.mubr.msk.bf16.mxu0 %vm2109_vm3, %v16913_v8 }
 0x1db   : > { %13121 = vmatmul.mubr.msk.bf16.gmra.mrb[64].mxu1 %vm2109_vm3, %v17485_v40  ;;  %13707 = vmatmul.mubr.msk.bf16.vlgmr.msra.gmra.mrb[0].mxu0 %vm2109_vm3, %v19286_v15 }
 0x1dc   : > { %13835 = vmatpush3.bf16.msra.mxu0 %v8309_v33  ;;  %13124 = vmatprep.mubr.msk.bf16.mxu1 %vm2109_vm3, %v17489_v10  ;;  %v19298_v33 = vld [vmem:[#allocation147_spill] sm:$0xff] }
 0x1dd   : > { %13710 = vmatprep.mubr.msk.bf16.mxu0 %vm2109_vm3, %v19287_v9  ;;  %v19348_v9 = vld [vmem:[#allocation114_spill] sm:$0xff] }
 0x1de   : > { %v3951_v15 = vrot.slane %v19348_v9, 5 }
 0x1e3   : > { %13125 = vmatmul.mubr.msk.bf16.gmra.mrb[68].mxu1 %vm2109_vm3, %v17503_v57  ;;  %13711 = vmatmul.mubr.msk.bf16.gmra.mrb[4].mxu0 %vm2109_vm3, %v19292_v31 }
 0x1e4   : > { %13128 = vmatprep.mubr.msk.bf16.mxu1 %vm2109_vm3, %v17507_v51  ;;  %13714 = vmatprep.mubr.msk.bf16.mxu0 %vm2109_vm3, %v19293_v24  ;;  %v19315_v24 = vld [vmem:[#allocation143_spill] sm:$0xff] }
 0x1eb   : > { %13129 = vmatmul.mubr.msk.bf16.gmra.mrb[72].mxu1 %vm2109_vm3, %v17519_v25  ;;  %13715 = vmatmul.mubr.msk.bf16.gmra.mrb[8].mxu0 %vm2109_vm3, %v19298_v33  ;;  %v19313_v33 = vld [vmem:[#allocation136_spill] sm:$0xff] }
 0x1ec   : > { %13132 = vmatprep.mubr.msk.bf16.mxu1 %vm2109_vm3, %v17523_v4  ;;  %13718 = vmatprep.mubr.msk.bf16.mxu0 %vm2109_vm3, %v19299_v37  ;;  %v19309_v37 = vld [vmem:[#allocation135_spill] sm:$0xff] }
 0x1ed   : > { %v17555_v2 = vcombine.low %v19309_v37, %v19308_v21  ;;  %v17571_v37 = vcombine.low %v19315_v24, %v19314_v38  ;;  %v19316_v21 = vld [vmem:[#allocation145_spill] sm:$0xff] }
 0x1ee   : > { %v19320_v38 = vld [vmem:[#allocation153_spill] sm:$0xff] }
 0x1f3   : > { %13133 = vmatmul.mubr.msk.bf16.gmra.mrb[76].mxu1 %vm2109_vm3, %v17535_v19  ;;  %13719 = vmatmul.mubr.msk.bf16.gmra.mrb[12].mxu0 %vm2109_vm3, %v19304_v55  ;;  %v19311_v55 = vld [vmem:[#allocation165_spill] sm:$0xff] }
 0x1f4   : > { %13136 = vmatprep.mubr.msk.bf16.mxu1 %vm2109_vm3, %v17539_v45  ;;  %13722 = vmatprep.mubr.msk.bf16.mxu0 %vm2109_vm3, %v19305_v41  ;;  %v19312_v41 = vld [vmem:[#allocation137_spill] sm:$0xff] }
 0x1f5   : > { %v17567_v59 = vcombine.low %v19313_v33, %v19312_v41  ;;  %v19318_v33 = vld [vmem:[#allocation146_spill] sm:$0xff] }
 0x1fb   : > { %13137 = vmatmul.mubr.msk.bf16.gmra.mrb[80].mxu1 %vm2109_vm3, %v17551_v16  ;;  %13723 = vmatmul.mubr.msk.bf16.gmra.mrb[16].mxu0 %vm2109_vm3, %v19310_v32  ;;  %v19319_v32 = vld [vmem:[#allocation151_spill] sm:$0xff] }
 0x1fc   : > { %13140 = vmatprep.mubr.msk.bf16.mxu1 %vm2109_vm3, %v17555_v2  ;;  %13726 = vmatprep.mubr.msk.bf16.mxu0 %vm2109_vm3, %v19311_v55  ;;  %v19317_v55 = vld [vmem:[#allocation144_spill] sm:$0xff]  ;;  %v17587_v24 = vcombine.low %v19319_v32, %v19318_v33 }
 0x1fd   : > { %v17583_v41 = vcombine.low %v19317_v55, %v19316_v21  ;;  %v19322_v21 = vld [vmem:[#allocation154_spill] sm:$0xff]  ;;  %v19325_v33 = vld [vmem:[#allocation160_spill] sm:$0xff] }
 0x203   : > { %13141 = vmatmul.mubr.msk.bf16.gmra.mrb[84].mxu1 %vm2109_vm3, %v17567_v59  ;;  %13727 = vmatmul.mubr.msk.bf16.gmra.mrb[20].mxu0 %vm2109_vm3, %v17177_v23  ;;  %v19323_v23 = vld [vmem:[#allocation159_spill] sm:$0xff] }
 0x204   : > { %13144 = vmatprep.mubr.msk.bf16.mxu1 %vm2109_vm3, %v17571_v37  ;;  %13730 = vmatprep.mubr.msk.bf16.mxu0 %vm2109_vm3, %v17183_v20  ;;  %v19321_v20 = vld [vmem:[#allocation152_spill] sm:$0xff]  ;;  %v17603_v32 = vcombine.low %v19323_v23, %v19322_v21  ;;  %v19326_v23 = vld [vmem:[#allocation162_spill] sm:$0xff]  ;;  %v19327_v21 = vld [vmem:[#allocation167_spill] sm:$0xff] }
 0x205   : > { %v17599_v55 = vcombine.low %v19321_v20, %v19320_v38  ;;  %v19324_v20 = vld [vmem:[#allocation161_spill] sm:$0xff] }
 0x206   : > { %v17615_v38 = vcombine.low %v19325_v33, %v19324_v20  ;;  %v19332_v33 = vld [vmem:[#allocation170_spill] sm:$0xff] }
 0x20b   : > { %13145 = vmatmul.mubr.msk.bf16.gmra.mrb[88].mxu1 %vm2109_vm3, %v17583_v41  ;;  %13731 = vmatmul.mubr.msk.bf16.gmra.mrb[24].mxu0 %vm2109_vm3, %v17216_v50 }
 0x20c   : > { %13148 = vmatprep.mubr.msk.bf16.mxu1 %vm2109_vm3, %v17587_v24  ;;  %13734 = vmatprep.mubr.msk.bf16.mxu0 %vm2109_vm3, %v17222_v7  ;;  %v17619_v7 = vcombine.low %v19327_v21, %v19326_v23  ;;  %v19333_v23 = vld [vmem:[#allocation175_spill] sm:$0xff] }
 0x20d   : > { %v17635_v21 = vcombine.low %v19333_v23, %v19332_v33  ;;  %v15403_v33 = vld [vmem:[%s15521_s5 + $0x21c] sm:$0xf]  ;;  %v15404_v23 = vld [vmem:[%s15521_s5 + $0x220] sm:$0xf] }
 0x20e   : > { %19328 = vst [vmem:[#allocation96_spill] sm:$0xff] %v17619_v7 }
 0x20f   : > { %19334 = vst [vmem:[#allocation99_spill] sm:$0xff] %v17635_v21 }
 0x213   : > { %13149 = vmatmul.mubr.msk.bf16.gmra.mrb[92].mxu1 %vm2109_vm3, %v17599_v55  ;;  %13735 = vmatmul.mubr.msk.bf16.gmra.mrb[28].mxu0 %vm2109_vm3, %v17249_v44  ;;  %v19330_v44 = vld [vmem:[#allocation168_spill] sm:$0xff] }
 0x214   : > { %13152 = vmatprep.mubr.msk.bf16.mxu1 %vm2109_vm3, %v17603_v32  ;;  %13738 = vmatprep.mubr.msk.bf16.mxu0 %vm2109_vm3, %v17255_v36  ;;  %v19329_v36 = vld [vmem:[#allocation169_spill] sm:$0xff] }
 0x215   : > { %v17631_v20 = vcombine.low %v19330_v44, %v19329_v36  ;;  %v15402_v44 = vld [vmem:[%s15521_s5 + $0x214] sm:$0xf] }
 0x216   : > { %v19335_v36 = vld [vmem:[#allocation176_spill] sm:$0xff] }
 0x217   : > { %19331 = vst [vmem:[#allocation100_spill] sm:$0xff] %v17631_v20 }
 0x21b   : > { %13153 = vmatmul.mubr.msk.bf16.gmra.mrb[96].mxu1 %vm2109_vm3, %v17615_v38  ;;  %13739 = vmatmul.mubr.msk.bf16.gmra.mrb[32].mxu0 %vm2109_vm3, %v17282_v5  ;;  %v17651_v5 = vcombine.low %v15403_v33, %v15404_v23  ;;  %v15407_v33 = vld [vmem:[%s15521_s5 + $0x230] sm:$0xf]  ;;  %v15408_v23 = vld [vmem:[%s15521_s5 + $0x234] sm:$0xf] }
 0x21c   : > { %13156 = vmatprep.mubr.msk.bf16.mxu1 %vm2109_vm3, %v17619_v7  ;;  %13742 = vmatprep.mubr.msk.bf16.mxu0 %vm2109_vm3, %v17288_v61  ;;  %v17647_v61 = vcombine.low %v19335_v36, %v15402_v44  ;;  %v15405_v44 = vld [vmem:[%s15521_s5 + $0x224] sm:$0xf]  ;;  %v15406_v36 = vld [vmem:[%s15521_s5 + $0x228] sm:$0xf] }
 0x21d   : > { %19337 = vst [vmem:[#allocation104_spill] sm:$0xff] %v17651_v5 }
 0x21e   : > { %19336 = vst [vmem:[#allocation112_spill] sm:$0xff] %v17647_v61 }
 0x223   : > { %13157 = vmatmul.mubr.msk.bf16.gmra.mrb[100].mxu1 %vm2109_vm3, %v17631_v20  ;;  %13743 = vmatmul.mubr.msk.bf16.gmra.mrb[36].mxu0 %vm2109_vm3, %v17315_v48  ;;  %v17667_v48 = vcombine.low %v15407_v33, %v15408_v23  ;;  %v15411_v33 = vld [vmem:[%s15521_s5 + $0x244] sm:$0xf]  ;;  %v15412_v23 = vld [vmem:[%s15521_s5 + $0x248] sm:$0xf] }
 0x224   : > { %13160 = vmatprep.mubr.msk.bf16.mxu1 %vm2109_vm3, %v17635_v21  ;;  %13746 = vmatprep.mubr.msk.bf16.mxu0 %vm2109_vm3, %v17321_v12  ;;  %v17663_v12 = vcombine.low %v15405_v44, %v15406_v36  ;;  %v15409_v44 = vld [vmem:[%s15521_s5 + $0x238] sm:$0xf]  ;;  %v15410_v36 = vld [vmem:[%s15521_s5 + $0x23c] sm:$0xf] }
 0x225   : > { %19339 = vst [vmem:[#allocation109_spill] sm:$0xff] %v17667_v48 }
 0x226   : > { %19338 = vst [vmem:[#allocation103_spill] sm:$0xff] %v17663_v12 }
 0x22b   : > { %13161 = vmatmul.mubr.msk.bf16.gmra.mrb[104].mxu1 %vm2109_vm3, %v17647_v61  ;;  %13747 = vmatmul.mubr.msk.bf16.gmra.mrb[40].mxu0 %vm2109_vm3, %v17350_v3  ;;  %v17683_v3 = vcombine.low %v15411_v33, %v15412_v23  ;;  %v15415_v33 = vld [vmem:[%s15521_s5 + $0x258] sm:$0xf]  ;;  %v15416_v23 = vld [vmem:[%s15521_s5 + $0x25c] sm:$0xf] }
 0x22c   : > { %13164 = vmatprep.mubr.msk.bf16.mxu1 %vm2109_vm3, %v17651_v5  ;;  %13750 = vmatprep.mubr.msk.bf16.mxu0 %vm2109_vm3, %v17356_v58  ;;  %v17679_v58 = vcombine.low %v15409_v44, %v15410_v36  ;;  %v15413_v44 = vld [vmem:[%s15521_s5 + $0x24c] sm:$0xf]  ;;  %v15414_v36 = vld [vmem:[%s15521_s5 + $0x250] sm:$0xf] }
 0x22d   : > { %19341 = vst [vmem:[#allocation111_spill] sm:$0xff] %v17683_v3 }
 0x22e   : > { %19340 = vst [vmem:[#allocation107_spill] sm:$0xff] %v17679_v58 }
 0x233   : > { %13165 = vmatmul.mubr.msk.bf16.gmra.mrb[108].mxu1 %vm2109_vm3, %v17663_v12  ;;  %13751 = vmatmul.mubr.msk.bf16.gmra.mrb[44].mxu0 %vm2109_vm3, %v17397_v43  ;;  %v17699_v43 = vcombine.low %v15415_v33, %v15416_v23  ;;  %v17716_v33 = vcombine.low %v16679_v13, %v16692_v63  ;;  %v19347_v23 = vld [vmem:[#allocation101_spill] sm:$0xff] }
 0x234   : > { %13168 = vmatprep.mubr.msk.bf16.mxu1 %vm2109_vm3, %v17667_v48  ;;  %13754 = vmatprep.mubr.msk.bf16.mxu0 %vm2109_vm3, %v17403_v1  ;;  %v17695_v1 = vcombine.low %v15413_v44, %v15414_v36  ;;  %v15417_v44 = vld [vmem:[%s15521_s5 + $0x260] sm:$0xf]  ;;  %v15418_v36 = vld [vmem:[%s15521_s5 + $0x264] sm:$0xf]  ;;  %v11131_v31 = vrot.slane %v19347_v23, 9 }
 0x235   : > { %19343 = vst [vmem:[#allocation113_spill] sm:$0xff] %v17699_v43  ;;  %v17712_v50 = vcombine.low %v15417_v44, %v15418_v36  ;;  %19346 = vst [vmem:[#allocation121_spill] sm:$0xff] %v17716_v33  ;;  %v17735_v44 = vcombine.low %v16698_v42, %v16720_v30  ;;  %v15419_v36 = vld [vmem:[%s15521_s5 + $0x10] sm:$0x1] }
 0x236   : > { %19342 = vst [vmem:[#allocation110_spill] sm:$0xff] %v17695_v1  ;;  %v3957_v23 = vrot.slane %v15419_v36, 5  ;;  %v19359_v36 = vld [vmem:[#allocation49_spill] sm:$0xff] }
 0x237   : > { %19345 = vst [vmem:[#allocation119_spill] sm:$0xff] %v17712_v50  ;;  %19350 = vst [vmem:[#allocation120_spill] sm:$0xff] %v17735_v44 }
 0x23b   : > { %13169 = vmatmul.mubr.msk.bf16.gmra.mrb[112].mxu1 %vm2109_vm3, %v17679_v58  ;;  %13755 = vmatmul.mubr.msk.bf16.gmra.mrb[48].mxu0 %vm2109_vm3, %v17435_v14 }
 0x23c   : > { %13172 = vmatprep.mubr.msk.bf16.mxu1 %vm2109_vm3, %v17683_v3  ;;  %13758 = vmatprep.mubr.msk.bf16.mxu0 %vm2109_vm3, %v17441_v52  ;;  %v19344_v52 = vld [vmem:[#allocation102_spill] sm:$0xff] }
 0x23d   : > { %v3948_v14 = vrot.slane %v19344_v52, 5  ;;  %v19349_v52 = vld [vmem:[#allocation115_spill] sm:$0xff] }
 0x23e   : > { %v3954_v13 = vrot.slane %v19349_v52, 5  ;;  %v19355_v52 = vld [vmem:[#allocation41_spill] sm:$0xff] }
 0x23f   : > { %v3949_v63 = vsel %vm15939_vm7, %v11131_v31, %v3948_v14  ;;  %v19354_v31 = vld [vmem:[#allocation40_spill] sm:$0xff] }
 0x240   : > { %v3956_v8 = vrot.slane %v3954_v13, 4 }
 0x242   : > { %v3958_v42 = vsel %vm15939_vm7, %v3956_v8, %v3957_v23  ;;  %v15420_v8 = vld [vmem:[%s18749_s2 + $0x8] sm:$0x3] }
 0x243   : > { %13173 = vmatmul.mubr.msk.bf16.gmra.mrb[116].mxu1 %vm2109_vm3, %v17695_v1  ;;  %13759 = vmatmul.mubr.msk.bf16.gmra.mrb[52].mxu0 %vm2109_vm3, %v17460_v22  ;;  %v3950_v22 = vrot.slane %v3948_v14, 4  ;;  %v17752_v14 = vld [vmem:[%s18749_s2 + $0x10] sm:$0x3]  ;;  %v19360_v23 = vld [vmem:[#allocation51_spill] sm:$0xff] }
 0x244   : > { %13176 = vmatprep.mubr.msk.bf16.mxu1 %vm2109_vm3, %v17699_v43  ;;  %13762 = vmatprep.mubr.msk.bf16.mxu0 %vm2109_vm3, %v17466_v11 }
 0x245   : > { %v3952_v9 = vsel %vm15939_vm7, %v3950_v22, %v3951_v15  ;;  %15129 = vmatprep.subr.msk.bf16.mxu0 %vm2302_vm0, %v17752_v14 }
 0x246   : > { %v11164_v11 = vcombine.low %v3949_v63, %v3952_v9  ;;  %v19357_v63 = vld [vmem:[#allocation46_spill] sm:$0xff]  ;;  %v19358_v9 = vld [vmem:[#allocation48_spill] sm:$0xff] }
 0x24b   : > { %13177 = vmatmul.mubr.msk.bf16.gmra.mrb[120].mxu1 %vm2109_vm3, %v17712_v50  ;;  %13763 = vmatmul.mubr.msk.bf16.gmra.mrb[56].mxu0 %vm2109_vm3, %v17485_v40  ;;  %v3953_v40 = vrot.slane %v3951_v15, 4  ;;  %v19352_v15 = vld [vmem:[#allocation36_spill] sm:$0xff] }
 0x24c   : > { %13180 = vmatprep.mubr.msk.bf16.mxu1 %vm2109_vm3, %v17716_v33  ;;  %13766 = vmatprep.mubr.msk.bf16.mxu0 %vm2109_vm3, %v17489_v10 }
 0x24d   : > { %v3955_v30 = vsel %vm15939_vm7, %v3953_v40, %v3954_v13  ;;  %v19351_v40 = vld [vmem:[#allocation35_spill] sm:$0xff] }
 0x24e   : > { %v11165_v22 = vcombine.low %v3955_v30, %v3958_v42  ;;  %v19356_v13 = vld [vmem:[#allocation43_spill] sm:$0xff]  ;;  %v19361_v30 = vld [vmem:[#allocation54_spill] sm:$0xff]  ;;  %v19362_v42 = vld [vmem:[#allocation56_spill] sm:$0xff] }
 0x253   : > { %13181 = vmatmul.mubr.msk.bf16.gmra.mrb[124].mxu1 %vm2109_vm3, %v17735_v44  ;;  %13767 = vmatmul.mubr.msk.bf16.gmra.mrb[60].mxu0 %vm2109_vm3, %v17503_v57 }
 0x254   : > { %13186 = vmatprep.mubr.msk.bf16.mxu1 %vm2109_vm3, %v11164_v11  ;;  %13770 = vmatprep.mubr.msk.bf16.mxu0 %vm2109_vm3, %v17507_v51  ;;  %v5443_v11 = vsel %vm2302_vm0, %v17479_v49, 0  ;;  %v19353_v49 = vld [vmem:[#allocation37_spill] sm:$0xff] }
 0x25b   : > { %13187 = vmatmul.mubr.msk.bf16.vlgmr.msra.gmra.mrb[0].mxu1 %vm2109_vm3, %v11165_v22  ;;  %13771 = vmatmul.mubr.msk.bf16.gmra.mrb[64].mxu0 %vm2109_vm3, %v17519_v25  ;;  %v19363_v22 = vld [vmem:[#allocation57_spill] sm:$0xff] }
 0x25c   : > { %13315 = vmatpush3.bf16.msra.mxu1 %v5443_v11  ;;  %13190 = vmatprep.mubr.msk.bf16.mxu1 %vm2109_vm3, %v19351_v40  ;;  %v19364_v11 = vld [vmem:[#allocation59_spill] sm:$0xff]  ;;  %v19365_v40 = vld [vmem:[#allocation62_spill] sm:$0xff] }
 0x25d   : > { %13774 = vmatprep.mubr.msk.bf16.mxu0 %vm2109_vm3, %v17523_v4  ;;  %15125 = vmatprep.subr.msk.bf16.mxu1 %vm2302_vm0, %v15420_v8  ;;  %v19366_v8 = vld [vmem:[#allocation64_spill] sm:$0xff] }
 0x263   : > { %13191 = vmatmul.mubr.msk.bf16.gmra.mrb[4].mxu1 %vm2109_vm3, %v19352_v15  ;;  %13775 = vmatmul.mubr.msk.bf16.gmra.mrb[68].mxu0 %vm2109_vm3, %v17535_v19  ;;  %v19367_v15 = vld [vmem:[#allocation65_spill] sm:$0xff] }
 0x264   : > { %13194 = vmatprep.mubr.msk.bf16.mxu1 %vm2109_vm3, %v19353_v49  ;;  %13778 = vmatprep.mubr.msk.bf16.mxu0 %vm2109_vm3, %v17539_v45 }
 0x26b   : > { %13195 = vmatmul.mubr.msk.bf16.gmra.mrb[8].mxu1 %vm2109_vm3, %v19354_v31  ;;  %13779 = vmatmul.mubr.msk.bf16.gmra.mrb[72].mxu0 %vm2109_vm3, %v17551_v16 }
 0x26c   : > { %13198 = vmatprep.mubr.msk.bf16.mxu1 %vm2109_vm3, %v19355_v52  ;;  %13782 = vmatprep.mubr.msk.bf16.mxu0 %vm2109_vm3, %v17555_v2 }
 0x273   : > { %13199 = vmatmul.mubr.msk.bf16.gmra.mrb[12].mxu1 %vm2109_vm3, %v19356_v13  ;;  %13783 = vmatmul.mubr.msk.bf16.gmra.mrb[76].mxu0 %vm2109_vm3, %v17567_v59 }
 0x274   : > { %13202 = vmatprep.mubr.msk.bf16.mxu1 %vm2109_vm3, %v19357_v63  ;;  %13786 = vmatprep.mubr.msk.bf16.mxu0 %vm2109_vm3, %v17571_v37 }
 0x27b   : > { %13203 = vmatmul.mubr.msk.bf16.gmra.mrb[16].mxu1 %vm2109_vm3, %v19358_v9  ;;  %13787 = vmatmul.mubr.msk.bf16.gmra.mrb[80].mxu0 %vm2109_vm3, %v17583_v41 }
 0x27c   : > { %13206 = vmatprep.mubr.msk.bf16.mxu1 %vm2109_vm3, %v19359_v36  ;;  %13790 = vmatprep.mubr.msk.bf16.mxu0 %vm2109_vm3, %v17587_v24 }
 0x283   : > { %13207 = vmatmul.mubr.msk.bf16.gmra.mrb[20].mxu1 %vm2109_vm3, %v19360_v23  ;;  %13791 = vmatmul.mubr.msk.bf16.gmra.mrb[84].mxu0 %vm2109_vm3, %v17599_v55 }
 0x284   : > { %13210 = vmatprep.mubr.msk.bf16.mxu1 %vm2109_vm3, %v19361_v30  ;;  %13794 = vmatprep.mubr.msk.bf16.mxu0 %vm2109_vm3, %v17603_v32 }
 0x28b   : > { %13211 = vmatmul.mubr.msk.bf16.gmra.mrb[24].mxu1 %vm2109_vm3, %v19362_v42  ;;  %13795 = vmatmul.mubr.msk.bf16.gmra.mrb[88].mxu0 %vm2109_vm3, %v17615_v38 }
 0x28c   : > { %13214 = vmatprep.mubr.msk.bf16.mxu1 %vm2109_vm3, %v19363_v22  ;;  %13798 = vmatprep.mubr.msk.bf16.mxu0 %vm2109_vm3, %v17619_v7  ;;  %v18170_v7 = vld [vmem:[%s17361_s21 + $0x24] sm:$0x1] }
 0x293   : > { %13215 = vmatmul.mubr.msk.bf16.gmra.mrb[28].mxu1 %vm2109_vm3, %v19364_v11  ;;  %13799 = vmatmul.mubr.msk.bf16.gmra.mrb[92].mxu0 %vm2109_vm3, %v17631_v20  ;;  %v19369_v20 = vld [vmem:[#allocation70_spill] sm:$0xff] }
 0x294   : > { %13218 = vmatprep.mubr.msk.bf16.mxu1 %vm2109_vm3, %v19365_v40  ;;  %13802 = vmatprep.mubr.msk.bf16.mxu0 %vm2109_vm3, %v17635_v21  ;;  %v19370_v21 = vld [vmem:[#allocation72_spill] sm:$0xff] }
 0x29b   : > { %13219 = vmatmul.mubr.msk.bf16.gmra.mrb[32].mxu1 %vm2109_vm3, %v19366_v8  ;;  %13803 = vmatmul.mubr.msk.bf16.gmra.mrb[96].mxu0 %vm2109_vm3, %v17647_v61  ;;  %v19371_v61 = vld [vmem:[#allocation73_spill] sm:$0xff] }
 0x29c   : > { %13222 = vmatprep.mubr.msk.bf16.mxu1 %vm2109_vm3, %v19367_v15  ;;  %13806 = vmatprep.mubr.msk.bf16.mxu0 %vm2109_vm3, %v17651_v5  ;;  %v19375_v5 = vld [vmem:[#allocation81_spill] sm:$0xff] }
 0x2a3   : > { %13223 = vmatmul.mubr.msk.bf16.gmra.mrb[36].mxu1 %vm2109_vm3, %v19368_v6  ;;  %13807 = vmatmul.mubr.msk.bf16.gmra.mrb[100].mxu0 %vm2109_vm3, %v17663_v12  ;;  %v19372_v12 = vld [vmem:[#allocation75_spill] sm:$0xff] }
 0x2a4   : > { %13226 = vmatprep.mubr.msk.bf16.mxu1 %vm2109_vm3, %v19369_v20  ;;  %13810 = vmatprep.mubr.msk.bf16.mxu0 %vm2109_vm3, %v17667_v48  ;;  %v19373_v48 = vld [vmem:[#allocation78_spill] sm:$0xff] }
 0x2ab   : > { %13227 = vmatmul.mubr.msk.bf16.gmra.mrb[40].mxu1 %vm2109_vm3, %v19370_v21  ;;  %13811 = vmatmul.mubr.msk.bf16.gmra.mrb[104].mxu0 %vm2109_vm3, %v17679_v58  ;;  %v19374_v58 = vld [vmem:[#allocation80_spill] sm:$0xff] }
 0x2ac   : > { %13230 = vmatprep.mubr.msk.bf16.mxu1 %vm2109_vm3, %v19371_v61  ;;  %13814 = vmatprep.mubr.msk.bf16.mxu0 %vm2109_vm3, %v17683_v3  ;;  %v19377_v3 = vld [vmem:[#allocation83_spill] sm:$0xff]  ;;  %v19388_v61 = vld [vmem:[#allocation5_spill] sm:$0xff]  ;;  %v19389_v21 = vld [vmem:[#allocation108_spill] sm:$0xff] }
 0x2b3   : > { %13231 = vmatmul.mubr.msk.bf16.gmra.mrb[44].mxu1 %vm2109_vm3, %v19372_v12  ;;  %13815 = vmatmul.mubr.msk.bf16.gmra.mrb[108].mxu0 %vm2109_vm3, %v17695_v1  ;;  %v17867_v1 = vcombine.low %v17390_v35, %v17369_v56  ;;  %v19384_v12 = vld [vmem:[#allocation92_spill] sm:$0xff] }
 0x2b4   : > { %13234 = vmatprep.mubr.msk.bf16.mxu1 %vm2109_vm3, %v19373_v48  ;;  %13818 = vmatprep.mubr.msk.bf16.mxu0 %vm2109_vm3, %v17699_v43  ;;  %v19378_v43 = vld [vmem:[#allocation86_spill] sm:$0xff] }
 0x2b5   : > { %19376 = vst [vmem:[#allocation122_spill] sm:$0xff] %v17867_v1 }
 0x2bb   : > { %13235 = vmatmul.mubr.msk.bf16.gmra.mrb[48].mxu1 %vm2109_vm3, %v19374_v58  ;;  %13819 = vmatmul.mubr.msk.bf16.gmra.mrb[112].mxu0 %vm2109_vm3, %v17712_v50  ;;  %v17878_v50 = vld [vmem:[%s17361_s21 + $0x14] sm:$0xf] }
 0x2bc   : > { %13238 = vmatprep.mubr.msk.bf16.mxu1 %vm2109_vm3, %v19375_v5  ;;  %13822 = vmatprep.mubr.msk.bf16.mxu0 %vm2109_vm3, %v17716_v33  ;;  %19379 = vst [vmem:[#allocation127_spill] sm:$0xff] %v17878_v50  ;;  %v17881_v5 = vld [vmem:[%s17361_s21 + $0x18] sm:$0xf]  ;;  %v17885_v33 = vcombine.low %v17393_v27, %v17411_v54  ;;  %v19382_v58 = vld [vmem:[#allocation88_spill] sm:$0xff] }
 0x2bd   : > { %19380 = vst [vmem:[#allocation129_spill] sm:$0xff] %v17881_v5 }
 0x2be   : > { %19381 = vst [vmem:[#allocation128_spill] sm:$0xff] %v17885_v33 }
 0x2c3   : > { %13239 = vmatmul.mubr.msk.bf16.gmra.mrb[52].mxu1 %vm2109_vm3, %v19377_v3  ;;  %13823 = vmatmul.mubr.msk.bf16.gmra.mrb[116].mxu0 %vm2109_vm3, %v17735_v44  ;;  %v11495_v3 = vcombine.low %v17878_v50, %v17881_v5  ;;  %v19383_v44 = vld [vmem:[#allocation90_spill] sm:$0xff] }
 0x2c4   : > { %13242 = vmatprep.mubr.msk.bf16.mxu1 %vm2109_vm3, %v19378_v43  ;;  %13826 = vmatprep.mubr.msk.bf16.mxu0 %vm2109_vm3, %v17867_v1  ;;  %v17897_v1 = vld [vmem:[%s17361_s21 + $0x1c] sm:$0xf]  ;;  %v17900_v43 = vld [vmem:[%s17361_s21 + $0x20] sm:$0xf] }
 0x2c5   : > { %v11496_v48 = vcombine.low %v17897_v1, %v17900_v43 }
 0x2cb   : > { %13243 = vmatmul.mubr.msk.bf16.gmra.mrb[56].mxu1 %vm2109_vm3, %v19382_v58  ;;  %13827 = vmatmul.mubr.msk.bf16.gmra.mrb[120].mxu0 %vm2109_vm3, %v17885_v33  ;;  %v19385_v58 = vld [vmem:[#allocation98_spill] sm:$0xff]  ;;  %v19386_v33 = vld [vmem:[#allocation4_spill] sm:$0xff] }
 0x2cc   : > { %13246 = vmatprep.mubr.msk.bf16.mxu1 %vm2109_vm3, %v19383_v44  ;;  %13830 = vmatprep.mubr.msk.bf16.mxu0 %vm2109_vm3, %v11495_v3  ;;  %v9013_v3 = vsel %vm2302_vm0, %v17752_v14, 0  ;;  %v19387_v44 = vld [vmem:[#allocation106_spill] sm:$0xff] }
 0x2cd   : > { %v19393_v14 = vld [vmem:[#allocation118_spill] sm:$0xff] }
 0x2d3   : > { %13247 = vmatmul.mubr.msk.bf16.gmra.mrb[60].mxu1 %vm2109_vm3, %v19384_v12  ;;  %13831 = vmatmul.mubr.msk.bf16.gmra.mrb[124].mxu0 %vm2109_vm3, %v11496_v48  ;;  %v19390_v48 = vld [vmem:[#allocation6_spill] sm:$0xff] }
 0x2d4   : > { %13250 = vmatprep.mubr.msk.bf16.mxu1 %vm2109_vm3, %v19385_v58  ;;  %13836 = vmatprep.mubr.msk.bf16.mxu0 %vm2109_vm3, %v19386_v33  ;;  %v19391_v58 = vld [vmem:[#allocation116_spill] sm:$0xff]  ;;  %v19392_v33 = vld [vmem:[#allocation7_spill] sm:$0xff] }
 0x2db   : > { %13251 = vmatmul.mubr.msk.bf16.gmra.mrb[64].mxu1 %vm2109_vm3, %v19387_v44  ;;  %13837 = vmatmul.mubr.msk.bf16.vlgmr.msra.gmra.mrb[0].mxu0 %vm2109_vm3, %v19388_v61  ;;  %v19394_v44 = vld [vmem:[#allocation8_spill] sm:$0xff] }
 0x2dc   : > { %13965 = vmatpush3.bf16.msra.mxu0 %v9013_v3  ;;  %13254 = vmatprep.mubr.msk.bf16.mxu1 %vm2109_vm3, %v19389_v21  ;;  %v19395_v61 = vld [vmem:[#allocation124_spill] sm:$0xff]  ;;  %v19396_v3 = vld [vmem:[#allocation9_spill] sm:$0xff]  ;;  %v19397_v21 = vld [vmem:[#allocation126_spill] sm:$0xff] }
 0x2dd   : > { %13840 = vmatprep.mubr.msk.bf16.mxu0 %vm2109_vm3, %v19390_v48  ;;  %v19398_v48 = vld [vmem:[#allocation10_spill] sm:$0xff] }
 0x2e3   : > { %13255 = vmatmul.mubr.msk.bf16.gmra.mrb[68].mxu1 %vm2109_vm3, %v19391_v58  ;;  %13841 = vmatmul.mubr.msk.bf16.gmra.mrb[4].mxu0 %vm2109_vm3, %v19392_v33  ;;  %v19399_v58 = vld [vmem:[#allocation132_spill] sm:$0xff]  ;;  %v19400_v33 = vld [vmem:[#allocation11_spill] sm:$0xff] }
 0x2e4   : > { %13258 = vmatprep.mubr.msk.bf16.mxu1 %vm2109_vm3, %v19393_v14  ;;  %13844 = vmatprep.mubr.msk.bf16.mxu0 %vm2109_vm3, %v19394_v44  ;;  %v19401_v14 = vld [vmem:[#allocation134_spill] sm:$0xff]  ;;  %v19402_v44 = vld [vmem:[#allocation12_spill] sm:$0xff] }
 0x2eb   : > { %13259 = vmatmul.mubr.msk.bf16.gmra.mrb[72].mxu1 %vm2109_vm3, %v19395_v61  ;;  %13845 = vmatmul.mubr.msk.bf16.gmra.mrb[8].mxu0 %vm2109_vm3, %v19396_v3  ;;  %v19403_v61 = vld [vmem:[#allocation140_spill] sm:$0xff]  ;;  %v19404_v3 = vld [vmem:[#allocation13_spill] sm:$0xff] }
 0x2ec   : > { %13262 = vmatprep.mubr.msk.bf16.mxu1 %vm2109_vm3, %v19397_v21  ;;  %13848 = vmatprep.mubr.msk.bf16.mxu0 %vm2109_vm3, %v19398_v48  ;;  %v19405_v21 = vld [vmem:[#allocation142_spill] sm:$0xff] }
 0x2ed   : > { %v19406_v48 = vld [vmem:[#allocation14_spill] sm:$0xff] }
 0x2f3   : > { %13263 = vmatmul.mubr.msk.bf16.gmra.mrb[76].mxu1 %vm2109_vm3, %v19399_v58  ;;  %13849 = vmatmul.mubr.msk.bf16.gmra.mrb[12].mxu0 %vm2109_vm3, %v19400_v33  ;;  %v19407_v58 = vld [vmem:[#allocation148_spill] sm:$0xff]  ;;  %v19408_v33 = vld [vmem:[#allocation15_spill] sm:$0xff] }
 0x2f4   : > { %13266 = vmatprep.mubr.msk.bf16.mxu1 %vm2109_vm3, %v19401_v14  ;;  %13852 = vmatprep.mubr.msk.bf16.mxu0 %vm2109_vm3, %v19402_v44  ;;  %v19409_v14 = vld [vmem:[#allocation150_spill] sm:$0xff]  ;;  %v19410_v44 = vld [vmem:[#allocation16_spill] sm:$0xff] }
 0x2fb   : > { %13267 = vmatmul.mubr.msk.bf16.gmra.mrb[80].mxu1 %vm2109_vm3, %v19403_v61  ;;  %13853 = vmatmul.mubr.msk.bf16.gmra.mrb[16].mxu0 %vm2109_vm3, %v19404_v3  ;;  %v19411_v61 = vld [vmem:[#allocation156_spill] sm:$0xff]  ;;  %v19412_v3 = vld [vmem:[#allocation17_spill] sm:$0xff] }
 0x2fc   : > { %13270 = vmatprep.mubr.msk.bf16.mxu1 %vm2109_vm3, %v19405_v21  ;;  %13856 = vmatprep.mubr.msk.bf16.mxu0 %vm2109_vm3, %v19406_v48  ;;  %v19413_v21 = vld [vmem:[#allocation158_spill] sm:$0xff] }
 0x2fd   : > { %v19414_v48 = vld [vmem:[#allocation18_spill] sm:$0xff] }
 0x303   : > { %13271 = vmatmul.mubr.msk.bf16.gmra.mrb[84].mxu1 %vm2109_vm3, %v19407_v58  ;;  %13857 = vmatmul.mubr.msk.bf16.gmra.mrb[20].mxu0 %vm2109_vm3, %v19408_v33  ;;  %v19415_v58 = vld [vmem:[#allocation164_spill] sm:$0xff]  ;;  %v19416_v33 = vld [vmem:[#allocation19_spill] sm:$0xff] }
 0x304   : > { %13274 = vmatprep.mubr.msk.bf16.mxu1 %vm2109_vm3, %v19409_v14  ;;  %13860 = vmatprep.mubr.msk.bf16.mxu0 %vm2109_vm3, %v19410_v44  ;;  %v19417_v14 = vld [vmem:[#allocation166_spill] sm:$0xff]  ;;  %v19418_v44 = vld [vmem:[#allocation20_spill] sm:$0xff] }
 0x30b   : > { %13275 = vmatmul.mubr.msk.bf16.gmra.mrb[88].mxu1 %vm2109_vm3, %v19411_v61  ;;  %13861 = vmatmul.mubr.msk.bf16.gmra.mrb[24].mxu0 %vm2109_vm3, %v19412_v3  ;;  %v19419_v61 = vld [vmem:[#allocation172_spill] sm:$0xff]  ;;  %v19420_v3 = vld [vmem:[#allocation21_spill] sm:$0xff] }
 0x30c   : > { %13278 = vmatprep.mubr.msk.bf16.mxu1 %vm2109_vm3, %v19413_v21  ;;  %13864 = vmatprep.mubr.msk.bf16.mxu0 %vm2109_vm3, %v19414_v48  ;;  %v19421_v21 = vld [vmem:[#allocation174_spill] sm:$0xff] }
 0x30d   : > { %v19422_v48 = vld [vmem:[#allocation22_spill] sm:$0xff] }
 0x313   : > { %13279 = vmatmul.mubr.msk.bf16.gmra.mrb[92].mxu1 %vm2109_vm3, %v19415_v58  ;;  %13865 = vmatmul.mubr.msk.bf16.gmra.mrb[28].mxu0 %vm2109_vm3, %v19416_v33  ;;  %v19423_v33 = vld [vmem:[#allocation23_spill] sm:$0xff] }
 0x314   : > { %13282 = vmatprep.mubr.msk.bf16.mxu1 %vm2109_vm3, %v19417_v14  ;;  %13868 = vmatprep.mubr.msk.bf16.mxu0 %vm2109_vm3, %v19418_v44  ;;  %v19424_v44 = vld [vmem:[#allocation24_spill] sm:$0xff] }
 0x315   : > { %v19464_v14 = vld [vmem:[#allocation68_spill] sm:$0xff] }
 0x31b   : > { %13283 = vmatmul.mubr.msk.bf16.gmra.mrb[96].mxu1 %vm2109_vm3, %v19419_v61  ;;  %13869 = vmatmul.mubr.msk.bf16.gmra.mrb[32].mxu0 %vm2109_vm3, %v19420_v3  ;;  %v19425_v3 = vld [vmem:[#allocation25_spill] sm:$0xff]  ;;  %v19462_v61 = vld [vmem:[#allocation66_spill] sm:$0xff] }
 0x31c   : > { %13286 = vmatprep.mubr.msk.bf16.mxu1 %vm2109_vm3, %v19421_v21  ;;  %13872 = vmatprep.mubr.msk.bf16.mxu0 %vm2109_vm3, %v19422_v48  ;;  %v19426_v48 = vld [vmem:[#allocation26_spill] sm:$0xff]  ;;  %v19460_v21 = vld [vmem:[#allocation63_spill] sm:$0xff] }
 0x323   : > { %13287 = vmatmul.mubr.msk.bf16.gmra.mrb[100].mxu1 %vm2109_vm3, %v17218_v34  ;;  %13873 = vmatmul.mubr.msk.bf16.gmra.mrb[36].mxu0 %vm2109_vm3, %v19423_v33  ;;  %v19427_v33 = vld [vmem:[#allocation27_spill] sm:$0xff]  ;;  %v19458_v34 = vld [vmem:[#allocation61_spill] sm:$0xff] }
 0x324   : > { %13290 = vmatprep.mubr.msk.bf16.mxu1 %vm2109_vm3, %v17224_v46  ;;  %13876 = vmatprep.mubr.msk.bf16.mxu0 %vm2109_vm3, %v19424_v44  ;;  %v19428_v44 = vld [vmem:[#allocation28_spill] sm:$0xff] }
 0x325   : > { %v19456_v46 = vld [vmem:[#allocation60_spill] sm:$0xff] }
 0x32b   : > { %13291 = vmatmul.mubr.msk.bf16.gmra.mrb[104].mxu1 %vm2109_vm3, %v17251_v62  ;;  %13877 = vmatmul.mubr.msk.bf16.gmra.mrb[40].mxu0 %vm2109_vm3, %v19425_v3  ;;  %v19429_v3 = vld [vmem:[#allocation29_spill] sm:$0xff]  ;;  %v19454_v62 = vld [vmem:[#allocation58_spill] sm:$0xff] }
 0x32c   : > { %13294 = vmatprep.mubr.msk.bf16.mxu1 %vm2109_vm3, %v17257_v47  ;;  %13880 = vmatprep.mubr.msk.bf16.mxu0 %vm2109_vm3, %v19426_v48  ;;  %v19430_v48 = vld [vmem:[#allocation30_spill] sm:$0xff]  ;;  %v19452_v47 = vld [vmem:[#allocation55_spill] sm:$0xff] }
 0x333   : > { %13295 = vmatmul.mubr.msk.bf16.gmra.mrb[108].mxu1 %vm2109_vm3, %v17284_v53  ;;  %13881 = vmatmul.mubr.msk.bf16.gmra.mrb[44].mxu0 %vm2109_vm3, %v19427_v33  ;;  %v19431_v33 = vld [vmem:[#allocation31_spill] sm:$0xff]  ;;  %v19450_v53 = vld [vmem:[#allocation53_spill] sm:$0xff] }
 0x334   : > { %13298 = vmatprep.mubr.msk.bf16.mxu1 %vm2109_vm3, %v17290_v28  ;;  %13884 = vmatprep.mubr.msk.bf16.mxu0 %vm2109_vm3, %v19428_v44  ;;  %v19432_v44 = vld [vmem:[#allocation33_spill] sm:$0xff]  ;;  %v19447_v28 = vld [vmem:[#allocation139_spill] sm:$0xff] }
 0x33b   : > { %13299 = vmatmul.mubr.msk.bf16.gmra.mrb[112].mxu1 %vm2109_vm3, %v17317_v17  ;;  %13885 = vmatmul.mubr.msk.bf16.gmra.mrb[48].mxu0 %vm2109_vm3, %v19429_v3  ;;  %v19433_v3 = vld [vmem:[#allocation34_spill] sm:$0xff]  ;;  %v19445_v17 = vld [vmem:[#allocation133_spill] sm:$0xff] }
 0x33c   : > { %13302 = vmatprep.mubr.msk.bf16.mxu1 %vm2109_vm3, %v17323_v26  ;;  %13888 = vmatprep.mubr.msk.bf16.mxu0 %vm2109_vm3, %v19430_v48  ;;  %v19434_v48 = vld [vmem:[#allocation38_spill] sm:$0xff]  ;;  %v19443_v26 = vld [vmem:[#allocation131_spill] sm:$0xff] }
 0x343   : > { %13303 = vmatmul.mubr.msk.bf16.gmra.mrb[116].mxu1 %vm2109_vm3, %v17352_v0  ;;  %13889 = vmatmul.mubr.msk.bf16.gmra.mrb[52].mxu0 %vm2109_vm3, %v19431_v33  ;;  %v19435_v33 = vld [vmem:[#allocation39_spill] sm:$0xff]  ;;  %v19441_v0 = vld [vmem:[#allocation125_spill] sm:$0xff] }
 0x344   : > { %13306 = vmatprep.mubr.msk.bf16.mxu1 %vm2109_vm3, %v17363_v29  ;;  %13892 = vmatprep.mubr.msk.bf16.mxu0 %vm2109_vm3, %v19432_v44  ;;  %v19436_v29 = vld [vmem:[#allocation117_spill] sm:$0xff]  ;;  %v19437_v44 = vld [vmem:[#allocation42_spill] sm:$0xff] }
 0x34b   : > { %13307 = vmatmul.mubr.msk.bf16.gmra.mrb[120].mxu1 %vm2109_vm3, %v17399_v18  ;;  %13893 = vmatmul.mubr.msk.bf16.gmra.mrb[56].mxu0 %vm2109_vm3, %v19433_v3  ;;  %v19438_v18 = vld [vmem:[#allocation123_spill] sm:$0xff]  ;;  %v19439_v3 = vld [vmem:[#allocation44_spill] sm:$0xff] }
 0x34c   : > { %13310 = vmatprep.mubr.msk.bf16.mxu1 %vm2109_vm3, %v17405_v60  ;;  %13896 = vmatprep.mubr.msk.bf16.mxu0 %vm2109_vm3, %v19434_v48  ;;  %v19440_v60 = vld [vmem:[#allocation2_spill] sm:$0xff] }
 0x353   : > { %13311 = vmatmul.mubr.msk.bf16.gmra.mrb[124].mxu1 %vm2109_vm3, %v17437_v39  ;;  %13897 = vmatmul.mubr.msk.bf16.gmra.mrb[60].mxu0 %vm2109_vm3, %v19435_v33  ;;  %v19442_v39 = vld [vmem:[#allocation45_spill] sm:$0xff] }
 0x354   : > { %13316 = vmatprep.mubr.msk.bf16.mxu1 %vm2109_vm3, %v19436_v29  ;;  %13900 = vmatprep.mubr.msk.bf16.mxu0 %vm2109_vm3, %v19437_v44  ;;  %v19444_v29 = vld [vmem:[#allocation47_spill] sm:$0xff] }
 0x35b   : > { %13317 = vmatmul.mubr.msk.bf16.vlgmr.msra.gmra.mrb[0].mxu1 %vm2109_vm3, %v19438_v18  ;;  %13901 = vmatmul.mubr.msk.bf16.gmra.mrb[64].mxu0 %vm2109_vm3, %v19439_v3  ;;  %v19446_v18 = vld [vmem:[#allocation50_spill] sm:$0xff] }
 0x35c   : > { %14095 = vmatpush3.bf16.msra.mxu1 %v19440_v60  ;;  %13320 = vmatprep.mubr.msk.bf16.mxu1 %vm2109_vm3, %v19441_v0  ;;  %v19448_v60 = vld [vmem:[#allocation52_spill] sm:$0xff]  ;;  %v19449_v0 = vld [vmem:[#allocation141_spill] sm:$0xff] }
 0x35d   : > { %13904 = vmatprep.mubr.msk.bf16.mxu0 %vm2109_vm3, %v19442_v39 }
 0x363   : > { %13321 = vmatmul.mubr.msk.bf16.gmra.mrb[4].mxu1 %vm2109_vm3, %v19443_v26  ;;  %13905 = vmatmul.mubr.msk.bf16.gmra.mrb[68].mxu0 %vm2109_vm3, %v19444_v29  ;;  %v19451_v26 = vld [vmem:[#allocation147_spill] sm:$0xff] }
 0x364   : > { %13324 = vmatprep.mubr.msk.bf16.mxu1 %vm2109_vm3, %v19445_v17  ;;  %13908 = vmatprep.mubr.msk.bf16.mxu0 %vm2109_vm3, %v19446_v18  ;;  %v19453_v17 = vld [vmem:[#allocation149_spill] sm:$0xff] }
 0x36b   : > { %13325 = vmatmul.mubr.msk.bf16.gmra.mrb[8].mxu1 %vm2109_vm3, %v19447_v28  ;;  %13909 = vmatmul.mubr.msk.bf16.gmra.mrb[72].mxu0 %vm2109_vm3, %v19448_v60  ;;  %v19455_v28 = vld [vmem:[#allocation155_spill] sm:$0xff] }
 0x36c   : > { %13328 = vmatprep.mubr.msk.bf16.mxu1 %vm2109_vm3, %v19449_v0  ;;  %13912 = vmatprep.mubr.msk.bf16.mxu0 %vm2109_vm3, %v19450_v53  ;;  %v19457_v0 = vld [vmem:[#allocation157_spill] sm:$0xff]  ;;  %v6152_v53 = vshrl.u32 %v17411_v54, 16  ;;  %v19485_v60 = vld [vmem:[#allocation195_spill] sm:$0xff] }
 0x373   : > { %13329 = vmatmul.mubr.msk.bf16.gmra.mrb[12].mxu1 %vm2109_vm3, %v19451_v26  ;;  %13913 = vmatmul.mubr.msk.bf16.gmra.mrb[76].mxu0 %vm2109_vm3, %v19452_v47  ;;  %v19459_v26 = vld [vmem:[#allocation163_spill] sm:$0xff]  ;;  %v19483_v47 = vld [vmem:[#allocation193_spill] sm:$0xff] }
 0x374   : > { %13332 = vmatprep.mubr.msk.bf16.mxu1 %vm2109_vm3, %v19453_v17  ;;  %13916 = vmatprep.mubr.msk.bf16.mxu0 %vm2109_vm3, %v19454_v62  ;;  %v19461_v17 = vld [vmem:[#allocation165_spill] sm:$0xff] }
 0x37b   : > { %13333 = vmatmul.mubr.msk.bf16.gmra.mrb[16].mxu1 %vm2109_vm3, %v19455_v28  ;;  %13917 = vmatmul.mubr.msk.bf16.gmra.mrb[80].mxu0 %vm2109_vm3, %v19456_v46  ;;  %v19463_v28 = vld [vmem:[#allocation171_spill] sm:$0xff] }
 0x37c   : > { %13336 = vmatprep.mubr.msk.bf16.mxu1 %vm2109_vm3, %v19457_v0  ;;  %13920 = vmatprep.mubr.msk.bf16.mxu0 %vm2109_vm3, %v19458_v34  ;;  %v19465_v0 = vld [vmem:[#allocation173_spill] sm:$0xff] }
 0x37d   : > { %v19466_v34 = vld [vmem:[#allocation69_spill] sm:$0xff] }
 0x383   : > { %13337 = vmatmul.mubr.msk.bf16.gmra.mrb[20].mxu1 %vm2109_vm3, %v19459_v26  ;;  %13921 = vmatmul.mubr.msk.bf16.gmra.mrb[84].mxu0 %vm2109_vm3, %v19460_v21  ;;  %v19467_v26 = vld [vmem:[#allocation177_spill] sm:$0xff]  ;;  %v19468_v21 = vld [vmem:[#allocation71_spill] sm:$0xff] }
 0x384   : > { %13340 = vmatprep.mubr.msk.bf16.mxu1 %vm2109_vm3, %v19461_v17  ;;  %13924 = vmatprep.mubr.msk.bf16.mxu0 %vm2109_vm3, %v19462_v61  ;;  %v19469_v17 = vld [vmem:[#allocation179_spill] sm:$0xff]  ;;  %v19470_v61 = vld [vmem:[#allocation74_spill] sm:$0xff] }
 0x38b   : > { %13341 = vmatmul.mubr.msk.bf16.gmra.mrb[24].mxu1 %vm2109_vm3, %v19463_v28  ;;  %13925 = vmatmul.mubr.msk.bf16.gmra.mrb[88].mxu0 %vm2109_vm3, %v19464_v14  ;;  %v19471_v28 = vld [vmem:[#allocation181_spill] sm:$0xff]  ;;  %v19472_v14 = vld [vmem:[#allocation76_spill] sm:$0xff] }
 0x38c   : > { %13344 = vmatprep.mubr.msk.bf16.mxu1 %vm2109_vm3, %v19465_v0  ;;  %13928 = vmatprep.mubr.msk.bf16.mxu0 %vm2109_vm3, %v19466_v34  ;;  %v19473_v0 = vld [vmem:[#allocation183_spill] sm:$0xff]  ;;  %v19474_v34 = vld [vmem:[#allocation77_spill] sm:$0xff] }
 0x393   : > { %13345 = vmatmul.mubr.msk.bf16.gmra.mrb[28].mxu1 %vm2109_vm3, %v19467_v26  ;;  %13929 = vmatmul.mubr.msk.bf16.gmra.mrb[92].mxu0 %vm2109_vm3, %v19468_v21  ;;  %v19475_v26 = vld [vmem:[#allocation185_spill] sm:$0xff]  ;;  %v19476_v21 = vld [vmem:[#allocation79_spill] sm:$0xff] }
 0x394   : > { %13348 = vmatprep.mubr.msk.bf16.mxu1 %vm2109_vm3, %v19469_v17  ;;  %13932 = vmatprep.mubr.msk.bf16.mxu0 %vm2109_vm3, %v19470_v61  ;;  %v19477_v17 = vld [vmem:[#allocation187_spill] sm:$0xff]  ;;  %v19478_v61 = vld [vmem:[#allocation82_spill] sm:$0xff] }
 0x39b   : > { %13349 = vmatmul.mubr.msk.bf16.gmra.mrb[32].mxu1 %vm2109_vm3, %v19471_v28  ;;  %13933 = vmatmul.mubr.msk.bf16.gmra.mrb[96].mxu0 %vm2109_vm3, %v19472_v14  ;;  %v19479_v28 = vld [vmem:[#allocation189_spill] sm:$0xff]  ;;  %v19480_v14 = vld [vmem:[#allocation84_spill] sm:$0xff] }
 0x39c   : > { %13352 = vmatprep.mubr.msk.bf16.mxu1 %vm2109_vm3, %v19473_v0  ;;  %13936 = vmatprep.mubr.msk.bf16.mxu0 %vm2109_vm3, %v19474_v34  ;;  %v19481_v0 = vld [vmem:[#allocation191_spill] sm:$0xff]  ;;  %v19482_v34 = vld [vmem:[#allocation85_spill] sm:$0xff] }
 0x3a3   : > { %13353 = vmatmul.mubr.msk.bf16.gmra.mrb[36].mxu1 %vm2109_vm3, %v19475_v26  ;;  %13937 = vmatmul.mubr.msk.bf16.gmra.mrb[100].mxu0 %vm2109_vm3, %v19476_v21  ;;  %v6119_v26 = vshrl.u32 %v17390_v35, 16  ;;  %v6122_v21 = vshll.u32 %v17390_v35, 16  ;;  %v6148_v35 = vshll.u32 %v17411_v54, 16  ;;  %v6154_v54 = vrot.slane %v6152_v53, 4 }
 0x3a4   : > { %13356 = vmatprep.mubr.msk.bf16.mxu1 %vm2109_vm3, %v19477_v17  ;;  %13940 = vmatprep.mubr.msk.bf16.mxu0 %vm2109_vm3, %v19478_v61  ;;  %v6128_v17 = vshll.u32 %v17369_v56, 16  ;;  %v6132_v61 = vshrl.u32 %v17369_v56, 16  ;;  %v19486_v56 = vld [vmem:[#allocation91_spill] sm:$0xff] }
 0x3a5   : > { %v6121_v58 = vrot.slane %v6119_v26, 4  ;;  %v6124_v46 = vrot.slane %v6122_v21, 5  ;;  %v8254_v26 = vshll.u32 %v17878_v50, 16  ;;  %v6150_v29 = vrot.slane %v6148_v35, 5  ;;  %v19489_v35 = vld [vmem:[#allocation201_spill] sm:$0xff] }
 0x3a6   : > { %v6134_v62 = vrot.slane %v6132_v61, 4  ;;  %v6158_v53 = vshll.u32 %v19489_v35, 16 }
 0x3a7   : > { %v6125_v21 = vor.u32 %v6124_v46, %v6121_v58  ;;  %v8256_v44 = vrot.slane %v8254_v26, 5  ;;  %v8274_v46 = vshrl.u32 %v17897_v1, 16  ;;  %v19487_v58 = vld [vmem:[#allocation197_spill] sm:$0xff] }
 0x3a9   : > { %v6126_v39 = vrot.slane %v6125_v21, 4  ;;  %v19490_v21 = vld [vmem:[#allocation199_spill] sm:$0xff] }
 0x3ab   : > { %13357 = vmatmul.mubr.msk.bf16.gmra.mrb[40].mxu1 %vm2109_vm3, %v19479_v28  ;;  %13941 = vmatmul.mubr.msk.bf16.gmra.mrb[104].mxu0 %vm2109_vm3, %v19480_v14  ;;  %v6130_v28 = vrot.slane %v6128_v17, 5  ;;  %v19484_v14 = vld [vmem:[#allocation87_spill] sm:$0xff]  ;;  %v8264_v17 = vshrl.u32 %v17881_v5, 16 }
 0x3ac   : > { %13360 = vmatprep.mubr.msk.bf16.mxu1 %vm2109_vm3, %v19481_v0  ;;  %13944 = vmatprep.mubr.msk.bf16.mxu0 %vm2109_vm3, %v19482_v34  ;;  %v6138_v0 = vshll.u32 %v17393_v27, 16  ;;  %v6142_v34 = vshrl.u32 %v17393_v27, 16  ;;  %v8260_v27 = vshll.u32 %v17881_v5, 16  ;;  %v6160_v5 = vrot.slane %v6158_v53, 5 }
 0x3ad   : > { %v6135_v61 = vor.u32 %v6134_v62, %v6130_v28  ;;  %v8284_v62 = vshrl.u32 %v17900_v43, 16  ;;  %v6131_v26 = vsel %vm15535_vm4, %v6126_v39, %v6130_v28 }
 0x3ae   : > { %v6144_v18 = vrot.slane %v6142_v34, 4  ;;  %v8262_v33 = vrot.slane %v8260_v27, 5  ;;  %v6155_v34 = vor.u32 %v6154_v54, %v6150_v29  ;;  %v8270_v27 = vshll.u32 %v17897_v1, 16 }
 0x3af   : > { %v6136_v3 = vrot.slane %v6135_v61, 4  ;;  %v19491_v61 = vld [vmem:[#allocation97_spill] sm:$0xff]  ;;  %v8286_v20 = vrot.slane %v8284_v62, 4 }
 0x3b0   : > { %v8272_v48 = vrot.slane %v8270_v27, 5 }
 0x3b3   : > { %13361 = vmatmul.mubr.msk.bf16.gmra.mrb[44].mxu1 %vm2109_vm3, %v19483_v47  ;;  %13945 = vmatmul.mubr.msk.bf16.gmra.mrb[108].mxu0 %vm2109_vm3, %v19484_v14  ;;  %v8251_v47 = vshrl.u32 %v17878_v50, 16  ;;  %v6140_v14 = vrot.slane %v6138_v0, 5  ;;  %v19488_v50 = vld [vmem:[#allocation93_spill] sm:$0xff] }
 0x3b4   : > { %13364 = vmatprep.mubr.msk.bf16.mxu1 %vm2109_vm3, %v19485_v60  ;;  %13948 = vmatprep.mubr.msk.bf16.mxu0 %vm2109_vm3, %v19486_v56  ;;  %v8266_v56 = vrot.slane %v8264_v17, 4 }
 0x3b5   : > { %v8253_v60 = vrot.slane %v8251_v47, 4  ;;  %v6145_v0 = vor.u32 %v6144_v18, %v6140_v14  ;;  %v6141_v17 = vsel %vm15535_vm4, %v6136_v3, %v6140_v14  ;;  %v8280_v18 = vshll.u32 %v17900_v43, 16  ;;  %v19493_v14 = vld [vmem:[#allocation202_spill] sm:$0xff]  ;;  %v19494_v3 = vld [vmem:[#allocation105_spill] sm:$0xff] }
 0x3b6   : > { %v18167_v35 = vcombine.low %v6131_v26, %v6141_v17 }
 0x3b7   : > { %v8257_v54 = vor.u32 %v8256_v44, %v8253_v60  ;;  %v8282_v12 = vrot.slane %v8280_v18, 5  ;;  %v19496_v18 = vld [vmem:[#allocation89_spill] sm:$0xff] }
 0x3b9   : > { %v8258_v39 = vrot.slane %v8257_v54, 4  ;;  %v8287_v62 = vor.u32 %v8286_v20, %v8282_v12  ;;  %v19521_v54 = vld [vmem:[#allocation119_spill] sm:$0xff] }
 0x3bb   : > { %13365 = vmatmul.mubr.msk.bf16.gmra.mrb[48].mxu1 %vm2109_vm3, %v19487_v58  ;;  %13949 = vmatmul.mubr.msk.bf16.gmra.mrb[112].mxu0 %vm2109_vm3, %v19488_v50  ;;  %v8267_v58 = vor.u32 %v8266_v56, %v8262_v33  ;;  %v6146_v50 = vrot.slane %v6145_v0, 4  ;;  %v19495_v56 = vld [vmem:[#allocation204_spill] sm:$0xff]  ;;  %v8290_v0 = vshll.u32 %v18170_v7, 16  ;;  %v8288_v17 = vrot.slane %v8287_v62, 4  ;;  %v19527_v62 = vld [vmem:[#allocation122_spill] sm:$0xff] }
 0x3bc   : > { %13368 = vmatprep.mubr.msk.bf16.mxu1 %vm2109_vm3, %v19490_v21  ;;  %13952 = vmatprep.mubr.msk.bf16.mxu0 %vm2109_vm3, %v19491_v61  ;;  %v6156_v21 = vrot.slane %v6155_v34, 4  ;;  %v8276_v61 = vrot.slane %v8274_v46, 4  ;;  %v8263_v34 = vsel %vm15535_vm4, %v8258_v39, %v8262_v33  ;;  %v19524_v39 = vld [vmem:[#allocation98_spill] sm:$0xff] }
 0x3bd   : > { %v8268_v28 = vrot.slane %v8267_v58, 4  ;;  %v6151_v44 = vsel %vm15535_vm4, %v6146_v50, %v6150_v29  ;;  %v8292_v27 = vrot.slane %v8290_v0, 5  ;;  %v19522_v58 = vld [vmem:[#allocation92_spill] sm:$0xff] }
 0x3be   : > { %v6161_v60 = vsel %vm15535_vm4, %v6156_v21, %v6160_v5  ;;  %v8277_v46 = vor.u32 %v8276_v61, %v8272_v48  ;;  %v19497_v5 = vld [vmem:[#allocation95_spill] sm:$0xff]  ;;  %v19498_v61 = vld [vmem:[#allocation94_spill] sm:$0xff]  ;;  %v19523_v21 = vld [vmem:[#allocation121_spill] sm:$0xff] }
 0x3bf   : > { %v8273_v53 = vsel %vm15535_vm4, %v8268_v28, %v8272_v48  ;;  %v18189_v50 = vcombine.low %v6151_v44, %v6161_v60  ;;  %v8293_v48 = vsel %vm15535_vm4, %v8288_v17, %v8292_v27  ;;  %v19525_v60 = vld [vmem:[#allocation120_spill] sm:$0xff] }
 0x3c0   : > { %v11562_v29 = vcombine.low %v8263_v34, %v8273_v53  ;;  %v8278_v26 = vrot.slane %v8277_v46, 4  ;;  %v19526_v46 = vld [vmem:[#allocation106_spill] sm:$0xff]  ;;  %v19528_v0 = vld [vmem:[#allocation108_spill] sm:$0xff] }
 0x3c1   : > { %v19529_v17 = vld [vmem:[#allocation128_spill] sm:$0xff] }
 0x3c2   : > { %v8283_v20 = vsel %vm15535_vm4, %v8278_v26, %v8282_v12  ;;  %v19499_v12 = vld [vmem:[#allocation96_spill] sm:$0xff] }
 0x3c3   : > { %13369 = vmatmul.mubr.msk.bf16.gmra.mrb[52].mxu1 %vm2109_vm3, %v19493_v14  ;;  %13953 = vmatmul.mubr.msk.bf16.gmra.mrb[116].mxu0 %vm2109_vm3, %v19494_v3  ;;  %v11563_v33 = vcombine.low %v8283_v20, %v8293_v48  ;;  %v19530_v27 = vld [vmem:[#allocation116_spill] sm:$0xff] }
 0x3c4   : > { %13372 = vmatprep.mubr.msk.bf16.mxu1 %vm2109_vm3, %v19495_v56  ;;  %13956 = vmatprep.mubr.msk.bf16.mxu0 %vm2109_vm3, %v18167_v35 }
 0x3cb   : > { %13373 = vmatmul.mubr.msk.bf16.gmra.mrb[56].mxu1 %vm2109_vm3, %v19496_v18  ;;  %13957 = vmatmul.mubr.msk.bf16.gmra.mrb[120].mxu0 %vm2109_vm3, %v18189_v50  ;;  %v19531_v18 = vld [vmem:[#allocation38_spill] sm:$0xff] }
 0x3cc   : > { %13376 = vmatprep.mubr.msk.bf16.mxu1 %vm2109_vm3, %v19497_v5  ;;  %13960 = vmatprep.mubr.msk.bf16.mxu0 %vm2109_vm3, %v11562_v29  ;;  %v19532_v5 = vld [vmem:[#allocation118_spill] sm:$0xff] }
 0x3d3   : > { %13377 = vmatmul.mubr.msk.bf16.gmra.mrb[60].mxu1 %vm2109_vm3, %v19498_v61  ;;  %13961 = vmatmul.mubr.msk.bf16.gmra.mrb[124].mxu0 %vm2109_vm3, %v11563_v33 }
 0x3d4   : > { %13380 = vmatprep.mubr.msk.bf16.mxu1 %vm2109_vm3, %v17489_v10  ;;  %13966 = vmatprep.mubr.msk.bf16.mxu0 %vm2109_vm3, %v19353_v49  ;;  %v19500_v10 = vld [vmem:[#allocation70_spill] sm:$0xff]  ;;  %v19513_v49 = vld [vmem:[#allocation107_spill] sm:$0xff] }
 0x3db   : > { %13381 = vmatmul.mubr.msk.bf16.gmra.mrb[64].mxu1 %vm2109_vm3, %v17503_v57  ;;  %13967 = vmatmul.mubr.msk.bf16.vlgmr.msra.gmra.mrb[0].mxu0 %vm2109_vm3, %v19354_v31  ;;  %v19501_v57 = vld [vmem:[#allocation100_spill] sm:$0xff]  ;;  %v19514_v31 = vld [vmem:[#allocation83_spill] sm:$0xff] }
 0x3dc   : > { %13384 = vmatprep.mubr.msk.bf16.mxu1 %vm2109_vm3, %v17507_v51  ;;  %13970 = vmatprep.mubr.msk.bf16.mxu0 %vm2109_vm3, %v19355_v52  ;;  %v19502_v51 = vld [vmem:[#allocation72_spill] sm:$0xff]  ;;  %v19515_v52 = vld [vmem:[#allocation111_spill] sm:$0xff] }
 0x3e3   : > { %13385 = vmatmul.mubr.msk.bf16.gmra.mrb[68].mxu1 %vm2109_vm3, %v17519_v25  ;;  %13971 = vmatmul.mubr.msk.bf16.gmra.mrb[4].mxu0 %vm2109_vm3, %v19356_v13  ;;  %v19503_v25 = vld [vmem:[#allocation99_spill] sm:$0xff]  ;;  %v19516_v13 = vld [vmem:[#allocation86_spill] sm:$0xff] }
 0x3e4   : > { %13388 = vmatprep.mubr.msk.bf16.mxu1 %vm2109_vm3, %v17523_v4  ;;  %13974 = vmatprep.mubr.msk.bf16.mxu0 %vm2109_vm3, %v19357_v63  ;;  %v19504_v4 = vld [vmem:[#allocation73_spill] sm:$0xff] }
 0x3eb   : > { %13389 = vmatmul.mubr.msk.bf16.gmra.mrb[72].mxu1 %vm2109_vm3, %v17535_v19  ;;  %13975 = vmatmul.mubr.msk.bf16.gmra.mrb[8].mxu0 %vm2109_vm3, %v19358_v9  ;;  %v19505_v19 = vld [vmem:[#allocation112_spill] sm:$0xff] }
 0x3ec   : > { %13392 = vmatprep.mubr.msk.bf16.mxu1 %vm2109_vm3, %v17539_v45  ;;  %13978 = vmatprep.mubr.msk.bf16.mxu0 %vm2109_vm3, %v19359_v36  ;;  %v19507_v45 = vld [vmem:[#allocation104_spill] sm:$0xff] }
 0x3f3   : > { %13393 = vmatmul.mubr.msk.bf16.gmra.mrb[76].mxu1 %vm2109_vm3, %v17551_v16  ;;  %13979 = vmatmul.mubr.msk.bf16.gmra.mrb[12].mxu0 %vm2109_vm3, %v19360_v23  ;;  %v19508_v16 = vld [vmem:[#allocation78_spill] sm:$0xff] }
 0x3f4   : > { %13396 = vmatprep.mubr.msk.bf16.mxu1 %vm2109_vm3, %v17555_v2  ;;  %13982 = vmatprep.mubr.msk.bf16.mxu0 %vm2109_vm3, %v19361_v30  ;;  %v19509_v2 = vld [vmem:[#allocation103_spill] sm:$0xff]  ;;  %v19517_v30 = vld [vmem:[#allocation110_spill] sm:$0xff] }
 0x3fb   : > { %13397 = vmatmul.mubr.msk.bf16.gmra.mrb[80].mxu1 %vm2109_vm3, %v17567_v59  ;;  %13983 = vmatmul.mubr.msk.bf16.gmra.mrb[16].mxu0 %vm2109_vm3, %v19362_v42  ;;  %v19510_v59 = vld [vmem:[#allocation80_spill] sm:$0xff] }
 0x3fc   : > { %13400 = vmatprep.mubr.msk.bf16.mxu1 %vm2109_vm3, %v17571_v37  ;;  %13986 = vmatprep.mubr.msk.bf16.mxu0 %vm2109_vm3, %v19363_v22  ;;  %v19511_v37 = vld [vmem:[#allocation109_spill] sm:$0xff]  ;;  %v19518_v42 = vld [vmem:[#allocation88_spill] sm:$0xff] }
 0x3fd   : > { %v19519_v22 = vld [vmem:[#allocation113_spill] sm:$0xff] }
 0x403   : > { %13401 = vmatmul.mubr.msk.bf16.gmra.mrb[84].mxu1 %vm2109_vm3, %v17583_v41  ;;  %13987 = vmatmul.mubr.msk.bf16.gmra.mrb[20].mxu0 %vm2109_vm3, %v19364_v11  ;;  %v19512_v41 = vld [vmem:[#allocation81_spill] sm:$0xff]  ;;  %v19520_v11 = vld [vmem:[#allocation90_spill] sm:$0xff] }
 0x404   : > { %13404 = vmatprep.mubr.msk.bf16.mxu1 %vm2109_vm3, %v17587_v24  ;;  %13990 = vmatprep.mubr.msk.bf16.mxu0 %vm2109_vm3, %v19365_v40 }
 0x40b   : > { %13405 = vmatmul.mubr.msk.bf16.gmra.mrb[88].mxu1 %vm2109_vm3, %v17599_v55  ;;  %13991 = vmatmul.mubr.msk.bf16.gmra.mrb[24].mxu0 %vm2109_vm3, %v19366_v8 }
 0x40c   : > { %13408 = vmatprep.mubr.msk.bf16.mxu1 %vm2109_vm3, %v17603_v32  ;;  %13994 = vmatprep.mubr.msk.bf16.mxu0 %vm2109_vm3, %v19367_v15 }
 0x413   : > { %13409 = vmatmul.mubr.msk.bf16.gmra.mrb[92].mxu1 %vm2109_vm3, %v17615_v38  ;;  %13995 = vmatmul.mubr.msk.bf16.gmra.mrb[28].mxu0 %vm2109_vm3, %v19368_v6  ;;  %v19506_v6 = vld [vmem:[#allocation75_spill] sm:$0xff] }
 0x414   : > { %13412 = vmatprep.mubr.msk.bf16.mxu1 %vm2109_vm3, %v19499_v12  ;;  %13998 = vmatprep.mubr.msk.bf16.mxu0 %vm2109_vm3, %v19500_v10  ;;  %v19533_v12 = vld [vmem:[#allocation39_spill] sm:$0xff]  ;;  %v19534_v10 = vld [vmem:[#allocation124_spill] sm:$0xff] }
 0x41b   : > { %13413 = vmatmul.mubr.msk.bf16.gmra.mrb[96].mxu1 %vm2109_vm3, %v19501_v57  ;;  %13999 = vmatmul.mubr.msk.bf16.gmra.mrb[32].mxu0 %vm2109_vm3, %v19502_v51  ;;  %v19535_v57 = vld [vmem:[#allocation42_spill] sm:$0xff] }
 0x41c   : > { %13416 = vmatprep.mubr.msk.bf16.mxu1 %vm2109_vm3, %v19503_v25  ;;  %14002 = vmatprep.mubr.msk.bf16.mxu0 %vm2109_vm3, %v19504_v4  ;;  %v19536_v51 = vld [vmem:[#allocation126_spill] sm:$0xff] }
 0x423   : > { %13417 = vmatmul.mubr.msk.bf16.gmra.mrb[100].mxu1 %vm2109_vm3, %v19505_v19  ;;  %14003 = vmatmul.mubr.msk.bf16.gmra.mrb[36].mxu0 %vm2109_vm3, %v19506_v6 }
 0x424   : > { %13420 = vmatprep.mubr.msk.bf16.mxu1 %vm2109_vm3, %v19507_v45  ;;  %14006 = vmatprep.mubr.msk.bf16.mxu0 %vm2109_vm3, %v19508_v16  ;;  %v19537_v45 = vld [vmem:[#allocation44_spill] sm:$0xff] }
 0x425   : > { %v19538_v16 = vld [vmem:[#allocation132_spill] sm:$0xff] }
 0x42b   : > { %13421 = vmatmul.mubr.msk.bf16.gmra.mrb[104].mxu1 %vm2109_vm3, %v19509_v2  ;;  %14007 = vmatmul.mubr.msk.bf16.gmra.mrb[40].mxu0 %vm2109_vm3, %v19510_v59  ;;  %v19539_v2 = vld [vmem:[#allocation45_spill] sm:$0xff]  ;;  %v19540_v59 = vld [vmem:[#allocation134_spill] sm:$0xff] }
 0x42c   : > { %13424 = vmatprep.mubr.msk.bf16.mxu1 %vm2109_vm3, %v19511_v37  ;;  %14010 = vmatprep.mubr.msk.bf16.mxu0 %vm2109_vm3, %v19512_v41 }
 0x42e   : > { %v18297_v24 = vpop.f32.mrb[0].mxu1 }
 0x42f   : > { %v18299_v55 = vpop.f32.mrb[1].mxu1 }
 0x430   : > { %v18301_v32 = vpop.f32.mrb[2].mxu1 }
 0x431   : > { %v18303_v38 = vpop.f32.mrb[3].mxu1 }
 0x433   : > { %13425 = vmatmul.mubr.msk.bf16.gmra.mrb[108].mxu1 %vm2109_vm3, %v19513_v49  ;;  %14011 = vmatmul.mubr.msk.bf16.gmra.mrb[44].mxu0 %vm2109_vm3, %v19514_v31 }
 0x434   : > { %13428 = vmatprep.mubr.msk.bf16.mxu1 %vm2109_vm3, %v19515_v52  ;;  %14014 = vmatprep.mubr.msk.bf16.mxu0 %vm2109_vm3, %v19516_v13  ;;  %v19541_v52 = vld [vmem:[#allocation47_spill] sm:$0xff]  ;;  %v19542_v13 = vld [vmem:[#allocation140_spill] sm:$0xff] }
 0x436   : > { %v18313_v63 = vpop.f32.mrb[4].mxu1 }
 0x437   : > { %v18315_v9 = vpop.f32.mrb[5].mxu1 }
 0x438   : > { %v18317_v36 = vpop.f32.mrb[6].mxu1 }
 0x439   : > { %v18319_v23 = vpop.f32.mrb[7].mxu1 }
 0x43b   : > { %13429 = vmatmul.mubr.msk.bf16.gmra.mrb[112].mxu1 %vm2109_vm3, %v19517_v30  ;;  %14015 = vmatmul.mubr.msk.bf16.gmra.mrb[48].mxu0 %vm2109_vm3, %v19518_v42  ;;  %v19543_v30 = vld [vmem:[#allocation50_spill] sm:$0xff] }
 0x43c   : > { %13432 = vmatprep.mubr.msk.bf16.mxu1 %vm2109_vm3, %v19519_v22  ;;  %14018 = vmatprep.mubr.msk.bf16.mxu0 %vm2109_vm3, %v19520_v11  ;;  %v19544_v42 = vld [vmem:[#allocation142_spill] sm:$0xff] }
 0x43e   : > { %v18329_v40 = vpop.f32.mrb[8].mxu1 }
 0x43f   : > { %v18331_v8 = vpop.f32.mrb[9].mxu1 }
 0x440   : > { %v18333_v15 = vpop.f32.mrb[10].mxu1 }
 0x441   : > { %v18335_v47 = vpop.f32.mrb[11].mxu1 }
 0x443   : > { %13433 = vmatmul.mubr.msk.bf16.gmra.mrb[116].mxu1 %vm2109_vm3, %v19521_v54  ;;  %14019 = vmatmul.mubr.msk.bf16.gmra.mrb[52].mxu0 %vm2109_vm3, %v19522_v58 }
 0x444   : > { %13436 = vmatprep.mubr.msk.bf16.mxu1 %vm2109_vm3, %v19523_v21  ;;  %14022 = vmatprep.mubr.msk.bf16.mxu0 %vm2109_vm3, %v19524_v39  ;;  %v19545_v21 = vld [vmem:[#allocation52_spill] sm:$0xff] }
 0x445   : > { %v19546_v39 = vld [vmem:[#allocation148_spill] sm:$0xff] }
 0x446   : > { %v18345_v28 = vpop.f32.mrb[12].mxu1 }
 0x447   : > { %v18347_v14 = vpop.f32.mrb[13].mxu1 }
 0x448   : > { %v18349_v44 = vpop.f32.mrb[14].mxu1 }
 0x449   : > { %v18351_v56 = vpop.f32.mrb[15].mxu1 }
 0x44b   : > { %13437 = vmatmul.mubr.msk.bf16.gmra.mrb[120].mxu1 %vm2109_vm3, %v19525_v60  ;;  %14023 = vmatmul.mubr.msk.bf16.gmra.mrb[56].mxu0 %vm2109_vm3, %v19526_v46  ;;  %v19547_v60 = vld [vmem:[#allocation53_spill] sm:$0xff]  ;;  %v19548_v46 = vld [vmem:[#allocation150_spill] sm:$0xff] }
 0x44c   : > { %13440 = vmatprep.mubr.msk.bf16.mxu1 %vm2109_vm3, %v19527_v62  ;;  %14026 = vmatprep.mubr.msk.bf16.mxu0 %vm2109_vm3, %v19528_v0 }
 0x44e   : > { %v18361_v34 = vpop.f32.mrb[16].mxu1 }
 0x44f   : > { %v18363_v53 = vpop.f32.mrb[17].mxu1 }
 0x450   : > { %v18365_v29 = vpop.f32.mrb[18].mxu1 }
 0x451   : > { %v18367_v26 = vpop.f32.mrb[19].mxu1 }
 0x453   : > { %13441 = vmatmul.mubr.msk.bf16.gmra.mrb[124].mxu1 %vm2109_vm3, %v19529_v17  ;;  %14027 = vmatmul.mubr.msk.bf16.gmra.mrb[60].mxu0 %vm2109_vm3, %v19530_v27 }
 0x454   : > { %13510 = vmatprep.mubr.msk.bf16.mxu1 %vm2109_vm3, %v19531_v18  ;;  %14030 = vmatprep.mubr.msk.bf16.mxu0 %vm2109_vm3, %v19532_v5  ;;  %v19549_v18 = vld [vmem:[#allocation55_spill] sm:$0xff]  ;;  %v19550_v5 = vld [vmem:[#allocation156_spill] sm:$0xff] }
 0x456   : > { %v18377_v20 = vpop.f32.mrb[20].mxu1 }
 0x457   : > { %v18379_v48 = vpop.f32.mrb[21].mxu1 }
 0x458   : > { %v18381_v33 = vpop.f32.mrb[22].mxu1 }
 0x459   : > { %v18383_v61 = vpop.f32.mrb[23].mxu1 }
 0x45b   : > { %13511 = vmatmul.mubr.msk.bf16.vlgmr.msra.gmra.mrb[64].mxu1 %vm2109_vm3, %v19533_v12  ;;  %14031 = vmatmul.mubr.msk.bf16.gmra.mrb[64].mxu0 %vm2109_vm3, %v19534_v10  ;;  %v19551_v12 = vld [vmem:[#allocation58_spill] sm:$0xff] }
 0x45c   : > { %13514 = vmatprep.mubr.msk.bf16.mxu1 %vm2109_vm3, %v19535_v57  ;;  %14034 = vmatprep.mubr.msk.bf16.mxu0 %vm2109_vm3, %v19536_v51  ;;  %v19552_v10 = vld [vmem:[#allocation158_spill] sm:$0xff] }
 0x45e   : > { %v18393_v25 = vpop.f32.mrb[24].mxu1 }
 0x45f   : > { %v18395_v4 = vpop.f32.mrb[25].mxu1 }
 0x460   : > { %v18397_v19 = vpop.f32.mrb[26].mxu1 }
 0x461   : > { %v18399_v6 = vpop.f32.mrb[27].mxu1 }
 0x463   : > { %13515 = vmatmul.mubr.msk.bf16.gmra.mrb[68].mxu1 %vm2109_vm3, %v19537_v45  ;;  %14035 = vmatmul.mubr.msk.bf16.gmra.mrb[68].mxu0 %vm2109_vm3, %v19538_v16 }
 0x464   : > { %13518 = vmatprep.mubr.msk.bf16.mxu1 %vm2109_vm3, %v19539_v2  ;;  %14038 = vmatprep.mubr.msk.bf16.mxu0 %vm2109_vm3, %v19540_v59  ;;  %v19556_v2 = vld [vmem:[#allocation60_spill] sm:$0xff] }
 0x465   : > { %v19557_v59 = vld [vmem:[#allocation164_spill] sm:$0xff] }
 0x466   : > { %v18409_v37 = vpop.f32.mrb[28].mxu1 }
 0x467   : > { %v18411_v41 = vpop.f32.mrb[29].mxu1 }
 0x468   : > { %v18413_v49 = vpop.f32.mrb[30].mxu1 }
 0x469   : > { %v18415_v31 = vpop.f32.mrb[31].mxu1 }
 0x46b   : > { %13519 = vmatmul.mubr.msk.bf16.gmra.mrb[72].mxu1 %vm2109_vm3, %v19541_v52  ;;  %14039 = vmatmul.mubr.msk.bf16.gmra.mrb[72].mxu0 %vm2109_vm3, %v19542_v13  ;;  %v19558_v52 = vld [vmem:[#allocation61_spill] sm:$0xff]  ;;  %v19559_v13 = vld [vmem:[#allocation166_spill] sm:$0xff] }
 0x46c   : > { %13522 = vmatprep.mubr.msk.bf16.mxu1 %vm2109_vm3, %v19543_v30  ;;  %14042 = vmatprep.mubr.msk.bf16.mxu0 %vm2109_vm3, %v19544_v42 }
 0x46e   : > { %v18425_v22 = vpop.f32.mrb[32].mxu1 }
 0x46f   : > { %v18427_v11 = vpop.f32.mrb[33].mxu1 }
 0x470   : > { %v18429_v54 = vpop.f32.mrb[34].mxu1 }
 0x471   : > { %v18431_v58 = vpop.f32.mrb[35].mxu1 }
 0x473   : > { %13523 = vmatmul.mubr.msk.bf16.gmra.mrb[76].mxu1 %vm2109_vm3, %v19545_v21  ;;  %14043 = vmatmul.mubr.msk.bf16.gmra.mrb[76].mxu0 %vm2109_vm3, %v19546_v39 }
 0x474   : > { %13526 = vmatprep.mubr.msk.bf16.mxu1 %vm2109_vm3, %v19547_v60  ;;  %14046 = vmatprep.mubr.msk.bf16.mxu0 %vm2109_vm3, %v19548_v46  ;;  %v19564_v60 = vld [vmem:[#allocation63_spill] sm:$0xff]  ;;  %v19565_v46 = vld [vmem:[#allocation172_spill] sm:$0xff] }
 0x476   : > { %v18441_v62 = vpop.f32.mrb[36].mxu1 }
 0x477   : > { %v18443_v0 = vpop.f32.mrb[37].mxu1 }
 0x478   : > { %v18445_v17 = vpop.f32.mrb[38].mxu1 }
 0x479   : > { %v18447_v27 = vpop.f32.mrb[39].mxu1 }
 0x47b   : > { %13527 = vmatmul.mubr.msk.bf16.gmra.mrb[80].mxu1 %vm2109_vm3, %v19549_v18  ;;  %14047 = vmatmul.mubr.msk.bf16.gmra.mrb[80].mxu0 %vm2109_vm3, %v19550_v5  ;;  %v19566_v18 = vld [vmem:[#allocation66_spill] sm:$0xff] }
 0x47c   : > { %13530 = vmatprep.mubr.msk.bf16.mxu1 %vm2109_vm3, %v19551_v12  ;;  %14050 = vmatprep.mubr.msk.bf16.mxu0 %vm2109_vm3, %v19552_v10  ;;  %v19567_v5 = vld [vmem:[#allocation174_spill] sm:$0xff] }
 0x47e   : > { %v18457_v57 = vpop.f32.mrb[40].mxu1 }
 0x47f   : > { %v18459_v51 = vpop.f32.mrb[41].mxu1 }
 0x480   : > { %19553 = vst [vmem:[#allocation130_spill] sm:$0xff] %v18459_v51  ;;  %v18461_v45 = vpop.f32.mrb[42].mxu1 }
 0x481   : > { %19554 = vst [vmem:[#allocation135_spill] sm:$0xff] %v18461_v45  ;;  %v18463_v16 = vpop.f32.mrb[43].mxu1 }
 0x482   : > { %19555 = vst [vmem:[#allocation137_spill] sm:$0xff] %v18463_v16 }
 0x483   : > { %13531 = vmatmul.mubr.msk.bf16.gmra.mrb[84].mxu1 %vm2109_vm3, %v19556_v2  ;;  %14051 = vmatmul.mubr.msk.bf16.gmra.mrb[84].mxu0 %vm2109_vm3, %v19557_v59 }
 0x484   : > { %13534 = vmatprep.mubr.msk.bf16.mxu1 %vm2109_vm3, %v19558_v52  ;;  %14054 = vmatprep.mubr.msk.bf16.mxu0 %vm2109_vm3, %v19559_v13  ;;  %v19572_v52 = vld [vmem:[#allocation68_spill] sm:$0xff]  ;;  %v19573_v13 = vld [vmem:[#allocation178_spill] sm:$0xff] }
 0x486   : > { %v18473_v30 = vpop.f32.mrb[44].mxu1 }
 0x487   : > { %19560 = vst [vmem:[#allocation136_spill] sm:$0xff] %v18473_v30  ;;  %v18475_v42 = vpop.f32.mrb[45].mxu1 }
 0x488   : > { %19561 = vst [vmem:[#allocation138_spill] sm:$0xff] %v18475_v42  ;;  %v18477_v21 = vpop.f32.mrb[46].mxu1 }
 0x489   : > { %19562 = vst [vmem:[#allocation143_spill] sm:$0xff] %v18477_v21  ;;  %v18479_v39 = vpop.f32.mrb[47].mxu1 }
 0x48a   : > { %19563 = vst [vmem:[#allocation145_spill] sm:$0xff] %v18479_v39  ;;  %v19603_v39 = vld [vmem:[#allocation196_spill] sm:$0xff] }
 0x48b   : > { %13535 = vmatmul.mubr.msk.bf16.gmra.mrb[88].mxu1 %vm2109_vm3, %v19564_v60  ;;  %14055 = vmatmul.mubr.msk.bf16.gmra.mrb[88].mxu0 %vm2109_vm3, %v19565_v46  ;;  %v19574_v60 = vld [vmem:[#allocation69_spill] sm:$0xff]  ;;  %v19575_v46 = vld [vmem:[#allocation180_spill] sm:$0xff] }
 0x48c   : > { %13538 = vmatprep.mubr.msk.bf16.mxu1 %vm2109_vm3, %v19566_v18  ;;  %14058 = vmatprep.mubr.msk.bf16.mxu0 %vm2109_vm3, %v19567_v5 }
 0x48e   : > { %v18489_v12 = vpop.f32.mrb[48].mxu1 }
 0x48f   : > { %19568 = vst [vmem:[#allocation144_spill] sm:$0xff] %v18489_v12  ;;  %v18491_v10 = vpop.f32.mrb[49].mxu1 }
 0x490   : > { %19569 = vst [vmem:[#allocation146_spill] sm:$0xff] %v18491_v10  ;;  %v18493_v2 = vpop.f32.mrb[50].mxu1  ;;  %v19580_v10 = vld [vmem:[#allocation71_spill] sm:$0xff] }
 0x491   : > { %19570 = vst [vmem:[#allocation151_spill] sm:$0xff] %v18493_v2  ;;  %v18495_v59 = vpop.f32.mrb[51].mxu1 }
 0x492   : > { %19571 = vst [vmem:[#allocation153_spill] sm:$0xff] %v18495_v59 }
 0x493   : > { %13539 = vmatmul.mubr.msk.bf16.gmra.mrb[92].mxu1 %vm2109_vm3, %v19572_v52  ;;  %14059 = vmatmul.mubr.msk.bf16.gmra.mrb[92].mxu0 %vm2109_vm3, %v19573_v13  ;;  %v19581_v52 = vld [vmem:[#allocation182_spill] sm:$0xff] }
 0x494   : > { %13542 = vmatprep.mubr.msk.bf16.mxu1 %vm2109_vm3, %v19574_v60  ;;  %14062 = vmatprep.mubr.msk.bf16.mxu0 %vm2109_vm3, %v19575_v46  ;;  %v19582_v13 = vld [vmem:[#allocation74_spill] sm:$0xff]  ;;  %v19583_v60 = vld [vmem:[#allocation184_spill] sm:$0xff] }
 0x496   : > { %v18505_v18 = vpop.f32.mrb[52].mxu1 }
 0x497   : > { %19576 = vst [vmem:[#allocation152_spill] sm:$0xff] %v18505_v18  ;;  %v18507_v5 = vpop.f32.mrb[53].mxu1 }
 0x498   : > { %19577 = vst [vmem:[#allocation154_spill] sm:$0xff] %v18507_v5  ;;  %v18509_v2 = vpop.f32.mrb[54].mxu1 }
 0x499   : > { %19578 = vst [vmem:[#allocation159_spill] sm:$0xff] %v18509_v2  ;;  %v18511_v59 = vpop.f32.mrb[55].mxu1 }
 0x49a   : > { %19579 = vst [vmem:[#allocation161_spill] sm:$0xff] %v18511_v59  ;;  %v19588_v59 = vld [vmem:[#allocation76_spill] sm:$0xff] }
 0x49b   : > { %13543 = vmatmul.mubr.msk.bf16.gmra.mrb[96].mxu1 %vm2109_vm3, %v19580_v10  ;;  %14063 = vmatmul.mubr.msk.bf16.gmra.mrb[96].mxu0 %vm2109_vm3, %v19581_v52  ;;  %v19589_v10 = vld [vmem:[#allocation186_spill] sm:$0xff]  ;;  %v19590_v52 = vld [vmem:[#allocation77_spill] sm:$0xff] }
 0x49c   : > { %13546 = vmatprep.mubr.msk.bf16.mxu1 %vm2109_vm3, %v19582_v13  ;;  %14066 = vmatprep.mubr.msk.bf16.mxu0 %vm2109_vm3, %v19583_v60  ;;  %v19591_v13 = vld [vmem:[#allocation188_spill] sm:$0xff] }
 0x49e   : > { %v18521_v46 = vpop.f32.mrb[56].mxu1 }
 0x49f   : > { %19584 = vst [vmem:[#allocation160_spill] sm:$0xff] %v18521_v46  ;;  %v18523_v18 = vpop.f32.mrb[57].mxu1 }
 0x4a0   : > { %19585 = vst [vmem:[#allocation162_spill] sm:$0xff] %v18523_v18  ;;  %v18525_v5 = vpop.f32.mrb[58].mxu1 }
 0x4a1   : > { %19586 = vst [vmem:[#allocation167_spill] sm:$0xff] %v18525_v5  ;;  %v18527_v2 = vpop.f32.mrb[59].mxu1 }
 0x4a2   : > { %19587 = vst [vmem:[#allocation169_spill] sm:$0xff] %v18527_v2 }
 0x4a3   : > { %13547 = vmatmul.mubr.msk.bf16.gmra.mrb[100].mxu1 %vm2109_vm3, %v19588_v59  ;;  %14067 = vmatmul.mubr.msk.bf16.gmra.mrb[100].mxu0 %vm2109_vm3, %v19589_v10  ;;  %v19596_v59 = vld [vmem:[#allocation79_spill] sm:$0xff]  ;;  %v19597_v10 = vld [vmem:[#allocation190_spill] sm:$0xff] }
 0x4a4   : > { %13550 = vmatprep.mubr.msk.bf16.mxu1 %vm2109_vm3, %v19590_v52  ;;  %14070 = vmatprep.mubr.msk.bf16.mxu0 %vm2109_vm3, %v19591_v13  ;;  %v19598_v52 = vld [vmem:[#allocation82_spill] sm:$0xff]  ;;  %v19599_v13 = vld [vmem:[#allocation192_spill] sm:$0xff] }
 0x4a6   : > { %v18538_v60 = vpop.f32.mrb[60].mxu1 }
 0x4a7   : > { %19592 = vst [vmem:[#allocation168_spill] sm:$0xff] %v18538_v60  ;;  %v18540_v18 = vpop.f32.mrb[61].mxu1 }
 0x4a8   : > { %19593 = vst [vmem:[#allocation170_spill] sm:$0xff] %v18540_v18  ;;  %v18542_v5 = vpop.f32.mrb[62].mxu1 }
 0x4a9   : > { %19594 = vst [vmem:[#allocation175_spill] sm:$0xff] %v18542_v5  ;;  %v18544_v2 = vpop.f32.mrb[63].mxu1 }
 0x4aa   : > { %19595 = vst [vmem:[#allocation176_spill] sm:$0xff] %v18544_v2 }
 0x4ab   : > { %13551 = vmatmul.mubr.msk.bf16.gmra.mrb[104].mxu1 %vm2109_vm3, %v19596_v59  ;;  %14071 = vmatmul.mubr.msk.bf16.gmra.mrb[104].mxu0 %vm2109_vm3, %v19597_v10 }
 0x4ac   : > { %13554 = vmatprep.mubr.msk.bf16.mxu1 %vm2109_vm3, %v19598_v52  ;;  %14074 = vmatprep.mubr.msk.bf16.mxu0 %vm2109_vm3, %v19599_v13 }
 0x4ae   : > { %v13968_v60 = vpop.f32.mrb[0].mxu0 }
 0x4af   : > { %v14096_v18 = vadd.f32 %v13968_v60, %v18297_v24  ;;  %v9049_v46 = vpop.f32.mrb[1].mxu0  ;;  %v19600_v24 = vld [vmem:[#allocation84_spill] sm:$0xff]  ;;  %v19601_v60 = vld [vmem:[#allocation194_spill] sm:$0xff] }
 0x4b0   : > { %v14097_v2 = vadd.f32 %v9049_v46, %v18299_v55  ;;  %v13969_v5 = vpop.f32.mrb[2].mxu0  ;;  %v19602_v46 = vld [vmem:[#allocation85_spill] sm:$0xff] }
 0x4b1   : > { %v14098_v59 = vadd.f32 %v13969_v5, %v18301_v32  ;;  %v9052_v12 = vpop.f32.mrb[3].mxu0  ;;  %v10463_v21 = vmul.f32 %v14096_v18, %v14096_v18 }
 0x4b2   : > { %v14099_v10 = vadd.f32 %v9052_v12, %v18303_v38  ;;  %v10461_v52 = vmul.f32 %v14097_v2, %v14097_v2 }
 0x4b3   : > { %v11964_v13 = vpack.c.bf16 %v14098_v59, %v14096_v18  ;;  %13555 = vmatmul.mubr.msk.bf16.gmra.mrb[108].mxu1 %vm2109_vm3, %v19600_v24  ;;  %14075 = vmatmul.mubr.msk.bf16.gmra.mrb[108].mxu0 %vm2109_vm3, %v19601_v60  ;;  %v10464_v16 = vmul.f32 %v14098_v59, %v14098_v59 }
 0x4b4   : > { %v11959_v55 = vpack.c.bf16 %v14099_v10, %v14097_v2  ;;  %v10328_v32 = vadd.f32 %v14099_v10, %v14097_v2  ;;  %v10462_v5 = vmul.f32 %v14099_v10, %v14099_v10  ;;  %13558 = vmatprep.mubr.msk.bf16.mxu1 %vm2109_vm3, %v19602_v46  ;;  %14078 = vmatprep.mubr.msk.bf16.mxu0 %vm2109_vm3, %v19603_v39 }
 0x4b5   : > { %12276 = vst [vmem:[%s18560_s6 + $0x8] sm:$0xff] %v11964_v13  }
 0x4b6   : > { %11960 = vst [vmem:[%s18560_s6] sm:$0xff] %v11959_v55   ;;  %v10329_v38 = vadd.f32 %v14096_v18, %v10328_v32  ;;  %v10589_v12 = vadd.f32 %v10462_v5, %v10461_v52  ;;  %v13972_v42 = vpop.f32.mrb[4].mxu0  ;;  %v19604_v32 = vld [vmem:[#allocation87_spill] sm:$0xff] }
 0x4b7   : > { %v14100_v24 = vadd.f32 %v13972_v42, %v18313_v63  ;;  %v9065_v30 = vpop.f32.mrb[5].mxu0  ;;  %v19605_v63 = vld [vmem:[#allocation198_spill] sm:$0xff] }
 0x4b8   : > { %v10330_v60 = vadd.f32 %v14098_v59, %v10329_v38  ;;  %v10590_v45 = vadd.f32 %v10589_v12, %v10463_v21  ;;  %v14101_v2 = vadd.f32 %v9065_v30, %v18315_v9  ;;  %v13973_v10 = vpop.f32.mrb[6].mxu0  ;;  %v19606_v59 = vld [vmem:[#allocation91_spill] sm:$0xff] }
 0x4b9   : > { %v14102_v46 = vadd.f32 %v13973_v10, %v18317_v36  ;;  %v9068_v51 = vpop.f32.mrb[7].mxu0  ;;  %v19607_v36 = vld [vmem:[#allocation200_spill] sm:$0xff] }
 0x4ba   : > { %v10591_v39 = vadd.f32 %v10590_v45, %v10464_v16  ;;  %v10331_v13 = vadd.f32 %v14101_v2, %v10330_v60  ;;  %v10465_v55 = vmul.f32 %v14101_v2, %v14101_v2  ;;  %v14103_v18 = vadd.f32 %v9068_v51, %v18319_v23  ;;  %v19608_v45 = vld [vmem:[#allocation129_spill] sm:$0xff] }
 0x4bb   : > { %v11974_v52 = vpack.c.bf16 %v14102_v46, %v14100_v24  ;;  %13559 = vmatmul.mubr.msk.bf16.gmra.mrb[112].mxu1 %vm2109_vm3, %v19604_v32  ;;  %14079 = vmatmul.mubr.msk.bf16.gmra.mrb[112].mxu0 %vm2109_vm3, %v19605_v63  ;;  %v8987_v23 = vrot.slane %v19608_v45, 5  ;;  %v10467_v51 = vmul.f32 %v14100_v24, %v14100_v24  ;;  %v19609_v32 = vld [vmem:[#allocation127_spill] sm:$0xff] }
 0x4bc   : > { %v10592_v42 = vadd.f32 %v10591_v39, %v10465_v55  ;;  %v11969_v9 = vpack.c.bf16 %v14103_v18, %v14101_v2  ;;  %v10332_v30 = vadd.f32 %v14103_v18, %v10331_v13  ;;  %v10466_v21 = vmul.f32 %v14103_v18, %v14103_v18  ;;  %13562 = vmatprep.mubr.msk.bf16.mxu1 %vm2109_vm3, %v19606_v59 }
 0x4bd   : > { %12278 = vst [vmem:[%s18560_s6 + $0x18] sm:$0xff] %v11974_v52   ;;  %14082 = vmatprep.mubr.msk.bf16.mxu0 %vm2109_vm3, %v19607_v36  ;;  %v10468_v2 = vmul.f32 %v14102_v46, %v14102_v46  ;;  %v11628_v63 = vrot.slane %v19609_v32, 9  ;;  %v8989_v59 = vrot.slane %v8987_v23, 4 }
 0x4be   : > { %12277 = vst [vmem:[%s18560_s6 + $0x10] sm:$0xff] %v11969_v9   ;;  %v10333_v16 = vadd.f32 %v14100_v24, %v10332_v30  ;;  %v10593_v5 = vadd.f32 %v10592_v42, %v10466_v21  ;;  %v13976_v38 = vpop.f32.mrb[8].mxu0  ;;  %v8990_v24 = vrot.slane %v17897_v1, 5  ;;  %v19610_v21 = vld [vmem:[#allocation93_spill] sm:$0xff] }
 0x4bf   : > { %v14104_v12 = vadd.f32 %v13976_v38, %v18329_v40  ;;  %v9081_v60 = vpop.f32.mrb[9].mxu0  ;;  %v19612_v1 = vld [vmem:[#allocation97_spill] sm:$0xff]  ;;  %v8988_v38 = vsel %vm15939_vm7, %v11628_v63, %v8987_v23 }
 0x4c0   : > { %v10334_v10 = vadd.f32 %v14102_v46, %v10333_v16  ;;  %v10594_v39 = vadd.f32 %v10593_v5, %v10467_v51  ;;  %v14105_v13 = vadd.f32 %v9081_v60, %v18331_v8  ;;  %v13977_v55 = vpop.f32.mrb[10].mxu0  ;;  %v19611_v8 = vld [vmem:[#allocation203_spill] sm:$0xff]  ;;  %v19613_v5 = vld [vmem:[#allocation205_spill] sm:$0xff] }
 0x4c1   : > { %v14106_v18 = vadd.f32 %v13977_v55, %v18333_v15  ;;  %v9084_v52 = vpop.f32.mrb[11].mxu0  ;;  %v8993_v15 = vrot.slane %v17900_v43, 5  ;;  %v10471_v60 = vmul.f32 %v14104_v12, %v14104_v12  ;;  %v8991_v43 = vsel %vm15939_vm7, %v8989_v59, %v8990_v24 }
 0x4c2   : > { %v10595_v42 = vadd.f32 %v10594_v39, %v10468_v2  ;;  %v10335_v9 = vadd.f32 %v14105_v13, %v10334_v10  ;;  %v10469_v40 = vmul.f32 %v14105_v13, %v14105_v13  ;;  %v14107_v30 = vadd.f32 %v9084_v52, %v18335_v47 }
 0x4c3   : > { %v11984_v46 = vpack.c.bf16 %v14106_v18, %v14104_v12  ;;  %13563 = vmatmul.mubr.msk.bf16.gmra.mrb[116].mxu1 %vm2109_vm3, %v19610_v21  ;;  %14083 = vmatmul.mubr.msk.bf16.gmra.mrb[116].mxu0 %vm2109_vm3, %v19611_v8  ;;  %v8992_v52 = vrot.slane %v8990_v24, 4  ;;  %v8995_v32 = vrot.slane %v8993_v15, 4  ;;  %v11630_v21 = vcombine.low %v8988_v38, %v8991_v43 }
 0x4c4   : > { %v10596_v36 = vadd.f32 %v10595_v42, %v10469_v40  ;;  %v11979_v45 = vpack.c.bf16 %v14107_v30, %v14105_v13  ;;  %v10336_v51 = vadd.f32 %v14107_v30, %v10335_v9  ;;  %v10470_v16 = vmul.f32 %v14107_v30, %v14107_v30  ;;  %13566 = vmatprep.mubr.msk.bf16.mxu1 %vm2109_vm3, %v19612_v1 }
 0x4c5   : > { %12280 = vst [vmem:[%s18560_s6 + $0x28] sm:$0xff] %v11984_v46   ;;  %14086 = vmatprep.mubr.msk.bf16.mxu0 %vm2109_vm3, %v19613_v5  ;;  %v8996_v42 = vrot.slane %v18170_v7, 5  ;;  %v10472_v9 = vmul.f32 %v14106_v18, %v14106_v18  ;;  %v19615_v7 = vld [vmem:[#allocation206_spill] sm:$0xff] }
 0x4c6   : > { %12279 = vst [vmem:[%s18560_s6 + $0x20] sm:$0xff] %v11979_v45   ;;  %v10337_v2 = vadd.f32 %v14104_v12, %v10336_v51  ;;  %v10597_v10 = vadd.f32 %v10596_v36, %v10470_v16  ;;  %v13980_v39 = vpop.f32.mrb[12].mxu0 }
 0x4c7   : > { %v14108_v13 = vadd.f32 %v13980_v39, %v18345_v28  ;;  %v9097_v55 = vpop.f32.mrb[13].mxu0 }
 0x4c8   : > { %v10338_v40 = vadd.f32 %v14106_v18, %v10337_v2  ;;  %v10598_v30 = vadd.f32 %v10597_v10, %v10471_v60  ;;  %v14109_v23 = vadd.f32 %v9097_v55, %v18347_v14  ;;  %v13981_v63 = vpop.f32.mrb[14].mxu0  ;;  %v8994_v14 = vsel %vm15939_vm7, %v8992_v52, %v8993_v15 }
 0x4c9   : > { %v14110_v12 = vadd.f32 %v13981_v63, %v18349_v44  ;;  %v9100_v46 = vpop.f32.mrb[15].mxu0  ;;  %v8997_v44 = vsel %vm15939_vm7, %v8995_v32, %v8996_v42 }
 0x4ca   : > { %v10599_v8 = vadd.f32 %v10598_v30, %v10472_v9  ;;  %v10339_v59 = vadd.f32 %v14109_v23, %v10338_v40  ;;  %v10473_v28 = vmul.f32 %v14109_v23, %v14109_v23  ;;  %v14111_v24 = vadd.f32 %v9100_v46, %v18351_v56 }
 0x4cb   : > { %v11994_v36 = vpack.c.bf16 %v14110_v12, %v14108_v13  ;;  %13567 = vmatmul.mubr.msk.bf16.gmra.mrb[120].mxu1 %vm2109_vm3, %v19494_v3  ;;  %14087 = vmatmul.mubr.msk.bf16.gmra.mrb[120].mxu0 %vm2109_vm3, %v19615_v7  ;;  %v10475_v3 = vmul.f32 %v14108_v13, %v14108_v13  ;;  %v11631_v47 = vcombine.low %v8994_v14, %v8997_v44 }
 0x4cc   : > { %v10600_v18 = vadd.f32 %v10599_v8, %v10473_v28  ;;  %v11989_v45 = vpack.c.bf16 %v14111_v24, %v14109_v23  ;;  %v10340_v51 = vadd.f32 %v14111_v24, %v10339_v59  ;;  %v10474_v16 = vmul.f32 %v14111_v24, %v14111_v24  ;;  %13570 = vmatprep.mubr.msk.bf16.mxu1 %vm2109_vm3, %v18167_v35 }
 0x4cd   : > { %12282 = vst [vmem:[%s18560_s6 + $0x38] sm:$0xff] %v11994_v36   ;;  %14090 = vmatprep.mubr.msk.bf16.mxu0 %vm2109_vm3, %v11630_v21  ;;  %v10476_v60 = vmul.f32 %v14110_v12, %v14110_v12 }
 0x4ce   : > { %12281 = vst [vmem:[%s18560_s6 + $0x30] sm:$0xff] %v11989_v45   ;;  %v10341_v56 = vadd.f32 %v14108_v13, %v10340_v51  ;;  %v10601_v1 = vadd.f32 %v10600_v18, %v10474_v16  ;;  %v13984_v5 = vpop.f32.mrb[16].mxu0 }
 0x4cf   : > { %v14112_v15 = vadd.f32 %v13984_v5, %v18361_v34  ;;  %v9113_v38 = vpop.f32.mrb[17].mxu0 }
 0x4d0   : > { %v10342_v2 = vadd.f32 %v14110_v12, %v10341_v56  ;;  %v10602_v10 = vadd.f32 %v10601_v1, %v10475_v3  ;;  %v14113_v39 = vadd.f32 %v9113_v38, %v18363_v53  ;;  %v13985_v43 = vpop.f32.mrb[18].mxu0 }
 0x4d1   : > { %v14114_v35 = vadd.f32 %v13985_v43, %v18365_v29  ;;  %v9116_v55 = vpop.f32.mrb[19].mxu0  ;;  %v10479_v23 = vmul.f32 %v14112_v15, %v14112_v15 }
 0x4d2   : > { %v10603_v52 = vadd.f32 %v10602_v10, %v10476_v60  ;;  %v10343_v32 = vadd.f32 %v14113_v39, %v10342_v2  ;;  %v10477_v13 = vmul.f32 %v14113_v39, %v14113_v39  ;;  %v14115_v42 = vadd.f32 %v9116_v55, %v18367_v26 }
 0x4d3   : > { %v12004_v9 = vpack.c.bf16 %v14114_v35, %v14112_v15  ;;  %13571 = vmatmul.mubr.msk.bf16.gmra.mrb[124].mxu1 %vm2109_vm3, %v18189_v50  ;;  %14091 = vmatmul.mubr.msk.bf16.gmra.mrb[124].mxu0 %vm2109_vm3, %v11631_v47  ;;  %v10480_v26 = vmul.f32 %v14114_v35, %v14114_v35 }
 0x4d4   : > { %v10604_v34 = vadd.f32 %v10603_v52, %v10477_v13  ;;  %v11999_v40 = vpack.c.bf16 %v14115_v42, %v14113_v39  ;;  %v10344_v30 = vadd.f32 %v14115_v42, %v10343_v32  ;;  %v10478_v53 = vmul.f32 %v14115_v42, %v14115_v42 }
 0x4d5   : > { %12284 = vst [vmem:[%s18560_s6 + $0x48] sm:$0xff] %v12004_v9  }
 0x4d6   : > { %12283 = vst [vmem:[%s18560_s6 + $0x40] sm:$0xff] %v11999_v40   ;;  %v10345_v29 = vadd.f32 %v14112_v15, %v10344_v30  ;;  %v10605_v63 = vadd.f32 %v10604_v34, %v10478_v53  ;;  %v13988_v12 = vpop.f32.mrb[20].mxu0 }
 0x4d7   : > { %v14116_v46 = vadd.f32 %v13988_v12, %v18377_v20  ;;  %v9129_v21 = vpop.f32.mrb[21].mxu0 }
 0x4d8   : > { %v10346_v8 = vadd.f32 %v14114_v35, %v10345_v29  ;;  %v10606_v59 = vadd.f32 %v10605_v63, %v10479_v23  ;;  %v14117_v50 = vadd.f32 %v9129_v21, %v18379_v48  ;;  %v13989_v28 = vpop.f32.mrb[22].mxu0 }
 0x4d9   : > { %v14118_v24 = vadd.f32 %v13989_v28, %v18381_v33  ;;  %v9132_v36 = vpop.f32.mrb[23].mxu0  ;;  %v10483_v56 = vmul.f32 %v14116_v46, %v14116_v46 }
 0x4da   : > { %v10607_v7 = vadd.f32 %v10606_v59, %v10480_v26  ;;  %v10347_v14 = vadd.f32 %v14117_v50, %v10346_v8  ;;  %v10481_v44 = vmul.f32 %v14117_v50, %v14117_v50  ;;  %v14119_v18 = vadd.f32 %v9132_v36, %v18383_v61 }
 0x4db   : > { %v12014_v45 = vpack.c.bf16 %v14118_v24, %v14116_v46  ;;  %v10484_v38 = vmul.f32 %v14118_v24, %v14118_v24 }
 0x4dc   : > { %v10608_v51 = vadd.f32 %v10607_v7, %v10481_v44  ;;  %v12009_v20 = vpack.c.bf16 %v14119_v18, %v14117_v50  ;;  %v10348_v16 = vadd.f32 %v14119_v18, %v10347_v14  ;;  %v10482_v3 = vmul.f32 %v14119_v18, %v14119_v18 }
 0x4dd   : > { %12286 = vst [vmem:[%s18560_s6 + $0x58] sm:$0xff] %v12014_v45  }
 0x4de   : > { %12285 = vst [vmem:[%s18560_s6 + $0x50] sm:$0xff] %v12009_v20   ;;  %v10349_v1 = vadd.f32 %v14116_v46, %v10348_v16  ;;  %v10609_v5 = vadd.f32 %v10608_v51, %v10482_v3  ;;  %v13992_v48 = vpop.f32.mrb[24].mxu0 }
 0x4df   : > { %v14120_v15 = vadd.f32 %v13992_v48, %v18393_v25  ;;  %v9145_v33 = vpop.f32.mrb[25].mxu0 }
 0x4e0   : > { %v10350_v47 = vadd.f32 %v14118_v24, %v10349_v1  ;;  %v10610_v60 = vadd.f32 %v10609_v5, %v10483_v56  ;;  %v14121_v61 = vadd.f32 %v9145_v33, %v18395_v4  ;;  %v13993_v2 = vpop.f32.mrb[26].mxu0 }
 0x4e1   : > { %v14122_v10 = vadd.f32 %v13993_v2, %v18397_v19  ;;  %v9148_v39 = vpop.f32.mrb[27].mxu0  ;;  %v10487_v34 = vmul.f32 %v14120_v15, %v14120_v15 }
 0x4e2   : > { %v10611_v43 = vadd.f32 %v10610_v60, %v10484_v38  ;;  %v10351_v35 = vadd.f32 %v14121_v61, %v10350_v47  ;;  %v10485_v55 = vmul.f32 %v14121_v61, %v14121_v61  ;;  %v14123_v52 = vadd.f32 %v9148_v39, %v18399_v6 }
 0x4e3   : > { %v12024_v32 = vpack.c.bf16 %v14122_v10, %v14120_v15  ;;  %v10488_v23 = vmul.f32 %v14122_v10, %v14122_v10 }
 0x4e4   : > { %v10612_v13 = vadd.f32 %v10611_v43, %v10485_v55  ;;  %v12019_v25 = vpack.c.bf16 %v14123_v52, %v14121_v61  ;;  %v10352_v42 = vadd.f32 %v14123_v52, %v10351_v35  ;;  %v10486_v9 = vmul.f32 %v14123_v52, %v14123_v52 }
 0x4e5   : > { %12288 = vst [vmem:[%s18560_s6 + $0x68] sm:$0xff] %v12024_v32  }
 0x4e6   : > { %12287 = vst [vmem:[%s18560_s6 + $0x60] sm:$0xff] %v12019_v25   ;;  %v10353_v40 = vadd.f32 %v14120_v15, %v10352_v42  ;;  %v10613_v30 = vadd.f32 %v10612_v13, %v10486_v9  ;;  %v13996_v4 = vpop.f32.mrb[28].mxu0 }
 0x4e7   : > { %v14124_v53 = vadd.f32 %v13996_v4, %v18409_v37  ;;  %v9161_v19 = vpop.f32.mrb[29].mxu0 }
 0x4e8   : > { %v10354_v29 = vadd.f32 %v14122_v10, %v10353_v40  ;;  %v10614_v63 = vadd.f32 %v10613_v30, %v10487_v34  ;;  %v14125_v6 = vadd.f32 %v9161_v19, %v18411_v41  ;;  %v13997_v12 = vpop.f32.mrb[30].mxu0 }
 0x4e9   : > { %v14126_v46 = vadd.f32 %v13997_v12, %v18413_v49  ;;  %v9164_v21 = vpop.f32.mrb[31].mxu0  ;;  %v10491_v14 = vmul.f32 %v14124_v53, %v14124_v53 }
 0x4ea   : > { %v10615_v26 = vadd.f32 %v10614_v63, %v10488_v23  ;;  %v10355_v8 = vadd.f32 %v14125_v6, %v10354_v29  ;;  %v10489_v59 = vmul.f32 %v14125_v6, %v14125_v6  ;;  %v14127_v50 = vadd.f32 %v9164_v21, %v18415_v31 }
 0x4eb   : > { %v12034_v28 = vpack.c.bf16 %v14126_v46, %v14124_v53  ;;  %v10492_v51 = vmul.f32 %v14126_v46, %v14126_v46 }
 0x4ec   : > { %v10616_v24 = vadd.f32 %v10615_v26, %v10489_v59  ;;  %v12029_v37 = vpack.c.bf16 %v14127_v50, %v14125_v6  ;;  %v10356_v36 = vadd.f32 %v14127_v50, %v10355_v8  ;;  %v10490_v7 = vmul.f32 %v14127_v50, %v14127_v50  ;;  %v19616_v26 = vld [vmem:[#allocation130_spill] sm:$0xff]  ;;  %v19617_v59 = vld [vmem:[#allocation135_spill] sm:$0xff] }
 0x4ed   : > { %12290 = vst [vmem:[%s18560_s6 + $0x78] sm:$0xff] %v12034_v28  }
 0x4ee   : > { %12289 = vst [vmem:[%s18560_s6 + $0x70] sm:$0xff] %v12029_v37   ;;  %v10357_v44 = vadd.f32 %v14124_v53, %v10356_v36  ;;  %v10617_v18 = vadd.f32 %v10616_v24, %v10490_v7  ;;  %v14000_v41 = vpop.f32.mrb[32].mxu0  ;;  %v19618_v7 = vld [vmem:[#allocation137_spill] sm:$0xff] }
 0x4ef   : > { %v14128_v45 = vadd.f32 %v14000_v41, %v18425_v22  ;;  %v9177_v49 = vpop.f32.mrb[33].mxu0 }
 0x4f0   : > { %v10358_v20 = vadd.f32 %v14126_v46, %v10357_v44  ;;  %v10618_v16 = vadd.f32 %v10617_v18, %v10491_v14  ;;  %v14129_v31 = vadd.f32 %v9177_v49, %v18427_v11  ;;  %v14001_v3 = vpop.f32.mrb[34].mxu0 }
 0x4f1   : > { %v14130_v56 = vadd.f32 %v14001_v3, %v18429_v54  ;;  %v9180_v1 = vpop.f32.mrb[35].mxu0  ;;  %v10495_v2 = vmul.f32 %v14128_v45, %v14128_v45 }
 0x4f2   : > { %v10619_v5 = vadd.f32 %v10618_v16, %v10492_v51  ;;  %v10359_v48 = vadd.f32 %v14129_v31, %v10358_v20  ;;  %v10493_v15 = vmul.f32 %v14129_v31, %v14129_v31  ;;  %v14131_v33 = vadd.f32 %v9180_v1, %v18431_v58 }
 0x4f3   : > { %v12044_v38 = vpack.c.bf16 %v14130_v56, %v14128_v45  ;;  %v10496_v35 = vmul.f32 %v14130_v56, %v14130_v56 }
 0x4f4   : > { %v10620_v47 = vadd.f32 %v10619_v5, %v10493_v15  ;;  %v12039_v22 = vpack.c.bf16 %v14131_v33, %v14129_v31  ;;  %v10360_v60 = vadd.f32 %v14131_v33, %v10359_v48  ;;  %v10494_v61 = vmul.f32 %v14131_v33, %v14131_v33  ;;  %v19619_v31 = vld [vmem:[#allocation136_spill] sm:$0xff]  ;;  %v19620_v15 = vld [vmem:[#allocation138_spill] sm:$0xff] }
 0x4f5   : > { %12292 = vst [vmem:[%s18560_s6 + $0x88] sm:$0xff] %v12044_v38  }
 0x4f6   : > { %12291 = vst [vmem:[%s18560_s6 + $0x80] sm:$0xff] %v12039_v22   ;;  %v10361_v10 = vadd.f32 %v14128_v45, %v10360_v60  ;;  %v10621_v39 = vadd.f32 %v10620_v47, %v10494_v61  ;;  %v14004_v11 = vpop.f32.mrb[36].mxu0  ;;  %v19621_v47 = vld [vmem:[#allocation143_spill] sm:$0xff] }
 0x4f7   : > { %v14132_v43 = vadd.f32 %v14004_v11, %v18441_v62  ;;  %v9193_v54 = vpop.f32.mrb[37].mxu0 }
 0x4f8   : > { %v10362_v55 = vadd.f32 %v14130_v56, %v10361_v10  ;;  %v10622_v52 = vadd.f32 %v10621_v39, %v10495_v2  ;;  %v14133_v58 = vadd.f32 %v9193_v54, %v18443_v0  ;;  %v14005_v32 = vpop.f32.mrb[38].mxu0  ;;  %v19622_v39 = vld [vmem:[#allocation145_spill] sm:$0xff] }
 0x4f9   : > { %v14134_v13 = vadd.f32 %v14005_v32, %v18445_v17  ;;  %v9196_v25 = vpop.f32.mrb[39].mxu0  ;;  %v10499_v23 = vmul.f32 %v14132_v43, %v14132_v43 }
 0x4fa   : > { %v10623_v42 = vadd.f32 %v10622_v52, %v10496_v35  ;;  %v10363_v9 = vadd.f32 %v14133_v58, %v10362_v55  ;;  %v10497_v34 = vmul.f32 %v14133_v58, %v14133_v58  ;;  %v14135_v40 = vadd.f32 %v9196_v25, %v18447_v27 }
 0x4fb   : > { %v12054_v30 = vpack.c.bf16 %v14134_v13, %v14132_v43  ;;  %v10500_v12 = vmul.f32 %v14134_v13, %v14134_v13 }
 0x4fc   : > { %v10624_v4 = vadd.f32 %v10623_v42, %v10497_v34  ;;  %v12049_v62 = vpack.c.bf16 %v14135_v40, %v14133_v58  ;;  %v10364_v53 = vadd.f32 %v14135_v40, %v10363_v9  ;;  %v10498_v19 = vmul.f32 %v14135_v40, %v14135_v40  ;;  %v19623_v42 = vld [vmem:[#allocation144_spill] sm:$0xff] }
 0x4fd   : > { %12294 = vst [vmem:[%s18560_s6 + $0x98] sm:$0xff] %v12054_v30  }
 0x4fe   : > { %12293 = vst [vmem:[%s18560_s6 + $0x90] sm:$0xff] %v12049_v62   ;;  %v10365_v29 = vadd.f32 %v14132_v43, %v10364_v53  ;;  %v10625_v63 = vadd.f32 %v10624_v4, %v10498_v19  ;;  %v14008_v0 = vpop.f32.mrb[40].mxu0  ;;  %v19624_v62 = vld [vmem:[#allocation146_spill] sm:$0xff] }
 0x4ff   : > { %v14136_v6 = vadd.f32 %v14008_v0, %v18457_v57  ;;  %v9209_v17 = vpop.f32.mrb[41].mxu0 }
 0x500   : > { %v10366_v46 = vadd.f32 %v14134_v13, %v10365_v29  ;;  %v10626_v21 = vadd.f32 %v10625_v63, %v10499_v23  ;;  %v14137_v27 = vadd.f32 %v9209_v17, %v19616_v26  ;;  %v14009_v8 = vpop.f32.mrb[42].mxu0  ;;  %v19625_v23 = vld [vmem:[#allocation151_spill] sm:$0xff] }
 0x501   : > { %v14138_v50 = vadd.f32 %v14009_v8, %v19617_v59  ;;  %v9212_v28 = vpop.f32.mrb[43].mxu0  ;;  %v10503_v49 = vmul.f32 %v14136_v6, %v14136_v6 }
 0x502   : > { %v10627_v24 = vadd.f32 %v10626_v21, %v10500_v12  ;;  %v10367_v37 = vadd.f32 %v14137_v27, %v10366_v46  ;;  %v10501_v36 = vmul.f32 %v14137_v27, %v14137_v27  ;;  %v14139_v14 = vadd.f32 %v9212_v28, %v19618_v7  ;;  %v19626_v12 = vld [vmem:[#allocation153_spill] sm:$0xff] }
 0x503   : > { %v12064_v44 = vpack.c.bf16 %v14138_v50, %v14136_v6  ;;  %v10504_v1 = vmul.f32 %v14138_v50, %v14138_v50 }
 0x504   : > { %v10628_v18 = vadd.f32 %v10627_v24, %v10501_v36  ;;  %v12059_v57 = vpack.c.bf16 %v14139_v14, %v14137_v27  ;;  %v10368_v41 = vadd.f32 %v14139_v14, %v10367_v37  ;;  %v10502_v45 = vmul.f32 %v14139_v14, %v14139_v14  ;;  %v19627_v36 = vld [vmem:[#allocation152_spill] sm:$0xff] }
 0x505   : > { %12296 = vst [vmem:[%s18560_s6 + $0xa8] sm:$0xff] %v12064_v44  }
 0x506   : > { %12295 = vst [vmem:[%s18560_s6 + $0xa0] sm:$0xff] %v12059_v57   ;;  %v10369_v51 = vadd.f32 %v14136_v6, %v10368_v41  ;;  %v10629_v20 = vadd.f32 %v10628_v18, %v10502_v45  ;;  %v14012_v16 = vpop.f32.mrb[44].mxu0  ;;  %v19628_v41 = vld [vmem:[#allocation154_spill] sm:$0xff] }
 0x507   : > { %v14140_v3 = vadd.f32 %v14012_v16, %v19619_v31  ;;  %v9225_v56 = vpop.f32.mrb[45].mxu0 }
 0x508   : > { %v10370_v5 = vadd.f32 %v14138_v50, %v10369_v51  ;;  %v10630_v48 = vadd.f32 %v10629_v20, %v10503_v49  ;;  %v14141_v33 = vadd.f32 %v9225_v56, %v19620_v15  ;;  %v14013_v38 = vpop.f32.mrb[46].mxu0  ;;  %v19629_v51 = vld [vmem:[#allocation159_spill] sm:$0xff] }
 0x509   : > { %v14142_v22 = vadd.f32 %v14013_v38, %v19621_v47  ;;  %v9228_v60 = vpop.f32.mrb[47].mxu0  ;;  %v10507_v58 = vmul.f32 %v14140_v3, %v14140_v3 }
 0x50a   : > { %v10631_v61 = vadd.f32 %v10630_v48, %v10504_v1  ;;  %v10371_v2 = vadd.f32 %v14141_v33, %v10370_v5  ;;  %v10505_v10 = vmul.f32 %v14141_v33, %v14141_v33  ;;  %v14143_v11 = vadd.f32 %v9228_v60, %v19622_v39  ;;  %v19630_v1 = vld [vmem:[#allocation161_spill] sm:$0xff] }
 0x50b   : > { %v12074_v43 = vpack.c.bf16 %v14142_v22, %v14140_v3  ;;  %v10508_v40 = vmul.f32 %v14142_v22, %v14142_v22 }
 0x50c   : > { %v10632_v54 = vadd.f32 %v10631_v61, %v10505_v10  ;;  %v12069_v35 = vpack.c.bf16 %v14143_v11, %v14141_v33  ;;  %v10372_v55 = vadd.f32 %v14143_v11, %v10371_v2  ;;  %v10506_v52 = vmul.f32 %v14143_v11, %v14143_v11  ;;  %v19631_v10 = vld [vmem:[#allocation160_spill] sm:$0xff] }
 0x50d   : > { %12298 = vst [vmem:[%s18560_s6 + $0xb8] sm:$0xff] %v12074_v43  }
 0x50e   : > { %12297 = vst [vmem:[%s18560_s6 + $0xb0] sm:$0xff] %v12069_v35   ;;  %v10373_v32 = vadd.f32 %v14140_v3, %v10372_v55  ;;  %v10633_v13 = vadd.f32 %v10632_v54, %v10506_v52  ;;  %v14016_v25 = vpop.f32.mrb[48].mxu0  ;;  %v19632_v55 = vld [vmem:[#allocation162_spill] sm:$0xff] }
 0x50f   : > { %v14144_v9 = vadd.f32 %v14016_v25, %v19623_v42  ;;  %v9241_v34 = vpop.f32.mrb[49].mxu0 }
 0x510   : > { %v10374_v30 = vadd.f32 %v14142_v22, %v10373_v32  ;;  %v10634_v4 = vadd.f32 %v10633_v13, %v10507_v58  ;;  %v14145_v53 = vadd.f32 %v9241_v34, %v19624_v62  ;;  %v14017_v19 = vpop.f32.mrb[50].mxu0  ;;  %v19633_v32 = vld [vmem:[#allocation167_spill] sm:$0xff] }
 0x511   : > { %v14146_v29 = vadd.f32 %v14017_v19, %v19625_v23  ;;  %v9244_v63 = vpop.f32.mrb[51].mxu0  ;;  %v10511_v50 = vmul.f32 %v14144_v9, %v14144_v9 }
 0x512   : > { %v10635_v0 = vadd.f32 %v10634_v4, %v10508_v40  ;;  %v10375_v6 = vadd.f32 %v14145_v53, %v10374_v30  ;;  %v10509_v17 = vmul.f32 %v14145_v53, %v14145_v53  ;;  %v14147_v46 = vadd.f32 %v9244_v63, %v19626_v12  ;;  %v19634_v40 = vld [vmem:[#allocation169_spill] sm:$0xff] }
 0x513   : > { %v12084_v21 = vpack.c.bf16 %v14146_v29, %v14144_v9  ;;  %v10512_v44 = vmul.f32 %v14146_v29, %v14146_v29 }
 0x514   : > { %v10636_v26 = vadd.f32 %v10635_v0, %v10509_v17  ;;  %v12079_v27 = vpack.c.bf16 %v14147_v46, %v14145_v53  ;;  %v10376_v8 = vadd.f32 %v14147_v46, %v10375_v6  ;;  %v10510_v59 = vmul.f32 %v14147_v46, %v14147_v46  ;;  %v19635_v17 = vld [vmem:[#allocation168_spill] sm:$0xff] }
 0x515   : > { %12300 = vst [vmem:[%s18560_s6 + $0xc8] sm:$0xff] %v12084_v21  }
 0x516   : > { %12299 = vst [vmem:[%s18560_s6 + $0xc0] sm:$0xff] %v12079_v27   ;;  %v10377_v28 = vadd.f32 %v14144_v9, %v10376_v8  ;;  %v10637_v24 = vadd.f32 %v10636_v26, %v10510_v59  ;;  %v14020_v37 = vpop.f32.mrb[52].mxu0  ;;  %v19636_v8 = vld [vmem:[#allocation170_spill] sm:$0xff] }
 0x517   : > { %v14148_v7 = vadd.f32 %v14020_v37, %v19627_v36  ;;  %v9257_v14 = vpop.f32.mrb[53].mxu0 }
 0x518   : > { %v10378_v18 = vadd.f32 %v14146_v29, %v10377_v28  ;;  %v10638_v57 = vadd.f32 %v10637_v24, %v10511_v50  ;;  %v14149_v45 = vadd.f32 %v9257_v14, %v19628_v41  ;;  %v14021_v49 = vpop.f32.mrb[54].mxu0  ;;  %v19637_v28 = vld [vmem:[#allocation175_spill] sm:$0xff] }
 0x519   : > { %v14150_v20 = vadd.f32 %v14021_v49, %v19629_v51  ;;  %v9260_v16 = vpop.f32.mrb[55].mxu0  ;;  %v10515_v22 = vmul.f32 %v14148_v7, %v14148_v7 }
 0x51a   : > { %v10639_v31 = vadd.f32 %v10638_v57, %v10512_v44  ;;  %v10379_v3 = vadd.f32 %v14149_v45, %v10378_v18  ;;  %v10513_v56 = vmul.f32 %v14149_v45, %v14149_v45  ;;  %v14151_v5 = vadd.f32 %v9260_v16, %v19630_v1  ;;  %v19638_v44 = vld [vmem:[#allocation176_spill] sm:$0xff] }
 0x51b   : > { %v12094_v48 = vpack.c.bf16 %v14150_v20, %v14148_v7  ;;  %v10516_v43 = vmul.f32 %v14150_v20, %v14150_v20 }
 0x51c   : > { %v10640_v15 = vadd.f32 %v10639_v31, %v10513_v56  ;;  %v12089_v33 = vpack.c.bf16 %v14151_v5, %v14149_v45  ;;  %v10380_v38 = vadd.f32 %v14151_v5, %v10379_v3  ;;  %v10514_v47 = vmul.f32 %v14151_v5, %v14151_v5 }
 0x51d   : > { %12302 = vst [vmem:[%s18560_s6 + $0xd8] sm:$0xff] %v12094_v48  }
 0x51e   : > { %12301 = vst [vmem:[%s18560_s6 + $0xd0] sm:$0xff] %v12089_v33   ;;  %v10381_v60 = vadd.f32 %v14148_v7, %v10380_v38  ;;  %v10641_v61 = vadd.f32 %v10640_v15, %v10514_v47  ;;  %v14024_v2 = vpop.f32.mrb[56].mxu0 }
 0x51f   : > { %v14152_v39 = vadd.f32 %v14024_v2, %v19631_v10  ;;  %v9273_v11 = vpop.f32.mrb[57].mxu0 }
 0x520   : > { %v10382_v54 = vadd.f32 %v14150_v20, %v10381_v60  ;;  %v10642_v35 = vadd.f32 %v10641_v61, %v10515_v22  ;;  %v14153_v52 = vadd.f32 %v9273_v11, %v19632_v55  ;;  %v14025_v58 = vpop.f32.mrb[58].mxu0 }
 0x521   : > { %v14154_v13 = vadd.f32 %v14025_v58, %v19633_v32  ;;  %v9276_v25 = vpop.f32.mrb[59].mxu0  ;;  %v10519_v29 = vmul.f32 %v14152_v39, %v14152_v39 }
 0x522   : > { %v10643_v42 = vadd.f32 %v10642_v35, %v10516_v43  ;;  %v10383_v9 = vadd.f32 %v14153_v52, %v10382_v54  ;;  %v10517_v34 = vmul.f32 %v14153_v52, %v14153_v52  ;;  %v14155_v30 = vadd.f32 %v9276_v25, %v19634_v40 }
 0x523   : > { %v12104_v4 = vpack.c.bf16 %v14154_v13, %v14152_v39  ;;  %v10520_v21 = vmul.f32 %v14154_v13, %v14154_v13 }
 0x524   : > { %v10644_v62 = vadd.f32 %v10643_v42, %v10517_v34  ;;  %v12099_v53 = vpack.c.bf16 %v14155_v30, %v14153_v52  ;;  %v10384_v19 = vadd.f32 %v14155_v30, %v10383_v9  ;;  %v10518_v23 = vmul.f32 %v14155_v30, %v14155_v30 }
 0x525   : > { %12304 = vst [vmem:[%s18560_s6 + $0xe8] sm:$0xff] %v12104_v4  }
 0x526   : > { %12303 = vst [vmem:[%s18560_s6 + $0xe0] sm:$0xff] %v12099_v53   ;;  %v10385_v63 = vadd.f32 %v14152_v39, %v10384_v19  ;;  %v10645_v0 = vadd.f32 %v10644_v62, %v10518_v23  ;;  %v14028_v6 = vpop.f32.mrb[60].mxu0 }
 0x527   : > { %v14156_v12 = vadd.f32 %v14028_v6, %v19635_v17  ;;  %v9289_v46 = vpop.f32.mrb[61].mxu0 }
 0x528   : > { %v10386_v26 = vadd.f32 %v14154_v13, %v10385_v63  ;;  %v10646_v27 = vadd.f32 %v10645_v0, %v10519_v29  ;;  %v14157_v59 = vadd.f32 %v9289_v46, %v19636_v8  ;;  %v14029_v50 = vpop.f32.mrb[62].mxu0 }
 0x529   : > { %v14158_v24 = vadd.f32 %v14029_v50, %v19637_v28  ;;  %v9292_v37 = vpop.f32.mrb[63].mxu0  ;;  %v10523_v20 = vmul.f32 %v14156_v12, %v14156_v12 }
 0x52a   : > { %v10647_v36 = vadd.f32 %v10646_v27, %v10520_v21  ;;  %v10387_v7 = vadd.f32 %v14157_v59, %v10386_v26  ;;  %v10521_v14 = vmul.f32 %v14157_v59, %v14157_v59  ;;  %v14159_v18 = vadd.f32 %v9292_v37, %v19638_v44 }
 0x52b   : > { %v12114_v57 = vpack.c.bf16 %v14158_v24, %v14156_v12  ;;  %v10524_v15 = vmul.f32 %v14158_v24, %v14158_v24 }
 0x52c   : > { %v10648_v41 = vadd.f32 %v10647_v36, %v10521_v14  ;;  %v12109_v45 = vpack.c.bf16 %v14159_v18, %v14157_v59  ;;  %v10388_v49 = vadd.f32 %v14159_v18, %v10387_v7  ;;  %v10522_v51 = vmul.f32 %v14159_v18, %v14159_v18 }
 0x52d   : > { %12306 = vst [vmem:[%s18560_s6 + $0xf8] sm:$0xff] %v12114_v57  }
 0x52e   : > { %12305 = vst [vmem:[%s18560_s6 + $0xf0] sm:$0xff] %v12109_v45   ;;  %v10389_v16 = vadd.f32 %v14156_v12, %v10388_v49  ;;  %v10649_v31 = vadd.f32 %v10648_v41, %v10522_v51  ;;  %v13512_v3 = vpop.f32.mrb[64].mxu1  ;;  %v14032_v56 = vpop.f32.mrb[64].mxu0 }
 0x52f   : > { %v14160_v1 = vadd.f32 %v14032_v56, %v13512_v3  ;;  %v6469_v5 = vpop.f32.mrb[65].mxu1  ;;  %v9305_v48 = vpop.f32.mrb[65].mxu0 }
 0x530   : > { %v10390_v33 = vadd.f32 %v14158_v24, %v10389_v16  ;;  %v10650_v38 = vadd.f32 %v10649_v31, %v10523_v20  ;;  %v14161_v47 = vadd.f32 %v9305_v48, %v6469_v5  ;;  %v13513_v22 = vpop.f32.mrb[66].mxu1  ;;  %v14033_v60 = vpop.f32.mrb[66].mxu0 }
 0x531   : > { %v14162_v61 = vadd.f32 %v14033_v60, %v13513_v22  ;;  %v6472_v2 = vpop.f32.mrb[67].mxu1  ;;  %v9308_v10 = vpop.f32.mrb[67].mxu0  ;;  %v10527_v13 = vmul.f32 %v14160_v1, %v14160_v1 }
 0x532   : > { %v10651_v39 = vadd.f32 %v10650_v38, %v10524_v15  ;;  %v10391_v11 = vadd.f32 %v14161_v47, %v10390_v33  ;;  %v10525_v43 = vmul.f32 %v14161_v47, %v14161_v47  ;;  %v14163_v54 = vadd.f32 %v9308_v10, %v6472_v2 }
 0x533   : > { %v12124_v35 = vpack.c.bf16 %v14162_v61, %v14160_v1  ;;  %v10528_v62 = vmul.f32 %v14162_v61, %v14162_v61 }
 0x534   : > { %v10652_v55 = vadd.f32 %v10651_v39, %v10525_v43  ;;  %v12119_v52 = vpack.c.bf16 %v14163_v54, %v14161_v47  ;;  %v10392_v58 = vadd.f32 %v14163_v54, %v10391_v11  ;;  %v10526_v32 = vmul.f32 %v14163_v54, %v14163_v54 }
 0x535   : > { %12308 = vst [vmem:[%s18560_s6 + $0x108] sm:$0xff] %v12124_v35  }
 0x536   : > { %12307 = vst [vmem:[%s18560_s6 + $0x100] sm:$0xff] %v12119_v52   ;;  %v10393_v25 = vadd.f32 %v14160_v1, %v10392_v58  ;;  %v10653_v42 = vadd.f32 %v10652_v55, %v10526_v32  ;;  %v13516_v9 = vpop.f32.mrb[68].mxu1  ;;  %v14036_v34 = vpop.f32.mrb[68].mxu0 }
 0x537   : > { %v14164_v40 = vadd.f32 %v14036_v34, %v13516_v9  ;;  %v6485_v30 = vpop.f32.mrb[69].mxu1  ;;  %v9321_v4 = vpop.f32.mrb[69].mxu0 }
 0x538   : > { %v10654_v53 = vadd.f32 %v10653_v42, %v10527_v13  ;;  %v14165_v19 = vadd.f32 %v9321_v4, %v6485_v30  ;;  %v10394_v23 = vadd.f32 %v14162_v61, %v10393_v25  ;;  %v13517_v29 = vpop.f32.mrb[70].mxu1  ;;  %v14037_v63 = vpop.f32.mrb[70].mxu0 }
 0x539   : > { %v14166_v0 = vadd.f32 %v14037_v63, %v13517_v29  ;;  %v6488_v6 = vpop.f32.mrb[71].mxu1  ;;  %v9324_v17 = vpop.f32.mrb[71].mxu0  ;;  %v10531_v24 = vmul.f32 %v14164_v40, %v14164_v40 }
 0x53a   : > { %v10395_v12 = vadd.f32 %v14165_v19, %v10394_v23  ;;  %v10529_v46 = vmul.f32 %v14165_v19, %v14165_v19  ;;  %v10655_v21 = vadd.f32 %v10654_v53, %v10528_v62  ;;  %v14167_v26 = vadd.f32 %v9324_v17, %v6488_v6 }
 0x53b   : > { %v12134_v27 = vpack.c.bf16 %v14166_v0, %v14164_v40  ;;  %v10532_v41 = vmul.f32 %v14166_v0, %v14166_v0 }
 0x53c   : > { %v10656_v8 = vadd.f32 %v10655_v21, %v10529_v46  ;;  %v12129_v59 = vpack.c.bf16 %v14167_v26, %v14165_v19  ;;  %v10396_v50 = vadd.f32 %v14167_v26, %v10395_v12  ;;  %v10530_v28 = vmul.f32 %v14167_v26, %v14167_v26 }
 0x53d   : > { %12310 = vst [vmem:[%s18560_s6 + $0x118] sm:$0xff] %v12134_v27  }
 0x53e   : > { %12309 = vst [vmem:[%s18560_s6 + $0x110] sm:$0xff] %v12129_v59   ;;  %v10397_v37 = vadd.f32 %v14164_v40, %v10396_v50  ;;  %v10657_v36 = vadd.f32 %v10656_v8, %v10530_v28  ;;  %v13520_v7 = vpop.f32.mrb[72].mxu1  ;;  %v14040_v14 = vpop.f32.mrb[72].mxu0 }
 0x53f   : > { %v14168_v44 = vadd.f32 %v14040_v14, %v13520_v7  ;;  %v6501_v18 = vpop.f32.mrb[73].mxu1  ;;  %v9337_v57 = vpop.f32.mrb[73].mxu0 }
 0x540   : > { %v10658_v45 = vadd.f32 %v10657_v36, %v10531_v24  ;;  %v14169_v49 = vadd.f32 %v9337_v57, %v6501_v18  ;;  %v10398_v51 = vadd.f32 %v14166_v0, %v10397_v37  ;;  %v13521_v20 = vpop.f32.mrb[74].mxu1  ;;  %v14041_v16 = vpop.f32.mrb[74].mxu0 }
 0x541   : > { %v14170_v31 = vadd.f32 %v14041_v16, %v13521_v20  ;;  %v6504_v3 = vpop.f32.mrb[75].mxu1  ;;  %v9340_v56 = vpop.f32.mrb[75].mxu0  ;;  %v10535_v61 = vmul.f32 %v14168_v44, %v14168_v44 }
 0x542   : > { %v10399_v1 = vadd.f32 %v14169_v49, %v10398_v51  ;;  %v10533_v5 = vmul.f32 %v14169_v49, %v14169_v49  ;;  %v10659_v48 = vadd.f32 %v10658_v45, %v10532_v41  ;;  %v14171_v15 = vadd.f32 %v9340_v56, %v6504_v3 }
 0x543   : > { %v12144_v33 = vpack.c.bf16 %v14170_v31, %v14168_v44  ;;  %v10536_v55 = vmul.f32 %v14170_v31, %v14170_v31 }
 0x544   : > { %v10660_v38 = vadd.f32 %v10659_v48, %v10533_v5  ;;  %v12139_v47 = vpack.c.bf16 %v14171_v15, %v14169_v49  ;;  %v10400_v22 = vadd.f32 %v14171_v15, %v10399_v1  ;;  %v10534_v60 = vmul.f32 %v14171_v15, %v14171_v15 }
 0x545   : > { %12312 = vst [vmem:[%s18560_s6 + $0x128] sm:$0xff] %v12144_v33  }
 0x546   : > { %12311 = vst [vmem:[%s18560_s6 + $0x120] sm:$0xff] %v12139_v47   ;;  %v10401_v2 = vadd.f32 %v14168_v44, %v10400_v22  ;;  %v10661_v10 = vadd.f32 %v10660_v38, %v10534_v60  ;;  %v13524_v39 = vpop.f32.mrb[76].mxu1  ;;  %v14044_v11 = vpop.f32.mrb[76].mxu0 }
 0x547   : > { %v14172_v43 = vadd.f32 %v14044_v11, %v13524_v39  ;;  %v6517_v54 = vpop.f32.mrb[77].mxu1  ;;  %v9353_v35 = vpop.f32.mrb[77].mxu0 }
 0x548   : > { %v10662_v52 = vadd.f32 %v10661_v10, %v10535_v61  ;;  %v14173_v58 = vadd.f32 %v9353_v35, %v6517_v54  ;;  %v10402_v32 = vadd.f32 %v14170_v31, %v10401_v2  ;;  %v13525_v13 = vpop.f32.mrb[78].mxu1  ;;  %v14045_v25 = vpop.f32.mrb[78].mxu0 }
 0x549   : > { %v14174_v42 = vadd.f32 %v14045_v25, %v13525_v13  ;;  %v6520_v9 = vpop.f32.mrb[79].mxu1  ;;  %v9356_v34 = vpop.f32.mrb[79].mxu0  ;;  %v10539_v0 = vmul.f32 %v14172_v43, %v14172_v43 }
 0x54a   : > { %v10403_v40 = vadd.f32 %v14173_v58, %v10402_v32  ;;  %v10537_v30 = vmul.f32 %v14173_v58, %v14173_v58  ;;  %v10663_v4 = vadd.f32 %v10662_v52, %v10536_v55  ;;  %v14175_v62 = vadd.f32 %v9356_v34, %v6520_v9 }
 0x54b   : > { %v12154_v53 = vpack.c.bf16 %v14174_v42, %v14172_v43  ;;  %v10540_v8 = vmul.f32 %v14174_v42, %v14174_v42 }
 0x54c   : > { %v10664_v19 = vadd.f32 %v10663_v4, %v10537_v30  ;;  %v12149_v23 = vpack.c.bf16 %v14175_v62, %v14173_v58  ;;  %v10404_v29 = vadd.f32 %v14175_v62, %v10403_v40  ;;  %v10538_v63 = vmul.f32 %v14175_v62, %v14175_v62 }
 0x54d   : > { %12314 = vst [vmem:[%s18560_s6 + $0x138] sm:$0xff] %v12154_v53  }
 0x54e   : > { %12313 = vst [vmem:[%s18560_s6 + $0x130] sm:$0xff] %v12149_v23   ;;  %v10405_v6 = vadd.f32 %v14172_v43, %v10404_v29  ;;  %v10665_v17 = vadd.f32 %v10664_v19, %v10538_v63  ;;  %v13528_v12 = vpop.f32.mrb[80].mxu1  ;;  %v14048_v46 = vpop.f32.mrb[80].mxu0 }
 0x54f   : > { %v14176_v21 = vadd.f32 %v14048_v46, %v13528_v12  ;;  %v6533_v26 = vpop.f32.mrb[81].mxu1  ;;  %v9369_v27 = vpop.f32.mrb[81].mxu0 }
 0x550   : > { %v10666_v59 = vadd.f32 %v10665_v17, %v10539_v0  ;;  %v14177_v50 = vadd.f32 %v9369_v27, %v6533_v26  ;;  %v10406_v28 = vadd.f32 %v14174_v42, %v10405_v6  ;;  %v13529_v24 = vpop.f32.mrb[82].mxu1  ;;  %v14049_v37 = vpop.f32.mrb[82].mxu0 }
 0x551   : > { %v14178_v36 = vadd.f32 %v14049_v37, %v13529_v24  ;;  %v6536_v7 = vpop.f32.mrb[83].mxu1  ;;  %v9372_v14 = vpop.f32.mrb[83].mxu0  ;;  %v10543_v31 = vmul.f32 %v14176_v21, %v14176_v21 }
 0x552   : > { %v10407_v44 = vadd.f32 %v14177_v50, %v10406_v28  ;;  %v10541_v18 = vmul.f32 %v14177_v50, %v14177_v50  ;;  %v10667_v57 = vadd.f32 %v10666_v59, %v10540_v8  ;;  %v14179_v41 = vadd.f32 %v9372_v14, %v6536_v7 }
 0x553   : > { %v12164_v45 = vpack.c.bf16 %v14178_v36, %v14176_v21  ;;  %v10544_v38 = vmul.f32 %v14178_v36, %v14178_v36 }
 0x554   : > { %v10668_v49 = vadd.f32 %v10667_v57, %v10541_v18  ;;  %v12159_v51 = vpack.c.bf16 %v14179_v41, %v14177_v50  ;;  %v10408_v20 = vadd.f32 %v14179_v41, %v10407_v44  ;;  %v10542_v16 = vmul.f32 %v14179_v41, %v14179_v41 }
 0x555   : > { %12316 = vst [vmem:[%s18560_s6 + $0x148] sm:$0xff] %v12164_v45  }
 0x556   : > { %12315 = vst [vmem:[%s18560_s6 + $0x140] sm:$0xff] %v12159_v51   ;;  %v10409_v3 = vadd.f32 %v14176_v21, %v10408_v20  ;;  %v10669_v56 = vadd.f32 %v10668_v49, %v10542_v16  ;;  %v13532_v1 = vpop.f32.mrb[84].mxu1  ;;  %v14052_v5 = vpop.f32.mrb[84].mxu0 }
 0x557   : > { %v14180_v48 = vadd.f32 %v14052_v5, %v13532_v1  ;;  %v6549_v15 = vpop.f32.mrb[85].mxu1  ;;  %v9385_v33 = vpop.f32.mrb[85].mxu0 }
 0x558   : > { %v10670_v47 = vadd.f32 %v10669_v56, %v10543_v31  ;;  %v14181_v22 = vadd.f32 %v9385_v33, %v6549_v15  ;;  %v10410_v60 = vadd.f32 %v14178_v36, %v10409_v3  ;;  %v13533_v61 = vpop.f32.mrb[86].mxu1  ;;  %v14053_v2 = vpop.f32.mrb[86].mxu0 }
 0x559   : > { %v14182_v10 = vadd.f32 %v14053_v2, %v13533_v61  ;;  %v6552_v39 = vpop.f32.mrb[87].mxu1  ;;  %v9388_v11 = vpop.f32.mrb[87].mxu0  ;;  %v10547_v42 = vmul.f32 %v14180_v48, %v14180_v48 }
 0x55a   : > { %v10411_v43 = vadd.f32 %v14181_v22, %v10410_v60  ;;  %v10545_v54 = vmul.f32 %v14181_v22, %v14181_v22  ;;  %v10671_v35 = vadd.f32 %v10670_v47, %v10544_v38  ;;  %v14183_v55 = vadd.f32 %v9388_v11, %v6552_v39 }
 0x55b   : > { %v12174_v52 = vpack.c.bf16 %v14182_v10, %v14180_v48  ;;  %v10548_v19 = vmul.f32 %v14182_v10, %v14182_v10 }
 0x55c   : > { %v10672_v58 = vadd.f32 %v10671_v35, %v10545_v54  ;;  %v12169_v32 = vpack.c.bf16 %v14183_v55, %v14181_v22  ;;  %v10412_v13 = vadd.f32 %v14183_v55, %v10411_v43  ;;  %v10546_v25 = vmul.f32 %v14183_v55, %v14183_v55 }
 0x55d   : > { %12318 = vst [vmem:[%s18560_s6 + $0x158] sm:$0xff] %v12174_v52  }
 0x55e   : > { %12317 = vst [vmem:[%s18560_s6 + $0x150] sm:$0xff] %v12169_v32   ;;  %v10413_v9 = vadd.f32 %v14180_v48, %v10412_v13  ;;  %v10673_v34 = vadd.f32 %v10672_v58, %v10546_v25  ;;  %v13536_v40 = vpop.f32.mrb[88].mxu1  ;;  %v14056_v30 = vpop.f32.mrb[88].mxu0 }
 0x55f   : > { %v14184_v4 = vadd.f32 %v14056_v30, %v13536_v40  ;;  %v6565_v62 = vpop.f32.mrb[89].mxu1  ;;  %v9401_v53 = vpop.f32.mrb[89].mxu0 }
 0x560   : > { %v10674_v23 = vadd.f32 %v10673_v34, %v10547_v42  ;;  %v14185_v29 = vadd.f32 %v9401_v53, %v6565_v62  ;;  %v10414_v63 = vadd.f32 %v14182_v10, %v10413_v9  ;;  %v13537_v0 = vpop.f32.mrb[90].mxu1  ;;  %v14057_v6 = vpop.f32.mrb[90].mxu0 }
 0x561   : > { %v14186_v17 = vadd.f32 %v14057_v6, %v13537_v0  ;;  %v6568_v12 = vpop.f32.mrb[91].mxu1  ;;  %v9404_v46 = vpop.f32.mrb[91].mxu0  ;;  %v10551_v36 = vmul.f32 %v14184_v4, %v14184_v4 }
 0x562   : > { %v10415_v21 = vadd.f32 %v14185_v29, %v10414_v63  ;;  %v10549_v26 = vmul.f32 %v14185_v29, %v14185_v29  ;;  %v10675_v27 = vadd.f32 %v10674_v23, %v10548_v19  ;;  %v14187_v8 = vadd.f32 %v9404_v46, %v6568_v12 }
 0x563   : > { %v12184_v59 = vpack.c.bf16 %v14186_v17, %v14184_v4  ;;  %v10552_v49 = vmul.f32 %v14186_v17, %v14186_v17 }
 0x564   : > { %v10676_v50 = vadd.f32 %v10675_v27, %v10549_v26  ;;  %v12179_v28 = vpack.c.bf16 %v14187_v8, %v14185_v29  ;;  %v10416_v24 = vadd.f32 %v14187_v8, %v10415_v21  ;;  %v10550_v37 = vmul.f32 %v14187_v8, %v14187_v8 }
 0x565   : > { %12320 = vst [vmem:[%s18560_s6 + $0x168] sm:$0xff] %v12184_v59  }
 0x566   : > { %12319 = vst [vmem:[%s18560_s6 + $0x160] sm:$0xff] %v12179_v28   ;;  %v10417_v7 = vadd.f32 %v14184_v4, %v10416_v24  ;;  %v10677_v14 = vadd.f32 %v10676_v50, %v10550_v37  ;;  %v13540_v44 = vpop.f32.mrb[92].mxu1  ;;  %v14060_v18 = vpop.f32.mrb[92].mxu0 }
 0x567   : > { %v14188_v57 = vadd.f32 %v14060_v18, %v13540_v44  ;;  %v6581_v41 = vpop.f32.mrb[93].mxu1  ;;  %v9417_v45 = vpop.f32.mrb[93].mxu0 }
 0x568   : > { %v10678_v51 = vadd.f32 %v10677_v14, %v10551_v36  ;;  %v14189_v20 = vadd.f32 %v9417_v45, %v6581_v41  ;;  %v10418_v16 = vadd.f32 %v14186_v17, %v10417_v7  ;;  %v13541_v31 = vpop.f32.mrb[94].mxu1  ;;  %v14061_v3 = vpop.f32.mrb[94].mxu0 }
 0x569   : > { %v14190_v56 = vadd.f32 %v14061_v3, %v13541_v31  ;;  %v6584_v1 = vpop.f32.mrb[95].mxu1  ;;  %v9420_v5 = vpop.f32.mrb[95].mxu0  ;;  %v10555_v10 = vmul.f32 %v14188_v57, %v14188_v57 }
 0x56a   : > { %v10419_v48 = vadd.f32 %v14189_v20, %v10418_v16  ;;  %v10553_v15 = vmul.f32 %v14189_v20, %v14189_v20  ;;  %v10679_v33 = vadd.f32 %v10678_v51, %v10552_v49  ;;  %v14191_v38 = vadd.f32 %v9420_v5, %v6584_v1 }
 0x56b   : > { %v12194_v47 = vpack.c.bf16 %v14190_v56, %v14188_v57  ;;  %v10556_v58 = vmul.f32 %v14190_v56, %v14190_v56 }
 0x56c   : > { %v10680_v22 = vadd.f32 %v10679_v33, %v10553_v15  ;;  %v12189_v60 = vpack.c.bf16 %v14191_v38, %v14189_v20  ;;  %v10420_v61 = vadd.f32 %v14191_v38, %v10419_v48  ;;  %v10554_v2 = vmul.f32 %v14191_v38, %v14191_v38 }
 0x56d   : > { %12322 = vst [vmem:[%s18560_s6 + $0x178] sm:$0xff] %v12194_v47  }
 0x56e   : > { %12321 = vst [vmem:[%s18560_s6 + $0x170] sm:$0xff] %v12189_v60   ;;  %v10421_v39 = vadd.f32 %v14188_v57, %v10420_v61  ;;  %v10681_v11 = vadd.f32 %v10680_v22, %v10554_v2  ;;  %v13544_v43 = vpop.f32.mrb[96].mxu1  ;;  %v14064_v54 = vpop.f32.mrb[96].mxu0 }
 0x56f   : > { %v14192_v35 = vadd.f32 %v14064_v54, %v13544_v43  ;;  %v6597_v55 = vpop.f32.mrb[97].mxu1  ;;  %v9433_v52 = vpop.f32.mrb[97].mxu0 }
 0x570   : > { %v10682_v32 = vadd.f32 %v10681_v11, %v10555_v10  ;;  %v14193_v13 = vadd.f32 %v9433_v52, %v6597_v55  ;;  %v10422_v25 = vadd.f32 %v14190_v56, %v10421_v39  ;;  %v13545_v42 = vpop.f32.mrb[98].mxu1  ;;  %v14065_v9 = vpop.f32.mrb[98].mxu0 }
 0x571   : > { %v14194_v34 = vadd.f32 %v14065_v9, %v13545_v42  ;;  %v6600_v40 = vpop.f32.mrb[99].mxu1  ;;  %v9436_v30 = vpop.f32.mrb[99].mxu0  ;;  %v10559_v17 = vmul.f32 %v14192_v35, %v14192_v35 }
 0x572   : > { %v10423_v4 = vadd.f32 %v14193_v13, %v10422_v25  ;;  %v10557_v62 = vmul.f32 %v14193_v13, %v14193_v13  ;;  %v10683_v53 = vadd.f32 %v10682_v32, %v10556_v58  ;;  %v14195_v19 = vadd.f32 %v9436_v30, %v6600_v40 }
 0x573   : > { %v12204_v23 = vpack.c.bf16 %v14194_v34, %v14192_v35  ;;  %v10560_v50 = vmul.f32 %v14194_v34, %v14194_v34 }
 0x574   : > { %v10684_v29 = vadd.f32 %v10683_v53, %v10557_v62  ;;  %v12199_v63 = vpack.c.bf16 %v14195_v19, %v14193_v13  ;;  %v10424_v0 = vadd.f32 %v14195_v19, %v10423_v4  ;;  %v10558_v6 = vmul.f32 %v14195_v19, %v14195_v19 }
 0x575   : > { %12324 = vst [vmem:[%s18560_s6 + $0x188] sm:$0xff] %v12204_v23  }
 0x576   : > { %12323 = vst [vmem:[%s18560_s6 + $0x180] sm:$0xff] %v12199_v63   ;;  %v10425_v12 = vadd.f32 %v14192_v35, %v10424_v0  ;;  %v10685_v46 = vadd.f32 %v10684_v29, %v10558_v6  ;;  %v13548_v21 = vpop.f32.mrb[100].mxu1  ;;  %v14068_v26 = vpop.f32.mrb[100].mxu0 }
 0x577   : > { %v14196_v27 = vadd.f32 %v14068_v26, %v13548_v21  ;;  %v6613_v8 = vpop.f32.mrb[101].mxu1  ;;  %v9449_v59 = vpop.f32.mrb[101].mxu0 }
 0x578   : > { %v10686_v28 = vadd.f32 %v10685_v46, %v10559_v17  ;;  %v14197_v24 = vadd.f32 %v9449_v59, %v6613_v8  ;;  %v10426_v37 = vadd.f32 %v14194_v34, %v10425_v12  ;;  %v13549_v36 = vpop.f32.mrb[102].mxu1  ;;  %v14069_v7 = vpop.f32.mrb[102].mxu0 }
 0x579   : > { %v14198_v14 = vadd.f32 %v14069_v7, %v13549_v36  ;;  %v6616_v44 = vpop.f32.mrb[103].mxu1  ;;  %v9452_v18 = vpop.f32.mrb[103].mxu0  ;;  %v10563_v56 = vmul.f32 %v14196_v27, %v14196_v27 }
 0x57a   : > { %v10427_v57 = vadd.f32 %v14197_v24, %v10426_v37  ;;  %v10561_v41 = vmul.f32 %v14197_v24, %v14197_v24  ;;  %v10687_v45 = vadd.f32 %v10686_v28, %v10560_v50  ;;  %v14199_v49 = vadd.f32 %v9452_v18, %v6616_v44 }
 0x57b   : > { %v12214_v51 = vpack.c.bf16 %v14198_v14, %v14196_v27  ;;  %v10564_v22 = vmul.f32 %v14198_v14, %v14198_v14 }
 0x57c   : > { %v10688_v20 = vadd.f32 %v10687_v45, %v10561_v41  ;;  %v12209_v16 = vpack.c.bf16 %v14199_v49, %v14197_v24  ;;  %v10428_v31 = vadd.f32 %v14199_v49, %v10427_v57  ;;  %v10562_v3 = vmul.f32 %v14199_v49, %v14199_v49 }
 0x57d   : > { %12326 = vst [vmem:[%s18560_s6 + $0x198] sm:$0xff] %v12214_v51  }
 0x57e   : > { %12325 = vst [vmem:[%s18560_s6 + $0x190] sm:$0xff] %v12209_v16   ;;  %v10429_v1 = vadd.f32 %v14196_v27, %v10428_v31  ;;  %v10689_v5 = vadd.f32 %v10688_v20, %v10562_v3  ;;  %v13552_v48 = vpop.f32.mrb[104].mxu1  ;;  %v14072_v15 = vpop.f32.mrb[104].mxu0 }
 0x57f   : > { %v14200_v33 = vadd.f32 %v14072_v15, %v13552_v48  ;;  %v6629_v38 = vpop.f32.mrb[105].mxu1  ;;  %v9465_v47 = vpop.f32.mrb[105].mxu0 }
 0x580   : > { %v10690_v60 = vadd.f32 %v10689_v5, %v10563_v56  ;;  %v14201_v61 = vadd.f32 %v9465_v47, %v6629_v38  ;;  %v10430_v2 = vadd.f32 %v14198_v14, %v10429_v1  ;;  %v13553_v10 = vpop.f32.mrb[106].mxu1  ;;  %v14073_v39 = vpop.f32.mrb[106].mxu0 }
 0x581   : > { %v14202_v11 = vadd.f32 %v14073_v39, %v13553_v10  ;;  %v6632_v43 = vpop.f32.mrb[107].mxu1  ;;  %v9468_v54 = vpop.f32.mrb[107].mxu0  ;;  %v10567_v34 = vmul.f32 %v14200_v33, %v14200_v33 }
 0x582   : > { %v10431_v35 = vadd.f32 %v14201_v61, %v10430_v2  ;;  %v10565_v55 = vmul.f32 %v14201_v61, %v14201_v61  ;;  %v10691_v52 = vadd.f32 %v10690_v60, %v10564_v22  ;;  %v14203_v58 = vadd.f32 %v9468_v54, %v6632_v43 }
 0x583   : > { %v12224_v32 = vpack.c.bf16 %v14202_v11, %v14200_v33  ;;  %v10568_v29 = vmul.f32 %v14202_v11, %v14202_v11 }
 0x584   : > { %v10692_v13 = vadd.f32 %v10691_v52, %v10565_v55  ;;  %v12219_v25 = vpack.c.bf16 %v14203_v58, %v14201_v61  ;;  %v10432_v42 = vadd.f32 %v14203_v58, %v10431_v35  ;;  %v10566_v9 = vmul.f32 %v14203_v58, %v14203_v58 }
 0x585   : > { %12328 = vst [vmem:[%s18560_s6 + $0x1a8] sm:$0xff] %v12224_v32  }
 0x586   : > { %12327 = vst [vmem:[%s18560_s6 + $0x1a0] sm:$0xff] %v12219_v25   ;;  %v10433_v40 = vadd.f32 %v14200_v33, %v10432_v42  ;;  %v10693_v30 = vadd.f32 %v10692_v13, %v10566_v9  ;;  %v13556_v4 = vpop.f32.mrb[108].mxu1  ;;  %v14076_v62 = vpop.f32.mrb[108].mxu0 }
 0x587   : > { %v14204_v53 = vadd.f32 %v14076_v62, %v13556_v4  ;;  %v6645_v19 = vpop.f32.mrb[109].mxu1  ;;  %v9481_v23 = vpop.f32.mrb[109].mxu0 }
 0x588   : > { %v10694_v63 = vadd.f32 %v10693_v30, %v10567_v34  ;;  %v14205_v0 = vadd.f32 %v9481_v23, %v6645_v19  ;;  %v10434_v6 = vadd.f32 %v14202_v11, %v10433_v40  ;;  %v13557_v17 = vpop.f32.mrb[110].mxu1  ;;  %v14077_v12 = vpop.f32.mrb[110].mxu0 }
 0x589   : > { %v14206_v46 = vadd.f32 %v14077_v12, %v13557_v17  ;;  %v6648_v21 = vpop.f32.mrb[111].mxu1  ;;  %v9484_v26 = vpop.f32.mrb[111].mxu0  ;;  %v10571_v14 = vmul.f32 %v14204_v53, %v14204_v53 }
 0x58a   : > { %v10435_v27 = vadd.f32 %v14205_v0, %v10434_v6  ;;  %v10569_v8 = vmul.f32 %v14205_v0, %v14205_v0  ;;  %v10695_v59 = vadd.f32 %v10694_v63, %v10568_v29  ;;  %v14207_v50 = vadd.f32 %v9484_v26, %v6648_v21 }
 0x58b   : > { %v12234_v28 = vpack.c.bf16 %v14206_v46, %v14204_v53  ;;  %v10572_v20 = vmul.f32 %v14206_v46, %v14206_v46 }
 0x58c   : > { %v10696_v24 = vadd.f32 %v10695_v59, %v10569_v8  ;;  %v12229_v37 = vpack.c.bf16 %v14207_v50, %v14205_v0  ;;  %v10436_v36 = vadd.f32 %v14207_v50, %v10435_v27  ;;  %v10570_v7 = vmul.f32 %v14207_v50, %v14207_v50 }
 0x58d   : > { %12330 = vst [vmem:[%s18560_s6 + $0x1b8] sm:$0xff] %v12234_v28  }
 0x58e   : > { %12329 = vst [vmem:[%s18560_s6 + $0x1b0] sm:$0xff] %v12229_v37   ;;  %v10437_v44 = vadd.f32 %v14204_v53, %v10436_v36  ;;  %v10697_v18 = vadd.f32 %v10696_v24, %v10570_v7  ;;  %v13560_v57 = vpop.f32.mrb[112].mxu1  ;;  %v14080_v41 = vpop.f32.mrb[112].mxu0 }
 0x58f   : > { %v14208_v45 = vadd.f32 %v14080_v41, %v13560_v57  ;;  %v6661_v49 = vpop.f32.mrb[113].mxu1  ;;  %v9497_v51 = vpop.f32.mrb[113].mxu0 }
 0x590   : > { %v10698_v16 = vadd.f32 %v10697_v18, %v10571_v14  ;;  %v14209_v31 = vadd.f32 %v9497_v51, %v6661_v49  ;;  %v10438_v3 = vadd.f32 %v14206_v46, %v10437_v44  ;;  %v13561_v56 = vpop.f32.mrb[114].mxu1  ;;  %v14081_v1 = vpop.f32.mrb[114].mxu0 }
 0x591   : > { %v14210_v5 = vadd.f32 %v14081_v1, %v13561_v56  ;;  %v6664_v48 = vpop.f32.mrb[115].mxu1  ;;  %v9500_v15 = vpop.f32.mrb[115].mxu0  ;;  %v10575_v11 = vmul.f32 %v14208_v45, %v14208_v45 }
 0x592   : > { %v10439_v33 = vadd.f32 %v14209_v31, %v10438_v3  ;;  %v10573_v38 = vmul.f32 %v14209_v31, %v14209_v31  ;;  %v10699_v47 = vadd.f32 %v10698_v16, %v10572_v20  ;;  %v14211_v22 = vadd.f32 %v9500_v15, %v6664_v48 }
 0x593   : > { %v12244_v60 = vpack.c.bf16 %v14210_v5, %v14208_v45  ;;  %v10576_v13 = vmul.f32 %v14210_v5, %v14210_v5 }
 0x594   : > { %v10700_v61 = vadd.f32 %v10699_v47, %v10573_v38  ;;  %v12239_v2 = vpack.c.bf16 %v14211_v22, %v14209_v31  ;;  %v10440_v10 = vadd.f32 %v14211_v22, %v10439_v33  ;;  %v10574_v39 = vmul.f32 %v14211_v22, %v14211_v22 }
 0x595   : > { %12332 = vst [vmem:[%s18560_s6 + $0x1c8] sm:$0xff] %v12244_v60  }
 0x596   : > { %12331 = vst [vmem:[%s18560_s6 + $0x1c0] sm:$0xff] %v12239_v2   ;;  %v10441_v43 = vadd.f32 %v14208_v45, %v10440_v10  ;;  %v10701_v54 = vadd.f32 %v10700_v61, %v10574_v39  ;;  %v13564_v35 = vpop.f32.mrb[116].mxu1  ;;  %v14084_v55 = vpop.f32.mrb[116].mxu0 }
 0x597   : > { %v14212_v52 = vadd.f32 %v14084_v55, %v13564_v35  ;;  %v6677_v58 = vpop.f32.mrb[117].mxu1  ;;  %v9513_v32 = vpop.f32.mrb[117].mxu0 }
 0x598   : > { %v10702_v25 = vadd.f32 %v10701_v54, %v10575_v11  ;;  %v14213_v42 = vadd.f32 %v9513_v32, %v6677_v58  ;;  %v10442_v9 = vadd.f32 %v14210_v5, %v10441_v43  ;;  %v13565_v34 = vpop.f32.mrb[118].mxu1  ;;  %v14085_v40 = vpop.f32.mrb[118].mxu0 }
 0x599   : > { %v14214_v30 = vadd.f32 %v14085_v40, %v13565_v34  ;;  %v6680_v4 = vpop.f32.mrb[119].mxu1  ;;  %v9516_v62 = vpop.f32.mrb[119].mxu0  ;;  %v10579_v46 = vmul.f32 %v14212_v52, %v14212_v52 }
 0x59a   : > { %v10443_v53 = vadd.f32 %v14213_v42, %v10442_v9  ;;  %v10577_v19 = vmul.f32 %v14213_v42, %v14213_v42  ;;  %v10703_v23 = vadd.f32 %v10702_v25, %v10576_v13  ;;  %v14215_v29 = vadd.f32 %v9516_v62, %v6680_v4 }
 0x59b   : > { %v12254_v63 = vpack.c.bf16 %v14214_v30, %v14212_v52  ;;  %v10580_v24 = vmul.f32 %v14214_v30, %v14214_v30 }
 0x59c   : > { %v10704_v0 = vadd.f32 %v10703_v23, %v10577_v19  ;;  %v12249_v6 = vpack.c.bf16 %v14215_v29, %v14213_v42  ;;  %v10444_v17 = vadd.f32 %v14215_v29, %v10443_v53  ;;  %v10578_v12 = vmul.f32 %v14215_v29, %v14215_v29 }
 0x59d   : > { %12334 = vst [vmem:[%s18560_s6 + $0x1d8] sm:$0xff] %v12254_v63  }
 0x59e   : > { %12333 = vst [vmem:[%s18560_s6 + $0x1d0] sm:$0xff] %v12249_v6   ;;  %v10445_v21 = vadd.f32 %v14212_v52, %v10444_v17  ;;  %v10705_v26 = vadd.f32 %v10704_v0, %v10578_v12  ;;  %v13568_v27 = vpop.f32.mrb[120].mxu1  ;;  %v14088_v8 = vpop.f32.mrb[120].mxu0 }
 0x59f   : > { %v14216_v59 = vadd.f32 %v14088_v8, %v13568_v27  ;;  %v6693_v50 = vpop.f32.mrb[121].mxu1  ;;  %v9529_v28 = vpop.f32.mrb[121].mxu0 }
 0x5a0   : > { %v10706_v37 = vadd.f32 %v10705_v26, %v10579_v46  ;;  %v14217_v36 = vadd.f32 %v9529_v28, %v6693_v50  ;;  %v10446_v7 = vadd.f32 %v14214_v30, %v10445_v21  ;;  %v13569_v14 = vpop.f32.mrb[122].mxu1  ;;  %v14089_v44 = vpop.f32.mrb[122].mxu0 }
 0x5a1   : > { %v14218_v18 = vadd.f32 %v14089_v44, %v13569_v14  ;;  %v6696_v57 = vpop.f32.mrb[123].mxu1  ;;  %v9532_v41 = vpop.f32.mrb[123].mxu0  ;;  %v10583_v5 = vmul.f32 %v14216_v59, %v14216_v59 }
 0x5a2   : > { %v10447_v45 = vadd.f32 %v14217_v36, %v10446_v7  ;;  %v10581_v49 = vmul.f32 %v14217_v36, %v14217_v36  ;;  %v10707_v51 = vadd.f32 %v10706_v37, %v10580_v24  ;;  %v14219_v20 = vadd.f32 %v9532_v41, %v6696_v57 }
 0x5a3   : > { %v12264_v16 = vpack.c.bf16 %v14218_v18, %v14216_v59  ;;  %v10584_v61 = vmul.f32 %v14218_v18, %v14218_v18 }
 0x5a4   : > { %v10708_v31 = vadd.f32 %v10707_v51, %v10581_v49  ;;  %v12259_v3 = vpack.c.bf16 %v14219_v20, %v14217_v36  ;;  %v10448_v56 = vadd.f32 %v14219_v20, %v10447_v45  ;;  %v10582_v1 = vmul.f32 %v14219_v20, %v14219_v20 }
 0x5a5   : > { %12336 = vst [vmem:[%s18560_s6 + $0x1e8] sm:$0xff] %v12264_v16  }
 0x5a6   : > { %12335 = vst [vmem:[%s18560_s6 + $0x1e0] sm:$0xff] %v12259_v3   ;;  %v10449_v48 = vadd.f32 %v14216_v59, %v10448_v56  ;;  %v10709_v15 = vadd.f32 %v10708_v31, %v10582_v1  ;;  %v13572_v33 = vpop.f32.mrb[124].mxu1  ;;  %v14092_v38 = vpop.f32.mrb[124].mxu0 }
 0x5a7   : > { %v14220_v47 = vadd.f32 %v14092_v38, %v13572_v33  ;;  %v6709_v22 = vpop.f32.mrb[125].mxu1  ;;  %v9545_v60 = vpop.f32.mrb[125].mxu0 }
 0x5a8   : > { %v10710_v2 = vadd.f32 %v10709_v15, %v10583_v5  ;;  %v14221_v10 = vadd.f32 %v9545_v60, %v6709_v22  ;;  %v10450_v39 = vadd.f32 %v14218_v18, %v10449_v48  ;;  %v13573_v11 = vpop.f32.mrb[126].mxu1  ;;  %v14093_v43 = vpop.f32.mrb[126].mxu0 }
 0x5a9   : > { %v14222_v54 = vadd.f32 %v14093_v43, %v13573_v11  ;;  %v6712_v35 = vpop.f32.mrb[127].mxu1  ;;  %v9548_v55 = vpop.f32.mrb[127].mxu0  ;;  %v10587_v30 = vmul.f32 %v14220_v47, %v14220_v47 }
 0x5aa   : > { %v10451_v52 = vadd.f32 %v14221_v10, %v10450_v39  ;;  %v10585_v58 = vmul.f32 %v14221_v10, %v14221_v10  ;;  %v10711_v32 = vadd.f32 %v10710_v2, %v10584_v61  ;;  %v14223_v13 = vadd.f32 %v9548_v55, %v6712_v35 }
 0x5ab   : > { %v12274_v25 = vpack.c.bf16 %v14222_v54, %v14220_v47  ;;  %v10588_v53 = vmul.f32 %v14222_v54, %v14222_v54 }
 0x5ac   : > { %v10712_v42 = vadd.f32 %v10711_v32, %v10585_v58  ;;  %v12269_v9 = vpack.c.bf16 %v14223_v13, %v14221_v10  ;;  %v10452_v34 = vadd.f32 %v14223_v13, %v10451_v52  ;;  %v10586_v40 = vmul.f32 %v14223_v13, %v14223_v13 }
 0x5ad   : > { %12338 = vst [vmem:[%s18560_s6 + $0x1f8] sm:$0xff] %v12274_v25  }
 0x5ae   : > { %12337 = vst [vmem:[%s18560_s6 + $0x1f0] sm:$0xff] %v12269_v9   ;;  %v10453_v4 = vadd.f32 %v14220_v47, %v10452_v34  ;;  %v10713_v62 = vadd.f32 %v10712_v42, %v10586_v40 }
 0x5b0   : > { %v10454_v19 = vadd.f32 %v14222_v54, %v10453_v4  ;;  %v10714_v23 = vadd.f32 %v10713_v62, %v10587_v30 }
 0x5b2   : > { %v10455_v29 = vrot.slane %v10454_v19, 4  ;;  %v10715_v63 = vadd.f32 %v10714_v23, %v10588_v53 }
 0x5b4   : > { %v10456_v0 = vadd.f32 %v10455_v29, %v10454_v19  ;;  %v10716_v6 = vrot.slane %v10715_v63, 4 }
 0x5b6   : > { %v10457_v17 = vrot.slane %v10456_v0, 2  ;;  %v10717_v12 = vadd.f32 %v10716_v6, %v10715_v63 }
 0x5b8   : > { %v10458_v46 = vadd.f32 %v10457_v17, %v10456_v0  ;;  %v10718_v21 = vrot.slane %v10717_v12, 2 }
 0x5ba   : > { %v10459_v26 = vrot.slane %v10458_v46, 1  ;;  %v10719_v27 = vadd.f32 %v10718_v21, %v10717_v12 }
 0x5bc   : > { %v10720_v8 = vrot.slane %v10719_v27, 1  ;;  %v10460_v59 = vadd.f32 %v10459_v26, %v10458_v46 }
 0x5be   : > { %v10721_v50 = vadd.f32 %v10720_v8, %v10719_v27 }
 0x5c0   : > { %v10723_v28 = vsel %vm10722_vm8, %v10460_v59, %v10721_v50 }
 0x5c1   : > { %10724 = vst [vmem:[%s331_s10] sm:$0x3] %v10723_v28 }
 0x5c2 PF: > { %s15_s17 = sadd.s32 1, %s15443_s17   ;;  %s19639_s15 = smov %s15439_s16 }
 0x5c3   : > { %p12_p6 = scmp.ge.s32.totalorder %s15_s17, 4   ;;  %s19640_s16 = smov %s19642_s18 }
 0x5c5   :  { %14 = sbr.rel (!%p12_p6) target bundleno = 2 (0x2), region = 85 }

</bundles_post_ra>
